<compile_context>
chip_gen: v5e
topology: v5e:2x2
jax: 0.10.0
libtpu: 0.0.40
codegen_flags: <defaults>
</compile_context>

<pallas_src>
import functools

import jax
import jax.numpy as jnp
from jax.experimental import pallas as pl
from jax.experimental.pallas import tpu as pltpu


ROW_TILE = 512              # output pixels per grid step (multiple of 8)
ACT_DTYPE = jnp.bfloat16    # HBM dtype for activations / weights / mask


def _round_up(x, m):
    return (x + m - 1) // m * m


# ----------------------------------------------------------------------------
# Pallas kernels: fused (TM, 9*Cin) @ (9*Cin, Cout) GEMM + bias + ReLU [+ mask]
# ----------------------------------------------------------------------------
def _gemm_bias_relu_mask_kernel(patch_ref, w_ref, bias_ref, mask_ref, out_ref):
    y = jnp.dot(patch_ref[...], w_ref[...], preferred_element_type=jnp.float32)
    y = jnp.maximum(y + bias_ref[...], 0.0)        # folded-BN bias + ReLU
    y = y * mask_ref[...].astype(jnp.float32)      # active-site mask
    out_ref[...] = y.astype(out_ref.dtype)


def _gemm_bias_relu_kernel(patch_ref, w_ref, bias_ref, out_ref):
    y = jnp.dot(patch_ref[...], w_ref[...], preferred_element_type=jnp.float32)
    y = jnp.maximum(y + bias_ref[...], 0.0)
    out_ref[...] = y.astype(out_ref.dtype)


def conv3x3_bn_relu(x, mask, w, bias, *, stride, row_tile=ROW_TILE):
    """3x3 conv (pad=1) + folded BN + ReLU [+ active-site mask].

    x:    (N, H, W, Cin)  NHWC activations (bf16)
    mask: (N, Ho, Wo, 1)  active-site mask at OUTPUT resolution, or None
    w:    (9*Cin, Cout)   BN-scale-folded weights (bf16), tap-major layout
    bias: (Cout,)         folded BN bias (f32)
    """
    N, H, W, Cin = x.shape
    K, Cout = w.shape
    assert K == 9 * Cin
    Ho = (H + 2 - 3) // stride + 1
    Wo = (W + 2 - 3) // stride + 1
    T = N * Ho * Wo

    # im2col with the 9 taps folded into the contraction dim (K = 9*Cin).
    xp = jnp.pad(x, ((0, 0), (1, 1), (1, 1), (0, 0)))
    taps = []
    for kh in range(3):
        for kw in range(3):
            taps.append(xp[:, kh:kh + stride * (Ho - 1) + 1:stride,
                           kw:kw + stride * (Wo - 1) + 1:stride, :])
    patches = jnp.concatenate(taps, axis=-1).reshape(T, K).astype(ACT_DTYPE)

    # Tile the pixel dimension; pad T up so the grid divides evenly.
    tm = min(row_tile, _round_up(T, 8))
    Tp = _round_up(T, tm)
    if Tp != T:
        patches = jnp.pad(patches, ((0, Tp - T), (0, 0)))

    in_specs = [
        pl.BlockSpec((tm, K), lambda i: (i, 0)),       # streamed row tile
        pl.BlockSpec((K, Cout), lambda i: (0, 0)),     # resident weights
        pl.BlockSpec((1, Cout), lambda i: (0, 0)),     # resident bias
    ]
    args = [patches, w, bias.reshape(1, Cout).astype(jnp.float32)]
    mask_bytes = 0
    if mask is not None:
        mflat = mask.reshape(T, 1).astype(ACT_DTYPE)
        if Tp != T:
            mflat = jnp.pad(mflat, ((0, Tp - T), (0, 0)))
        in_specs.append(pl.BlockSpec((tm, 1), lambda i: (i, 0)))
        args.append(mflat)
        kernel = _gemm_bias_relu_mask_kernel
        mask_bytes = Tp * 2
    else:
        kernel = _gemm_bias_relu_kernel

    cost = pl.CostEstimate(
        flops=2 * Tp * K * Cout,
        transcendentals=0,
        bytes_accessed=(Tp * K * 2 + K * Cout * 2 + Cout * 4
                        + Tp * Cout * 2 + mask_bytes),
    )

    out = pl.pallas_call(
        kernel,
        out_shape=jax.ShapeDtypeStruct((Tp, Cout), ACT_DTYPE),
        grid_spec=pltpu.PrefetchScalarGridSpec(
            num_scalar_prefetch=0,
            grid=(Tp // tm,),
            in_specs=in_specs,
            out_specs=pl.BlockSpec((tm, Cout), lambda i: (i, 0)),
        ),
        compiler_params=pltpu.CompilerParams(
            dimension_semantics=("parallel",),        # megacore-shardable (v7x)
            vmem_limit_bytes=48 * 1024 * 1024,
        ),
        cost_estimate=cost,
    )(*args)

    return out[:T].reshape(N, Ho, Wo, Cout)


# ----------------------------------------------------------------------------
# Glue: active-site mask downsampling for SparseConv2d (3x3, stride 2, pad 1)
# ----------------------------------------------------------------------------
def downsample_mask(mask, stride):
    N, H, W, _ = mask.shape
    Ho = (H + 2 - 3) // stride + 1
    Wo = (W + 2 - 3) // stride + 1
    mp = jnp.pad(mask, ((0, 0), (1, 1), (1, 1), (0, 0)))
    out = jnp.zeros((N, Ho, Wo, 1), mask.dtype)
    for kh in range(3):
        for kw in range(3):
            out = jnp.maximum(
                out, mp[:, kh:kh + stride * (Ho - 1) + 1:stride,
                        kw:kw + stride * (Wo - 1) + 1:stride, :])
    return out


# ----------------------------------------------------------------------------
# Parameters: BN (eval, eps=1e-3) scale folded into weights, bias kept in f32.
# ----------------------------------------------------------------------------
def init_block(key, cin, cout):
    k1, k2, k3, k4, k5 = jax.random.split(key, 5)
    w = jax.random.normal(k1, (3, 3, cin, cout), jnp.float32) * (0.3 / (cin ** 0.5))
    gamma = 1.0 + 0.1 * jax.random.normal(k2, (cout,), jnp.float32)
    beta = 0.05 * jax.random.normal(k3, (cout,), jnp.float32)
    rmean = 0.05 * jax.random.normal(k4, (cout,), jnp.float32)
    rvar = 1.0 + 0.1 * jax.random.uniform(k5, (cout,), jnp.float32)
    eps = 1e-3
    scale = gamma / jnp.sqrt(rvar + eps)
    bias = beta - rmean * scale
    # Fold BN scale into the conv weights; flatten taps into K (tap-major, then Cin).
    w_folded = (w * scale).reshape(9 * cin, cout).astype(ACT_DTYPE)
    return {"w": w_folded, "bias": bias.astype(jnp.float32)}


STAGE_CFG = {
    "conv1": [(32, 32, 1), (32, 32, 1)],
    "conv2": [(32, 64, 2), (64, 64, 1), (64, 64, 1)],
    "conv3": [(64, 128, 2), (128, 128, 1), (128, 128, 1)],
    "conv4": [(128, 256, 2), (256, 256, 1), (256, 256, 1)],
    "conv5": [(256, 256, 2), (256, 256, 1), (256, 256, 1)],  # dense blocks
}


def init_params(key):
    params = {}
    for stage, blocks in STAGE_CFG.items():
        params[stage] = []
        for (cin, cout, _s) in blocks:
            key, sub = jax.random.split(key)
            params[stage].append(init_block(sub, cin, cout))
    return params


# ----------------------------------------------------------------------------
# Forward pass (mirrors PillarBackBone8x.forward)
# ----------------------------------------------------------------------------
def pillar_backbone_forward(params, dense_in, mask):
    """dense_in: (N,H,W,32) NHWC densified pillar features, mask: (N,H,W,1)."""
    outs = {}
    h = dense_in.astype(ACT_DTYPE)
    mask = mask.astype(ACT_DTYPE)

    def run_stage(h, m_in, stage):
        m = m_in
        for (cin, cout, stride), p in zip(STAGE_CFG[stage], params[stage]):
            if stride > 1:  # SparseConv2d: new active mask at output resolution
                m = downsample_mask(m, stride) if m is not None else None
            h = conv3x3_bn_relu(h, m, p["w"], p["bias"], stride=stride)
        return h, m

    h, m1 = run_stage(h, mask, "conv1")
    outs["x_conv1"] = h
    h, m2 = run_stage(h, m1, "conv2")
    outs["x_conv2"] = h
    h, m3 = run_stage(h, m2, "conv3")
    outs["x_conv3"] = h
    h, m4 = run_stage(h, m3, "conv4")
    # x_conv4.dense(): inactive sites already zero (masked); transpose to NCHW.
    outs["x_conv4"] = jnp.transpose(h, (0, 3, 1, 2))
    # conv5 is a plain dense nn.Conv2d stack: no active-site mask.
    h, _ = run_stage(h, None, "conv5")
    outs["x_conv5"] = jnp.transpose(h, (0, 3, 1, 2))

    strides = {"x_conv1": 1, "x_conv2": 2, "x_conv3": 4, "x_conv4": 8,
               "x_conv5": 16}
    return outs, strides


# TODO(synk): spconv's rulebook/indice_key bookkeeping has no Pallas equivalent;
# sparse tensors are emulated as dense NHWC grids + active-site masks (values
# at active sites match the sparse computation, up to bf16 rounding).

if __name__ == "__main__":
    key = jax.random.PRNGKey(0)

    # Small, module-consistent shapes: batch=2, 16x16 BEV grid, 32 pillar chans.
    N, H, W, C_IN = 2, 16, 16, 32
    NUM_PILLARS = 48

    kf, kb, ky, kx, kp = jax.random.split(key, 5)
    pillar_features = jax.random.normal(kf, (NUM_PILLARS, C_IN), jnp.float32)
    coords_b = jax.random.randint(kb, (NUM_PILLARS,), 0, N)
    coords_y = jax.random.randint(ky, (NUM_PILLARS,), 0, H)
    coords_x = jax.random.randint(kx, (NUM_PILLARS,), 0, W)
    pillar_coords = jnp.stack([coords_b, coords_y, coords_x], axis=1)  # (P, 3)

    # Densify sparse pillars (SparseConvTensor): NHWC grid + active mask.
    dense_in = jnp.zeros((N, H, W, C_IN), jnp.float32).at[
        coords_b, coords_y, coords_x].set(pillar_features)
    active_mask = jnp.zeros((N, H, W, 1), jnp.float32).at[
        coords_b, coords_y, coords_x, 0].set(1.0)

    params = init_params(kp)

    fwd = jax.jit(functools.partial(pillar_backbone_forward, params))
    outs, strides = fwd(dense_in, active_mask)
    jax.tree_util.tree_map(jax.block_until_ready, outs)

    # Shape sanity checks against the PyTorch module.
    assert outs["x_conv1"].shape == (N, H, W, 32)
    assert outs["x_conv2"].shape == (N, H // 2, W // 2, 64)
    assert outs["x_conv3"].shape == (N, H // 4, W // 4, 128)
    assert outs["x_conv4"].shape == (N, 256, H // 8, W // 8)      # NCHW (.dense())
    assert outs["x_conv5"].shape == (N, 256, H // 16, W // 16)    # NCHW
    assert strides == {"x_conv1": 1, "x_conv2": 2, "x_conv3": 4,
                       "x_conv4": 8, "x_conv5": 16}

    print("KERNEL_OK")
</pallas_src>

<mosaic_0001>
module attributes {stable_mosaic.version = 11 : i64} {
  func.func @_gemm_bias_relu_mask_kernel(%arg0: i32, %arg1: memref<512x288xbf16, #tpu.memory_space<vmem>>, %arg2: memref<288x32xbf16, #tpu.memory_space<vmem>>, %arg3: memref<1x32xf32, #tpu.memory_space<vmem>>, %arg4: memref<512x1xbf16, #tpu.memory_space<vmem>>, %arg5: memref<512x32xbf16, #tpu.memory_space<vmem>>) attributes {dimension_semantics = [#tpu.dimension_semantics<parallel>], iteration_bounds = array<i64: 1>, scalar_prefetch = 0 : i64, scratch_operands = 0 : i64, tpu.core_type = #tpu.core_type<tc>, window_params = [{transform_indices = @transform_0, window_bounds = array<i64: 512, 288>}, {pipeline_mode = #tpu.pipeline_mode<synchronous>, transform_indices = @transform_1, window_bounds = array<i64: 288, 32>}, {pipeline_mode = #tpu.pipeline_mode<synchronous>, transform_indices = @transform_2, window_bounds = array<i64: 1, 32>}, {transform_indices = @transform_3, window_bounds = array<i64: 512, 1>}, {transform_indices = @transform_4, window_bounds = array<i64: 512, 32>}]} {
    %c0 = arith.constant 0 : index
    %c0_0 = arith.constant 0 : index
    %0 = vector.load %arg1[%c0, %c0_0] : memref<512x288xbf16, #tpu.memory_space<vmem>>, vector<512x288xbf16>
    %c0_1 = arith.constant 0 : index
    %c0_2 = arith.constant 0 : index
    %1 = vector.load %arg2[%c0_1, %c0_2] : memref<288x32xbf16, #tpu.memory_space<vmem>>, vector<288x32xbf16>
    %cst = arith.constant dense<0.000000e+00> : vector<512x32xf32>
    %2 = tpu.matmul %0, %1, %cst {dimension_numbers = #tpu.dot_dimension_numbers<[1], [0], [0], [1], [0, 0, 1, 1], [], []>} : vector<512x288xbf16>, vector<288x32xbf16>, vector<512x32xf32> -> vector<512x32xf32>
    %c0_3 = arith.constant 0 : index
    %c0_4 = arith.constant 0 : index
    %3 = vector.load %arg3[%c0_3, %c0_4] : memref<1x32xf32, #tpu.memory_space<vmem>>, vector<1x32xf32>
    %4 = vector.broadcast %3 : vector<1x32xf32> to vector<512x32xf32>
    %5 = arith.addf %2, %4 : vector<512x32xf32>
    %cst_5 = arith.constant 0.000000e+00 : f32
    %6 = vector.broadcast %cst_5 : f32 to vector<512x32xf32>
    %7 = arith.maximumf %5, %6 : vector<512x32xf32>
    %c0_6 = arith.constant 0 : index
    %c0_7 = arith.constant 0 : index
    %8 = vector.load %arg4[%c0_6, %c0_7] : memref<512x1xbf16, #tpu.memory_space<vmem>>, vector<512x1xbf16>
    %9 = arith.extf %8 : vector<512x1xbf16> to vector<512x1xf32>
    %10 = vector.broadcast %9 : vector<512x1xf32> to vector<512x32xf32>
    %11 = arith.mulf %7, %10 : vector<512x32xf32>
    %12 = arith.truncf %11 : vector<512x32xf32> to vector<512x32xbf16>
    %c0_8 = arith.constant 0 : index
    %c0_9 = arith.constant 0 : index
    %13 = vector.load %arg5[%c0_8, %c0_9] : memref<512x32xbf16, #tpu.memory_space<vmem>>, vector<512x32xbf16>
    tpu.vector_store %arg5[%c0_8, %c0_9], %12 {strides = array<i32>} : memref<512x32xbf16, #tpu.memory_space<vmem>>, vector<512x32xbf16>,
    return
  }
  func.func @transform_0(%arg0: i32) -> (i32, i32) {
    %c0_i32 = arith.constant 0 : i32
    %c0_i32_0 = arith.constant 0 : i32
    return %arg0, %c0_i32 : i32, i32
  }
  func.func @transform_1(%arg0: i32) -> (i32, i32) {
    %c0_i32 = arith.constant 0 : i32
    %c0_i32_0 = arith.constant 0 : i32
    %c0_i32_1 = arith.constant 0 : i32
    return %c0_i32, %c0_i32_0 : i32, i32
  }
  func.func @transform_2(%arg0: i32) -> (i32, i32) {
    %c0_i32 = arith.constant 0 : i32
    %c0_i32_0 = arith.constant 0 : i32
    %c0_i32_1 = arith.constant 0 : i32
    return %c0_i32, %c0_i32_0 : i32, i32
  }
  func.func @transform_3(%arg0: i32) -> (i32, i32) {
    %c0_i32 = arith.constant 0 : i32
    %c0_i32_0 = arith.constant 0 : i32
    return %arg0, %c0_i32 : i32, i32
  }
  func.func @transform_4(%arg0: i32) -> (i32, i32) {
    %c0_i32 = arith.constant 0 : i32
    %c0_i32_0 = arith.constant 0 : i32
    return %arg0, %c0_i32 : i32, i32
  }
}

module attributes {stable_mosaic.version = 11 : i64} {
  func.func @_gemm_bias_relu_mask_kernel(%arg0: i32, %arg1: memref<128x288xbf16, #tpu.memory_space<vmem>>, %arg2: memref<288x64xbf16, #tpu.memory_space<vmem>>, %arg3: memref<1x64xf32, #tpu.memory_space<vmem>>, %arg4: memref<128x1xbf16, #tpu.memory_space<vmem>>, %arg5: memref<128x64xbf16, #tpu.memory_space<vmem>>) attributes {dimension_semantics = [#tpu.dimension_semantics<parallel>], iteration_bounds = array<i64: 1>, scalar_prefetch = 0 : i64, scratch_operands = 0 : i64, tpu.core_type = #tpu.core_type<tc>, window_params = [{transform_indices = @transform_0, window_bounds = array<i64: 128, 288>}, {pipeline_mode = #tpu.pipeline_mode<synchronous>, transform_indices = @transform_1, window_bounds = array<i64: 288, 64>}, {pipeline_mode = #tpu.pipeline_mode<synchronous>, transform_indices = @transform_2, window_bounds = array<i64: 1, 64>}, {transform_indices = @transform_3, window_bounds = array<i64: 128, 1>}, {transform_indices = @transform_4, window_bounds = array<i64: 128, 64>}]} {
    %c0 = arith.constant 0 : index
    %c0_0 = arith.constant 0 : index
    %0 = vector.load %arg1[%c0, %c0_0] : memref<128x288xbf16, #tpu.memory_space<vmem>>, vector<128x288xbf16>
    %c0_1 = arith.constant 0 : index
    %c0_2 = arith.constant 0 : index
    %1 = vector.load %arg2[%c0_1, %c0_2] : memref<288x64xbf16, #tpu.memory_space<vmem>>, vector<288x64xbf16>
    %cst = arith.constant dense<0.000000e+00> : vector<128x64xf32>
    %2 = tpu.matmul %0, %1, %cst {dimension_numbers = #tpu.dot_dimension_numbers<[1], [0], [0], [1], [0, 0, 1, 1], [], []>} : vector<128x288xbf16>, vector<288x64xbf16>, vector<128x64xf32> -> vector<128x64xf32>
    %c0_3 = arith.constant 0 : index
    %c0_4 = arith.constant 0 : index
    %3 = vector.load %arg3[%c0_3, %c0_4] : memref<1x64xf32, #tpu.memory_space<vmem>>, vector<1x64xf32>
    %4 = vector.broadcast %3 : vector<1x64xf32> to vector<128x64xf32>
    %5 = arith.addf %2, %4 : vector<128x64xf32>
    %cst_5 = arith.constant 0.000000e+00 : f32
    %6 = vector.broadcast %cst_5 : f32 to vector<128x64xf32>
    %7 = arith.maximumf %5, %6 : vector<128x64xf32>
    %c0_6 = arith.constant 0 : index
    %c0_7 = arith.constant 0 : index
    %8 = vector.load %arg4[%c0_6, %c0_7] : memref<128x1xbf16, #tpu.memory_space<vmem>>, vector<128x1xbf16>
    %9 = arith.extf %8 : vector<128x1xbf16> to vector<128x1xf32>
    %10 = vector.broadcast %9 : vector<128x1xf32> to vector<128x64xf32>
    %11 = arith.mulf %7, %10 : vector<128x64xf32>
    %12 = arith.truncf %11 : vector<128x64xf32> to vector<128x64xbf16>
    %c0_8 = arith.constant 0 : index
    %c0_9 = arith.constant 0 : index
    %13 = vector.load %arg5[%c0_8, %c0_9] : memref<128x64xbf16, #tpu.memory_space<vmem>>, vector<128x64xbf16>
    tpu.vector_store %arg5[%c0_8, %c0_9], %12 {strides = array<i32>} : memref<128x64xbf16, #tpu.memory_space<vmem>>, vector<128x64xbf16>,
    return
  }
  func.func @transform_0(%arg0: i32) -> (i32, i32) {
    %c0_i32 = arith.constant 0 : i32
    %c0_i32_0 = arith.constant 0 : i32
    return %arg0, %c0_i32 : i32, i32
  }
  func.func @transform_1(%arg0: i32) -> (i32, i32) {
    %c0_i32 = arith.constant 0 : i32
    %c0_i32_0 = arith.constant 0 : i32
    %c0_i32_1 = arith.constant 0 : i32
    return %c0_i32, %c0_i32_0 : i32, i32
  }
  func.func @transform_2(%arg0: i32) -> (i32, i32) {
    %c0_i32 = arith.constant 0 : i32
    %c0_i32_0 = arith.constant 0 : i32
    %c0_i32_1 = arith.constant 0 : i32
    return %c0_i32, %c0_i32_0 : i32, i32
  }
  func.func @transform_3(%arg0: i32) -> (i32, i32) {
    %c0_i32 = arith.constant 0 : i32
    %c0_i32_0 = arith.constant 0 : i32
    return %arg0, %c0_i32 : i32, i32
  }
  func.func @transform_4(%arg0: i32) -> (i32, i32) {
    %c0_i32 = arith.constant 0 : i32
    %c0_i32_0 = arith.constant 0 : i32
    return %arg0, %c0_i32 : i32, i32
  }
}

module attributes {stable_mosaic.version = 11 : i64} {
  func.func @_gemm_bias_relu_mask_kernel(%arg0: i32, %arg1: memref<128x576xbf16, #tpu.memory_space<vmem>>, %arg2: memref<576x64xbf16, #tpu.memory_space<vmem>>, %arg3: memref<1x64xf32, #tpu.memory_space<vmem>>, %arg4: memref<128x1xbf16, #tpu.memory_space<vmem>>, %arg5: memref<128x64xbf16, #tpu.memory_space<vmem>>) attributes {dimension_semantics = [#tpu.dimension_semantics<parallel>], iteration_bounds = array<i64: 1>, scalar_prefetch = 0 : i64, scratch_operands = 0 : i64, tpu.core_type = #tpu.core_type<tc>, window_params = [{transform_indices = @transform_0, window_bounds = array<i64: 128, 576>}, {pipeline_mode = #tpu.pipeline_mode<synchronous>, transform_indices = @transform_1, window_bounds = array<i64: 576, 64>}, {pipeline_mode = #tpu.pipeline_mode<synchronous>, transform_indices = @transform_2, window_bounds = array<i64: 1, 64>}, {transform_indices = @transform_3, window_bounds = array<i64: 128, 1>}, {transform_indices = @transform_4, window_bounds = array<i64: 128, 64>}]} {
    %c0 = arith.constant 0 : index
    %c0_0 = arith.constant 0 : index
    %0 = vector.load %arg1[%c0, %c0_0] : memref<128x576xbf16, #tpu.memory_space<vmem>>, vector<128x576xbf16>
    %c0_1 = arith.constant 0 : index
    %c0_2 = arith.constant 0 : index
    %1 = vector.load %arg2[%c0_1, %c0_2] : memref<576x64xbf16, #tpu.memory_space<vmem>>, vector<576x64xbf16>
    %cst = arith.constant dense<0.000000e+00> : vector<128x64xf32>
    %2 = tpu.matmul %0, %1, %cst {dimension_numbers = #tpu.dot_dimension_numbers<[1], [0], [0], [1], [0, 0, 1, 1], [], []>} : vector<128x576xbf16>, vector<576x64xbf16>, vector<128x64xf32> -> vector<128x64xf32>
    %c0_3 = arith.constant 0 : index
    %c0_4 = arith.constant 0 : index
    %3 = vector.load %arg3[%c0_3, %c0_4] : memref<1x64xf32, #tpu.memory_space<vmem>>, vector<1x64xf32>
    %4 = vector.broadcast %3 : vector<1x64xf32> to vector<128x64xf32>
    %5 = arith.addf %2, %4 : vector<128x64xf32>
    %cst_5 = arith.constant 0.000000e+00 : f32
    %6 = vector.broadcast %cst_5 : f32 to vector<128x64xf32>
    %7 = arith.maximumf %5, %6 : vector<128x64xf32>
    %c0_6 = arith.constant 0 : index
    %c0_7 = arith.constant 0 : index
    %8 = vector.load %arg4[%c0_6, %c0_7] : memref<128x1xbf16, #tpu.memory_space<vmem>>, vector<128x1xbf16>
    %9 = arith.extf %8 : vector<128x1xbf16> to vector<128x1xf32>
    %10 = vector.broadcast %9 : vector<128x1xf32> to vector<128x64xf32>
    %11 = arith.mulf %7, %10 : vector<128x64xf32>
    %12 = arith.truncf %11 : vector<128x64xf32> to vector<128x64xbf16>
    %c0_8 = arith.constant 0 : index
    %c0_9 = arith.constant 0 : index
    %13 = vector.load %arg5[%c0_8, %c0_9] : memref<128x64xbf16, #tpu.memory_space<vmem>>, vector<128x64xbf16>
    tpu.vector_store %arg5[%c0_8, %c0_9], %12 {strides = array<i32>} : memref<128x64xbf16, #tpu.memory_space<vmem>>, vector<128x64xbf16>,
    return
  }
  func.func @transform_0(%arg0: i32) -> (i32, i32) {
    %c0_i32 = arith.constant 0 : i32
    %c0_i32_0 = arith.constant 0 : i32
    return %arg0, %c0_i32 : i32, i32
  }
  func.func @transform_1(%arg0: i32) -> (i32, i32) {
    %c0_i32 = arith.constant 0 : i32
    %c0_i32_0 = arith.constant 0 : i32
    %c0_i32_1 = arith.constant 0 : i32
    return %c0_i32, %c0_i32_0 : i32, i32
  }
  func.func @transform_2(%arg0: i32) -> (i32, i32) {
    %c0_i32 = arith.constant 0 : i32
    %c0_i32_0 = arith.constant 0 : i32
    %c0_i32_1 = arith.constant 0 : i32
    return %c0_i32, %c0_i32_0 : i32, i32
  }
  func.func @transform_3(%arg0: i32) -> (i32, i32) {
    %c0_i32 = arith.constant 0 : i32
    %c0_i32_0 = arith.constant 0 : i32
    return %arg0, %c0_i32 : i32, i32
  }
  func.func @transform_4(%arg0: i32) -> (i32, i32) {
    %c0_i32 = arith.constant 0 : i32
    %c0_i32_0 = arith.constant 0 : i32
    return %arg0, %c0_i32 : i32, i32
  }
}

module attributes {stable_mosaic.version = 11 : i64} {
  func.func @_gemm_bias_relu_mask_kernel(%arg0: i32, %arg1: memref<32x576xbf16, #tpu.memory_space<vmem>>, %arg2: memref<576x128xbf16, #tpu.memory_space<vmem>>, %arg3: memref<1x128xf32, #tpu.memory_space<vmem>>, %arg4: memref<32x1xbf16, #tpu.memory_space<vmem>>, %arg5: memref<32x128xbf16, #tpu.memory_space<vmem>>) attributes {dimension_semantics = [#tpu.dimension_semantics<parallel>], iteration_bounds = array<i64: 1>, scalar_prefetch = 0 : i64, scratch_operands = 0 : i64, tpu.core_type = #tpu.core_type<tc>, window_params = [{transform_indices = @transform_0, window_bounds = array<i64: 32, 576>}, {pipeline_mode = #tpu.pipeline_mode<synchronous>, transform_indices = @transform_1, window_bounds = array<i64: 576, 128>}, {pipeline_mode = #tpu.pipeline_mode<synchronous>, transform_indices = @transform_2, window_bounds = array<i64: 1, 128>}, {transform_indices = @transform_3, window_bounds = array<i64: 32, 1>}, {transform_indices = @transform_4, window_bounds = array<i64: 32, 128>}]} {
    %c0 = arith.constant 0 : index
    %c0_0 = arith.constant 0 : index
    %0 = vector.load %arg1[%c0, %c0_0] : memref<32x576xbf16, #tpu.memory_space<vmem>>, vector<32x576xbf16>
    %c0_1 = arith.constant 0 : index
    %c0_2 = arith.constant 0 : index
    %1 = vector.load %arg2[%c0_1, %c0_2] : memref<576x128xbf16, #tpu.memory_space<vmem>>, vector<576x128xbf16>
    %cst = arith.constant dense<0.000000e+00> : vector<32x128xf32>
    %2 = tpu.matmul %0, %1, %cst {dimension_numbers = #tpu.dot_dimension_numbers<[1], [0], [0], [1], [0, 0, 1, 1], [], []>} : vector<32x576xbf16>, vector<576x128xbf16>, vector<32x128xf32> -> vector<32x128xf32>
    %c0_3 = arith.constant 0 : index
    %c0_4 = arith.constant 0 : index
    %3 = vector.load %arg3[%c0_3, %c0_4] : memref<1x128xf32, #tpu.memory_space<vmem>>, vector<1x128xf32>
    %4 = vector.broadcast %3 : vector<1x128xf32> to vector<32x128xf32>
    %5 = arith.addf %2, %4 : vector<32x128xf32>
    %cst_5 = arith.constant 0.000000e+00 : f32
    %6 = vector.broadcast %cst_5 : f32 to vector<32x128xf32>
    %7 = arith.maximumf %5, %6 : vector<32x128xf32>
    %c0_6 = arith.constant 0 : index
    %c0_7 = arith.constant 0 : index
    %8 = vector.load %arg4[%c0_6, %c0_7] : memref<32x1xbf16, #tpu.memory_space<vmem>>, vector<32x1xbf16>
    %9 = arith.extf %8 : vector<32x1xbf16> to vector<32x1xf32>
    %10 = vector.broadcast %9 : vector<32x1xf32> to vector<32x128xf32>
    %11 = arith.mulf %7, %10 : vector<32x128xf32>
    %12 = arith.truncf %11 : vector<32x128xf32> to vector<32x128xbf16>
    %c0_8 = arith.constant 0 : index
    %c0_9 = arith.constant 0 : index
    %13 = vector.load %arg5[%c0_8, %c0_9] : memref<32x128xbf16, #tpu.memory_space<vmem>>, vector<32x128xbf16>
    tpu.vector_store %arg5[%c0_8, %c0_9], %12 {strides = array<i32>} : memref<32x128xbf16, #tpu.memory_space<vmem>>, vector<32x128xbf16>,
    return
  }
  func.func @transform_0(%arg0: i32) -> (i32, i32) {
    %c0_i32 = arith.constant 0 : i32
    %c0_i32_0 = arith.constant 0 : i32
    return %arg0, %c0_i32 : i32, i32
  }
  func.func @transform_1(%arg0: i32) -> (i32, i32) {
    %c0_i32 = arith.constant 0 : i32
    %c0_i32_0 = arith.constant 0 : i32
    %c0_i32_1 = arith.constant 0 : i32
    return %c0_i32, %c0_i32_0 : i32, i32
  }
  func.func @transform_2(%arg0: i32) -> (i32, i32) {
    %c0_i32 = arith.constant 0 : i32
    %c0_i32_0 = arith.constant 0 : i32
    %c0_i32_1 = arith.constant 0 : i32
    return %c0_i32, %c0_i32_0 : i32, i32
  }
  func.func @transform_3(%arg0: i32) -> (i32, i32) {
    %c0_i32 = arith.constant 0 : i32
    %c0_i32_0 = arith.constant 0 : i32
    return %arg0, %c0_i32 : i32, i32
  }
  func.func @transform_4(%arg0: i32) -> (i32, i32) {
    %c0_i32 = arith.constant 0 : i32
    %c0_i32_0 = arith.constant 0 : i32
    return %arg0, %c0_i32 : i32, i32
  }
}

module attributes {stable_mosaic.version = 11 : i64} {
  func.func @_gemm_bias_relu_mask_kernel(%arg0: i32, %arg1: memref<32x1152xbf16, #tpu.memory_space<vmem>>, %arg2: memref<1152x128xbf16, #tpu.memory_space<vmem>>, %arg3: memref<1x128xf32, #tpu.memory_space<vmem>>, %arg4: memref<32x1xbf16, #tpu.memory_space<vmem>>, %arg5: memref<32x128xbf16, #tpu.memory_space<vmem>>) attributes {dimension_semantics = [#tpu.dimension_semantics<parallel>], iteration_bounds = array<i64: 1>, scalar_prefetch = 0 : i64, scratch_operands = 0 : i64, tpu.core_type = #tpu.core_type<tc>, window_params = [{transform_indices = @transform_0, window_bounds = array<i64: 32, 1152>}, {pipeline_mode = #tpu.pipeline_mode<synchronous>, transform_indices = @transform_1, window_bounds = array<i64: 1152, 128>}, {pipeline_mode = #tpu.pipeline_mode<synchronous>, transform_indices = @transform_2, window_bounds = array<i64: 1, 128>}, {transform_indices = @transform_3, window_bounds = array<i64: 32, 1>}, {transform_indices = @transform_4, window_bounds = array<i64: 32, 128>}]} {
    %c0 = arith.constant 0 : index
    %c0_0 = arith.constant 0 : index
    %0 = vector.load %arg1[%c0, %c0_0] : memref<32x1152xbf16, #tpu.memory_space<vmem>>, vector<32x1152xbf16>
    %c0_1 = arith.constant 0 : index
    %c0_2 = arith.constant 0 : index
    %1 = vector.load %arg2[%c0_1, %c0_2] : memref<1152x128xbf16, #tpu.memory_space<vmem>>, vector<1152x128xbf16>
    %cst = arith.constant dense<0.000000e+00> : vector<32x128xf32>
    %2 = tpu.matmul %0, %1, %cst {dimension_numbers = #tpu.dot_dimension_numbers<[1], [0], [0], [1], [0, 0, 1, 1], [], []>} : vector<32x1152xbf16>, vector<1152x128xbf16>, vector<32x128xf32> -> vector<32x128xf32>
    %c0_3 = arith.constant 0 : index
    %c0_4 = arith.constant 0 : index
    %3 = vector.load %arg3[%c0_3, %c0_4] : memref<1x128xf32, #tpu.memory_space<vmem>>, vector<1x128xf32>
    %4 = vector.broadcast %3 : vector<1x128xf32> to vector<32x128xf32>
    %5 = arith.addf %2, %4 : vector<32x128xf32>
    %cst_5 = arith.constant 0.000000e+00 : f32
    %6 = vector.broadcast %cst_5 : f32 to vector<32x128xf32>
    %7 = arith.maximumf %5, %6 : vector<32x128xf32>
    %c0_6 = arith.constant 0 : index
    %c0_7 = arith.constant 0 : index
    %8 = vector.load %arg4[%c0_6, %c0_7] : memref<32x1xbf16, #tpu.memory_space<vmem>>, vector<32x1xbf16>
    %9 = arith.extf %8 : vector<32x1xbf16> to vector<32x1xf32>
    %10 = vector.broadcast %9 : vector<32x1xf32> to vector<32x128xf32>
    %11 = arith.mulf %7, %10 : vector<32x128xf32>
    %12 = arith.truncf %11 : vector<32x128xf32> to vector<32x128xbf16>
    %c0_8 = arith.constant 0 : index
    %c0_9 = arith.constant 0 : index
    %13 = vector.load %arg5[%c0_8, %c0_9] : memref<32x128xbf16, #tpu.memory_space<vmem>>, vector<32x128xbf16>
    tpu.vector_store %arg5[%c0_8, %c0_9], %12 {strides = array<i32>} : memref<32x128xbf16, #tpu.memory_space<vmem>>, vector<32x128xbf16>,
    return
  }
  func.func @transform_0(%arg0: i32) -> (i32, i32) {
    %c0_i32 = arith.constant 0 : i32
    %c0_i32_0 = arith.constant 0 : i32
    return %arg0, %c0_i32 : i32, i32
  }
  func.func @transform_1(%arg0: i32) -> (i32, i32) {
    %c0_i32 = arith.constant 0 : i32
    %c0_i32_0 = arith.constant 0 : i32
    %c0_i32_1 = arith.constant 0 : i32
    return %c0_i32, %c0_i32_0 : i32, i32
  }
  func.func @transform_2(%arg0: i32) -> (i32, i32) {
    %c0_i32 = arith.constant 0 : i32
    %c0_i32_0 = arith.constant 0 : i32
    %c0_i32_1 = arith.constant 0 : i32
    return %c0_i32, %c0_i32_0 : i32, i32
  }
  func.func @transform_3(%arg0: i32) -> (i32, i32) {
    %c0_i32 = arith.constant 0 : i32
    %c0_i32_0 = arith.constant 0 : i32
    return %arg0, %c0_i32 : i32, i32
  }
  func.func @transform_4(%arg0: i32) -> (i32, i32) {
    %c0_i32 = arith.constant 0 : i32
    %c0_i32_0 = arith.constant 0 : i32
    return %arg0, %c0_i32 : i32, i32
  }
}

module attributes {stable_mosaic.version = 11 : i64} {
  func.func @_gemm_bias_relu_mask_kernel(%arg0: i32, %arg1: memref<8x1152xbf16, #tpu.memory_space<vmem>>, %arg2: memref<1152x256xbf16, #tpu.memory_space<vmem>>, %arg3: memref<1x256xf32, #tpu.memory_space<vmem>>, %arg4: memref<8x1xbf16, #tpu.memory_space<vmem>>, %arg5: memref<8x256xbf16, #tpu.memory_space<vmem>>) attributes {dimension_semantics = [#tpu.dimension_semantics<parallel>], iteration_bounds = array<i64: 1>, scalar_prefetch = 0 : i64, scratch_operands = 0 : i64, tpu.core_type = #tpu.core_type<tc>, window_params = [{transform_indices = @transform_0, window_bounds = array<i64: 8, 1152>}, {pipeline_mode = #tpu.pipeline_mode<synchronous>, transform_indices = @transform_1, window_bounds = array<i64: 1152, 256>}, {pipeline_mode = #tpu.pipeline_mode<synchronous>, transform_indices = @transform_2, window_bounds = array<i64: 1, 256>}, {transform_indices = @transform_3, window_bounds = array<i64: 8, 1>}, {transform_indices = @transform_4, window_bounds = array<i64: 8, 256>}]} {
    %c0 = arith.constant 0 : index
    %c0_0 = arith.constant 0 : index
    %0 = vector.load %arg1[%c0, %c0_0] : memref<8x1152xbf16, #tpu.memory_space<vmem>>, vector<8x1152xbf16>
    %c0_1 = arith.constant 0 : index
    %c0_2 = arith.constant 0 : index
    %1 = vector.load %arg2[%c0_1, %c0_2] : memref<1152x256xbf16, #tpu.memory_space<vmem>>, vector<1152x256xbf16>
    %cst = arith.constant dense<0.000000e+00> : vector<8x256xf32>
    %2 = tpu.matmul %0, %1, %cst {dimension_numbers = #tpu.dot_dimension_numbers<[1], [0], [0], [1], [0, 0, 1, 1], [], []>} : vector<8x1152xbf16>, vector<1152x256xbf16>, vector<8x256xf32> -> vector<8x256xf32>
    %c0_3 = arith.constant 0 : index
    %c0_4 = arith.constant 0 : index
    %3 = vector.load %arg3[%c0_3, %c0_4] : memref<1x256xf32, #tpu.memory_space<vmem>>, vector<1x256xf32>
    %4 = vector.broadcast %3 : vector<1x256xf32> to vector<8x256xf32>
    %5 = arith.addf %2, %4 : vector<8x256xf32>
    %cst_5 = arith.constant 0.000000e+00 : f32
    %6 = vector.broadcast %cst_5 : f32 to vector<8x256xf32>
    %7 = arith.maximumf %5, %6 : vector<8x256xf32>
    %c0_6 = arith.constant 0 : index
    %c0_7 = arith.constant 0 : index
    %8 = vector.load %arg4[%c0_6, %c0_7] : memref<8x1xbf16, #tpu.memory_space<vmem>>, vector<8x1xbf16>
    %9 = arith.extf %8 : vector<8x1xbf16> to vector<8x1xf32>
    %10 = vector.broadcast %9 : vector<8x1xf32> to vector<8x256xf32>
    %11 = arith.mulf %7, %10 : vector<8x256xf32>
    %12 = arith.truncf %11 : vector<8x256xf32> to vector<8x256xbf16>
    %c0_8 = arith.constant 0 : index
    %c0_9 = arith.constant 0 : index
    %13 = vector.load %arg5[%c0_8, %c0_9] : memref<8x256xbf16, #tpu.memory_space<vmem>>, vector<8x256xbf16>
    tpu.vector_store %arg5[%c0_8, %c0_9], %12 {strides = array<i32>} : memref<8x256xbf16, #tpu.memory_space<vmem>>, vector<8x256xbf16>,
    return
  }
  func.func @transform_0(%arg0: i32) -> (i32, i32) {
    %c0_i32 = arith.constant 0 : i32
    %c0_i32_0 = arith.constant 0 : i32
    return %arg0, %c0_i32 : i32, i32
  }
  func.func @transform_1(%arg0: i32) -> (i32, i32) {
    %c0_i32 = arith.constant 0 : i32
    %c0_i32_0 = arith.constant 0 : i32
    %c0_i32_1 = arith.constant 0 : i32
    return %c0_i32, %c0_i32_0 : i32, i32
  }
  func.func @transform_2(%arg0: i32) -> (i32, i32) {
    %c0_i32 = arith.constant 0 : i32
    %c0_i32_0 = arith.constant 0 : i32
    %c0_i32_1 = arith.constant 0 : i32
    return %c0_i32, %c0_i32_0 : i32, i32
  }
  func.func @transform_3(%arg0: i32) -> (i32, i32) {
    %c0_i32 = arith.constant 0 : i32
    %c0_i32_0 = arith.constant 0 : i32
    return %arg0, %c0_i32 : i32, i32
  }
  func.func @transform_4(%arg0: i32) -> (i32, i32) {
    %c0_i32 = arith.constant 0 : i32
    %c0_i32_0 = arith.constant 0 : i32
    return %arg0, %c0_i32 : i32, i32
  }
}

module attributes {stable_mosaic.version = 11 : i64} {
  func.func @_gemm_bias_relu_mask_kernel(%arg0: i32, %arg1: memref<8x2304xbf16, #tpu.memory_space<vmem>>, %arg2: memref<2304x256xbf16, #tpu.memory_space<vmem>>, %arg3: memref<1x256xf32, #tpu.memory_space<vmem>>, %arg4: memref<8x1xbf16, #tpu.memory_space<vmem>>, %arg5: memref<8x256xbf16, #tpu.memory_space<vmem>>) attributes {dimension_semantics = [#tpu.dimension_semantics<parallel>], iteration_bounds = array<i64: 1>, scalar_prefetch = 0 : i64, scratch_operands = 0 : i64, tpu.core_type = #tpu.core_type<tc>, window_params = [{transform_indices = @transform_0, window_bounds = array<i64: 8, 2304>}, {pipeline_mode = #tpu.pipeline_mode<synchronous>, transform_indices = @transform_1, window_bounds = array<i64: 2304, 256>}, {pipeline_mode = #tpu.pipeline_mode<synchronous>, transform_indices = @transform_2, window_bounds = array<i64: 1, 256>}, {transform_indices = @transform_3, window_bounds = array<i64: 8, 1>}, {transform_indices = @transform_4, window_bounds = array<i64: 8, 256>}]} {
    %c0 = arith.constant 0 : index
    %c0_0 = arith.constant 0 : index
    %0 = vector.load %arg1[%c0, %c0_0] : memref<8x2304xbf16, #tpu.memory_space<vmem>>, vector<8x2304xbf16>
    %c0_1 = arith.constant 0 : index
    %c0_2 = arith.constant 0 : index
    %1 = vector.load %arg2[%c0_1, %c0_2] : memref<2304x256xbf16, #tpu.memory_space<vmem>>, vector<2304x256xbf16>
    %cst = arith.constant dense<0.000000e+00> : vector<8x256xf32>
    %2 = tpu.matmul %0, %1, %cst {dimension_numbers = #tpu.dot_dimension_numbers<[1], [0], [0], [1], [0, 0, 1, 1], [], []>} : vector<8x2304xbf16>, vector<2304x256xbf16>, vector<8x256xf32> -> vector<8x256xf32>
    %c0_3 = arith.constant 0 : index
    %c0_4 = arith.constant 0 : index
    %3 = vector.load %arg3[%c0_3, %c0_4] : memref<1x256xf32, #tpu.memory_space<vmem>>, vector<1x256xf32>
    %4 = vector.broadcast %3 : vector<1x256xf32> to vector<8x256xf32>
    %5 = arith.addf %2, %4 : vector<8x256xf32>
    %cst_5 = arith.constant 0.000000e+00 : f32
    %6 = vector.broadcast %cst_5 : f32 to vector<8x256xf32>
    %7 = arith.maximumf %5, %6 : vector<8x256xf32>
    %c0_6 = arith.constant 0 : index
    %c0_7 = arith.constant 0 : index
    %8 = vector.load %arg4[%c0_6, %c0_7] : memref<8x1xbf16, #tpu.memory_space<vmem>>, vector<8x1xbf16>
    %9 = arith.extf %8 : vector<8x1xbf16> to vector<8x1xf32>
    %10 = vector.broadcast %9 : vector<8x1xf32> to vector<8x256xf32>
    %11 = arith.mulf %7, %10 : vector<8x256xf32>
    %12 = arith.truncf %11 : vector<8x256xf32> to vector<8x256xbf16>
    %c0_8 = arith.constant 0 : index
    %c0_9 = arith.constant 0 : index
    %13 = vector.load %arg5[%c0_8, %c0_9] : memref<8x256xbf16, #tpu.memory_space<vmem>>, vector<8x256xbf16>
    tpu.vector_store %arg5[%c0_8, %c0_9], %12 {strides = array<i32>} : memref<8x256xbf16, #tpu.memory_space<vmem>>, vector<8x256xbf16>,
    return
  }
  func.func @transform_0(%arg0: i32) -> (i32, i32) {
    %c0_i32 = arith.constant 0 : i32
    %c0_i32_0 = arith.constant 0 : i32
    return %arg0, %c0_i32 : i32, i32
  }
  func.func @transform_1(%arg0: i32) -> (i32, i32) {
    %c0_i32 = arith.constant 0 : i32
    %c0_i32_0 = arith.constant 0 : i32
    %c0_i32_1 = arith.constant 0 : i32
    return %c0_i32, %c0_i32_0 : i32, i32
  }
  func.func @transform_2(%arg0: i32) -> (i32, i32) {
    %c0_i32 = arith.constant 0 : i32
    %c0_i32_0 = arith.constant 0 : i32
    %c0_i32_1 = arith.constant 0 : i32
    return %c0_i32, %c0_i32_0 : i32, i32
  }
  func.func @transform_3(%arg0: i32) -> (i32, i32) {
    %c0_i32 = arith.constant 0 : i32
    %c0_i32_0 = arith.constant 0 : i32
    return %arg0, %c0_i32 : i32, i32
  }
  func.func @transform_4(%arg0: i32) -> (i32, i32) {
    %c0_i32 = arith.constant 0 : i32
    %c0_i32_0 = arith.constant 0 : i32
    return %arg0, %c0_i32 : i32, i32
  }
}

module attributes {stable_mosaic.version = 11 : i64} {
  func.func @_gemm_bias_relu_kernel(%arg0: i32, %arg1: memref<8x2304xbf16, #tpu.memory_space<vmem>>, %arg2: memref<2304x256xbf16, #tpu.memory_space<vmem>>, %arg3: memref<1x256xf32, #tpu.memory_space<vmem>>, %arg4: memref<8x256xbf16, #tpu.memory_space<vmem>>) attributes {dimension_semantics = [#tpu.dimension_semantics<parallel>], iteration_bounds = array<i64: 1>, scalar_prefetch = 0 : i64, scratch_operands = 0 : i64, tpu.core_type = #tpu.core_type<tc>, window_params = [{transform_indices = @transform_0, window_bounds = array<i64: 8, 2304>}, {pipeline_mode = #tpu.pipeline_mode<synchronous>, transform_indices = @transform_1, window_bounds = array<i64: 2304, 256>}, {pipeline_mode = #tpu.pipeline_mode<synchronous>, transform_indices = @transform_2, window_bounds = array<i64: 1, 256>}, {transform_indices = @transform_3, window_bounds = array<i64: 8, 256>}]} {
    %c0 = arith.constant 0 : index
    %c0_0 = arith.constant 0 : index
    %0 = vector.load %arg1[%c0, %c0_0] : memref<8x2304xbf16, #tpu.memory_space<vmem>>, vector<8x2304xbf16>
    %c0_1 = arith.constant 0 : index
    %c0_2 = arith.constant 0 : index
    %1 = vector.load %arg2[%c0_1, %c0_2] : memref<2304x256xbf16, #tpu.memory_space<vmem>>, vector<2304x256xbf16>
    %cst = arith.constant dense<0.000000e+00> : vector<8x256xf32>
    %2 = tpu.matmul %0, %1, %cst {dimension_numbers = #tpu.dot_dimension_numbers<[1], [0], [0], [1], [0, 0, 1, 1], [], []>} : vector<8x2304xbf16>, vector<2304x256xbf16>, vector<8x256xf32> -> vector<8x256xf32>
    %c0_3 = arith.constant 0 : index
    %c0_4 = arith.constant 0 : index
    %3 = vector.load %arg3[%c0_3, %c0_4] : memref<1x256xf32, #tpu.memory_space<vmem>>, vector<1x256xf32>
    %4 = vector.broadcast %3 : vector<1x256xf32> to vector<8x256xf32>
    %5 = arith.addf %2, %4 : vector<8x256xf32>
    %cst_5 = arith.constant 0.000000e+00 : f32
    %6 = vector.broadcast %cst_5 : f32 to vector<8x256xf32>
    %7 = arith.maximumf %5, %6 : vector<8x256xf32>
    %8 = arith.truncf %7 : vector<8x256xf32> to vector<8x256xbf16>
    %c0_6 = arith.constant 0 : index
    %c0_7 = arith.constant 0 : index
    %9 = vector.load %arg4[%c0_6, %c0_7] : memref<8x256xbf16, #tpu.memory_space<vmem>>, vector<8x256xbf16>
    tpu.vector_store %arg4[%c0_6, %c0_7], %8 {strides = array<i32>} : memref<8x256xbf16, #tpu.memory_space<vmem>>, vector<8x256xbf16>,
    return
  }
  func.func @transform_0(%arg0: i32) -> (i32, i32) {
    %c0_i32 = arith.constant 0 : i32
    %c0_i32_0 = arith.constant 0 : i32
    return %arg0, %c0_i32 : i32, i32
  }
  func.func @transform_1(%arg0: i32) -> (i32, i32) {
    %c0_i32 = arith.constant 0 : i32
    %c0_i32_0 = arith.constant 0 : i32
    %c0_i32_1 = arith.constant 0 : i32
    return %c0_i32, %c0_i32_0 : i32, i32
  }
  func.func @transform_2(%arg0: i32) -> (i32, i32) {
    %c0_i32 = arith.constant 0 : i32
    %c0_i32_0 = arith.constant 0 : i32
    %c0_i32_1 = arith.constant 0 : i32
    return %c0_i32, %c0_i32_0 : i32, i32
  }
  func.func @transform_3(%arg0: i32) -> (i32, i32) {
    %c0_i32 = arith.constant 0 : i32
    %c0_i32_0 = arith.constant 0 : i32
    return %arg0, %c0_i32 : i32, i32
  }
}

</mosaic_0001>

<bundles_post_ra>
// kernel: pillar_backbone_forward.14
= control target key start
LH: loop header
LB: loop body
LE: loop exit
PB: predicated region body
PF: predicated region fallthrough
CT: control target
= control target key end

     0   :  { %vm774_vm0 = vcmask 261120   ;;  %v3033_v13 = vmov 0   ;;  %vm2018_vm1 = vcmask 257024   ;;  %s4376_s1 = inlined_call_operand.vmem [shape: bf16[288,32], index: 1, kind: input, shape index: {}]   ;;  %s4377_s0 = inlined_call_operand.vmem [shape: bf16[512,288], index: 0, kind: input, shape index: {}]   ;;  %s4378_s3 = inlined_call_operand.vmem [shape: bf16[512,1], index: 3, kind: input, shape index: {}]   ;;  %s4379_s2 = inlined_call_operand.vmem [shape: f32[1,32], index: 2, kind: input, shape index: {}]   ;;  %s4380_s4 = inlined_call_operand.vmem [shape: bf16[512,32], index: 4, kind: output, shape index: {}]  }
   0x1   :  { %v2678_v0 = vld [vmem:[%s4376_s1 + $0x38] sm:$0xff]  ;;  %v3065_v1 = vld [vmem:[%s4376_s1 + $0x88] sm:$0xff]  ;;  %v2677_v3 = vld [vmem:[%s4376_s1 + $0x30] sm:$0xff]  ;;  %2867 = vset.pattern.permute.xlu0 %v3033_v13  ;;  %2878 = vset.pattern.permute.xlu1 %v3033_v13 }
   0x2   :  { %v3070_v2 = vld [vmem:[%s4376_s1 + $0x78] sm:$0xff]  ;;  %871 = vmatpush.bf16.msra.mxu0 %v2678_v0  ;;  %2848 = vmatpush.bf16.msra.mxu3 %v2678_v0  ;;  %v3078_v4 = vld [vmem:[%s4376_s1 + $0x80] sm:$0xff]  ;;  %v3085_v5 = vld [vmem:[%s4376_s1 + $0x70] sm:$0xff] }
   0x3   :  { %1215 = vmatpush.bf16.msra.mxu2 %v3065_v1  ;;  %1040 = vmatpush.bf16.msra.mxu1 %v3070_v2  ;;  %v2097_v6 = vld [vmem:[%s4377_s0 + $0x8] sm:$0xf]  ;;  %v2577_v7 = vld [vmem:[%s4377_s0 + $0x10] sm:$0xf0]  ;;  %v2675_v11 = vld [vmem:[%s4376_s1 + $0x20] sm:$0xff] }
   0x4   :  { %v2098_v8 = vor.u32 %v2577_v7, %v2097_v6  ;;  %v2676_v9 = vld [vmem:[%s4376_s1 + $0x28] sm:$0xff]  ;;  %v3111_v12 = vld [vmem:[%s4376_s1 + $0x60] sm:$0xff]  ;;  %2889 = vset.pattern.permute.xlu2 %v3033_v13  ;;  %v2674_v14 = vld [vmem:[%s4376_s1 + $0x18] sm:$0xff] }
   0x5   :  { %v3101_v10 = vld [vmem:[%s4376_s1 + $0x68] sm:$0xff]  ;;  %v2690_v15 = vld [vmem:[%s4378_s3] sm:$0xff]   ;;  %v3123_v16 = vld [vmem:[%s4376_s1 + $0x58] sm:$0xff] }
   0x6   :  { %872 = vmatpush.bf16.msra.mxu0 %v2677_v3  ;;  %2849 = vmatpush.bf16.msra.mxu3 %v2677_v3  ;;  %v2691_v17 = vunpack.c.l.bf16 %v2690_v15  ;;  %v2692_v18 = vunpack.c.h.bf16 %v2690_v15  ;;  %v2673_v20 = vld [vmem:[%s4376_s1 + $0x10] sm:$0xff]  ;;  %v2109_v22 = vld [vmem:[%s4377_s0 + $0x20] sm:$0xf]  ;;  %v2580_v23 = vld [vmem:[%s4377_s0 + $0x28] sm:$0xf0] }
   0x7   :  { %1216 = vmatpush.bf16.msra.mxu2 %v3078_v4  ;;  %1041 = vmatpush.bf16.msra.mxu1 %v3085_v5  ;;  %v3132_v21 = vld [vmem:[%s4376_s1 + $0x50] sm:$0xff]  ;;  %v2110_v24 = vor.u32 %v2580_v23, %v2109_v22  ;;  %v2672_v25 = vld [vmem:[%s4376_s1 + $0x8] sm:$0xff]  ;;  %v2671_v27 = vld [vmem:[%s4376_s1] sm:$0xff] }
   0x8   :  { %v2868_v19 = vpack.i.bf16 %v2692_v18, %v2691_v17  ;;  %v2680_v26 = vld [vmem:[%s4376_s1 + $0x48] sm:$0xff]  ;;  %v3153_v28 = vld [vmem:[%s4376_s1 + $0x40] sm:$0xff]  ;;  %v2091_v34 = vld [vmem:[%s4377_s0 + $0xc] sm:$0xf0] }
   0x9   :  { %v2089_v29 = vld [vmem:[%s4377_s0] sm:$0xf]  ;;  %v2576_v30 = vld [vmem:[%s4377_s0 + $0x8] sm:$0xf0]  ;;  %v2575_v33 = vld [vmem:[%s4377_s0 + $0x4] sm:$0xf] }
   0xa   :  { %2543 = vmatmul.msk.bf16.vlgmr.msra.gmra.mxu2 %vm774_vm0, %v2098_v8  ;;  %873 = vmatpush.bf16.msra.mxu0 %v2676_v9  ;;  %v2377_v31 = vld [vmem:[%s4377_s0 + $0x240] sm:$0xf]  ;;  %v2648_v32 = vld [vmem:[%s4377_s0 + $0x248] sm:$0xf0]  ;;  %v2090_v35 = vor.u32 %v2576_v30, %v2089_v29  ;;  %v2094_v37 = vor.u32 %v2575_v33, %v2091_v34  ;;  %v2121_v42 = vld [vmem:[%s4377_s0 + $0x38] sm:$0xf] }
   0xb   :  { %2850 = vmatpush.bf16.msra.mxu3 %v2676_v9  ;;  %1042 = vmatpush.bf16.msra.mxu1 %v3101_v10  ;;  %v2378_v36 = vor.u32 %v2648_v32, %v2377_v31  ;;  %v2817_v38 = vld [vmem:[%s4378_s3 + $0x8] sm:$0xff]   ;;  %v2583_v43 = vld [vmem:[%s4377_s0 + $0x40] sm:$0xf0]  ;;  %v2101_v45 = vld [vmem:[%s4377_s0 + $0x18] sm:$0xf] }
   0xc   :  { %2869 = vperm.xlu0 %2867, %v2868_v19   ;;  %v2695_v39 = vunpack.c.l.bf16 %v2817_v38  ;;  %v2696_v40 = vunpack.c.h.bf16 %v2817_v38  ;;  %v2122_v44 = vor.u32 %v2583_v43, %v2121_v42  ;;  %v2579_v46 = vld [vmem:[%s4377_s0 + $0x20] sm:$0xf0]  ;;  %v2389_v47 = vld [vmem:[%s4377_s0 + $0x258] sm:$0xf]  ;;  %v2578_v49 = vld [vmem:[%s4377_s0 + $0x1c] sm:$0xf] }
   0xd   :  { %v2651_v48 = vld [vmem:[%s4377_s0 + $0x260] sm:$0xf0]  ;;  %v2103_v50 = vld [vmem:[%s4377_s0 + $0x24] sm:$0xf0]  ;;  %v2102_v51 = vor.u32 %v2579_v46, %v2101_v45  ;;  %v2818_v54 = vld [vmem:[%s4378_s3 + $0x10] sm:$0xff]  }
   0xe   :  { %874 = vmatpush.bf16.msra.mxu0 %v2675_v11  ;;  %v2873_v41 = vpack.i.bf16 %v2696_v40, %v2695_v39  ;;  %v2390_v52 = vor.u32 %v2651_v48, %v2389_v47  ;;  %v2106_v53 = vor.u32 %v2578_v49, %v2103_v50  ;;  %v2699_v55 = vunpack.c.l.bf16 %v2818_v54  ;;  %v2133_v58 = vld [vmem:[%s4377_s0 + $0x50] sm:$0xf]  ;;  %v2586_v59 = vld [vmem:[%s4377_s0 + $0x58] sm:$0xf0]  ;;  %v2115_v3 = vld [vmem:[%s4377_s0 + $0x3c] sm:$0xf0] }
   0xf   :  { %2851 = vmatpush.bf16.msra.mxu3 %v2675_v11  ;;  %1043 = vmatpush.bf16.msra.mxu1 %v3111_v12  ;;  %v2700_v56 = vunpack.c.h.bf16 %v2818_v54  ;;  %v2134_v60 = vor.u32 %v2586_v59, %v2133_v58  ;;  %v2113_v61 = vld [vmem:[%s4377_s0 + $0x30] sm:$0xf]  ;;  %v2582_v62 = vld [vmem:[%s4377_s0 + $0x38] sm:$0xf0]  ;;  %v2413_v15 = vld [vmem:[%s4377_s0 + $0x288] sm:$0xf] }
  0x10   :  { %v2401_v63 = vld [vmem:[%s4377_s0 + $0x270] sm:$0xf]  ;;  %v2654_v0 = vld [vmem:[%s4377_s0 + $0x278] sm:$0xf0]  ;;  %v2584_v17 = vld [vmem:[%s4377_s0 + $0x4c] sm:$0xf] }
  0x11   :  { %v2879_v57 = vpack.i.bf16 %v2700_v56, %v2699_v55  ;;  %v2402_v6 = vor.u32 %v2654_v0, %v2401_v63  ;;  %v2819_v8 = vld [vmem:[%s4378_s3 + $0x18] sm:$0xff]   ;;  %v2157_v22 = vld [vmem:[%s4377_s0 + $0x80] sm:$0xf]  ;;  %v2592_v23 = vld [vmem:[%s4377_s0 + $0x88] sm:$0xf0] }
  0x12   :  { %875 = vmatpush.bf16.msra.mxu0 %v2674_v14  ;;  %v2703_v9 = vunpack.c.l.bf16 %v2819_v8  ;;  %v2127_v18 = vld [vmem:[%s4377_s0 + $0x54] sm:$0xf0]  ;;  %v2587_v29 = vld [vmem:[%s4377_s0 + $0x64] sm:$0xf]  ;;  %v2139_v30 = vld [vmem:[%s4377_s0 + $0x6c] sm:$0xf0] }
  0x13   :  { %2852 = vmatpush.bf16.msra.mxu3 %v2674_v14  ;;  %1044 = vmatpush.bf16.msra.mxu1 %v3123_v16  ;;  %v2125_v14 = vld [vmem:[%s4377_s0 + $0x48] sm:$0xf]  ;;  %v2142_v33 = vor.u32 %v2587_v29, %v2139_v30  ;;  %v2169_v34 = vld [vmem:[%s4377_s0 + $0x98] sm:$0xf]  ;;  %v2591_v42 = vld [vmem:[%s4377_s0 + $0x80] sm:$0xf0] }
  0x14   :  { %2874 = vperm.xlu0 %2867, %v2873_v41   ;;  %2880 = vperm.xlu1 %2878, %v2879_v57   ;;  %v2149_v41 = vld [vmem:[%s4377_s0 + $0x78] sm:$0xf]  ;;  %v2590_v45 = vld [vmem:[%s4377_s0 + $0x7c] sm:$0xf]  ;;  %v2151_v46 = vld [vmem:[%s4377_s0 + $0x84] sm:$0xf0] }
  0x15   :  { %v2437_v43 = vld [vmem:[%s4377_s0 + $0x2b8] sm:$0xf]  ;;  %v2150_v47 = vor.u32 %v2591_v42, %v2149_v41  ;;  %v2154_v49 = vor.u32 %v2590_v45, %v2151_v46  ;;  %v2822_v50 = vld [vmem:[%s4378_s3 + $0x30] sm:$0xff]   ;;  %v2598_v55 = vld [vmem:[%s4377_s0 + $0xb8] sm:$0xf0] }
  0x16   :  { %876 = vmatpush.bf16.msra.mxu0 %v2673_v20  ;;  %v2181_v54 = vld [vmem:[%s4377_s0 + $0xb0] sm:$0xf]  ;;  %v2821_v57 = vld [vmem:[%s4378_s3 + $0x28] sm:$0xff]   ;;  %v2666_v0 = vld [vmem:[%s4377_s0 + $0x2d8] sm:$0xf0] }
  0x17   :  { %2853 = vmatpush.bf16.msra.mxu3 %v2673_v20  ;;  %1045 = vmatpush.bf16.msra.mxu1 %v3132_v21  ;;  %v2182_v56 = vor.u32 %v2598_v55, %v2181_v54  ;;  %v2711_v58 = vunpack.c.l.bf16 %v2821_v57  ;;  %v2712_v59 = vunpack.c.h.bf16 %v2821_v57  ;;  %v2449_v63 = vld [vmem:[%s4377_s0 + $0x2d0] sm:$0xf]  ;;  %v2600_v29 = vld [vmem:[%s4377_s0 + $0xc8] sm:$0xf0]  ;;  %v2647_v30 = vld [vmem:[%s4377_s0 + $0x244] sm:$0xf] }
  0x1a   :  { %2544 = vmatmul.msk.bf16.gmra.mxu2 %vm774_vm0, %v2110_v24  ;;  %877 = vmatpush.bf16.msra.mxu0 %v2672_v25  ;;  %v2158_v24 = vor.u32 %v2592_v23, %v2157_v22  ;;  %v2205_v23 = vld [vmem:[%s4377_s0 + $0xe0] sm:$0xf] }
  0x1b   :  { %2854 = vmatpush.bf16.msra.mxu3 %v2672_v25  ;;  %1046 = vmatpush.bf16.msra.mxu1 %v2680_v26  ;;  %v2137_v25 = vld [vmem:[%s4377_s0 + $0x60] sm:$0xf] }
  0x1e   :  { %878 = vmatpush.bf16.msra.mxu0 %v2671_v27 }
  0x1f   :  { %2855 = vmatpush.bf16.msra.mxu3 %v2671_v27  ;;  %1047 = vmatpush.bf16.msra.mxu1 %v3153_v28  ;;  %v2425_v27 = vld [vmem:[%s4377_s0 + $0x2a0] sm:$0xf] }
  0x21   :  { %879 = vmatmul.bf16.vlgmr.msra.gmra.mxu0 %v2090_v35  ;;  %v2595_v35 = vld [vmem:[%s4377_s0 + $0xa0] sm:$0xf0] }
  0x22   :  { %999 = vmatmul.bf16.vlgmr.msra.gmra.mxu3 %v2378_v36  ;;  %1048 = vmatmul.bf16.vlgmr.msra.gmra.mxu1 %v2094_v37  ;;  %v2170_v36 = vor.u32 %v2595_v35, %v2169_v34  ;;  %v2820_v37 = vld [vmem:[%s4378_s3 + $0x20] sm:$0xff]  }
  0x23   :  { %2856 = vmatpush.bf16.msrb.mxu3 %v3070_v2  ;;  %v2581_v2 = vld [vmem:[%s4377_s0 + $0x34] sm:$0xf]  ;;  %v2707_v38 = vunpack.c.l.bf16 %v2820_v37  ;;  %v2708_v39 = vunpack.c.h.bf16 %v2820_v37 }
  0x24   :  { %v2118_v7 = vor.u32 %v2581_v2, %v2115_v3  ;;  %v2593_v2 = vld [vmem:[%s4377_s0 + $0x94] sm:$0xf]  ;;  %v2163_v3 = vld [vmem:[%s4377_s0 + $0x9c] sm:$0xf0] }
  0x25   :  { %v2890_v40 = vpack.i.bf16 %v2708_v39, %v2707_v38  ;;  %v2825_v39 = vld [vmem:[%s4378_s3 + $0x48] sm:$0xff]  }
  0x26   :  { %v2727_v42 = vunpack.c.l.bf16 %v2825_v39 }
  0x27   :  { %2857 = vmatpush.bf16.msrb.mxu3 %v3085_v5  ;;  %v2114_v5 = vor.u32 %v2582_v62, %v2113_v61  ;;  %2891 = vperm.xlu2 %2889, %v2890_v40   ;;  %v2161_v61 = vld [vmem:[%s4377_s0 + $0x90] sm:$0xf]  ;;  %v2594_v62 = vld [vmem:[%s4377_s0 + $0x98] sm:$0xf0] }
  0x2a   :  { %2545 = vmatmul.msk.bf16.gmra.mxu2 %vm774_vm0, %v2122_v44  ;;  %v2663_v44 = vld [vmem:[%s4377_s0 + $0x2c0] sm:$0xf0] }
  0x2b   :  { %2858 = vmatpush.bf16.msrb.mxu3 %v3101_v10  ;;  %v2704_v10 = vunpack.c.h.bf16 %v2819_v8  ;;  %v2438_v48 = vor.u32 %v2663_v44, %v2437_v43  ;;  %v2823_v8 = vld [vmem:[%s4378_s3 + $0x38] sm:$0xff]   ;;  %v2728_v43 = vunpack.c.h.bf16 %v2825_v39 }
  0x2d   :  { %v2884_v11 = vpack.i.bf16 %v2704_v10, %v2703_v9  ;;  %v2719_v9 = vunpack.c.l.bf16 %v2823_v8  ;;  %v2720_v10 = vunpack.c.h.bf16 %v2823_v8  ;;  %v2915_v46 = vpack.i.bf16 %v2728_v43, %v2727_v42  ;;  %v2606_v42 = vld [vmem:[%s4377_s0 + $0xf8] sm:$0xf0]  ;;  %v2653_v43 = vld [vmem:[%s4377_s0 + $0x274] sm:$0xf] }
  0x2f   :  { %2859 = vmatpush.bf16.msrb.mxu3 %v3111_v12  ;;  %v2145_v12 = vld [vmem:[%s4377_s0 + $0x68] sm:$0xf]  ;;  %2885 = vperm.xlu1 %2878, %v2884_v11   ;;  %v2905_v11 = vpack.i.bf16 %v2720_v10, %v2719_v9  ;;  %v2602_v9 = vld [vmem:[%s4377_s0 + $0xdc] sm:$0xf] }
  0x30   :  { %v2199_v10 = vld [vmem:[%s4377_s0 + $0xe4] sm:$0xf0] }
  0x31   :  { %884 = vmatmul.bf16.gmra.mxu0 %v2102_v51  ;;  %v2715_v51 = vunpack.c.l.bf16 %v2822_v50 }
  0x32   :  { %1004 = vmatmul.bf16.gmra.mxu3 %v2390_v52  ;;  %1053 = vmatmul.bf16.gmra.mxu1 %v2106_v53  ;;  %v2716_v52 = vunpack.c.h.bf16 %v2822_v50  ;;  %v2607_v50 = vld [vmem:[%s4377_s0 + $0x100] sm:$0xf0] }
  0x33   :  { %2860 = vmatpush.bf16.msrb.mxu3 %v3123_v16  ;;  %v2657_v16 = vld [vmem:[%s4377_s0 + $0x290] sm:$0xf0] }
  0x34   :  { %v2414_v20 = vor.u32 %v2657_v16, %v2413_v15  ;;  %v2900_v53 = vpack.i.bf16 %v2716_v52, %v2715_v51  ;;  %v2461_v15 = vld [vmem:[%s4377_s0 + $0x2e8] sm:$0xf]  ;;  %v2669_v16 = vld [vmem:[%s4377_s0 + $0x2f0] sm:$0xf0] }
  0x36   :  { %2901 = vperm.xlu0 %2867, %v2900_v53  }
  0x37   :  { %2861 = vmatpush.bf16.msrb.mxu3 %v3132_v21  ;;  %v2130_v21 = vor.u32 %v2584_v17, %v2127_v18  ;;  %2906 = vperm.xlu1 %2878, %v2905_v11   ;;  %v2596_v17 = vld [vmem:[%s4377_s0 + $0xac] sm:$0xf]  ;;  %v2175_v18 = vld [vmem:[%s4377_s0 + $0xb4] sm:$0xf0] }
  0x38   :  { %v2178_v22 = vor.u32 %v2596_v17, %v2175_v18 }
  0x3a   :  { %2546 = vmatmul.msk.bf16.gmra.mxu2 %vm774_vm0, %v2134_v60  ;;  %v2895_v60 = vpack.i.bf16 %v2712_v59, %v2711_v58 }
  0x3b   :  { %2862 = vmatpush.bf16.msrb.mxu3 %v2680_v26  ;;  %v2588_v26 = vld [vmem:[%s4377_s0 + $0x68] sm:$0xf0] }
  0x3c   :  { %v2138_v31 = vor.u32 %v2588_v26, %v2137_v25  ;;  %2896 = vperm.xlu2 %2889, %v2895_v60  }
  0x3e   :  { %2916 = vperm.xlu0 %2867, %v2915_v46  }
  0x3f   :  { %2863 = vmatpush.bf16.msrb.mxu3 %v3153_v28  ;;  %v2660_v28 = vld [vmem:[%s4377_s0 + $0x2a8] sm:$0xf0] }
  0x40   :  { %v2426_v32 = vor.u32 %v2660_v28, %v2425_v27  ;;  %v3389_v27 = vld [vmem:[%s4379_s2] ss:$0 sm:$0xff] }
  0x41   :  { %889 = vmatmul.bf16.gmra.mxu0 %v2114_v5  ;;  %v2162_v5 = vor.u32 %v2594_v62, %v2161_v61  ;;  %v2185_v28 = vld [vmem:[%s4377_s0 + $0xc0] sm:$0xf] }
  0x42   :  { %1009 = vmatmul.bf16.gmra.mxu3 %v2402_v6  ;;  %1058 = vmatmul.bf16.gmra.mxu1 %v2118_v7  ;;  %v2450_v6 = vor.u32 %v2666_v0, %v2449_v63  ;;  %v2166_v7 = vor.u32 %v2593_v2, %v2163_v3  ;;  %v2186_v35 = vor.u32 %v2600_v29, %v2185_v28  ;;  %v2197_v0 = vld [vmem:[%s4377_s0 + $0xd8] sm:$0xf]  ;;  %v2603_v2 = vld [vmem:[%s4377_s0 + $0xe0] sm:$0xf0]  ;;  %v2650_v3 = vld [vmem:[%s4377_s0 + $0x25c] sm:$0xf] }
  0x43   :  { %2864 = vmatpush.bf16.msra.mxu3 %v3065_v1  ;;  %v2589_v1 = vld [vmem:[%s4377_s0 + $0x70] sm:$0xf0]  ;;  %v2229_v29 = vld [vmem:[%s4377_s0 + $0x110] sm:$0xf] }
  0x44   :  { %v2146_v13 = vor.u32 %v2589_v1, %v2145_v12  ;;  %v2193_v12 = vld [vmem:[%s4377_s0 + $0xc8] sm:$0xf]  ;;  %v2601_v1 = vld [vmem:[%s4377_s0 + $0xd0] sm:$0xf0] }
  0x47   :  { %2865 = vmatpush.bf16.msra.mxu3 %v3078_v4  ;;  %v2585_v4 = vld [vmem:[%s4377_s0 + $0x50] sm:$0xf0] }
  0x48   :  { %v2126_v19 = vor.u32 %v2585_v4, %v2125_v14  ;;  %v2173_v14 = vld [vmem:[%s4377_s0 + $0xa8] sm:$0xf]  ;;  %v2597_v4 = vld [vmem:[%s4377_s0 + $0xb0] sm:$0xf0] }
  0x4a   :  { %2547 = vmatmul.msk.bf16.gmra.mxu2 %vm774_vm0, %v2146_v13  ;;  %v2194_v13 = vor.u32 %v2601_v1, %v2193_v12 }
  0x51   :  { %894 = vmatmul.bf16.gmra.mxu0 %v2126_v19 }
  0x52   :  { %1014 = vmatmul.bf16.gmra.mxu3 %v2414_v20  ;;  %1063 = vmatmul.bf16.gmra.mxu1 %v2130_v21  ;;  %v2174_v20 = vor.u32 %v2597_v4, %v2173_v14  ;;  %v2462_v21 = vor.u32 %v2669_v16, %v2461_v15  ;;  %v2202_v15 = vor.u32 %v2602_v9, %v2199_v10  ;;  %v2826_v16 = vld [vmem:[%s4378_s3 + $0x50] sm:$0xff]  }
  0x5a   :  { %2548 = vmatmul.msk.bf16.gmra.mxu2 %vm774_vm0, %v2158_v24  ;;  %v2604_v24 = vld [vmem:[%s4377_s0 + $0xe8] sm:$0xf0] }
  0x5b   :  { %v2206_v26 = vor.u32 %v2604_v24, %v2205_v23 }
  0x61   :  { %899 = vmatmul.bf16.gmra.mxu0 %v2138_v31  ;;  %v2379_v31 = vld [vmem:[%s4377_s0 + $0x24c] sm:$0xf0] }
  0x62   :  { %1019 = vmatmul.bf16.gmra.mxu3 %v2426_v32  ;;  %1068 = vmatmul.bf16.gmra.mxu1 %v2142_v33  ;;  %v2599_v32 = vld [vmem:[%s4377_s0 + $0xc4] sm:$0xf]  ;;  %v2187_v33 = vld [vmem:[%s4377_s0 + $0xcc] sm:$0xf0]  ;;  %v2382_v37 = vor.u32 %v2647_v30, %v2379_v31  ;;  %v2610_v30 = vld [vmem:[%s4377_s0 + $0x118] sm:$0xf0] }
  0x63   :  { %v2190_v38 = vor.u32 %v2599_v32, %v2187_v33 }
  0x6a   :  { %2549 = vmatmul.msk.bf16.gmra.mxu2 %vm774_vm0, %v2170_v36 }
  0x71   :  { %904 = vmatmul.bf16.gmra.mxu0 %v2150_v47 }
  0x72   :  { %1024 = vmatmul.bf16.gmra.mxu3 %v2438_v48  ;;  %1073 = vmatmul.bf16.gmra.mxu1 %v2154_v49  ;;  %v2217_v49 = vld [vmem:[%s4377_s0 + $0xf8] sm:$0xf] }
  0x73   :  { %v2218_v55 = vor.u32 %v2607_v50, %v2217_v49 }
  0x7a   :  { %2550 = vmatmul.msk.bf16.gmra.mxu2 %vm774_vm0, %v2182_v56  ;;  %v2824_v56 = vld [vmem:[%s4378_s3 + $0x40] sm:$0xff]  }
  0x7b   :  { %v2723_v60 = vunpack.c.l.bf16 %v2824_v56  ;;  %v2724_v61 = vunpack.c.h.bf16 %v2824_v56 }
  0x7e   :  { %v2870_v44 = vpop.permute.xlu0 %2869 }
  0x7f   :  { %v2871_v48 = vunpack.i.l.bf16 %v2870_v44 }
  0x81   :  { %909 = vmatmul.bf16.gmra.mxu0 %v2162_v5  ;;  %v2391_v5 = vld [vmem:[%s4377_s0 + $0x264] sm:$0xf0] }
  0x82   :  { %1029 = vmatmul.bf16.gmra.mxu3 %v2450_v6  ;;  %1078 = vmatmul.bf16.gmra.mxu1 %v2166_v7  ;;  %v2910_v6 = vpack.i.bf16 %v2724_v61, %v2723_v60  ;;  %v2872_v7 = vunpack.i.h.bf16 %v2870_v44  ;;  %v2394_v4 = vor.u32 %v2650_v3, %v2391_v5  ;;  %v2403_v44 = vld [vmem:[%s4377_s0 + $0x27c] sm:$0xf0]  ;;  %v2613_v3 = vld [vmem:[%s4377_s0 + $0x130] sm:$0xf0] }
  0x83   :  { %v2406_v56 = vor.u32 %v2653_v43, %v2403_v44  ;;  %v2253_v43 = vld [vmem:[%s4377_s0 + $0x140] sm:$0xf]  ;;  %v2616_v44 = vld [vmem:[%s4377_s0 + $0x148] sm:$0xf0] }
  0x84   :  { %2911 = vperm.xlu2 %2889, %v2910_v6  }
  0x86   :  { %v2881_v60 = vpop.permute.xlu1 %2880 }
  0x8a   :  { %2551 = vmatmul.msk.bf16.gmra.mxu2 %vm774_vm0, %v2194_v13  ;;  %v2198_v13 = vor.u32 %v2603_v2, %v2197_v0  ;;  %v2882_v0 = vunpack.i.l.bf16 %v2881_v60  ;;  %v2241_v2 = vld [vmem:[%s4377_s0 + $0x128] sm:$0xf] }
  0x8b   :  { %v2242_v9 = vor.u32 %v2613_v3, %v2241_v2 }
  0x8d   :  { %v1218_v19 = vpop.f32.mrf.mxu2 }
  0x91   :  { %914 = vmatmul.bf16.gmra.mxu0 %v2174_v20  ;;  %v2731_v20 = vunpack.c.l.bf16 %v2826_v16 }
  0x92   :  { %1034 = vmatmul.bf16.gmra.mxu3 %v2462_v21  ;;  %1083 = vmatmul.bf16.gmra.mxu1 %v2178_v22  ;;  %v2732_v21 = vunpack.c.h.bf16 %v2826_v16  ;;  %v2875_v22 = vpop.permute.xlu0 %2874  ;;  %v2656_v16 = vld [vmem:[%s4377_s0 + $0x28c] sm:$0xf] }
  0x93   :  { %v2876_v28 = vunpack.i.l.bf16 %v2875_v22 }
  0x95   :  { %v1220_v25 = vpop.f32.mrf.mxu2 }
  0x9a   :  { %2552 = vmatmul.msk.bf16.gmra.mxu2 %vm774_vm0, %v2206_v26 }
  0x9d   :  { %v3410_v34 = vpop.f32.mrf.mxu2 }
  0x9e   :  { %v880_v36 = vpop.f32.mrf.mxu0 }
  0x9f   :  { %v881_v40 = vadd.f32 %v3389_v27, %v880_v36  ;;  %v1049_v41 = vpop.f32.mrf.mxu1  ;;  %v2230_v36 = vor.u32 %v2610_v30, %v2229_v29  ;;  %v2828_v30 = vld [vmem:[%s4378_s3 + $0x60] sm:$0xff]  }
  0xa1   :  { %v1050_v45 = vadd.f32 %v1049_v41, %v881_v40  ;;  %919 = vmatmul.bf16.gmra.mxu0 %v2186_v35  ;;  %v2209_v41 = vld [vmem:[%s4377_s0 + $0xf0] sm:$0xf] }
  0xa2   :  { %1168 = vmatmul.bf16.vlgmr.msrb.gmra.mxu3 %v2382_v37  ;;  %1088 = vmatmul.bf16.gmra.mxu1 %v2190_v38 }
  0xa3   :  { %v1219_v47 = vadd.f32 %v1218_v19, %v1050_v45  ;;  %v2877_v45 = vunpack.i.h.bf16 %v2875_v22 }
  0xa5   :  { %v1378_v51 = vmax.f32 %v1219_v47, 0.0  ;;  %v3422_v52 = vpop.f32.mrf.mxu3  ;;  %v3424_v53 = vpop.f32.mrf.mxu2  ;;  %v2605_v47 = vld [vmem:[%s4377_s0 + $0xf4] sm:$0xf] }
  0xa6   :  { %v882_v54 = vpop.f32.mrf.mxu0 }
  0xa7   :  { %v1890_v57 = vmul.f32 %v2871_v48, %v1378_v51  ;;  %v883_v58 = vadd.f32 %v3389_v27, %v882_v54  ;;  %v1051_v59 = vpop.f32.mrf.mxu1  ;;  %v2211_v48 = vld [vmem:[%s4377_s0 + $0xfc] sm:$0xf0]  ;;  %v2210_v54 = vor.u32 %v2606_v42, %v2209_v41 }
  0xa9   :  { %v1954_v62 = vpack.c.bf16 %v1890_v57, %v1890_v57  ;;  %v1052_v63 = vadd.f32 %v1051_v59, %v883_v58  ;;  %v2214_v57 = vor.u32 %v2605_v47, %v2211_v48 }
  0xaa   :  { %2553 = vmatmul.msk.bf16.gmra.mxu2 %vm774_vm0, %v2218_v55 }
  0xab   :  { %2019 = vst.msk [vmem:[%s4380_s4] sm:$0xf] %vm2018_vm1, %v1954_v62  ;;  %v1221_v8 = vadd.f32 %v1220_v25, %v1052_v63  ;;  %v2920_v25 = vpack.i.bf16 %v2732_v21, %v2731_v20  ;;  %v2608_v20 = vld [vmem:[%s4377_s0 + $0x10c] sm:$0xf]  ;;  %v2223_v21 = vld [vmem:[%s4377_s0 + $0x114] sm:$0xf0] }
  0xac   :  { %v2226_v29 = vor.u32 %v2608_v20, %v2223_v21  ;;  %v2892_v20 = vpop.permute.xlu2 %2891 }
  0xad   :  { %v1379_v11 = vmax.f32 %v1221_v8, 0.0  ;;  %v3453_v12 = vpop.f32.mrf.mxu3  ;;  %v1228_v1 = vpop.f32.mrf.mxu2  ;;  %2921 = vperm.xlu1 %2878, %v2920_v25  }
  0xae   :  { %v885_v14 = vpop.f32.mrf.mxu0 }
  0xaf   :  { %v1891_v17 = vmul.f32 %v2872_v7, %v1379_v11  ;;  %v886_v18 = vadd.f32 %v3389_v27, %v885_v14  ;;  %v1054_v19 = vpop.f32.mrf.mxu1 }
  0xb1   :  { %v1955_v23 = vpack.c.bf16 %v1891_v17, %v1891_v17  ;;  %v1055_v24 = vadd.f32 %v1054_v19, %v886_v18  ;;  %924 = vmatmul.bf16.gmra.mxu0 %v2198_v13  ;;  %v2415_v17 = vld [vmem:[%s4377_s0 + $0x294] sm:$0xf0]  ;;  %v2883_v18 = vunpack.i.h.bf16 %v2881_v60  ;;  %v2233_v60 = vld [vmem:[%s4377_s0 + $0x120] sm:$0xf] }
  0xb2   :  { %1173 = vmatmul.bf16.gmra.mxu3 %v2394_v4  ;;  %1093 = vmatmul.bf16.gmra.mxu1 %v2202_v15  ;;  %v2221_v4 = vld [vmem:[%s4377_s0 + $0x108] sm:$0xf]  ;;  %v2609_v15 = vld [vmem:[%s4377_s0 + $0x110] sm:$0xf0] }
  0xb3   :  { %2020 = vst.msk [vmem:[%s4380_s4 + $0x4] sm:$0xf] %vm2018_vm1, %v1955_v23  ;;  %v1224_v26 = vadd.f32 %v3410_v34, %v1055_v24  ;;  %v2222_v25 = vor.u32 %v2609_v15, %v2221_v4 }
  0xb5   :  { %v1380_v31 = vmax.f32 %v1224_v26, 0.0  ;;  %v3470_v32 = vpop.f32.mrf.mxu3  ;;  %v1230_v33 = vpop.f32.mrf.mxu2 }
  0xb6   :  { %v887_v35 = vpop.f32.mrf.mxu0 }
  0xb7   :  { %v1892_v37 = vmul.f32 %v2876_v28, %v1380_v31  ;;  %v888_v38 = vadd.f32 %v3389_v27, %v887_v35  ;;  %v1056_v34 = vpop.f32.mrf.mxu1  ;;  %v2418_v28 = vor.u32 %v2656_v16, %v2415_v17 }
  0xb9   :  { %v1956_v39 = vpack.c.bf16 %v1892_v37, %v1892_v37  ;;  %v1057_v40 = vadd.f32 %v1056_v34, %v888_v38  ;;  %v2740_v37 = vunpack.c.h.bf16 %v2828_v30  ;;  %v2886_v38 = vpop.permute.xlu1 %2885 }
  0xba   :  { %2554 = vmatmul.msk.bf16.gmra.mxu2 %vm774_vm0, %v2230_v36  ;;  %v2739_v36 = vunpack.c.l.bf16 %v2828_v30  ;;  %v2887_v42 = vunpack.i.l.bf16 %v2886_v38  ;;  %v2888_v2 = vunpack.i.h.bf16 %v2886_v38  ;;  %v2619_v30 = vld [vmem:[%s4377_s0 + $0x160] sm:$0xf0] }
  0xbb   :  { %2021 = vst.msk [vmem:[%s4380_s4 + $0x8] sm:$0xf] %vm2018_vm1, %v1956_v39  ;;  %v1226_v46 = vadd.f32 %v3424_v53, %v1057_v40 }
  0xbc   :  { %v2930_v40 = vpack.i.bf16 %v2740_v37, %v2739_v36 }
  0xbd   :  { %v1381_v49 = vmax.f32 %v1226_v46, 0.0  ;;  %v3497_v50 = vpop.f32.mrf.mxu3  ;;  %v1233_v51 = vpop.f32.mrf.mxu2 }
  0xbe   :  { %v890_v55 = vpop.f32.mrf.mxu0  ;;  %2931 = vperm.xlu0 %2867, %v2930_v40  }
  0xbf   :  { %v1893_v58 = vmul.f32 %v2877_v45, %v1381_v49  ;;  %v891_v59 = vadd.f32 %v3389_v27, %v890_v55  ;;  %v1059_v53 = vpop.f32.mrf.mxu1  ;;  %v2254_v49 = vor.u32 %v2616_v44, %v2253_v43  ;;  %v2662_v43 = vld [vmem:[%s4377_s0 + $0x2bc] sm:$0xf]  ;;  %v2439_v44 = vld [vmem:[%s4377_s0 + $0x2c4] sm:$0xf0] }
  0xc1   :  { %v1957_v61 = vpack.c.bf16 %v1893_v58, %v1893_v58  ;;  %v1060_v62 = vadd.f32 %v1059_v53, %v891_v59  ;;  %929 = vmatmul.bf16.gmra.mxu0 %v2210_v54 }
  0xc2   :  { %1178 = vmatmul.bf16.gmra.mxu3 %v2406_v56  ;;  %1098 = vmatmul.bf16.gmra.mxu1 %v2214_v57 }
  0xc3   :  { %2022 = vst.msk [vmem:[%s4380_s4 + $0xc] sm:$0xf] %vm2018_vm1, %v1957_v61  ;;  %v1229_v63 = vadd.f32 %v1228_v1, %v1060_v62  ;;  %v2612_v61 = vld [vmem:[%s4377_s0 + $0x128] sm:$0xf0]  ;;  %v2659_v62 = vld [vmem:[%s4377_s0 + $0x2a4] sm:$0xf] }
  0xc5   :  { %v1382_v5 = vmax.f32 %v1229_v63, 0.0  ;;  %v3510_v6 = vpop.f32.mrf.mxu3  ;;  %v3512_v7 = vpop.f32.mrf.mxu2  ;;  %v2427_v63 = vld [vmem:[%s4377_s0 + $0x2ac] sm:$0xf0] }
  0xc6   :  { %v892_v8 = vpop.f32.mrf.mxu0 }
  0xc7   :  { %v1894_v10 = vmul.f32 %v2882_v0, %v1382_v5  ;;  %v893_v11 = vadd.f32 %v3389_v27, %v892_v8  ;;  %v1061_v1 = vpop.f32.mrf.mxu1  ;;  %v2611_v5 = vld [vmem:[%s4377_s0 + $0x124] sm:$0xf]  ;;  %v2235_v8 = vld [vmem:[%s4377_s0 + $0x12c] sm:$0xf0] }
  0xc8   :  { %v2238_v4 = vor.u32 %v2611_v5, %v2235_v8  ;;  %v2277_v5 = vld [vmem:[%s4377_s0 + $0x170] sm:$0xf]  ;;  %v2622_v8 = vld [vmem:[%s4377_s0 + $0x178] sm:$0xf0] }
  0xc9   :  { %v1958_v13 = vpack.c.bf16 %v1894_v10, %v1894_v10  ;;  %v1062_v14 = vadd.f32 %v1061_v1, %v893_v11  ;;  %v2234_v1 = vor.u32 %v2612_v61, %v2233_v60 }
  0xca   :  { %2555 = vmatmul.msk.bf16.gmra.mxu2 %vm774_vm0, %v2242_v9 }
  0xcb   :  { %2023 = vst.msk [vmem:[%s4380_s4 + $0x10] sm:$0xf] %vm2018_vm1, %v1958_v13  ;;  %v1231_v19 = vadd.f32 %v1230_v33, %v1062_v14  ;;  %v2430_v14 = vor.u32 %v2659_v62, %v2427_v63  ;;  %v2897_v62 = vpop.permute.xlu2 %2896 }
  0xcd   :  { %v1383_v22 = vmax.f32 %v1231_v19, 0.0  ;;  %v3538_v23 = vpop.f32.mrf.mxu3  ;;  %v3540_v24 = vpop.f32.mrf.mxu2 }
  0xce   :  { %v895_v26 = vpop.f32.mrf.mxu0 }
  0xcf   :  { %v1895_v31 = vmul.f32 %v2883_v18, %v1383_v22  ;;  %v896_v33 = vadd.f32 %v3389_v27, %v895_v26  ;;  %v1064_v35 = vpop.f32.mrf.mxu1 }
  0xd1   :  { %v1959_v34 = vpack.c.bf16 %v1895_v31, %v1895_v31  ;;  %v1065_v39 = vadd.f32 %v1064_v35, %v896_v33  ;;  %934 = vmatmul.bf16.gmra.mxu0 %v2222_v25 }
  0xd2   :  { %1183 = vmatmul.bf16.gmra.mxu3 %v2418_v28  ;;  %1103 = vmatmul.bf16.gmra.mxu1 %v2226_v29  ;;  %v2893_v28 = vunpack.i.l.bf16 %v2892_v20  ;;  %v2265_v29 = vld [vmem:[%s4377_s0 + $0x158] sm:$0xf] }
  0xd3   :  { %2024 = vst.msk [vmem:[%s4380_s4 + $0x14] sm:$0xf] %vm2018_vm1, %v1959_v34  ;;  %v1234_v41 = vadd.f32 %v1233_v51, %v1065_v39  ;;  %v2827_v51 = vld [vmem:[%s4378_s3 + $0x58] sm:$0xff]   ;;  %v2266_v37 = vor.u32 %v2619_v30, %v2265_v29 }
  0xd4   :  { %v2735_v57 = vunpack.c.l.bf16 %v2827_v51  ;;  %v2736_v58 = vunpack.c.h.bf16 %v2827_v51  ;;  %v2247_v51 = vld [vmem:[%s4377_s0 + $0x144] sm:$0xf0] }
  0xd5   :  { %v1384_v45 = vmax.f32 %v1234_v41, 0.0  ;;  %v3556_v46 = vpop.f32.mrf.mxu3  ;;  %v3558_v47 = vpop.f32.mrf.mxu2  ;;  %v2245_v41 = vld [vmem:[%s4377_s0 + $0x138] sm:$0xf] }
  0xd6   :  { %v897_v48 = vpop.f32.mrf.mxu0  ;;  %v2925_v0 = vpack.i.bf16 %v2736_v58, %v2735_v57 }
  0xd7   :  { %v1896_v54 = vmul.f32 %v2887_v42, %v1384_v45  ;;  %v898_v55 = vadd.f32 %v3389_v27, %v897_v48  ;;  %v1066_v56 = vpop.f32.mrf.mxu1  ;;  %v2615_v42 = vld [vmem:[%s4377_s0 + $0x140] sm:$0xf0]  ;;  %v2894_v45 = vunpack.i.h.bf16 %v2892_v20  ;;  %v2665_v20 = vld [vmem:[%s4377_s0 + $0x2d4] sm:$0xf] }
  0xd8   :  { %2926 = vperm.xlu2 %2889, %v2925_v0   ;;  %v2246_v57 = vor.u32 %v2615_v42, %v2245_v41 }
  0xd9   :  { %v1960_v59 = vpack.c.bf16 %v1896_v54, %v1896_v54  ;;  %v1067_v53 = vadd.f32 %v1066_v56, %v898_v55 }
  0xda   :  { %2556 = vmatmul.msk.bf16.gmra.mxu2 %vm774_vm0, %v2254_v49  ;;  %v2614_v49 = vld [vmem:[%s4377_s0 + $0x13c] sm:$0xf] }
  0xdb   :  { %2025 = vst.msk [vmem:[%s4380_s4 + $0x18] sm:$0xf] %vm2018_vm1, %v1960_v59  ;;  %v1236_v3 = vadd.f32 %v3512_v7, %v1067_v53  ;;  %v2829_v7 = vld [vmem:[%s4378_s3 + $0x68] sm:$0xff]   ;;  %v2442_v59 = vor.u32 %v2662_v43, %v2439_v44  ;;  %v2250_v53 = vor.u32 %v2614_v49, %v2247_v51  ;;  %v2902_v43 = vpop.permute.xlu0 %2901 }
  0xdc   :  { %v2743_v18 = vunpack.c.l.bf16 %v2829_v7  ;;  %v2744_v19 = vunpack.c.h.bf16 %v2829_v7  ;;  %v2903_v51 = vunpack.i.l.bf16 %v2902_v43 }
  0xdd   :  { %v1385_v9 = vmax.f32 %v1236_v3, 0.0  ;;  %v3588_v10 = vpop.f32.mrf.mxu3  ;;  %v1243_v11 = vpop.f32.mrf.mxu2  ;;  %v2898_v3 = vunpack.i.l.bf16 %v2897_v62 }
  0xde   :  { %v900_v13 = vpop.f32.mrf.mxu0  ;;  %v2935_v25 = vpack.i.bf16 %v2744_v19, %v2743_v18  ;;  %v2257_v18 = vld [vmem:[%s4377_s0 + $0x150] sm:$0xf]  ;;  %v2618_v19 = vld [vmem:[%s4377_s0 + $0x158] sm:$0xf0] }
  0xdf   :  { %v1897_v15 = vmul.f32 %v2888_v2, %v1385_v9  ;;  %v901_v16 = vadd.f32 %v3389_v27, %v900_v13  ;;  %v1069_v17 = vpop.f32.mrf.mxu1 }
  0xe0   :  { %2936 = vperm.xlu1 %2878, %v2935_v25  }
  0xe1   :  { %v1961_v21 = vpack.c.bf16 %v1897_v15, %v1897_v15  ;;  %v1070_v22 = vadd.f32 %v1069_v17, %v901_v16  ;;  %939 = vmatmul.bf16.gmra.mxu0 %v2234_v1 }
  0xe2   :  { %1188 = vmatmul.bf16.gmra.mxu3 %v2430_v14  ;;  %1108 = vmatmul.bf16.gmra.mxu1 %v2238_v4  ;;  %v2278_v4 = vor.u32 %v2622_v8, %v2277_v5 }
  0xe3   :  { %2026 = vst.msk [vmem:[%s4380_s4 + $0x1c] sm:$0xf] %vm2018_vm1, %v1961_v21  ;;  %v1239_v26 = vadd.f32 %v3540_v24, %v1070_v22  ;;  %v2451_v21 = vld [vmem:[%s4377_s0 + $0x2dc] sm:$0xf0]  ;;  %v2899_v22 = vunpack.i.h.bf16 %v2897_v62 }
  0xe5   :  { %v1386_v31 = vmax.f32 %v1239_v26, 0.0  ;;  %v3605_v33 = vpop.f32.mrf.mxu3  ;;  %v1245_v35 = vpop.f32.mrf.mxu2  ;;  %v2617_v26 = vld [vmem:[%s4377_s0 + $0x154] sm:$0xf] }
  0xe6   :  { %v902_v36 = vpop.f32.mrf.mxu0 }
  0xe7   :  { %v1898_v38 = vmul.f32 %v2893_v28, %v1386_v31  ;;  %v903_v34 = vadd.f32 %v3389_v27, %v902_v36  ;;  %v1071_v24 = vpop.f32.mrf.mxu1  ;;  %v2259_v28 = vld [vmem:[%s4377_s0 + $0x15c] sm:$0xf0]  ;;  %v2258_v36 = vor.u32 %v2618_v19, %v2257_v18  ;;  %v2620_v19 = vld [vmem:[%s4377_s0 + $0x16c] sm:$0xf] }
  0xe9   :  { %v1962_v39 = vpack.c.bf16 %v1898_v38, %v1898_v38  ;;  %v1072_v40 = vadd.f32 %v1071_v24, %v903_v34  ;;  %v2454_v38 = vor.u32 %v2665_v20, %v2451_v21  ;;  %v2262_v34 = vor.u32 %v2617_v26, %v2259_v28  ;;  %v2271_v20 = vld [vmem:[%s4377_s0 + $0x174] sm:$0xf0] }
  0xea   :  { %2557 = vmatmul.msk.bf16.gmra.mxu2 %vm774_vm0, %v2266_v37 }
  0xeb   :  { %2027 = vst.msk [vmem:[%s4380_s4 + $0x20] sm:$0xf] %vm2018_vm1, %v1962_v39  ;;  %v1241_v48 = vadd.f32 %v3558_v47, %v1072_v40 }
  0xed   :  { %v1387_v54 = vmax.f32 %v1241_v48, 0.0  ;;  %v3632_v55 = vpop.f32.mrf.mxu3  ;;  %v1248_v56 = vpop.f32.mrf.mxu2 }
  0xee   :  { %v905_v58 = vpop.f32.mrf.mxu0 }
  0xef   :  { %v1899_v60 = vmul.f32 %v2894_v45, %v1387_v54  ;;  %v906_v61 = vadd.f32 %v3389_v27, %v905_v58  ;;  %v1074_v47 = vpop.f32.mrf.mxu1  ;;  %v2289_v54 = vld [vmem:[%s4377_s0 + $0x188] sm:$0xf] }
  0xf1   :  { %v1963_v63 = vpack.c.bf16 %v1899_v60, %v1899_v60  ;;  %v1075_v0 = vadd.f32 %v1074_v47, %v906_v61  ;;  %944 = vmatmul.bf16.gmra.mxu0 %v2246_v57  ;;  %v2625_v57 = vld [vmem:[%s4377_s0 + $0x190] sm:$0xf0] }
  0xf2   :  { %1193 = vmatmul.bf16.gmra.mxu3 %v2442_v59  ;;  %1113 = vmatmul.bf16.gmra.mxu1 %v2250_v53  ;;  %v2290_v61 = vor.u32 %v2625_v57, %v2289_v54 }
  0xf3   :  { %2028 = vst.msk [vmem:[%s4380_s4 + $0x24] sm:$0xf] %vm2018_vm1, %v1963_v63  ;;  %v1244_v2 = vadd.f32 %v1243_v11, %v1075_v0 }
  0xf5   :  { %v1388_v9 = vmax.f32 %v1244_v2, 0.0  ;;  %v3645_v1 = vpop.f32.mrf.mxu3  ;;  %v3647_v13 = vpop.f32.mrf.mxu2 }
  0xf6   :  { %v907_v14 = vpop.f32.mrf.mxu0 }
  0xf7   :  { %v1900_v7 = vmul.f32 %v2898_v3, %v1388_v9  ;;  %v908_v15 = vadd.f32 %v3389_v27, %v907_v14  ;;  %v1076_v11 = vpop.f32.mrf.mxu1  ;;  %v2834_v3 = vld [vmem:[%s4378_s3 + $0x90] sm:$0xff]   ;;  %v2269_v9 = vld [vmem:[%s4377_s0 + $0x168] sm:$0xf] }
  0xf8   :  { %v2763_v14 = vunpack.c.l.bf16 %v2834_v3 }
  0xf9   :  { %v1964_v16 = vpack.c.bf16 %v1900_v7, %v1900_v7  ;;  %v1077_v17 = vadd.f32 %v1076_v11, %v908_v15  ;;  %v2621_v7 = vld [vmem:[%s4377_s0 + $0x170] sm:$0xf0]  ;;  %v2668_v15 = vld [vmem:[%s4377_s0 + $0x2ec] sm:$0xf]  ;;  %v2463_v11 = vld [vmem:[%s4377_s0 + $0x2f4] sm:$0xf0] }
  0xfa   :  { %2558 = vmatmul.msk.bf16.gmra.mxu2 %vm774_vm0, %v2278_v4  ;;  %v2764_v4 = vunpack.c.h.bf16 %v2834_v3  ;;  %v2270_v28 = vor.u32 %v2621_v7, %v2269_v9  ;;  %v2836_v9 = vld [vmem:[%s4378_s3 + $0xa0] sm:$0xff]  }
  0xfb   :  { %2029 = vst.msk [vmem:[%s4380_s4 + $0x28] sm:$0xf] %vm2018_vm1, %v1964_v16  ;;  %v1246_v25 = vadd.f32 %v1245_v35, %v1077_v17  ;;  %v2831_v35 = vld [vmem:[%s4378_s3 + $0x78] sm:$0xff]   ;;  %v2904_v17 = vunpack.i.h.bf16 %v2902_v43 }
  0xfc   :  { %v2751_v41 = vunpack.c.l.bf16 %v2831_v35  ;;  %v2752_v42 = vunpack.c.h.bf16 %v2831_v35  ;;  %v2960_v21 = vpack.i.bf16 %v2764_v4, %v2763_v14  ;;  %v2835_v14 = vld [vmem:[%s4378_s3 + $0x98] sm:$0xff]   ;;  %v2840_v4 = vld [vmem:[%s4378_s3 + $0xc0] sm:$0xff]  }
  0xfd   :  { %v1389_v29 = vmax.f32 %v1246_v25, 0.0  ;;  %v3673_v30 = vpop.f32.mrf.mxu3  ;;  %v3675_v31 = vpop.f32.mrf.mxu2 }
  0xfe   :  { %v910_v37 = vpop.f32.mrf.mxu0  ;;  %v2945_v48 = vpack.i.bf16 %v2752_v42, %v2751_v41  ;;  %v2833_v41 = vld [vmem:[%s4378_s3 + $0x88] sm:$0xff]  }
  0xff   :  { %v1901_v24 = vmul.f32 %v2899_v22, %v1389_v29  ;;  %v911_v39 = vadd.f32 %v3389_v27, %v910_v37  ;;  %v1079_v40 = vpop.f32.mrf.mxu1  ;;  %v2832_v37 = vld [vmem:[%s4378_s3 + $0x80] sm:$0xff]   ;;  %v2837_v42 = vld [vmem:[%s4378_s3 + $0xa8] sm:$0xff]  }
 0x100   :  { %2946 = vperm.xlu0 %2867, %v2945_v48   ;;  %v2759_v48 = vunpack.c.l.bf16 %v2833_v41 }
 0x101   :  { %v1965_v44 = vpack.c.bf16 %v1901_v24, %v1901_v24  ;;  %v1080_v45 = vadd.f32 %v1079_v40, %v911_v39  ;;  %949 = vmatmul.bf16.gmra.mxu0 %v2258_v36  ;;  %v2466_v36 = vor.u32 %v2668_v15, %v2463_v11  ;;  %v2755_v24 = vunpack.c.l.bf16 %v2832_v37  ;;  %v3734_v40 = vpop.permute.xlu1 %2906  ;;  %v2281_v11 = vld [vmem:[%s4377_s0 + $0x180] sm:$0xf] }
 0x102   :  { %1198 = vmatmul.bf16.gmra.mxu3 %v2454_v38  ;;  %1118 = vmatmul.bf16.gmra.mxu1 %v2262_v34  ;;  %v2756_v39 = vunpack.c.h.bf16 %v2832_v37  ;;  %v2908_v57 = vunpack.i.l.bf16 %v3734_v40  ;;  %v2623_v37 = vld [vmem:[%s4377_s0 + $0x184] sm:$0xf] }
 0x103   :  { %2030 = vst.msk [vmem:[%s4380_s4 + $0x2c] sm:$0xf] %vm2018_vm1, %v1965_v44  ;;  %v1249_v49 = vadd.f32 %v1248_v56, %v1080_v45  ;;  %v2830_v56 = vld [vmem:[%s4378_s3 + $0x70] sm:$0xff]  }
 0x104   :  { %v2747_v0 = vunpack.c.l.bf16 %v2830_v56  ;;  %v2748_v2 = vunpack.c.h.bf16 %v2830_v56  ;;  %v2950_v45 = vpack.i.bf16 %v2756_v39, %v2755_v24 }
 0x105   :  { %v1390_v58 = vmax.f32 %v1249_v49, 0.0  ;;  %v3691_v59 = vpop.f32.mrf.mxu3  ;;  %v3693_v53 = vpop.f32.mrf.mxu2  ;;  %v2760_v49 = vunpack.c.h.bf16 %v2833_v41 }
 0x106   :  { %v912_v60 = vpop.f32.mrf.mxu0  ;;  %v2940_v16 = vpack.i.bf16 %v2748_v2, %v2747_v0  ;;  %2951 = vperm.xlu1 %2878, %v2950_v45  }
 0x107   :  { %v1902_v47 = vmul.f32 %v2903_v51, %v1390_v58  ;;  %v913_v62 = vadd.f32 %v3389_v27, %v912_v60  ;;  %v1081_v63 = vpop.f32.mrf.mxu1  ;;  %v2775_v51 = vunpack.c.l.bf16 %v2837_v42  ;;  %v2301_v58 = vld [vmem:[%s4377_s0 + $0x1a0] sm:$0xf]  ;;  %v2628_v60 = vld [vmem:[%s4377_s0 + $0x1a8] sm:$0xf0]  ;;  %v2955_v56 = vpack.i.bf16 %v2760_v49, %v2759_v48 }
 0x108   :  { %2941 = vperm.xlu2 %2889, %v2940_v16   ;;  %2961 = vperm.xlu0 %2867, %v2960_v21   ;;  %v2302_v2 = vor.u32 %v2628_v60, %v2301_v58  ;;  %v2771_v16 = vunpack.c.l.bf16 %v2836_v9  ;;  %v2767_v21 = vunpack.c.l.bf16 %v2835_v14 }
 0x109   :  { %v1966_v5 = vpack.c.bf16 %v1902_v47, %v1902_v47  ;;  %v1082_v8 = vadd.f32 %v1081_v63, %v913_v62 }
 0x10a   :  { %2559 = vmatmul.msk.bf16.gmra.mxu2 %vm774_vm0, %v2290_v61  ;;  %v2776_v61 = vunpack.c.h.bf16 %v2837_v42 }
 0x10b   :  { %2031 = vst.msk [vmem:[%s4380_s4 + $0x30] sm:$0xf] %vm2018_vm1, %v1966_v5  ;;  %v1251_v18 = vadd.f32 %v3647_v13, %v1082_v8  ;;  %v2274_v13 = vor.u32 %v2620_v19, %v2271_v20  ;;  %v2409_v19 = vld [vmem:[%s4377_s0 + $0x278] sm:$0xf]  ;;  %v2655_v20 = vld [vmem:[%s4377_s0 + $0x280] sm:$0xf0] }
 0x10c   :  { %v2975_v0 = vpack.i.bf16 %v2776_v61, %v2775_v51  ;;  %v3798_v51 = vpop.permute.xlu2 %2911 }
 0x10d   :  { %v1391_v22 = vmax.f32 %v1251_v18, 0.0  ;;  %v3726_v25 = vpop.f32.mrf.mxu3  ;;  %v3728_v26 = vpop.f32.mrf.mxu2  ;;  %v2624_v18 = vld [vmem:[%s4377_s0 + $0x188] sm:$0xf0] }
 0x10e   :  { %v915_v29 = vpop.f32.mrf.mxu0  ;;  %v2282_v42 = vor.u32 %v2624_v18, %v2281_v11 }
 0x10f   :  { %v1903_v38 = vmul.f32 %v2904_v17, %v1391_v22  ;;  %v916_v34 = vadd.f32 %v3389_v27, %v915_v29  ;;  %v1084_v35 = vpop.f32.mrf.mxu1  ;;  %v2772_v17 = vunpack.c.h.bf16 %v2836_v9  ;;  %v2768_v22 = vunpack.c.h.bf16 %v2835_v14 }
 0x110   :  { %2956 = vperm.xlu2 %2889, %v2955_v56   ;;  %2976 = vperm.xlu0 %2867, %v2975_v0   ;;  %v2788_v29 = vunpack.c.h.bf16 %v2840_v4  ;;  %v2843_v56 = vld [vmem:[%s4378_s3 + $0xd8] sm:$0xff]  }
 0x111   :  { %v1967_v43 = vpack.c.bf16 %v1903_v38, %v1903_v38  ;;  %v1085_v44 = vadd.f32 %v1084_v35, %v916_v34  ;;  %954 = vmatmul.bf16.gmra.mxu0 %v2270_v28  ;;  %v2787_v28 = vunpack.c.l.bf16 %v2840_v4  ;;  %v2283_v38 = vld [vmem:[%s4377_s0 + $0x18c] sm:$0xf0]  ;;  %v2970_v34 = vpack.i.bf16 %v2772_v17, %v2771_v16 }
 0x112   :  { %1203 = vmatmul.bf16.gmra.mxu3 %v2466_v36  ;;  %1123 = vmatmul.bf16.gmra.mxu1 %v2274_v13  ;;  %v2909_v36 = vunpack.i.h.bf16 %v3734_v40  ;;  %v2965_v35 = vpack.i.bf16 %v2768_v22, %v2767_v21  ;;  %v2799_v9 = vunpack.c.l.bf16 %v2843_v56  ;;  %v2800_v14 = vunpack.c.h.bf16 %v2843_v56 }
 0x113   :  { %2032 = vst.msk [vmem:[%s4380_s4 + $0x34] sm:$0xf] %vm2018_vm1, %v1967_v43  ;;  %v1254_v54 = vadd.f32 %v3675_v31, %v1085_v44  ;;  %v2990_v24 = vpack.i.bf16 %v2788_v29, %v2787_v28  ;;  %v2410_v44 = vor.u32 %v2655_v20, %v2409_v19  ;;  %v1001_v4 = vadd.f32 %v3389_v27, %v3422_v52  ;;  %v2842_v52 = vld [vmem:[%s4378_s3 + $0xd0] sm:$0xff]   ;;  %v2841_v29 = vld [vmem:[%s4378_s3 + $0xc8] sm:$0xff]  }
 0x114   :  { %2966 = vperm.xlu1 %2878, %v2965_v35   ;;  %v3005_v17 = vpack.i.bf16 %v2800_v14, %v2799_v9  ;;  %v2627_v35 = vld [vmem:[%s4377_s0 + $0x1a0] sm:$0xf0] }
 0x115   :  { %v1392_v47 = vmax.f32 %v1254_v54, 0.0  ;;  %v3754_v62 = vpop.f32.mrf.mxu3  ;;  %v3756_v63 = vpop.f32.mrf.mxu2  ;;  %v2839_v54 = vld [vmem:[%s4378_s3 + $0xb8] sm:$0xff]  }
 0x116   :  { %v917_v31 = vpop.f32.mrf.mxu0  ;;  %v2783_v61 = vunpack.c.l.bf16 %v2839_v54 }
 0x117   :  { %v1904_v3 = vmul.f32 %v2908_v57, %v1392_v47  ;;  %v918_v5 = vadd.f32 %v3389_v27, %v917_v31  ;;  %v1086_v8 = vpop.f32.mrf.mxu1  ;;  %v2838_v57 = vld [vmem:[%s4378_s3 + $0xb0] sm:$0xff]   ;;  %v2784_v47 = vunpack.c.h.bf16 %v2839_v54  ;;  %v1003_v54 = vadd.f32 %v3389_v27, %v3453_v12  ;;  %v2844_v12 = vld [vmem:[%s4378_s3 + $0xe0] sm:$0xff]  }
 0x118   :  { %2971 = vperm.xlu2 %2889, %v2970_v34   ;;  %2991 = vperm.xlu0 %2867, %v2990_v24   ;;  %v2779_v0 = vunpack.c.l.bf16 %v2838_v57  ;;  %v2780_v31 = vunpack.c.h.bf16 %v2838_v57  ;;  %v2796_v34 = vunpack.c.h.bf16 %v2842_v52  ;;  %v2421_v24 = vld [vmem:[%s4377_s0 + $0x290] sm:$0xf]  ;;  %v2803_v14 = vunpack.c.l.bf16 %v2844_v12 }
 0x119   :  { %v1968_v7 = vpack.c.bf16 %v1904_v3, %v1904_v3  ;;  %v1087_v15 = vadd.f32 %v1086_v8, %v918_v5  ;;  %v2913_v3 = vunpack.i.l.bf16 %v3798_v51  ;;  %v2313_v5 = vld [vmem:[%s4377_s0 + $0x1b8] sm:$0xf]  ;;  %v2631_v8 = vld [vmem:[%s4377_s0 + $0x1c0] sm:$0xf0] }
 0x11a   :  { %2560 = vmatmul.msk.bf16.gmra.mxu2 %vm774_vm0, %v2302_v2  ;;  %v2314_v20 = vor.u32 %v2631_v8, %v2313_v5  ;;  %v2917_v5 = vpop.permute.xlu0 %2916 }
 0x11b   :  { %2033 = vst.msk [vmem:[%s4380_s4 + $0x38] sm:$0xf] %vm2018_vm1, %v1968_v7  ;;  %v1256_v13 = vadd.f32 %v3693_v53, %v1087_v15  ;;  %v2286_v53 = vor.u32 %v2623_v37, %v2283_v38  ;;  %v2985_v7 = vpack.i.bf16 %v2784_v47, %v2783_v61  ;;  %v2980_v15 = vpack.i.bf16 %v2780_v31, %v2779_v0  ;;  %v2293_v37 = vld [vmem:[%s4377_s0 + $0x198] sm:$0xf] }
 0x11c   :  { %v2795_v38 = vunpack.c.l.bf16 %v2842_v52  ;;  %v2294_v61 = vor.u32 %v2627_v35, %v2293_v37  ;;  %v2433_v35 = vld [vmem:[%s4377_s0 + $0x2a8] sm:$0xf] }
 0x11d   :  { %v1393_v39 = vmax.f32 %v1256_v13, 0.0  ;;  %v3793_v40 = vpop.f32.mrf.mxu3  ;;  %v3795_v41 = vpop.f32.mrf.mxu2  ;;  %2981 = vperm.xlu1 %2878, %v2980_v15   ;;  %v2918_v15 = vunpack.i.l.bf16 %v2917_v5 }
 0x11e   :  { %v920_v43 = vpop.f32.mrf.mxu0 }
 0x11f   :  { %v1905_v45 = vmul.f32 %v2909_v36, %v1393_v39  ;;  %v921_v48 = vadd.f32 %v3389_v27, %v920_v43  ;;  %v1089_v49 = vpop.f32.mrf.mxu1  ;;  %v2658_v39 = vld [vmem:[%s4377_s0 + $0x298] sm:$0xf0]  ;;  %v2792_v43 = vunpack.c.h.bf16 %v2841_v29 }
 0x120   :  { %2986 = vperm.xlu2 %2889, %v2985_v7   ;;  %3006 = vperm.xlu0 %2867, %v3005_v17   ;;  %v2422_v47 = vor.u32 %v2658_v39, %v2421_v24  ;;  %v1006_v17 = vadd.f32 %v3389_v27, %v3470_v32  ;;  %v2661_v24 = vld [vmem:[%s4377_s0 + $0x2b0] sm:$0xf0]  ;;  %v2919_v39 = vunpack.i.h.bf16 %v2917_v5 }
 0x121   :  { %v1969_v58 = vpack.c.bf16 %v1905_v45, %v1905_v45  ;;  %v1090_v60 = vadd.f32 %v1089_v49, %v921_v48  ;;  %959 = vmatmul.bf16.gmra.mxu0 %v2282_v42  ;;  %v2791_v42 = vunpack.c.l.bf16 %v2841_v29  ;;  %v2626_v45 = vld [vmem:[%s4377_s0 + $0x19c] sm:$0xf]  ;;  %v2295_v48 = vld [vmem:[%s4377_s0 + $0x1a4] sm:$0xf0]  ;;  %v3000_v49 = vpack.i.bf16 %v2796_v34, %v2795_v38  ;;  %v2305_v38 = vld [vmem:[%s4377_s0 + $0x1b0] sm:$0xf] }
 0x122   :  { %2569 = vmatmul.msk.bf16.vlgmr.msra.gmra.mxu3 %vm774_vm0, %v2410_v44  ;;  %1128 = vmatmul.bf16.gmra.mxu1 %v2286_v53  ;;  %v2914_v44 = vunpack.i.h.bf16 %v3798_v51  ;;  %v2298_v0 = vor.u32 %v2626_v45, %v2295_v48  ;;  %v2630_v34 = vld [vmem:[%s4377_s0 + $0x1b8] sm:$0xf0] }
 0x123   :  { %2034 = vst.msk [vmem:[%s4380_s4 + $0x3c] sm:$0xf] %vm2018_vm1, %v1969_v58  ;;  %v1259_v2 = vadd.f32 %v3728_v26, %v1090_v60  ;;  %v2995_v51 = vpack.i.bf16 %v2792_v43, %v2791_v42  ;;  %v2629_v43 = vld [vmem:[%s4377_s0 + $0x1b4] sm:$0xf] }
 0x125   :  { %v1394_v11 = vmax.f32 %v1259_v2, 0.0  ;;  %v1169_v16 = vpop.f32.mrf.mxu3  ;;  %v3824_v26 = vpop.f32.mrf.mxu2  ;;  %2996 = vperm.xlu1 %2878, %v2995_v51  }
 0x126   :  { %v3826_v18 = vadd.f32 %v1169_v16, %v1001_v4  ;;  %v922_v19 = vpop.f32.mrf.mxu0  ;;  %v2804_v4 = vunpack.c.h.bf16 %v2844_v12  ;;  %v2634_v16 = vld [vmem:[%s4377_s0 + $0x1d8] sm:$0xf0] }
 0x127   :  { %v1906_v21 = vmul.f32 %v2913_v3, %v1394_v11  ;;  %v923_v22 = vadd.f32 %v3389_v27, %v922_v19  ;;  %v1091_v28 = vpop.f32.mrf.mxu1  ;;  %v2325_v11 = vld [vmem:[%s4377_s0 + $0x1d0] sm:$0xf] }
 0x128   :  { %3001 = vperm.xlu2 %2889, %v3000_v49   ;;  %v3010_v19 = vpack.i.bf16 %v2804_v4, %v2803_v14  ;;  %v2326_v52 = vor.u32 %v2634_v16, %v2325_v11 }
 0x129   :  { %v1970_v36 = vpack.c.bf16 %v1906_v21, %v1906_v21  ;;  %v1092_v13 = vadd.f32 %v1091_v28, %v923_v22 }
 0x12a   :  { %2561 = vmatmul.msk.bf16.gmra.mxu2 %vm774_vm0, %v2314_v20 }
 0x12b   :  { %2035 = vst.msk [vmem:[%s4380_s4 + $0x40] sm:$0xf] %vm2018_vm1, %v1970_v36  ;;  %v1261_v53 = vadd.f32 %v3756_v63, %v1092_v13  ;;  %v3891_v36 = vld [vmem:[%s4379_s2] ss:$0 sm:$0xff] }
 0x12c   :  { %v1011_v11 = vadd.f32 %v3891_v36, %v3510_v6  ;;  %v2317_v6 = vld [vmem:[%s4377_s0 + $0x1c8] sm:$0xf] }
 0x12d   :  { %v1395_v57 = vmax.f32 %v1261_v53, 0.0  ;;  %v1171_v58 = vpop.f32.mrf.mxu3  ;;  %v3862_v60 = vpop.f32.mrf.mxu2  ;;  %3011 = vperm.xlu1 %2878, %v3010_v19   ;;  %v1008_v53 = vadd.f32 %v3891_v36, %v3497_v50  ;;  %v2846_v50 = vld [vmem:[%s4378_s3 + $0xf0] sm:$0xff]  }
 0x12e   :  { %v3864_v56 = vadd.f32 %v1171_v58, %v1003_v54  ;;  %v925_v63 = vpop.f32.mrf.mxu0  ;;  %v2306_v54 = vor.u32 %v2630_v34, %v2305_v38  ;;  %v2633_v38 = vld [vmem:[%s4377_s0 + $0x1d0] sm:$0xf0]  ;;  %v2445_v34 = vld [vmem:[%s4377_s0 + $0x2c0] sm:$0xf] }
 0x12f   :  { %v1907_v31 = vmul.f32 %v2914_v44, %v1395_v57  ;;  %v926_v2 = vadd.f32 %v3389_v27, %v925_v63  ;;  %v1094_v3 = vpop.f32.mrf.mxu1  ;;  %v2307_v44 = vld [vmem:[%s4377_s0 + $0x1bc] sm:$0xf0] }
 0x130   :  { %v2310_v58 = vor.u32 %v2629_v43, %v2307_v44  ;;  %v2319_v43 = vld [vmem:[%s4377_s0 + $0x1d4] sm:$0xf0]  ;;  %v1013_v44 = vadd.f32 %v3891_v36, %v3538_v23 }
 0x131   :  { %v1971_v8 = vpack.c.bf16 %v1907_v31, %v1907_v31  ;;  %v1095_v9 = vadd.f32 %v1094_v3, %v926_v2  ;;  %964 = vmatmul.bf16.gmra.mxu0 %v2294_v61  ;;  %v2847_v31 = vld [vmem:[%s4378_s3 + $0xf8] sm:$0xff]  }
 0x132   :  { %2570 = vmatmul.msk.bf16.gmra.mxu3 %vm774_vm0, %v2422_v47  ;;  %1133 = vmatmul.bf16.gmra.mxu1 %v2298_v0  ;;  %v2922_v0 = vpop.permute.xlu1 %2921  ;;  %v2815_v5 = vunpack.c.l.bf16 %v2847_v31  ;;  %v2816_v12 = vunpack.c.h.bf16 %v2847_v31 }
 0x133   :  { %2036 = vst.msk [vmem:[%s4380_s4 + $0x44] sm:$0xf] %vm2018_vm1, %v1971_v8  ;;  %v1264_v7 = vadd.f32 %v3795_v41, %v1095_v9  ;;  %v2811_v8 = vunpack.c.l.bf16 %v2846_v50  ;;  %v2812_v9 = vunpack.c.h.bf16 %v2846_v50  ;;  %v2923_v4 = vunpack.i.l.bf16 %v2922_v0 }
 0x134   :  { %v3025_v16 = vpack.i.bf16 %v2816_v12, %v2815_v5  ;;  %v2640_v5 = vld [vmem:[%s4377_s0 + $0x208] sm:$0xf0]  ;;  %v1016_v12 = vadd.f32 %v3891_v36, %v3556_v46  ;;  %v2329_v46 = vld [vmem:[%s4377_s0 + $0x1e0] sm:$0xf] }
 0x135   :  { %v1396_v20 = vmax.f32 %v1264_v7, 0.0  ;;  %v1174_v21 = vpop.f32.mrf.mxu3  ;;  %v3884_v22 = vpop.f32.mrf.mxu2  ;;  %v2337_v7 = vld [vmem:[%s4377_s0 + $0x1e8] sm:$0xf] }
 0x136   :  { %v3886_v28 = vadd.f32 %v1174_v21, %v1006_v17  ;;  %v927_v41 = vpop.f32.mrf.mxu0  ;;  %v3020_v17 = vpack.i.bf16 %v2812_v9, %v2811_v8  ;;  %3026 = vperm.xlu1 %2878, %v3025_v16  }
 0x137   :  { %v1908_v29 = vmul.f32 %v2918_v15, %v1396_v20  ;;  %v928_v13 = vadd.f32 %v3891_v36, %v927_v41  ;;  %v1096_v37 = vpop.f32.mrf.mxu1  ;;  %v2637_v15 = vld [vmem:[%s4377_s0 + $0x1f0] sm:$0xf0] }
 0x138   :  { %3021 = vperm.xlu0 %2867, %v3020_v17   ;;  %v2845_v17 = vld [vmem:[%s4378_s3 + $0xe8] sm:$0xff]  }
 0x139   :  { %v1972_v27 = vpack.c.bf16 %v1908_v29, %v1908_v29  ;;  %v1097_v32 = vadd.f32 %v1096_v37, %v928_v13 }
 0x13a   :  { %2562 = vmatmul.msk.bf16.gmra.mxu2 %vm774_vm0, %v2326_v52  ;;  %v2338_v52 = vor.u32 %v2637_v15, %v2337_v7 }
 0x13b   :  { %2037 = vst.msk [vmem:[%s4380_s4 + $0x48] sm:$0xf] %vm2018_vm1, %v1972_v27  ;;  %v1266_v42 = vadd.f32 %v3824_v26, %v1097_v32  ;;  %v2434_v26 = vor.u32 %v2661_v24, %v2433_v35  ;;  %v2664_v35 = vld [vmem:[%s4377_s0 + $0x2c8] sm:$0xf0]  ;;  %v2924_v24 = vunpack.i.h.bf16 %v2922_v0  ;;  %v2927_v0 = vpop.permute.xlu2 %2926 }
 0x13d   :  { %v1397_v45 = vmax.f32 %v1266_v42, 0.0  ;;  %v1176_v48 = vpop.f32.mrf.mxu3  ;;  %v3920_v49 = vpop.f32.mrf.mxu2  ;;  %v2632_v42 = vld [vmem:[%s4377_s0 + $0x1cc] sm:$0xf] }
 0x13e   :  { %v3922_v51 = vadd.f32 %v1176_v48, %v1008_v53  ;;  %v930_v57 = vpop.f32.mrf.mxu0 }
 0x13f   :  { %v1909_v61 = vmul.f32 %v2919_v39, %v1397_v45  ;;  %v931_v63 = vadd.f32 %v3891_v36, %v930_v57  ;;  %v1099_v47 = vpop.f32.mrf.mxu1 }
 0x141   :  { %v1973_v2 = vpack.c.bf16 %v1909_v61, %v1909_v61  ;;  %v1100_v3 = vadd.f32 %v1099_v47, %v931_v63  ;;  %969 = vmatmul.bf16.gmra.mxu0 %v2306_v54  ;;  %v2318_v54 = vor.u32 %v2633_v38, %v2317_v6  ;;  %v2635_v6 = vld [vmem:[%s4377_s0 + $0x1e4] sm:$0xf]  ;;  %v2331_v38 = vld [vmem:[%s4377_s0 + $0x1ec] sm:$0xf0] }
 0x142   :  { %2571 = vmatmul.msk.bf16.gmra.mxu3 %vm774_vm0, %v2434_v26  ;;  %1138 = vmatmul.bf16.gmra.mxu1 %v2310_v58  ;;  %v2322_v58 = vor.u32 %v2632_v42, %v2319_v43 }
 0x143   :  { %2038 = vst.msk [vmem:[%s4380_s4 + $0x4c] sm:$0xf] %vm2018_vm1, %v1973_v2  ;;  %v1269_v14 = vadd.f32 %v3862_v60, %v1100_v3  ;;  %v2928_v2 = vunpack.i.l.bf16 %v2927_v0  ;;  %v2349_v3 = vld [vmem:[%s4377_s0 + $0x200] sm:$0xf] }
 0x145   :  { %v1398_v19 = vmax.f32 %v1269_v14, 0.0  ;;  %v1179_v20 = vpop.f32.mrf.mxu3  ;;  %v3945_v21 = vpop.f32.mrf.mxu2 }
 0x146   :  { %v3947_v41 = vadd.f32 %v1179_v20, %v1011_v11  ;;  %v932_v60 = vpop.f32.mrf.mxu0 }
 0x147   :  { %v1910_v29 = vmul.f32 %v2923_v4, %v1398_v19  ;;  %v933_v13 = vadd.f32 %v3891_v36, %v932_v60  ;;  %v1101_v37 = vpop.f32.mrf.mxu1  ;;  %v2807_v60 = vunpack.c.l.bf16 %v2845_v17 }
 0x149   :  { %v1974_v27 = vpack.c.bf16 %v1910_v29, %v1910_v29  ;;  %v1102_v32 = vadd.f32 %v1101_v37, %v933_v13  ;;  %v2636_v29 = vld [vmem:[%s4377_s0 + $0x1e8] sm:$0xf0]  ;;  %v2457_v13 = vld [vmem:[%s4377_s0 + $0x2d8] sm:$0xf]  ;;  %v2667_v37 = vld [vmem:[%s4377_s0 + $0x2e0] sm:$0xf0] }
 0x14a   :  { %2563 = vmatmul.msk.bf16.gmra.mxu2 %vm774_vm0, %v2338_v52  ;;  %v2808_v52 = vunpack.c.h.bf16 %v2845_v17  ;;  %v2330_v43 = vor.u32 %v2636_v29, %v2329_v46  ;;  %v2670_v17 = vld [vmem:[%s4377_s0 + $0x2f8] sm:$0xf0] }
 0x14b   :  { %2039 = vst.msk [vmem:[%s4380_s4 + $0x50] sm:$0xf] %vm2018_vm1, %v1974_v27  ;;  %v1271_v39 = vadd.f32 %v3884_v22, %v1102_v32  ;;  %v2446_v22 = vor.u32 %v2664_v35, %v2445_v34  ;;  %v2929_v27 = vunpack.i.h.bf16 %v2927_v0  ;;  %v1018_v35 = vadd.f32 %v3891_v36, %v3588_v10  ;;  %v2361_v0 = vld [vmem:[%s4377_s0 + $0x218] sm:$0xf]  ;;  %v2638_v46 = vld [vmem:[%s4377_s0 + $0x1fc] sm:$0xf] }
 0x14c   :  { %v3015_v34 = vpack.i.bf16 %v2808_v52, %v2807_v60  ;;  %v2343_v60 = vld [vmem:[%s4377_s0 + $0x204] sm:$0xf0]  ;;  %v1023_v52 = vadd.f32 %v3891_v36, %v3632_v55 }
 0x14d   :  { %v1399_v53 = vmax.f32 %v1271_v39, 0.0  ;;  %v1181_v45 = vpop.f32.mrf.mxu3  ;;  %v3976_v48 = vpop.f32.mrf.mxu2 }
 0x14e   :  { %v3978_v57 = vadd.f32 %v1181_v45, %v1013_v44  ;;  %v935_v26 = vpop.f32.mrf.mxu0  ;;  %3016 = vperm.xlu2 %2889, %v3015_v34   ;;  %v2334_v45 = vor.u32 %v2635_v6, %v2331_v38 }
 0x14f   :  { %v1911_v61 = vmul.f32 %v2924_v24, %v1399_v53  ;;  %v936_v63 = vadd.f32 %v3891_v36, %v935_v26  ;;  %v1104_v47 = vpop.f32.mrf.mxu1  ;;  %v2458_v53 = vor.u32 %v2667_v37, %v2457_v13 }
 0x151   :  { %v1975_v31 = vpack.c.bf16 %v1911_v61, %v1911_v61  ;;  %v1105_v50 = vadd.f32 %v1104_v47, %v936_v63  ;;  %974 = vmatmul.bf16.gmra.mxu0 %v2318_v54 }
 0x152   :  { %2572 = vmatmul.msk.bf16.gmra.mxu3 %vm774_vm0, %v2446_v22  ;;  %1143 = vmatmul.bf16.gmra.mxu1 %v2322_v58  ;;  %v2932_v58 = vpop.permute.xlu0 %2931 }
 0x153   :  { %2040 = vst.msk [vmem:[%s4380_s4 + $0x54] sm:$0xf] %vm2018_vm1, %v1975_v31  ;;  %v1274_v23 = vadd.f32 %v3920_v49, %v1105_v50  ;;  %v2350_v49 = vor.u32 %v2640_v5, %v2349_v3  ;;  %v2933_v47 = vunpack.i.l.bf16 %v2932_v58  ;;  %v2643_v31 = vld [vmem:[%s4377_s0 + $0x220] sm:$0xf0]  ;;  %v1021_v50 = vadd.f32 %v3891_v36, %v3605_v33 }
 0x154   :  { %v2639_v33 = vld [vmem:[%s4377_s0 + $0x200] sm:$0xf0] }
 0x155   :  { %v1400_v8 = vmax.f32 %v1274_v23, 0.0  ;;  %v1184_v9 = vpop.f32.mrf.mxu3  ;;  %v3995_v14 = vpop.f32.mrf.mxu2 }
 0x156   :  { %v3997_v4 = vadd.f32 %v1184_v9, %v1016_v12  ;;  %v937_v7 = vpop.f32.mrf.mxu0 }
 0x157   :  { %v1912_v15 = vmul.f32 %v2928_v2, %v1400_v8  ;;  %v938_v11 = vadd.f32 %v3891_v36, %v937_v7  ;;  %v1106_v16 = vpop.f32.mrf.mxu1  ;;  %v2362_v8 = vor.u32 %v2643_v31, %v2361_v0 }
 0x159   :  { %v1976_v19 = vpack.c.bf16 %v1912_v15, %v1912_v15  ;;  %v1107_v20 = vadd.f32 %v1106_v16, %v938_v11  ;;  %v2341_v11 = vld [vmem:[%s4377_s0 + $0x1f8] sm:$0xf]  ;;  %v2469_v16 = vld [vmem:[%s4377_s0 + $0x2f0] sm:$0xf] }
 0x15a   :  { %2564 = vmatmul.msk.bf16.gmra.mxu2 %vm774_vm0, %v2350_v49  ;;  %v2470_v38 = vor.u32 %v2670_v17, %v2469_v16 }
 0x15b   :  { %2041 = vst.msk [vmem:[%s4380_s4 + $0x58] sm:$0xf] %vm2018_vm1, %v1976_v19  ;;  %v1276_v32 = vadd.f32 %v3945_v21, %v1107_v20  ;;  %v2934_v19 = vunpack.i.h.bf16 %v2932_v58 }
 0x15d   :  { %v1401_v24 = vmax.f32 %v1276_v32, 0.0  ;;  %v1186_v39 = vpop.f32.mrf.mxu3  ;;  %v1283_v42 = vpop.f32.mrf.mxu2 }
 0x15e   :  { %v4029_v44 = vadd.f32 %v1186_v39, %v1018_v35  ;;  %v940_v21 = vpop.f32.mrf.mxu0  ;;  %v2937_v39 = vpop.permute.xlu1 %2936 }
 0x15f   :  { %v1913_v54 = vmul.f32 %v2929_v27, %v1401_v24  ;;  %v941_v26 = vadd.f32 %v3891_v36, %v940_v21  ;;  %v1109_v22 = vpop.f32.mrf.mxu1  ;;  %v2342_v27 = vor.u32 %v2639_v33, %v2341_v11 }
 0x161   :  { %v1977_v61 = vpack.c.bf16 %v1913_v54, %v1913_v54  ;;  %v1110_v63 = vadd.f32 %v1109_v22, %v941_v26  ;;  %979 = vmatmul.bf16.gmra.mxu0 %v2330_v43  ;;  %v2646_v54 = vld [vmem:[%s4377_s0 + $0x238] sm:$0xf0]  ;;  %v1026_v26 = vadd.f32 %v3891_v36, %v3645_v1 }
 0x162   :  { %2573 = vmatmul.msk.bf16.gmra.mxu3 %vm774_vm0, %v2458_v53  ;;  %1148 = vmatmul.bf16.gmra.mxu1 %v2334_v45  ;;  %v2938_v53 = vunpack.i.l.bf16 %v2937_v39  ;;  %v2373_v45 = vld [vmem:[%s4377_s0 + $0x230] sm:$0xf]  ;;  %v2642_v1 = vld [vmem:[%s4377_s0 + $0x218] sm:$0xf0] }
 0x163   :  { %2042 = vst.msk [vmem:[%s4380_s4 + $0x5c] sm:$0xf] %vm2018_vm1, %v1977_v61  ;;  %v1279_v10 = vadd.f32 %v3976_v48, %v1110_v63 }
 0x165   :  { %v1402_v23 = vmax.f32 %v1279_v10, 0.0  ;;  %v1189_v2 = vpop.f32.mrf.mxu3  ;;  %v1285_v3 = vpop.f32.mrf.mxu2 }
 0x166   :  { %v4046_v5 = vadd.f32 %v1189_v2, %v1021_v50  ;;  %v942_v12 = vpop.f32.mrf.mxu0  ;;  %v2353_v2 = vld [vmem:[%s4377_s0 + $0x210] sm:$0xf] }
 0x167   :  { %v1914_v48 = vmul.f32 %v2933_v47, %v1402_v23  ;;  %v943_v9 = vadd.f32 %v3891_v36, %v942_v12  ;;  %v1111_v7 = vpop.f32.mrf.mxu1  ;;  %v2374_v47 = vor.u32 %v2646_v54, %v2373_v45  ;;  %v2939_v12 = vunpack.i.h.bf16 %v2937_v39 }
 0x168   :  { %v2354_v16 = vor.u32 %v2642_v1, %v2353_v2 }
 0x169   :  { %v1978_v49 = vpack.c.bf16 %v1914_v48, %v1914_v48  ;;  %v1112_v15 = vadd.f32 %v1111_v7, %v943_v9  ;;  %v2641_v48 = vld [vmem:[%s4377_s0 + $0x214] sm:$0xf]  ;;  %v2355_v9 = vld [vmem:[%s4377_s0 + $0x21c] sm:$0xf0]  ;;  %v1028_v7 = vadd.f32 %v3891_v36, %v3673_v30 }
 0x16a   :  { %2565 = vmatmul.msk.bf16.gmra.mxu2 %vm774_vm0, %v2362_v8 }
 0x16b   :  { %2043 = vst.msk [vmem:[%s4380_s4 + $0x60] sm:$0xf] %vm2018_vm1, %v1978_v49  ;;  %v1281_v20 = vadd.f32 %v3995_v14, %v1112_v15  ;;  %v2346_v14 = vor.u32 %v2638_v46, %v2343_v60  ;;  %v2942_v49 = vpop.permute.xlu2 %2941 }
 0x16d   :  { %v1403_v29 = vmax.f32 %v1281_v20, 0.0  ;;  %v1191_v13 = vpop.f32.mrf.mxu3  ;;  %v1288_v37 = vpop.f32.mrf.mxu2 }
 0x16e   :  { %v4075_v32 = vadd.f32 %v1191_v13, %v1023_v52  ;;  %v945_v6 = vpop.f32.mrf.mxu0  ;;  %v2943_v13 = vunpack.i.l.bf16 %v2942_v49 }
 0x16f   :  { %v1915_v34 = vmul.f32 %v2934_v19, %v1403_v29  ;;  %v946_v35 = vadd.f32 %v3891_v36, %v945_v6  ;;  %v1114_v24 = vpop.f32.mrf.mxu1  ;;  %v2649_v6 = vld [vmem:[%s4377_s0 + $0x250] sm:$0xf0] }
 0x171   :  { %v1979_v43 = vpack.c.bf16 %v1915_v34, %v1915_v34  ;;  %v1115_v21 = vadd.f32 %v1114_v24, %v946_v35  ;;  %984 = vmatmul.bf16.gmra.mxu0 %v2342_v27  ;;  %v2385_v27 = vld [vmem:[%s4377_s0 + $0x248] sm:$0xf] }
 0x172   :  { %2574 = vmatmul.msk.bf16.gmra.mxu3 %vm774_vm0, %v2470_v38  ;;  %1153 = vmatmul.bf16.gmra.mxu1 %v2346_v14  ;;  %v1031_v38 = vadd.f32 %v3891_v36, %v3691_v59  ;;  %v2365_v59 = vld [vmem:[%s4377_s0 + $0x228] sm:$0xf] }
 0x173   :  { %2044 = vst.msk [vmem:[%s4380_s4 + $0x64] sm:$0xf] %vm2018_vm1, %v1979_v43  ;;  %v1284_v55 = vadd.f32 %v1283_v42, %v1115_v21  ;;  %v4128_v14 = vpop.permute.xlu2 %2956  ;;  %v2386_v43 = vor.u32 %v2649_v6, %v2385_v27 }
 0x175   :  { %v1404_v22 = vmax.f32 %v1284_v55, 0.0  ;;  %v1194_v58 = vpop.f32.mrf.mxu3  ;;  %v1290_v61 = vpop.f32.mrf.mxu2 }
 0x176   :  { %v4091_v63 = vadd.f32 %v1194_v58, %v1026_v26  ;;  %v947_v10 = vpop.f32.mrf.mxu0  ;;  %v2645_v26 = vld [vmem:[%s4377_s0 + $0x230] sm:$0xf0] }
 0x177   :  { %v1916_v42 = vmul.f32 %v2938_v53, %v1404_v22  ;;  %v948_v0 = vadd.f32 %v3891_v36, %v947_v10  ;;  %v1116_v31 = vpop.f32.mrf.mxu1  ;;  %v2944_v22 = vunpack.i.h.bf16 %v2942_v49  ;;  %v2644_v10 = vld [vmem:[%s4377_s0 + $0x22c] sm:$0xf]  ;;  %v2366_v2 = vor.u32 %v2645_v26, %v2365_v59 }
 0x179   :  { %v1980_v50 = vpack.c.bf16 %v1916_v42, %v1916_v42  ;;  %v1117_v23 = vadd.f32 %v1116_v31, %v948_v0  ;;  %v1033_v42 = vadd.f32 %v3891_v36, %v3726_v25  ;;  %v2947_v0 = vpop.permute.xlu0 %2946 }
 0x17a   :  { %2566 = vmatmul.msk.bf16.gmra.mxu2 %vm774_vm0, %v2374_v47  ;;  %v2367_v47 = vld [vmem:[%s4377_s0 + $0x234] sm:$0xf0] }
 0x17b   :  { %2045 = vst.msk [vmem:[%s4380_s4 + $0x68] sm:$0xf] %vm2018_vm1, %v1980_v50  ;;  %v1286_v8 = vadd.f32 %v1285_v3, %v1117_v23  ;;  %v2358_v3 = vor.u32 %v2641_v48, %v2355_v9 }
 0x17d   :  { %v1405_v15 = vmax.f32 %v1286_v8, 0.0  ;;  %v1196_v11 = vpop.f32.mrf.mxu3  ;;  %v1293_v33 = vpop.f32.mrf.mxu2 }
 0x17e   :  { %v4113_v17 = vadd.f32 %v1196_v11, %v1028_v7  ;;  %v950_v19 = vpop.f32.mrf.mxu0  ;;  %v4155_v7 = vpop.permute.xlu2 %2971  ;;  %v2948_v11 = vunpack.i.l.bf16 %v2947_v0 }
 0x17f   :  { %v1917_v20 = vmul.f32 %v2939_v12, %v1405_v15  ;;  %v951_v46 = vadd.f32 %v3891_v36, %v950_v19  ;;  %v1119_v60 = vpop.f32.mrf.mxu1  ;;  %v2652_v19 = vld [vmem:[%s4377_s0 + $0x268] sm:$0xf0] }
 0x181   :  { %v1981_v52 = vpack.c.bf16 %v1917_v20, %v1917_v20  ;;  %v1120_v29 = vadd.f32 %v1119_v60, %v951_v46  ;;  %989 = vmatmul.bf16.gmra.mxu0 %v2354_v16  ;;  %v2397_v16 = vld [vmem:[%s4377_s0 + $0x260] sm:$0xf]  ;;  %v4169_v20 = vpop.permute.xlu0 %2961 }
 0x182   :  { %1158 = vmatmul.bf16.gmra.mxu1 %v2358_v3  ;;  %v1036_v3 = vadd.f32 %v3891_v36, %v3754_v62  ;;  %v2949_v62 = vunpack.i.h.bf16 %v2947_v0 }
 0x183   :  { %2046 = vst.msk [vmem:[%s4380_s4 + $0x6c] sm:$0xf] %vm2018_vm1, %v1981_v52  ;;  %v1289_v30 = vadd.f32 %v1288_v37, %v1120_v29 }
 0x185   :  { %v1406_v34 = vmax.f32 %v1289_v30, 0.0  ;;  %v1199_v35 = vpop.f32.mrf.mxu3  ;;  %v1295_v24 = vpop.f32.mrf.mxu2  ;;  %v2398_v30 = vor.u32 %v2652_v19, %v2397_v16 }
 0x186   :  { %v4130_v39 = vadd.f32 %v1199_v35, %v1031_v38  ;;  %v952_v37 = vpop.f32.mrf.mxu0  ;;  %v4174_v35 = vpop.permute.xlu2 %2986 }
 0x187   :  { %v1918_v21 = vmul.f32 %v2943_v13, %v1406_v34  ;;  %v953_v55 = vadd.f32 %v3891_v36, %v952_v37  ;;  %v1121_v53 = vpop.f32.mrf.mxu1 }
 0x189   :  { %v1982_v45 = vpack.c.bf16 %v1918_v21, %v1918_v21  ;;  %v1122_v54 = vadd.f32 %v1121_v53, %v953_v55  ;;  %v2952_v21 = vpop.permute.xlu1 %2951 }
 0x18a   :  { %2567 = vmatmul.msk.bf16.gmra.mxu2 %vm774_vm0, %v2386_v43  ;;  %v1038_v43 = vadd.f32 %v3891_v36, %v3793_v40 }
 0x18b   :  { %2047 = vst.msk [vmem:[%s4380_s4 + $0x70] sm:$0xf] %vm2018_vm1, %v1982_v45  ;;  %v1291_v58 = vadd.f32 %v1290_v61, %v1122_v54  ;;  %v2370_v61 = vor.u32 %v2644_v10, %v2367_v47  ;;  %v4186_v10 = vpop.permute.xlu0 %2976 }
 0x18d   :  { %v1407_v31 = vmax.f32 %v1291_v58, 0.0  ;;  %v1201_v50 = vpop.f32.mrf.mxu3  ;;  %v1298_v23 = vpop.f32.mrf.mxu2 }
 0x18e   :  { %v4152_v1 = vadd.f32 %v1201_v50, %v1033_v42  ;;  %v955_v12 = vpop.f32.mrf.mxu0  ;;  %v3002_v0 = vpop.permute.xlu2 %3001 }
 0x18f   :  { %v1919_v8 = vmul.f32 %v2944_v22, %v1407_v31  ;;  %v956_v48 = vadd.f32 %v3891_v36, %v955_v12  ;;  %v1124_v9 = vpop.f32.mrf.mxu1 }
 0x191   :  { %v1983_v49 = vpack.c.bf16 %v1919_v8, %v1919_v8  ;;  %v1125_v15 = vadd.f32 %v1124_v9, %v956_v48  ;;  %994 = vmatmul.bf16.gmra.mxu0 %v2366_v2  ;;  %v4192_v31 = vpop.permute.xlu1 %2966  ;;  %v3003_v8 = vunpack.i.l.bf16 %v3002_v0 }
 0x192   :  { %1163 = vmatmul.bf16.gmra.mxu1 %v2370_v61 }
 0x193   :  { %2048 = vst.msk [vmem:[%s4380_s4 + $0x74] sm:$0xf] %vm2018_vm1, %v1983_v49  ;;  %v1294_v25 = vadd.f32 %v1293_v33, %v1125_v15  ;;  %v4196_v19 = vpop.permute.xlu0 %2991 }
 0x195   :  { %v1408_v46 = vmax.f32 %v1294_v25, 0.0  ;;  %v1204_v60 = vpop.f32.mrf.mxu3  ;;  %v1300_v52 = vpop.f32.mrf.mxu2 }
 0x196   :  { %v4171_v29 = vadd.f32 %v1204_v60, %v1036_v3  ;;  %v957_v33 = vpop.f32.mrf.mxu0  ;;  %v2954_v3 = vunpack.i.h.bf16 %v2952_v21 }
 0x197   :  { %v1920_v13 = vmul.f32 %v2948_v11, %v1408_v46  ;;  %v958_v27 = vadd.f32 %v3891_v36, %v957_v33  ;;  %v1126_v6 = vpop.f32.mrf.mxu1 }
 0x199   :  { %v1984_v38 = vpack.c.bf16 %v1920_v13, %v1920_v13  ;;  %v1127_v34 = vadd.f32 %v1126_v6, %v958_v27  ;;  %v3004_v13 = vunpack.i.h.bf16 %v3002_v0 }
 0x19a   :  { %2568 = vmatmul.msk.bf16.gmra.mxu2 %vm774_vm0, %v2398_v30 }
 0x19b   :  { %2049 = vst.msk [vmem:[%s4380_s4 + $0x78] sm:$0xf] %vm2018_vm1, %v1984_v38  ;;  %v1296_v37 = vadd.f32 %v1295_v24, %v1127_v34  ;;  %v2953_v24 = vunpack.i.l.bf16 %v2952_v21 }
 0x19d   :  { %v1409_v55 = vmax.f32 %v1296_v37, 0.0  ;;  %v1206_v53 = vpop.f32.mrf.mxu3  ;;  %v1303_v45 = vpop.f32.mrf.mxu2 }
 0x19e   :  { %v4183_v54 = vadd.f32 %v1206_v53, %v1038_v43  ;;  %v960_v59 = vpop.f32.mrf.mxu0  ;;  %v4208_v37 = vpop.permute.xlu1 %2981  ;;  %v2958_v53 = vunpack.i.l.bf16 %v4128_v14 }
 0x19f   :  { %v1921_v26 = vmul.f32 %v2949_v62, %v1409_v55  ;;  %v961_v22 = vadd.f32 %v3891_v36, %v960_v59  ;;  %v1129_v58 = vpop.f32.mrf.mxu1 }
 0x1a1   :  { %v1985_v47 = vpack.c.bf16 %v1921_v26, %v1921_v26  ;;  %v1130_v42 = vadd.f32 %v1129_v58, %v961_v22 }
 0x1a3   :  { %2050 = vst.msk [vmem:[%s4380_s4 + $0x7c] sm:$0xf] %vm2018_vm1, %v1985_v47  ;;  %v1299_v40 = vadd.f32 %v1298_v23, %v1130_v42 }
 0x1a5   :  { %v1410_v50 = vmax.f32 %v1299_v40, 0.0  ;;  %v1305_v2 = vpop.f32.mrf.mxu2  ;;  %v1348_v12 = vpop.f32.mrf.mxu3 }
 0x1a6   :  { %v1349_v61 = vadd.f32 %v1348_v12, %v3947_v41  ;;  %v962_v48 = vpop.f32.mrf.mxu0 }
 0x1a7   :  { %v1922_v9 = vmul.f32 %v2953_v24, %v1410_v50  ;;  %v963_v49 = vadd.f32 %v3891_v36, %v962_v48  ;;  %v1131_v15 = vpop.f32.mrf.mxu1  ;;  %v4221_v48 = vpop.permute.xlu1 %2996 }
 0x1a8   :  { %v1430_v25 = vmax.f32 %v1349_v61, 0.0 }
 0x1a9   :  { %v1986_v11 = vpack.c.bf16 %v1922_v9, %v1922_v9  ;;  %v1132_v16 = vadd.f32 %v1131_v15, %v963_v49  ;;  %v2959_v49 = vunpack.i.h.bf16 %v4128_v14 }
 0x1aa   :  { %v1942_v23 = vmul.f32 %v3003_v8, %v1430_v25 }
 0x1ab   :  { %2051 = vst.msk [vmem:[%s4380_s4 + $0x80] sm:$0xf] %vm2018_vm1, %v1986_v11  ;;  %v1301_v46 = vadd.f32 %v1300_v52, %v1132_v16 }
 0x1ac   :  { %v2006_v41 = vpack.c.bf16 %v1942_v23, %v1942_v23 }
 0x1ad   :  { %v1411_v60 = vmax.f32 %v1301_v46, 0.0  ;;  %v1308_v33 = vpop.f32.mrf.mxu2  ;;  %v1350_v30 = vpop.f32.mrf.mxu3 }
 0x1ae   :  { %2071 = vst.msk [vmem:[%s4380_s4 + $0xd0] sm:$0xf] %vm2018_vm1, %v2006_v41  ;;  %v1351_v27 = vadd.f32 %v1350_v30, %v3978_v57  ;;  %v965_v6 = vpop.f32.mrf.mxu0  ;;  %v3007_v57 = vpop.permute.xlu0 %3006 }
 0x1af   :  { %v1923_v38 = vmul.f32 %v2954_v3, %v1411_v60  ;;  %v966_v34 = vadd.f32 %v3891_v36, %v965_v6  ;;  %v1134_v62 = vpop.f32.mrf.mxu1  ;;  %v3008_v40 = vunpack.i.l.bf16 %v3007_v57  ;;  %v3009_v23 = vunpack.i.h.bf16 %v3007_v57 }
 0x1b0   :  { %v1431_v52 = vmax.f32 %v1351_v27, 0.0  ;;  %v2963_v6 = vunpack.i.l.bf16 %v4169_v20 }
 0x1b1   :  { %v1987_v43 = vpack.c.bf16 %v1923_v38, %v1923_v38  ;;  %v1135_v21 = vadd.f32 %v1134_v62, %v966_v34  ;;  %v3012_v34 = vpop.permute.xlu1 %3011 }
 0x1b2   :  { %v1943_v55 = vmul.f32 %v3004_v13, %v1431_v52 }
 0x1b3   :  { %2052 = vst.msk [vmem:[%s4380_s4 + $0x84] sm:$0xf] %vm2018_vm1, %v1987_v43  ;;  %v1304_v59 = vadd.f32 %v1303_v45, %v1135_v21 }
 0x1b4   :  { %v2007_v26 = vpack.c.bf16 %v1943_v55, %v1943_v55  ;;  %v3013_v55 = vunpack.i.l.bf16 %v3012_v34 }
 0x1b5   :  { %v1412_v22 = vmax.f32 %v1304_v59, 0.0  ;;  %v1310_v58 = vpop.f32.mrf.mxu2  ;;  %v1353_v47 = vpop.f32.mrf.mxu3 }
 0x1b6   :  { %2072 = vst.msk [vmem:[%s4380_s4 + $0xd4] sm:$0xf] %vm2018_vm1, %v2007_v26  ;;  %v1354_v42 = vadd.f32 %v1353_v47, %v3997_v4  ;;  %v967_v24 = vpop.f32.mrf.mxu0 }
 0x1b7   :  { %v1924_v0 = vmul.f32 %v2958_v53, %v1412_v22  ;;  %v968_v50 = vadd.f32 %v3891_v36, %v967_v24  ;;  %v1136_v12 = vpop.f32.mrf.mxu1 }
 0x1b8   :  { %v1432_v61 = vmax.f32 %v1354_v42, 0.0 }
 0x1b9   :  { %v1988_v45 = vpack.c.bf16 %v1924_v0, %v1924_v0  ;;  %v1137_v8 = vadd.f32 %v1136_v12, %v968_v50 }
 0x1ba   :  { %v1944_v9 = vmul.f32 %v3008_v40, %v1432_v61  ;;  %v2964_v40 = vunpack.i.h.bf16 %v4169_v20  ;;  %v3014_v61 = vunpack.i.h.bf16 %v3012_v34 }
 0x1bb   :  { %2053 = vst.msk [vmem:[%s4380_s4 + $0x88] sm:$0xf] %vm2018_vm1, %v1988_v45  ;;  %v1306_v4 = vadd.f32 %v1305_v2, %v1137_v8 }
 0x1bc   :  { %v2008_v15 = vpack.c.bf16 %v1944_v9, %v1944_v9 }
 0x1bd   :  { %v1413_v25 = vmax.f32 %v1306_v4, 0.0  ;;  %v1313_v11 = vpop.f32.mrf.mxu2  ;;  %v1355_v16 = vpop.f32.mrf.mxu3 }
 0x1be   :  { %2073 = vst.msk [vmem:[%s4380_s4 + $0xd8] sm:$0xf] %vm2018_vm1, %v2008_v15  ;;  %v1356_v3 = vadd.f32 %v1355_v16, %v4029_v44  ;;  %v970_v46 = vpop.f32.mrf.mxu0  ;;  %v2968_v16 = vunpack.i.l.bf16 %v4192_v31 }
 0x1bf   :  { %v1925_v14 = vmul.f32 %v2959_v49, %v1413_v25  ;;  %v971_v41 = vadd.f32 %v3891_v36, %v970_v46  ;;  %v1139_v60 = vpop.f32.mrf.mxu1 }
 0x1c0   :  { %v1433_v30 = vmax.f32 %v1356_v3, 0.0  ;;  %v3017_v3 = vpop.permute.xlu2 %3016 }
 0x1c1   :  { %v1989_v13 = vpack.c.bf16 %v1925_v14, %v1925_v14  ;;  %v1140_v2 = vadd.f32 %v1139_v60, %v971_v41 }
 0x1c2   :  { %v1945_v27 = vmul.f32 %v3009_v23, %v1433_v30  ;;  %v3018_v30 = vunpack.i.l.bf16 %v3017_v3 }
 0x1c3   :  { %2054 = vst.msk [vmem:[%s4380_s4 + $0x8c] sm:$0xf] %vm2018_vm1, %v1989_v13  ;;  %v1309_v38 = vadd.f32 %v1308_v33, %v1140_v2 }
 0x1c4   :  { %v2009_v62 = vpack.c.bf16 %v1945_v27, %v1945_v27 }
 0x1c5   :  { %v1414_v44 = vmax.f32 %v1309_v38, 0.0  ;;  %v1315_v52 = vpop.f32.mrf.mxu2  ;;  %v1358_v43 = vpop.f32.mrf.mxu3 }
 0x1c6   :  { %2074 = vst.msk [vmem:[%s4380_s4 + $0xdc] sm:$0xf] %vm2018_vm1, %v2009_v62  ;;  %v1359_v21 = vadd.f32 %v1358_v43, %v4046_v5  ;;  %v972_v53 = vpop.f32.mrf.mxu0 }
 0x1c7   :  { %v1926_v59 = vmul.f32 %v2963_v6, %v1414_v44  ;;  %v973_v57 = vadd.f32 %v3891_v36, %v972_v53  ;;  %v1141_v26 = vpop.f32.mrf.mxu1 }
 0x1c8   :  { %v1434_v22 = vmax.f32 %v1359_v21, 0.0  ;;  %v2969_v21 = vunpack.i.h.bf16 %v4192_v31 }
 0x1c9   :  { %v1990_v33 = vpack.c.bf16 %v1926_v59, %v1926_v59  ;;  %v1142_v47 = vadd.f32 %v1141_v26, %v973_v57  ;;  %v3019_v59 = vunpack.i.h.bf16 %v3017_v3 }
 0x1ca   :  { %v1946_v42 = vmul.f32 %v3013_v55, %v1434_v22 }
 0x1cb   :  { %2055 = vst.msk [vmem:[%s4380_s4 + $0x90] sm:$0xf] %vm2018_vm1, %v1990_v33  ;;  %v1311_v24 = vadd.f32 %v1310_v58, %v1142_v47 }
 0x1cc   :  { %v2010_v0 = vpack.c.bf16 %v1946_v42, %v1946_v42 }
 0x1cd   :  { %v1415_v5 = vmax.f32 %v1311_v24, 0.0  ;;  %v1318_v50 = vpop.f32.mrf.mxu2  ;;  %v1360_v12 = vpop.f32.mrf.mxu3 }
 0x1ce   :  { %2075 = vst.msk [vmem:[%s4380_s4 + $0xe0] sm:$0xf] %vm2018_vm1, %v2010_v0  ;;  %v1361_v45 = vadd.f32 %v1360_v12, %v4075_v32  ;;  %v975_v8 = vpop.f32.mrf.mxu0  ;;  %v3022_v0 = vpop.permute.xlu0 %3021  ;;  %v2973_v12 = vunpack.i.l.bf16 %v4155_v7 }
 0x1cf   :  { %v1927_v20 = vmul.f32 %v2964_v40, %v1415_v5  ;;  %v976_v9 = vadd.f32 %v3891_v36, %v975_v8  ;;  %v1144_v49 = vpop.f32.mrf.mxu1 }
 0x1d0   :  { %v1435_v4 = vmax.f32 %v1361_v45, 0.0 }
 0x1d1   :  { %v1991_v15 = vpack.c.bf16 %v1927_v20, %v1927_v20  ;;  %v1145_v58 = vadd.f32 %v1144_v49, %v976_v9 }
 0x1d2   :  { %v1947_v25 = vmul.f32 %v3014_v61, %v1435_v4 }
 0x1d3   :  { %2056 = vst.msk [vmem:[%s4380_s4 + $0x94] sm:$0xf] %vm2018_vm1, %v1991_v15  ;;  %v1314_v23 = vadd.f32 %v1313_v11, %v1145_v58 }
 0x1d4   :  { %v2011_v46 = vpack.c.bf16 %v1947_v25, %v1947_v25 }
 0x1d5   :  { %v1416_v32 = vmax.f32 %v1314_v23, 0.0  ;;  %v1320_v14 = vpop.f32.mrf.mxu2  ;;  %v1363_v41 = vpop.f32.mrf.mxu3 }
 0x1d6   :  { %2076 = vst.msk [vmem:[%s4380_s4 + $0xe4] sm:$0xf] %vm2018_vm1, %v2011_v46  ;;  %v1364_v60 = vadd.f32 %v1363_v41, %v4091_v63  ;;  %v977_v13 = vpop.f32.mrf.mxu0  ;;  %v2974_v46 = vunpack.i.h.bf16 %v4155_v7 }
 0x1d7   :  { %v1928_v2 = vmul.f32 %v2968_v16, %v1416_v32  ;;  %v978_v27 = vadd.f32 %v3891_v36, %v977_v13  ;;  %v1146_v6 = vpop.f32.mrf.mxu1 }
 0x1d8   :  { %v1436_v38 = vmax.f32 %v1364_v60, 0.0 }
 0x1d9   :  { %v1992_v11 = vpack.c.bf16 %v1928_v2, %v1928_v2  ;;  %v1147_v34 = vadd.f32 %v1146_v6, %v978_v27  ;;  %v3024_v6 = vunpack.i.h.bf16 %v3022_v0 }
 0x1da   :  { %v1948_v62 = vmul.f32 %v3018_v30, %v1436_v38 }
 0x1db   :  { %2057 = vst.msk [vmem:[%s4380_s4 + $0x98] sm:$0xf] %vm2018_vm1, %v1992_v11  ;;  %v1316_v44 = vadd.f32 %v1315_v52, %v1147_v34 }
 0x1dc   :  { %v2012_v43 = vpack.c.bf16 %v1948_v62, %v1948_v62  ;;  %v3027_v62 = vpop.permute.xlu1 %3026 }
 0x1dd   :  { %v1417_v63 = vmax.f32 %v1316_v44, 0.0  ;;  %v1323_v55 = vpop.f32.mrf.mxu2  ;;  %v1365_v53 = vpop.f32.mrf.mxu3 }
 0x1de   :  { %2077 = vst.msk [vmem:[%s4380_s4 + $0xe8] sm:$0xf] %vm2018_vm1, %v2012_v43  ;;  %v1366_v57 = vadd.f32 %v1365_v53, %v4113_v17  ;;  %v980_v26 = vpop.f32.mrf.mxu0 }
 0x1df   :  { %v1929_v22 = vmul.f32 %v2969_v21, %v1417_v63  ;;  %v981_v33 = vadd.f32 %v3891_v36, %v980_v26  ;;  %v1149_v47 = vpop.f32.mrf.mxu1 }
 0x1e0   :  { %v1437_v52 = vmax.f32 %v1366_v57, 0.0 }
 0x1e1   :  { %v1993_v42 = vpack.c.bf16 %v1929_v22, %v1929_v22  ;;  %v1150_v40 = vadd.f32 %v1149_v47, %v981_v33 }
 0x1e2   :  { %v1949_v31 = vmul.f32 %v3019_v59, %v1437_v52 }
 0x1e3   :  { %2058 = vst.msk [vmem:[%s4380_s4 + $0x9c] sm:$0xf] %vm2018_vm1, %v1993_v42  ;;  %v1319_v24 = vadd.f32 %v1318_v50, %v1150_v40  ;;  %v3023_v50 = vunpack.i.l.bf16 %v3022_v0 }
 0x1e4   :  { %v2013_v5 = vpack.c.bf16 %v1949_v31, %v1949_v31 }
 0x1e5   :  { %v1418_v17 = vmax.f32 %v1319_v24, 0.0  ;;  %v1325_v61 = vpop.f32.mrf.mxu2  ;;  %v1368_v45 = vpop.f32.mrf.mxu3  ;;  %v2979_v24 = vunpack.i.h.bf16 %v4186_v10 }
 0x1e6   :  { %2078 = vst.msk [vmem:[%s4380_s4 + $0xec] sm:$0xf] %vm2018_vm1, %v2013_v5  ;;  %v1369_v8 = vadd.f32 %v1368_v45, %v4130_v39  ;;  %v982_v20 = vpop.f32.mrf.mxu0  ;;  %v3032_v45 = vld [vmem:[%s4379_s2] ss:$0 sm:$0xff] }
 0x1e7   :  { %v1930_v9 = vmul.f32 %v2973_v12, %v1418_v17  ;;  %v983_v49 = vadd.f32 %v3891_v36, %v982_v20  ;;  %v1151_v4 = vpop.f32.mrf.mxu1  ;;  %v3029_v20 = vunpack.i.h.bf16 %v3027_v62 }
 0x1e8   :  { %v1438_v15 = vmax.f32 %v1369_v8, 0.0 }
 0x1e9   :  { %v1994_v58 = vpack.c.bf16 %v1930_v9, %v1930_v9  ;;  %v1152_v25 = vadd.f32 %v1151_v4, %v983_v49 }
 0x1ea   :  { %v1950_v16 = vmul.f32 %v3023_v50, %v1438_v15  ;;  %v2983_v15 = vunpack.i.l.bf16 %v4208_v37 }
 0x1eb   :  { %2059 = vst.msk [vmem:[%s4380_s4 + $0xa0] sm:$0xf] %vm2018_vm1, %v1994_v58  ;;  %v1321_v23 = vadd.f32 %v1320_v14, %v1152_v25 }
 0x1ec   :  { %v2014_v3 = vpack.c.bf16 %v1950_v16, %v1950_v16 }
 0x1ed   :  { %v1419_v39 = vmax.f32 %v1321_v23, 0.0  ;;  %v1328_v32 = vpop.f32.mrf.mxu2  ;;  %v1370_v41 = vpop.f32.mrf.mxu3 }
 0x1ee   :  { %2079 = vst.msk [vmem:[%s4380_s4 + $0xf0] sm:$0xf] %vm2018_vm1, %v2014_v3  ;;  %v1371_v60 = vadd.f32 %v1370_v41, %v4152_v1  ;;  %v985_v30 = vpop.f32.mrf.mxu0  ;;  %v2978_v1 = vunpack.i.l.bf16 %v4186_v10 }
 0x1ef   :  { %v1931_v13 = vmul.f32 %v2974_v46, %v1419_v39  ;;  %v986_v2 = vadd.f32 %v3891_v36, %v985_v30  ;;  %v1154_v27 = vpop.f32.mrf.mxu1 }
 0x1f0   :  { %v1439_v14 = vmax.f32 %v1371_v60, 0.0  ;;  %v2984_v60 = vunpack.i.h.bf16 %v4208_v37 }
 0x1f1   :  { %v1995_v38 = vpack.c.bf16 %v1931_v13, %v1931_v13  ;;  %v1155_v11 = vadd.f32 %v1154_v27, %v986_v2 }
 0x1f2   :  { %v1951_v7 = vmul.f32 %v3024_v6, %v1439_v14 }
 0x1f3   :  { %2060 = vst.msk [vmem:[%s4380_s4 + $0xa4] sm:$0xf] %vm2018_vm1, %v1995_v38  ;;  %v1324_v34 = vadd.f32 %v1323_v55, %v1155_v11  ;;  %v3028_v55 = vunpack.i.l.bf16 %v3027_v62  ;;  %v2993_v11 = vunpack.i.l.bf16 %v4196_v19 }
 0x1f4   :  { %v2015_v44 = vpack.c.bf16 %v1951_v7, %v1951_v7 }
 0x1f5   :  { %v1420_v43 = vmax.f32 %v1324_v34, 0.0  ;;  %v1330_v21 = vpop.f32.mrf.mxu2  ;;  %v1373_v63 = vpop.f32.mrf.mxu3 }
 0x1f6   :  { %2080 = vst.msk [vmem:[%s4380_s4 + $0xf4] sm:$0xf] %vm2018_vm1, %v2015_v44  ;;  %v1374_v53 = vadd.f32 %v1373_v63, %v4171_v29  ;;  %v987_v59 = vpop.f32.mrf.mxu0 }
 0x1f7   :  { %v1932_v57 = vmul.f32 %v2978_v1, %v1420_v43  ;;  %v988_v26 = vadd.f32 %v3891_v36, %v987_v59  ;;  %v1156_v22 = vpop.f32.mrf.mxu1  ;;  %v2988_v43 = vunpack.i.l.bf16 %v4174_v35 }
 0x1f8   :  { %v1440_v33 = vmax.f32 %v1374_v53, 0.0 }
 0x1f9   :  { %v1996_v47 = vpack.c.bf16 %v1932_v57, %v1932_v57  ;;  %v1157_v52 = vadd.f32 %v1156_v22, %v988_v26  ;;  %v2994_v22 = vunpack.i.h.bf16 %v4196_v19 }
 0x1fa   :  { %v1952_v42 = vmul.f32 %v3028_v55, %v1440_v33 }
 0x1fb   :  { %2061 = vst.msk [vmem:[%s4380_s4 + $0xa8] sm:$0xf] %vm2018_vm1, %v1996_v47  ;;  %v1326_v40 = vadd.f32 %v1325_v61, %v1157_v52 }
 0x1fc   :  { %v2016_v31 = vpack.c.bf16 %v1952_v42, %v1952_v42 }
 0x1fd   :  { %v1421_v29 = vmax.f32 %v1326_v40, 0.0  ;;  %v1333_v0 = vpop.f32.mrf.mxu2  ;;  %v1375_v5 = vpop.f32.mrf.mxu3 }
 0x1fe   :  { %2081 = vst.msk [vmem:[%s4380_s4 + $0xf8] sm:$0xf] %vm2018_vm1, %v2016_v31  ;;  %v1376_v36 = vadd.f32 %v1375_v5, %v4183_v54  ;;  %v990_v12 = vpop.f32.mrf.mxu0  ;;  %v2989_v31 = vunpack.i.h.bf16 %v4174_v35 }
 0x1ff   :  { %v1933_v17 = vmul.f32 %v2979_v24, %v1421_v29  ;;  %v991_v61 = vadd.f32 %v3032_v45, %v990_v12  ;;  %v1159_v8 = vpop.f32.mrf.mxu1 }
 0x200   :  { %v1441_v10 = vmax.f32 %v1376_v36, 0.0 }
 0x201   :  { %v1997_v9 = vpack.c.bf16 %v1933_v17, %v1933_v17  ;;  %v1160_v49 = vadd.f32 %v1159_v8, %v991_v61 }
 0x202   :  { %v1953_v4 = vmul.f32 %v3029_v20, %v1441_v10 }
 0x203   :  { %2062 = vst.msk [vmem:[%s4380_s4 + $0xac] sm:$0xf] %vm2018_vm1, %v1997_v9  ;;  %v1329_v50 = vadd.f32 %v1328_v32, %v1160_v49 }
 0x204   :  { %v2017_v54 = vpack.c.bf16 %v1953_v4, %v1953_v4 }
 0x205   :  { %v1422_v58 = vmax.f32 %v1329_v50, 0.0  ;;  %v1335_v25 = vpop.f32.mrf.mxu2 }
 0x206   :  { %2082 = vst.msk [vmem:[%s4380_s4 + $0xfc] sm:$0xf] %vm2018_vm1, %v2017_v54  ;;  %v992_v16 = vpop.f32.mrf.mxu0 }
 0x207   :  { %v1934_v23 = vmul.f32 %v2983_v15, %v1422_v58  ;;  %v993_v3 = vadd.f32 %v3032_v45, %v992_v16  ;;  %v1161_v46 = vpop.f32.mrf.mxu1 }
 0x209   :  { %v1998_v39 = vpack.c.bf16 %v1934_v23, %v1934_v23  ;;  %v1162_v41 = vadd.f32 %v1161_v46, %v993_v3 }
 0x20b   :  { %2063 = vst.msk [vmem:[%s4380_s4 + $0xb0] sm:$0xf] %vm2018_vm1, %v1998_v39  ;;  %v1331_v32 = vadd.f32 %v1330_v21, %v1162_v41 }
 0x20d   :  { %v1423_v30 = vmax.f32 %v1331_v32, 0.0  ;;  %v1338_v13 = vpop.f32.mrf.mxu2 }
 0x20e   :  { %v1339_v2 = vadd.f32 %v1338_v13, %v3826_v18  ;;  %v995_v27 = vpop.f32.mrf.mxu0 }
 0x20f   :  { %v1935_v6 = vmul.f32 %v2984_v60, %v1423_v30  ;;  %v996_v14 = vadd.f32 %v3032_v45, %v995_v27  ;;  %v1164_v38 = vpop.f32.mrf.mxu1 }
 0x210   :  { %v1426_v7 = vmax.f32 %v1339_v2, 0.0 }
 0x211   :  { %v1999_v34 = vpack.c.bf16 %v1935_v6, %v1935_v6  ;;  %v1165_v62 = vadd.f32 %v1164_v38, %v996_v14 }
 0x212   :  { %v1938_v44 = vmul.f32 %v2993_v11, %v1426_v7 }
 0x213   :  { %2064 = vst.msk [vmem:[%s4380_s4 + $0xb4] sm:$0xf] %vm2018_vm1, %v1999_v34  ;;  %v1334_v37 = vadd.f32 %v1333_v0, %v1165_v62  ;;  %v2998_v0 = vunpack.i.l.bf16 %v4221_v48 }
 0x214   :  { %v2002_v1 = vpack.c.bf16 %v1938_v44, %v1938_v44 }
 0x215   :  { %v1424_v18 = vmax.f32 %v1334_v37, 0.0  ;;  %v1340_v21 = vpop.f32.mrf.mxu2 }
 0x216   :  { %2067 = vst.msk [vmem:[%s4380_s4 + $0xc0] sm:$0xf] %vm2018_vm1, %v2002_v1  ;;  %v1341_v63 = vadd.f32 %v1340_v21, %v3864_v56  ;;  %v997_v53 = vpop.f32.mrf.mxu0 }
 0x217   :  { %v1936_v59 = vmul.f32 %v2988_v43, %v1424_v18  ;;  %v998_v57 = vadd.f32 %v3032_v45, %v997_v53  ;;  %v1166_v26 = vpop.f32.mrf.mxu1  ;;  %v2999_v45 = vunpack.i.h.bf16 %v4221_v48 }
 0x218   :  { %v1427_v55 = vmax.f32 %v1341_v63, 0.0 }
 0x219   :  { %v2000_v33 = vpack.c.bf16 %v1936_v59, %v1936_v59  ;;  %v1167_v47 = vadd.f32 %v1166_v26, %v998_v57 }
 0x21a   :  { %v1939_v52 = vmul.f32 %v2994_v22, %v1427_v55 }
 0x21b   :  { %2065 = vst.msk [vmem:[%s4380_s4 + $0xb8] sm:$0xf] %vm2018_vm1, %v2000_v33  ;;  %v1336_v42 = vadd.f32 %v1335_v25, %v1167_v47 }
 0x21c   :  { %v2003_v40 = vpack.c.bf16 %v1939_v52, %v1939_v52 }
 0x21d   :  { %v1425_v56 = vmax.f32 %v1336_v42, 0.0  ;;  %v1343_v24 = vpop.f32.mrf.mxu2 }
 0x21e   :  { %2068 = vst.msk [vmem:[%s4380_s4 + $0xc4] sm:$0xf] %vm2018_vm1, %v2003_v40  ;;  %v1344_v19 = vadd.f32 %v1343_v24, %v3886_v28 }
 0x21f   :  { %v1937_v29 = vmul.f32 %v2989_v31, %v1425_v56 }
 0x220   :  { %v1428_v5 = vmax.f32 %v1344_v19, 0.0 }
 0x221   :  { %v2001_v36 = vpack.c.bf16 %v1937_v29, %v1937_v29 }
 0x222   :  { %v1940_v12 = vmul.f32 %v2998_v0, %v1428_v5 }
 0x223   :  { %2066 = vst.msk [vmem:[%s4380_s4 + $0xbc] sm:$0xf] %vm2018_vm1, %v2001_v36 }
 0x224   :  { %v2004_v35 = vpack.c.bf16 %v1940_v12, %v1940_v12 }
 0x225   :  { %v1345_v17 = vpop.f32.mrf.mxu2 }
 0x226   :  { %2069 = vst.msk [vmem:[%s4380_s4 + $0xc8] sm:$0xf] %vm2018_vm1, %v2004_v35  ;;  %v1346_v28 = vadd.f32 %v1345_v17, %v3922_v51 }
 0x228   :  { %v1429_v61 = vmax.f32 %v1346_v28, 0.0 }
 0x22a   :  { %v1941_v8 = vmul.f32 %v2999_v45, %v1429_v61 }
 0x22c   :  { %v2005_v20 = vpack.c.bf16 %v1941_v8, %v1941_v8 }
 0x22e   :  { %2070 = vst.msk [vmem:[%s4380_s4 + $0xcc] sm:$0xf] %vm2018_vm1, %v2005_v20 }

// kernel: pillar_backbone_forward.16
= control target key start
LH: loop header
LB: loop body
LE: loop exit
PB: predicated region body
PF: predicated region fallthrough
CT: control target
= control target key end

     0   :  { %vm318_vm0 = vcmask 261120   ;;  %v989_v13 = vmov 0   ;;  %vm650_vm1 = vcmask 519168   ;;  %s1370_s1 = inlined_call_operand.vmem [shape: bf16[288,64], index: 1, kind: input, shape index: {}]   ;;  %s1371_s0 = inlined_call_operand.vmem [shape: bf16[128,288], index: 0, kind: input, shape index: {}]   ;;  %s1372_s3 = inlined_call_operand.vmem [shape: bf16[128,1], index: 3, kind: input, shape index: {}]   ;;  %s1373_s2 = inlined_call_operand.vmem [shape: f32[1,64], index: 2, kind: input, shape index: {}]   ;;  %s1374_s4 = inlined_call_operand.vmem [shape: bf16[128,64], index: 4, kind: output, shape index: {}]  }
   0x1   :  { %v878_v0 = vld [vmem:[%s1370_s1 + $0x38] sm:$0xff]  ;;  %v888_v1 = vld [vmem:[%s1370_s1 + $0x88] sm:$0xff]  ;;  %v877_v3 = vld [vmem:[%s1370_s1 + $0x30] sm:$0xff]  ;;  %945 = vset.pattern.permute.xlu0 %v989_v13  ;;  %956 = vset.pattern.permute.xlu1 %v989_v13 }
   0x2   :  { %v1024_v2 = vld [vmem:[%s1370_s1 + $0x78] sm:$0xff]  ;;  %343 = vmatpush.bf16.msra.mxu0 %v878_v0  ;;  %928 = vmatpush.bf16.msra.mxu3 %v878_v0  ;;  %v887_v4 = vld [vmem:[%s1370_s1 + $0x80] sm:$0xff]  ;;  %v1036_v5 = vld [vmem:[%s1370_s1 + $0x70] sm:$0xff] }
   0x3   :  { %447 = vmatpush.bf16.msra.mxu2 %v888_v1  ;;  %392 = vmatpush.bf16.msra.mxu1 %v1024_v2  ;;  %v681_v6 = vld [vmem:[%s1371_s0 + $0x8] sm:$0xf]  ;;  %v849_v7 = vld [vmem:[%s1371_s0 + $0x10] sm:$0xf0]  ;;  %v875_v11 = vld [vmem:[%s1370_s1 + $0x20] sm:$0xff] }
   0x4   :  { %v682_v8 = vor.u32 %v849_v7, %v681_v6  ;;  %v876_v9 = vld [vmem:[%s1370_s1 + $0x28] sm:$0xff]  ;;  %v1061_v12 = vld [vmem:[%s1370_s1 + $0x60] sm:$0xff]  ;;  %v874_v14 = vld [vmem:[%s1370_s1 + $0x18] sm:$0xff]  ;;  %967 = vset.pattern.permute.xlu2 %v989_v13 }
   0x5   :  { %v1051_v10 = vld [vmem:[%s1370_s1 + $0x68] sm:$0xff]  ;;  %v890_v15 = vld [vmem:[%s1372_s3] sm:$0xff]   ;;  %v1073_v16 = vld [vmem:[%s1370_s1 + $0x58] sm:$0xff] }
   0x6   :  { %344 = vmatpush.bf16.msra.mxu0 %v877_v3  ;;  %929 = vmatpush.bf16.msra.mxu3 %v877_v3  ;;  %v891_v17 = vunpack.c.l.bf16 %v890_v15  ;;  %v892_v18 = vunpack.c.h.bf16 %v890_v15  ;;  %v873_v20 = vld [vmem:[%s1370_s1 + $0x10] sm:$0xff]  ;;  %v693_v22 = vld [vmem:[%s1371_s0 + $0x20] sm:$0xf]  ;;  %v852_v23 = vld [vmem:[%s1371_s0 + $0x28] sm:$0xf0] }
   0x7   :  { %448 = vmatpush.bf16.msra.mxu2 %v887_v4  ;;  %393 = vmatpush.bf16.msra.mxu1 %v1036_v5  ;;  %v1082_v21 = vld [vmem:[%s1370_s1 + $0x50] sm:$0xff]  ;;  %v694_v24 = vor.u32 %v852_v23, %v693_v22  ;;  %v872_v25 = vld [vmem:[%s1370_s1 + $0x8] sm:$0xff]  ;;  %v871_v27 = vld [vmem:[%s1370_s1] sm:$0xff] }
   0x8   :  { %v946_v19 = vpack.i.bf16 %v892_v18, %v891_v17  ;;  %v880_v26 = vld [vmem:[%s1370_s1 + $0x48] sm:$0xff]  ;;  %v1103_v28 = vld [vmem:[%s1370_s1 + $0x40] sm:$0xff]  ;;  %v745_v31 = vld [vmem:[%s1371_s0 + $0x90] sm:$0xf] }
   0x9   :  { %v673_v29 = vld [vmem:[%s1371_s0] sm:$0xf]  ;;  %v848_v30 = vld [vmem:[%s1371_s0 + $0x8] sm:$0xf0]  ;;  %v866_v32 = vld [vmem:[%s1371_s0 + $0x98] sm:$0xf0] }
   0xa   :  { %839 = vmatmul.msk.bf16.vlgmr.msra.gmra.mxu2 %vm318_vm0, %v682_v8  ;;  %345 = vmatpush.bf16.msra.mxu0 %v876_v9  ;;  %v847_v33 = vld [vmem:[%s1371_s0 + $0x4] sm:$0xf]  ;;  %v675_v34 = vld [vmem:[%s1371_s0 + $0xc] sm:$0xf0]  ;;  %v674_v35 = vor.u32 %v848_v30, %v673_v29  ;;  %v746_v36 = vor.u32 %v866_v32, %v745_v31  ;;  %v921_v38 = vld [vmem:[%s1372_s3 + $0x8] sm:$0xff]  }
   0xb   :  { %930 = vmatpush.bf16.msra.mxu3 %v876_v9  ;;  %394 = vmatpush.bf16.msra.mxu1 %v1051_v10  ;;  %v678_v37 = vor.u32 %v847_v33, %v675_v34  ;;  %v895_v39 = vunpack.c.l.bf16 %v921_v38  ;;  %v896_v40 = vunpack.c.h.bf16 %v921_v38  ;;  %v705_v42 = vld [vmem:[%s1371_s0 + $0x38] sm:$0xf]  ;;  %v855_v43 = vld [vmem:[%s1371_s0 + $0x40] sm:$0xf0]  ;;  %v757_v47 = vld [vmem:[%s1371_s0 + $0xa8] sm:$0xf] }
   0xc   :  { %947 = vperm.xlu0 %945, %v946_v19   ;;  %v706_v44 = vor.u32 %v855_v43, %v705_v42  ;;  %v685_v45 = vld [vmem:[%s1371_s0 + $0x18] sm:$0xf]  ;;  %v851_v46 = vld [vmem:[%s1371_s0 + $0x20] sm:$0xf0]  ;;  %v869_v48 = vld [vmem:[%s1371_s0 + $0xb0] sm:$0xf0] }
   0xd   :  { %v951_v41 = vpack.i.bf16 %v896_v40, %v895_v39  ;;  %v850_v49 = vld [vmem:[%s1371_s0 + $0x1c] sm:$0xf]  ;;  %v687_v50 = vld [vmem:[%s1371_s0 + $0x24] sm:$0xf0]  ;;  %v686_v51 = vor.u32 %v851_v46, %v685_v45  ;;  %v758_v52 = vor.u32 %v869_v48, %v757_v47  ;;  %v922_v54 = vld [vmem:[%s1372_s3 + $0x10] sm:$0xff]  }
   0xe   :  { %346 = vmatpush.bf16.msra.mxu0 %v875_v11  ;;  %v690_v53 = vor.u32 %v850_v49, %v687_v50  ;;  %v899_v55 = vunpack.c.l.bf16 %v922_v54  ;;  %v900_v56 = vunpack.c.h.bf16 %v922_v54  ;;  %v717_v58 = vld [vmem:[%s1371_s0 + $0x50] sm:$0xf]  ;;  %v858_v59 = vld [vmem:[%s1371_s0 + $0x58] sm:$0xf0]  ;;  %v865_v63 = vld [vmem:[%s1371_s0 + $0x94] sm:$0xf] }
   0xf   :  { %931 = vmatpush.bf16.msra.mxu3 %v875_v11  ;;  %395 = vmatpush.bf16.msra.mxu1 %v1061_v12  ;;  %v718_v60 = vor.u32 %v858_v59, %v717_v58  ;;  %v697_v61 = vld [vmem:[%s1371_s0 + $0x30] sm:$0xf]  ;;  %v854_v62 = vld [vmem:[%s1371_s0 + $0x38] sm:$0xf0]  ;;  %v747_v0 = vld [vmem:[%s1371_s0 + $0x9c] sm:$0xf0] }
  0x10   :  { %v957_v57 = vpack.i.bf16 %v900_v56, %v899_v55  ;;  %v853_v1 = vld [vmem:[%s1371_s0 + $0x34] sm:$0xf]  ;;  %v698_v3 = vor.u32 %v854_v62, %v697_v61  ;;  %v750_v4 = vor.u32 %v865_v63, %v747_v0  ;;  %v923_v6 = vld [vmem:[%s1372_s3 + $0x18] sm:$0xff]   ;;  %v709_v13 = vld [vmem:[%s1371_s0 + $0x48] sm:$0xf] }
  0x11   :  { %v903_v7 = vunpack.c.l.bf16 %v923_v6  ;;  %v904_v8 = vunpack.c.h.bf16 %v923_v6  ;;  %v861_v11 = vld [vmem:[%s1371_s0 + $0x70] sm:$0xf0]  ;;  %v868_v15 = vld [vmem:[%s1371_s0 + $0xac] sm:$0xf]  ;;  %v711_v18 = vld [vmem:[%s1371_s0 + $0x54] sm:$0xf0] }
  0x12   :  { %347 = vmatpush.bf16.msra.mxu0 %v874_v14  ;;  %958 = vperm.xlu1 %956, %v957_v57   ;;  %v856_v17 = vld [vmem:[%s1371_s0 + $0x4c] sm:$0xf]  ;;  %v741_v22 = vld [vmem:[%s1371_s0 + $0x80] sm:$0xf]  ;;  %v927_v30 = vld [vmem:[%s1372_s3 + $0x38] sm:$0xff]  }
  0x13   :  { %932 = vmatpush.bf16.msra.mxu3 %v874_v14  ;;  %396 = vmatpush.bf16.msra.mxu1 %v1073_v16  ;;  %v962_v9 = vpack.i.bf16 %v904_v8, %v903_v7  ;;  %v857_v14 = vld [vmem:[%s1371_s0 + $0x50] sm:$0xf0]  ;;  %v864_v23 = vld [vmem:[%s1371_s0 + $0x88] sm:$0xf0]  ;;  %v924_v31 = vld [vmem:[%s1372_s3 + $0x20] sm:$0xff]  }
  0x14   :  { %952 = vperm.xlu0 %945, %v951_v41   ;;  %v710_v19 = vor.u32 %v857_v14, %v709_v13  ;;  %v860_v29 = vld [vmem:[%s1371_s0 + $0x68] sm:$0xf0]  ;;  %v859_v32 = vld [vmem:[%s1371_s0 + $0x64] sm:$0xf]  ;;  %v723_v33 = vld [vmem:[%s1371_s0 + $0x6c] sm:$0xf0]  ;;  %v908_v38 = vunpack.c.h.bf16 %v924_v31 }
  0x15   :  { %v726_v41 = vor.u32 %v859_v32, %v723_v33  ;;  %v753_v43 = vld [vmem:[%s1371_s0 + $0x98] sm:$0xf]  ;;  %v863_v47 = vld [vmem:[%s1371_s0 + $0x80] sm:$0xf0]  ;;  %v862_v48 = vld [vmem:[%s1371_s0 + $0x7c] sm:$0xf] }
  0x16   :  { %348 = vmatpush.bf16.msra.mxu0 %v873_v20  ;;  %v733_v46 = vld [vmem:[%s1371_s0 + $0x78] sm:$0xf]  ;;  %v735_v49 = vld [vmem:[%s1371_s0 + $0x84] sm:$0xf0]  ;;  %v1276_v61 = vld [vmem:[%s1373_s2] ss:$0 sm:$0xff] }
  0x17   :  { %933 = vmatpush.bf16.msra.mxu3 %v873_v20  ;;  %397 = vmatpush.bf16.msra.mxu1 %v1082_v21  ;;  %v734_v50 = vor.u32 %v863_v47, %v733_v46  ;;  %v925_v54 = vld [vmem:[%s1372_s3 + $0x28] sm:$0xff]  }
  0x18   :  { %v911_v56 = vunpack.c.l.bf16 %v925_v54  ;;  %v912_v57 = vunpack.c.h.bf16 %v925_v54 }
  0x1a   :  { %840 = vmatmul.msk.bf16.gmra.mxu2 %vm318_vm0, %v694_v24  ;;  %349 = vmatpush.bf16.msra.mxu0 %v872_v25  ;;  %v742_v24 = vor.u32 %v864_v23, %v741_v22  ;;  %v973_v58 = vpack.i.bf16 %v912_v57, %v911_v56 }
  0x1b   :  { %934 = vmatpush.bf16.msra.mxu3 %v872_v25  ;;  %398 = vmatpush.bf16.msra.mxu1 %v880_v26  ;;  %v926_v25 = vld [vmem:[%s1372_s3 + $0x30] sm:$0xff]  }
  0x1c   :  { %963 = vperm.xlu1 %956, %v962_v9  }
  0x1e   :  { %350 = vmatpush.bf16.msra.mxu0 %v871_v27 }
  0x1f   :  { %935 = vmatpush.bf16.msra.mxu3 %v871_v27  ;;  %399 = vmatpush.bf16.msra.mxu1 %v1103_v28  ;;  %v915_v27 = vunpack.c.l.bf16 %v926_v25 }
  0x21   :  { %351 = vmatmul.bf16.vlgmr.msra.gmra.mxu0 %v674_v35  ;;  %v919_v35 = vunpack.c.l.bf16 %v927_v30 }
  0x22   :  { %381 = vmatmul.bf16.vlgmr.msra.gmra.mxu3 %v746_v36  ;;  %400 = vmatmul.bf16.vlgmr.msra.gmra.mxu1 %v678_v37  ;;  %v920_v36 = vunpack.c.h.bf16 %v927_v30  ;;  %v907_v37 = vunpack.c.l.bf16 %v924_v31 }
  0x23   :  { %936 = vmatpush.bf16.msrb.mxu3 %v1024_v2  ;;  %v699_v2 = vld [vmem:[%s1371_s0 + $0x3c] sm:$0xf0] }
  0x24   :  { %v983_v40 = vpack.i.bf16 %v920_v36, %v919_v35  ;;  %v968_v42 = vpack.i.bf16 %v908_v38, %v907_v37 }
  0x26   :  { %984 = vperm.xlu1 %956, %v983_v40   ;;  %969 = vperm.xlu2 %967, %v968_v42  }
  0x27   :  { %937 = vmatpush.bf16.msrb.mxu3 %v1036_v5  ;;  %v702_v5 = vor.u32 %v853_v1, %v699_v2 }
  0x2a   :  { %841 = vmatmul.msk.bf16.gmra.mxu2 %vm318_vm0, %v706_v44  ;;  %v867_v44 = vld [vmem:[%s1371_s0 + $0xa0] sm:$0xf0] }
  0x2b   :  { %938 = vmatpush.bf16.msrb.mxu3 %v1051_v10  ;;  %v729_v10 = vld [vmem:[%s1371_s0 + $0x68] sm:$0xf]  ;;  %v754_v45 = vor.u32 %v867_v44, %v753_v43 }
  0x2e   :  { %974 = vperm.xlu2 %967, %v973_v58  }
  0x2f   :  { %939 = vmatpush.bf16.msrb.mxu3 %v1061_v12  ;;  %v730_v12 = vor.u32 %v861_v11, %v729_v10 }
  0x31   :  { %356 = vmatmul.bf16.gmra.mxu0 %v686_v51  ;;  %v738_v51 = vor.u32 %v862_v48, %v735_v49 }
  0x32   :  { %386 = vmatmul.bf16.gmra.mxu3 %v758_v52  ;;  %405 = vmatmul.bf16.gmra.mxu1 %v690_v53  ;;  %v765_v52 = vld [vmem:[%s1371_s0 + $0xb0] sm:$0xf]  ;;  %v870_v53 = vld [vmem:[%s1371_s0 + $0xb8] sm:$0xf0] }
  0x33   :  { %940 = vmatpush.bf16.msrb.mxu3 %v1073_v16  ;;  %v759_v16 = vld [vmem:[%s1371_s0 + $0xb4] sm:$0xf0]  ;;  %v766_v55 = vor.u32 %v870_v53, %v765_v52 }
  0x34   :  { %v762_v20 = vor.u32 %v868_v15, %v759_v16 }
  0x37   :  { %941 = vmatpush.bf16.msrb.mxu3 %v1082_v21  ;;  %v714_v21 = vor.u32 %v856_v17, %v711_v18 }
  0x3a   :  { %842 = vmatmul.msk.bf16.gmra.mxu2 %vm318_vm0, %v718_v60 }
  0x3b   :  { %942 = vmatpush.bf16.msrb.mxu3 %v880_v26  ;;  %v721_v26 = vld [vmem:[%s1371_s0 + $0x60] sm:$0xf] }
  0x3c   :  { %v722_v39 = vor.u32 %v860_v29, %v721_v26 }
  0x3f   :  { %943 = vmatpush.bf16.msrb.mxu3 %v1103_v28  ;;  %v916_v28 = vunpack.c.h.bf16 %v926_v25 }
  0x41   :  { %361 = vmatmul.bf16.gmra.mxu0 %v698_v3  ;;  %v978_v34 = vpack.i.bf16 %v916_v28, %v915_v27 }
  0x42   :  { %430 = vmatmul.bf16.vlgmr.msrb.gmra.mxu3 %v750_v4  ;;  %410 = vmatmul.bf16.gmra.mxu1 %v702_v5 }
  0x43   :  { %979 = vperm.xlu0 %945, %v978_v34  }
  0x4a   :  { %843 = vmatmul.msk.bf16.gmra.mxu2 %vm318_vm0, %v730_v12 }
  0x51   :  { %366 = vmatmul.bf16.gmra.mxu0 %v710_v19 }
  0x52   :  { %435 = vmatmul.bf16.gmra.mxu3 %v762_v20  ;;  %415 = vmatmul.bf16.gmra.mxu1 %v714_v21 }
  0x5a   :  { %844 = vmatmul.msk.bf16.gmra.mxu2 %vm318_vm0, %v742_v24 }
  0x61   :  { %371 = vmatmul.bf16.gmra.mxu0 %v722_v39 }
  0x62   :  { %420 = vmatmul.bf16.gmra.mxu1 %v726_v41 }
  0x6a   :  { %845 = vmatmul.msk.bf16.gmra.mxu2 %vm318_vm0, %v754_v45 }
  0x71   :  { %376 = vmatmul.bf16.gmra.mxu0 %v734_v50 }
  0x72   :  { %425 = vmatmul.bf16.gmra.mxu1 %v738_v51 }
  0x7a   :  { %846 = vmatmul.msk.bf16.gmra.mxu2 %vm318_vm0, %v766_v55 }
  0x7e   :  { %v948_v2 = vpop.permute.xlu0 %947 }
  0x7f   :  { %v949_v5 = vunpack.i.l.bf16 %v948_v2  ;;  %v950_v14 = vunpack.i.h.bf16 %v948_v2 }
  0x84   :  { %v959_v44 = vpop.permute.xlu1 %958 }
  0x85   :  { %v960_v48 = vunpack.i.l.bf16 %v959_v44  ;;  %v961_v58 = vunpack.i.h.bf16 %v959_v44 }
  0x86   :  { %v953_v22 = vpop.permute.xlu0 %952 }
  0x87   :  { %v954_v26 = vunpack.i.l.bf16 %v953_v22  ;;  %v955_v36 = vunpack.i.h.bf16 %v953_v22 }
  0x8d   :  { %v450_v59 = vpop.f32.mrf.mxu2 }
  0x95   :  { %v452_v60 = vpop.f32.mrf.mxu2 }
  0x9d   :  { %v455_v62 = vpop.f32.mrf.mxu2 }
  0x9e   :  { %v352_v63 = vpop.f32.mrf.mxu0 }
  0x9f   :  { %v353_v0 = vadd.f32 %v1276_v61, %v352_v63  ;;  %v401_v1 = vpop.f32.mrf.mxu1 }
  0xa1   :  { %v402_v3 = vadd.f32 %v401_v1, %v353_v0 }
  0xa3   :  { %v451_v4 = vadd.f32 %v450_v59, %v402_v3 }
  0xa5   :  { %v490_v6 = vmax.f32 %v451_v4, 0.0  ;;  %v457_v7 = vpop.f32.mrf.mxu2  ;;  %v1290_v35 = vpop.f32.mrf.mxu3 }
  0xa6   :  { %v354_v8 = vpop.f32.mrf.mxu0  ;;  %v964_v4 = vpop.permute.xlu1 %963 }
  0xa7   :  { %v618_v9 = vmul.f32 %v949_v5, %v490_v6  ;;  %v355_v10 = vadd.f32 %v1276_v61, %v354_v8  ;;  %v403_v11 = vpop.f32.mrf.mxu1  ;;  %v965_v8 = vunpack.i.l.bf16 %v964_v4 }
  0xa9   :  { %v634_v12 = vpack.c.bf16 %v618_v9, %v618_v9  ;;  %v404_v13 = vadd.f32 %v403_v11, %v355_v10 }
  0xab   :  { %651 = vst.msk [vmem:[%s1374_s4] sm:$0xf] %vm650_vm1, %v634_v12  ;;  %v453_v15 = vadd.f32 %v452_v60, %v404_v13 }
  0xad   :  { %v491_v16 = vmax.f32 %v453_v15, 0.0  ;;  %v460_v17 = vpop.f32.mrf.mxu2  ;;  %v1301_v49 = vpop.f32.mrf.mxu3 }
  0xae   :  { %v357_v18 = vpop.f32.mrf.mxu0 }
  0xaf   :  { %v619_v19 = vmul.f32 %v950_v14, %v491_v16  ;;  %v358_v20 = vadd.f32 %v1276_v61, %v357_v18  ;;  %v406_v21 = vpop.f32.mrf.mxu1  ;;  %v966_v18 = vunpack.i.h.bf16 %v964_v4 }
  0xb1   :  { %v635_v23 = vpack.c.bf16 %v619_v19, %v619_v19  ;;  %v407_v24 = vadd.f32 %v406_v21, %v358_v20 }
  0xb3   :  { %652 = vst.msk [vmem:[%s1374_s4 + $0x4] sm:$0xf] %vm650_vm1, %v635_v23  ;;  %v456_v25 = vadd.f32 %v455_v62, %v407_v24 }
  0xb5   :  { %v492_v27 = vmax.f32 %v456_v25, 0.0  ;;  %v462_v28 = vpop.f32.mrf.mxu2  ;;  %v1308_v0 = vpop.f32.mrf.mxu3 }
  0xb6   :  { %v359_v29 = vpop.f32.mrf.mxu0  ;;  %v980_v44 = vpop.permute.xlu0 %979 }
  0xb7   :  { %v620_v30 = vmul.f32 %v954_v26, %v492_v27  ;;  %v360_v31 = vadd.f32 %v1276_v61, %v359_v29  ;;  %v408_v32 = vpop.f32.mrf.mxu1  ;;  %v970_v26 = vpop.permute.xlu2 %969 }
  0xb9   :  { %v636_v33 = vpack.c.bf16 %v620_v30, %v620_v30  ;;  %v409_v34 = vadd.f32 %v408_v32, %v360_v31  ;;  %v971_v31 = vunpack.i.l.bf16 %v970_v26 }
  0xbb   :  { %653 = vst.msk [vmem:[%s1374_s4 + $0x8] sm:$0xf] %vm650_vm1, %v636_v33  ;;  %v458_v37 = vadd.f32 %v457_v7, %v409_v34 }
  0xbd   :  { %v493_v38 = vmax.f32 %v458_v37, 0.0  ;;  %v465_v39 = vpop.f32.mrf.mxu2  ;;  %v1316_v15 = vpop.f32.mrf.mxu3 }
  0xbe   :  { %v362_v40 = vpop.f32.mrf.mxu0 }
  0xbf   :  { %v621_v41 = vmul.f32 %v955_v36, %v493_v38  ;;  %v363_v42 = vadd.f32 %v1276_v61, %v362_v40  ;;  %v411_v43 = vpop.f32.mrf.mxu1 }
  0xc1   :  { %v637_v45 = vpack.c.bf16 %v621_v41, %v621_v41  ;;  %v412_v46 = vadd.f32 %v411_v43, %v363_v42  ;;  %v972_v42 = vunpack.i.h.bf16 %v970_v26 }
  0xc3   :  { %654 = vst.msk [vmem:[%s1374_s4 + $0xc] sm:$0xf] %vm650_vm1, %v637_v45  ;;  %v461_v47 = vadd.f32 %v460_v17, %v412_v46 }
  0xc5   :  { %v494_v50 = vmax.f32 %v461_v47, 0.0  ;;  %v467_v51 = vpop.f32.mrf.mxu2  ;;  %v431_v29 = vpop.f32.mrf.mxu3 }
  0xc6   :  { %v364_v52 = vpop.f32.mrf.mxu0 }
  0xc7   :  { %v622_v53 = vmul.f32 %v960_v48, %v494_v50  ;;  %v365_v54 = vadd.f32 %v1276_v61, %v364_v52  ;;  %v413_v55 = vpop.f32.mrf.mxu1 }
  0xc9   :  { %v638_v56 = vpack.c.bf16 %v622_v53, %v622_v53  ;;  %v414_v57 = vadd.f32 %v413_v55, %v365_v54  ;;  %v385_v55 = vadd.f32 %v1276_v61, %v1301_v49 }
  0xcb   :  { %655 = vst.msk [vmem:[%s1374_s4 + $0x10] sm:$0xf] %vm650_vm1, %v638_v56  ;;  %v463_v59 = vadd.f32 %v462_v28, %v414_v57  ;;  %v975_v57 = vpop.permute.xlu2 %974 }
  0xcd   :  { %v495_v60 = vmax.f32 %v463_v59, 0.0  ;;  %v470_v62 = vpop.f32.mrf.mxu2  ;;  %v433_v46 = vpop.f32.mrf.mxu3 }
  0xce   :  { %v367_v63 = vpop.f32.mrf.mxu0 }
  0xcf   :  { %v623_v1 = vmul.f32 %v961_v58, %v495_v60  ;;  %v368_v2 = vadd.f32 %v1276_v61, %v367_v63  ;;  %v416_v3 = vpop.f32.mrf.mxu1  ;;  %v976_v63 = vunpack.i.l.bf16 %v975_v57 }
  0xd1   :  { %v639_v5 = vpack.c.bf16 %v623_v1, %v623_v1  ;;  %v417_v6 = vadd.f32 %v416_v3, %v368_v2  ;;  %v434_v1 = vadd.f32 %v433_v46, %v385_v55 }
  0xd3   :  { %656 = vst.msk [vmem:[%s1374_s4 + $0x14] sm:$0xf] %vm650_vm1, %v639_v5  ;;  %v466_v7 = vadd.f32 %v465_v39, %v417_v6  ;;  %v383_v39 = vadd.f32 %v1276_v61, %v1290_v35  ;;  %v982_v5 = vunpack.i.h.bf16 %v980_v44 }
  0xd5   :  { %v496_v9 = vmax.f32 %v466_v7, 0.0  ;;  %v472_v10 = vpop.f32.mrf.mxu2  ;;  %v432_v45 = vadd.f32 %v431_v29, %v383_v39  ;;  %v436_v7 = vpop.f32.mrf.mxu3 }
  0xd6   :  { %v369_v11 = vpop.f32.mrf.mxu0 }
  0xd7   :  { %v624_v12 = vmul.f32 %v965_v8, %v496_v9  ;;  %v370_v13 = vadd.f32 %v1276_v61, %v369_v11  ;;  %v418_v14 = vpop.f32.mrf.mxu1  ;;  %v388_v11 = vadd.f32 %v1276_v61, %v1308_v0 }
  0xd9   :  { %v640_v16 = vpack.c.bf16 %v624_v12, %v624_v12  ;;  %v419_v17 = vadd.f32 %v418_v14, %v370_v13 }
  0xdb   :  { %657 = vst.msk [vmem:[%s1374_s4 + $0x18] sm:$0xf] %vm650_vm1, %v640_v16  ;;  %v468_v19 = vadd.f32 %v467_v51, %v419_v17  ;;  %v981_v51 = vunpack.i.l.bf16 %v980_v44  ;;  %v977_v17 = vunpack.i.h.bf16 %v975_v57 }
  0xdd   :  { %v497_v20 = vmax.f32 %v468_v19, 0.0  ;;  %v475_v21 = vpop.f32.mrf.mxu2  ;;  %v437_v19 = vadd.f32 %v436_v7, %v388_v11 }
  0xde   :  { %v372_v22 = vpop.f32.mrf.mxu0 }
  0xdf   :  { %v625_v23 = vmul.f32 %v966_v18, %v497_v20  ;;  %v373_v24 = vadd.f32 %v1276_v61, %v372_v22  ;;  %v421_v25 = vpop.f32.mrf.mxu1 }
  0xe1   :  { %v641_v27 = vpack.c.bf16 %v625_v23, %v625_v23  ;;  %v422_v28 = vadd.f32 %v421_v25, %v373_v24  ;;  %v390_v25 = vadd.f32 %v1276_v61, %v1316_v15 }
  0xe3   :  { %658 = vst.msk [vmem:[%s1374_s4 + $0x1c] sm:$0xf] %vm650_vm1, %v641_v27  ;;  %v471_v30 = vadd.f32 %v470_v62, %v422_v28  ;;  %v438_v28 = vpop.f32.mrf.mxu3 }
  0xe5   :  { %v498_v32 = vmax.f32 %v471_v30, 0.0  ;;  %v477_v33 = vpop.f32.mrf.mxu2 }
  0xe6   :  { %v374_v34 = vpop.f32.mrf.mxu0 }
  0xe7   :  { %v626_v36 = vmul.f32 %v971_v31, %v498_v32  ;;  %v375_v37 = vadd.f32 %v1276_v61, %v374_v34  ;;  %v423_v38 = vpop.f32.mrf.mxu1  ;;  %v439_v31 = vadd.f32 %v438_v28, %v390_v25 }
  0xe9   :  { %v642_v40 = vpack.c.bf16 %v626_v36, %v626_v36  ;;  %v424_v41 = vadd.f32 %v423_v38, %v375_v37 }
  0xeb   :  { %659 = vst.msk [vmem:[%s1374_s4 + $0x20] sm:$0xf] %vm650_vm1, %v642_v40  ;;  %v473_v43 = vadd.f32 %v472_v10, %v424_v41 }
  0xed   :  { %v499_v47 = vmax.f32 %v473_v43, 0.0  ;;  %v480_v48 = vpop.f32.mrf.mxu2 }
  0xee   :  { %v481_v50 = vadd.f32 %v480_v48, %v432_v45  ;;  %v377_v52 = vpop.f32.mrf.mxu0 }
  0xef   :  { %v627_v53 = vmul.f32 %v972_v42, %v499_v47  ;;  %v378_v35 = vadd.f32 %v1276_v61, %v377_v52  ;;  %v426_v54 = vpop.f32.mrf.mxu1 }
  0xf0   :  { %v502_v56 = vmax.f32 %v481_v50, 0.0 }
  0xf1   :  { %v643_v58 = vpack.c.bf16 %v627_v53, %v627_v53  ;;  %v427_v59 = vadd.f32 %v426_v54, %v378_v35 }
  0xf2   :  { %v630_v60 = vmul.f32 %v981_v51, %v502_v56 }
  0xf3   :  { %660 = vst.msk [vmem:[%s1374_s4 + $0x24] sm:$0xf] %vm650_vm1, %v643_v58  ;;  %v476_v62 = vadd.f32 %v475_v21, %v427_v59  ;;  %v985_v21 = vpop.permute.xlu1 %984 }
  0xf4   :  { %v646_v2 = vpack.c.bf16 %v630_v60, %v630_v60  ;;  %v986_v26 = vunpack.i.l.bf16 %v985_v21 }
  0xf5   :  { %v500_v3 = vmax.f32 %v476_v62, 0.0  ;;  %v482_v4 = vpop.f32.mrf.mxu2 }
  0xf6   :  { %663 = vst.msk [vmem:[%s1374_s4 + $0x30] sm:$0xf] %vm650_vm1, %v646_v2  ;;  %v483_v49 = vadd.f32 %v482_v4, %v434_v1  ;;  %v379_v6 = vpop.f32.mrf.mxu0 }
  0xf7   :  { %v628_v8 = vmul.f32 %v976_v63, %v500_v3  ;;  %v380_v9 = vadd.f32 %v1276_v61, %v379_v6  ;;  %v428_v10 = vpop.f32.mrf.mxu1  ;;  %v987_v61 = vunpack.i.h.bf16 %v985_v21 }
  0xf8   :  { %v503_v12 = vmax.f32 %v483_v49, 0.0 }
  0xf9   :  { %v644_v13 = vpack.c.bf16 %v628_v8, %v628_v8  ;;  %v429_v14 = vadd.f32 %v428_v10, %v380_v9 }
  0xfa   :  { %v631_v16 = vmul.f32 %v982_v5, %v503_v12 }
  0xfb   :  { %661 = vst.msk [vmem:[%s1374_s4 + $0x28] sm:$0xf] %vm650_vm1, %v644_v13  ;;  %v478_v18 = vadd.f32 %v477_v33, %v429_v14 }
  0xfc   :  { %v647_v20 = vpack.c.bf16 %v631_v16, %v631_v16 }
  0xfd   :  { %v501_v22 = vmax.f32 %v478_v18, 0.0  ;;  %v485_v23 = vpop.f32.mrf.mxu2 }
  0xfe   :  { %664 = vst.msk [vmem:[%s1374_s4 + $0x34] sm:$0xf] %vm650_vm1, %v647_v20  ;;  %v486_v0 = vadd.f32 %v485_v23, %v437_v19 }
  0xff   :  { %v629_v24 = vmul.f32 %v977_v17, %v501_v22 }
 0x100   :  { %v504_v27 = vmax.f32 %v486_v0, 0.0 }
 0x101   :  { %v645_v29 = vpack.c.bf16 %v629_v24, %v629_v24 }
 0x102   :  { %v632_v30 = vmul.f32 %v986_v26, %v504_v27 }
 0x103   :  { %662 = vst.msk [vmem:[%s1374_s4 + $0x2c] sm:$0xf] %vm650_vm1, %v645_v29 }
 0x104   :  { %v648_v32 = vpack.c.bf16 %v632_v30, %v632_v30 }
 0x105   :  { %v487_v33 = vpop.f32.mrf.mxu2 }
 0x106   :  { %665 = vst.msk [vmem:[%s1374_s4 + $0x38] sm:$0xf] %vm650_vm1, %v648_v32  ;;  %v488_v34 = vadd.f32 %v487_v33, %v439_v31 }
 0x108   :  { %v505_v15 = vmax.f32 %v488_v34, 0.0 }
 0x10a   :  { %v633_v36 = vmul.f32 %v987_v61, %v505_v15 }
 0x10c   :  { %v649_v37 = vpack.c.bf16 %v633_v36, %v633_v36 }
 0x10e   :  { %666 = vst.msk [vmem:[%s1374_s4 + $0x3c] sm:$0xf] %vm650_vm1, %v649_v37 }

// kernel: pillar_backbone_forward.17
= control target key start
LH: loop header
LB: loop body
LE: loop exit
PB: predicated region body
PF: predicated region fallthrough
CT: control target
= control target key end

     0   :  { %v1505_v55 = vmov 0   ;;  %vm558_vm0 = vcmask 523264   ;;  %vm988_vm1 = vcmask 519168   ;;  %s2032_s1 = inlined_call_operand.vmem [shape: bf16[576,64], index: 1, kind: input, shape index: {}]   ;;  %s2033_s2 = inlined_call_operand.vmem [shape: f32[1,64], index: 2, kind: input, shape index: {}]   ;;  %s2034_s0 = inlined_call_operand.vmem [shape: bf16[128,576], index: 0, kind: input, shape index: {}]   ;;  %s2035_s3 = inlined_call_operand.vmem [shape: bf16[128,1], index: 3, kind: input, shape index: {}]   ;;  %s2036_s4 = inlined_call_operand.vmem [shape: bf16[128,64], index: 4, kind: output, shape index: {}]  }
   0x1   :  { %v1368_v0 = vld [vmem:[%s2032_s1 + $0x38] sm:$0xff]  ;;  %v1367_v1 = vld [vmem:[%s2032_s1 + $0x30] sm:$0xff]  ;;  %v1366_v2 = vld [vmem:[%s2032_s1 + $0x28] sm:$0xff]  ;;  %1461 = vset.pattern.permute.xlu0 %v1505_v55  ;;  %1472 = vset.pattern.permute.xlu1 %v1505_v55 }
   0x2   :  { %1436 = vmatpush.bf16.msra.mxu1 %v1368_v0  ;;  %1437 = vmatpush.bf16.msra.mxu2 %v1368_v0  ;;  %v1365_v3 = vld [vmem:[%s2032_s1 + $0x20] sm:$0xff]  ;;  %v1364_v4 = vld [vmem:[%s2032_s1 + $0x18] sm:$0xff]  ;;  %v1363_v5 = vld [vmem:[%s2032_s1 + $0x10] sm:$0xff] }
   0x3   :  { %1438 = vmatpush.bf16.msra.mxu3 %v1368_v0  ;;  %583 = vmatpush.bf16.msra.mxu0 %v1368_v0  ;;  %v1362_v6 = vld [vmem:[%s2032_s1 + $0x8] sm:$0xff]  ;;  %v1361_v7 = vld [vmem:[%s2032_s1] sm:$0xff]  ;;  %v1051_v8 = vld [vmem:[%s2034_s0 + $0x50] sm:$0xf] }
   0x4   :  { %v1333_v9 = vld [vmem:[%s2034_s0 + $0x60] sm:$0xf0]  ;;  %v1091_v10 = vld [vmem:[%s2034_s0 + $0xa0] sm:$0xf]  ;;  %v1343_v11 = vld [vmem:[%s2034_s0 + $0xb0] sm:$0xf0]  ;;  %1483 = vset.pattern.permute.xlu2 %v1505_v55 }
   0x5   :  { %v1131_v12 = vld [vmem:[%s2034_s0 + $0xf0] sm:$0xf]  ;;  %v1353_v13 = vld [vmem:[%s2034_s0 + $0x100] sm:$0xf0]  ;;  %v1011_v14 = vld [vmem:[%s2034_s0] sm:$0xf]  ;;  %v1052_v18 = vor.u32 %v1333_v9, %v1051_v8  ;;  %v1092_v19 = vor.u32 %v1343_v11, %v1091_v10 }
   0x6   :  { %1439 = vmatpush.bf16.msra.mxu1 %v1367_v1  ;;  %1440 = vmatpush.bf16.msra.mxu2 %v1367_v1  ;;  %v1323_v15 = vld [vmem:[%s2034_s0 + $0x10] sm:$0xf0]  ;;  %v1384_v16 = vld [vmem:[%s2032_s1 + $0xb8] sm:$0xff]  ;;  %v1132_v20 = vor.u32 %v1353_v13, %v1131_v12  ;;  %v1382_v28 = vld [vmem:[%s2032_s1 + $0xa8] sm:$0xff] }
   0x7   :  { %1441 = vmatpush.bf16.msra.mxu3 %v1367_v1  ;;  %584 = vmatpush.bf16.msra.mxu0 %v1367_v1  ;;  %v1376_v17 = vld [vmem:[%s2032_s1 + $0x78] sm:$0xff]  ;;  %v1012_v21 = vor.u32 %v1323_v15, %v1011_v14  ;;  %v1383_v24 = vld [vmem:[%s2032_s1 + $0xb0] sm:$0xff]  ;;  %v1374_v29 = vld [vmem:[%s2032_s1 + $0x68] sm:$0xff] }
   0x8   :  { %v1392_v22 = vld [vmem:[%s2032_s1 + $0xf8] sm:$0xff]  ;;  %v1375_v25 = vld [vmem:[%s2032_s1 + $0x70] sm:$0xff]  ;;  %v1390_v30 = vld [vmem:[%s2032_s1 + $0xe8] sm:$0xff] }
   0x9   :  { %v1396_v23 = vld [vmem:[%s2032_s1 + $0x118] sm:$0xff]  ;;  %v1391_v26 = vld [vmem:[%s2032_s1 + $0xf0] sm:$0xff]  ;;  %v1394_v31 = vld [vmem:[%s2032_s1 + $0x108] sm:$0xff] }
   0xa   :  { %1442 = vmatpush.bf16.msra.mxu1 %v1366_v2  ;;  %1443 = vmatpush.bf16.msra.mxu2 %v1366_v2  ;;  %v1395_v27 = vld [vmem:[%s2032_s1 + $0x110] sm:$0xff]  ;;  %v1381_v32 = vld [vmem:[%s2032_s1 + $0xa0] sm:$0xff]  ;;  %v1071_v35 = vld [vmem:[%s2034_s0 + $0x78] sm:$0xf] }
   0xb   :  { %1444 = vmatpush.bf16.msra.mxu3 %v1366_v2  ;;  %585 = vmatpush.bf16.msra.mxu0 %v1366_v2  ;;  %v1373_v33 = vld [vmem:[%s2032_s1 + $0x60] sm:$0xff]  ;;  %v1338_v36 = vld [vmem:[%s2034_s0 + $0x88] sm:$0xf0]  ;;  %v1111_v37 = vld [vmem:[%s2034_s0 + $0xc8] sm:$0xf] }
   0xc   :  { %v1389_v34 = vld [vmem:[%s2032_s1 + $0xe0] sm:$0xff]  ;;  %v1348_v38 = vld [vmem:[%s2034_s0 + $0xd8] sm:$0xf0]  ;;  %v1151_v39 = vld [vmem:[%s2034_s0 + $0x118] sm:$0xf]  ;;  %v1072_v46 = vor.u32 %v1338_v36, %v1071_v35 }
   0xd   :  { %v1358_v40 = vld [vmem:[%s2034_s0 + $0x128] sm:$0xf0]  ;;  %v1031_v41 = vld [vmem:[%s2034_s0 + $0x28] sm:$0xf]  ;;  %v1328_v42 = vld [vmem:[%s2034_s0 + $0x38] sm:$0xf0]  ;;  %v1112_v47 = vor.u32 %v1348_v38, %v1111_v37 }
   0xe   :  { %1445 = vmatpush.bf16.msra.mxu1 %v1365_v3  ;;  %1446 = vmatpush.bf16.msra.mxu2 %v1365_v3  ;;  %v1393_v43 = vld [vmem:[%s2032_s1 + $0x100] sm:$0xff]  ;;  %v1380_v44 = vld [vmem:[%s2032_s1 + $0x98] sm:$0xff]  ;;  %v1152_v48 = vor.u32 %v1358_v40, %v1151_v39  ;;  %v1032_v49 = vor.u32 %v1328_v42, %v1031_v41  ;;  %v1379_v51 = vld [vmem:[%s2032_s1 + $0x90] sm:$0xff] }
   0xf   :  { %1447 = vmatpush.bf16.msra.mxu3 %v1365_v3  ;;  %586 = vmatpush.bf16.msra.mxu0 %v1365_v3  ;;  %v1372_v45 = vld [vmem:[%s2032_s1 + $0x58] sm:$0xff]  ;;  %v1371_v52 = vld [vmem:[%s2032_s1 + $0x50] sm:$0xff]  ;;  %v1398_v53 = vld [vmem:[%s2035_s3] sm:$0xff]  }
  0x10   :  { %v1388_v50 = vld [vmem:[%s2032_s1 + $0xd8] sm:$0xff]  ;;  %v1387_v54 = vld [vmem:[%s2032_s1 + $0xd0] sm:$0xff]  ;;  %v1399_v56 = vunpack.c.l.bf16 %v1398_v53  ;;  %v1400_v57 = vunpack.c.h.bf16 %v1398_v53  ;;  %v1378_v58 = vld [vmem:[%s2032_s1 + $0x88] sm:$0xff] }
  0x11   :  { %v1370_v59 = vld [vmem:[%s2032_s1 + $0x48] sm:$0xff]  ;;  %v1377_v62 = vld [vmem:[%s2032_s1 + $0x80] sm:$0xff]  ;;  %v1013_v2 = vld [vmem:[%s2034_s0 + $0x14] sm:$0xf0] }
  0x12   :  { %1448 = vmatpush.bf16.msra.mxu1 %v1364_v4  ;;  %1449 = vmatpush.bf16.msra.mxu2 %v1364_v4  ;;  %v1462_v60 = vpack.i.bf16 %v1400_v57, %v1399_v56  ;;  %v1386_v61 = vld [vmem:[%s2032_s1 + $0xc8] sm:$0xff]  ;;  %v1369_v63 = vld [vmem:[%s2032_s1 + $0x40] sm:$0xff]  ;;  %v1059_v35 = vld [vmem:[%s2034_s0 + $0x58] sm:$0xf] }
  0x13   :  { %1450 = vmatpush.bf16.msra.mxu3 %v1364_v4  ;;  %587 = vmatpush.bf16.msra.mxu0 %v1364_v4  ;;  %v1385_v0 = vld [vmem:[%s2032_s1 + $0xc0] sm:$0xff]  ;;  %v1019_v3 = vld [vmem:[%s2034_s0 + $0x8] sm:$0xf]  ;;  %v1324_v4 = vld [vmem:[%s2034_s0 + $0x18] sm:$0xf0] }
  0x14   :  { %1463 = vperm.xlu0 %1461, %v1462_v60   ;;  %v1321_v1 = vld [vmem:[%s2034_s0 + $0x4] sm:$0xf]  ;;  %v1020_v10 = vor.u32 %v1324_v4, %v1019_v3  ;;  %v1429_v13 = vld [vmem:[%s2035_s3 + $0x8] sm:$0xff]   ;;  %v1332_v37 = vld [vmem:[%s2034_s0 + $0x5c] sm:$0xf] }
  0x15   :  { %v1325_v8 = vld [vmem:[%s2034_s0 + $0x20] sm:$0xf0]  ;;  %v1016_v9 = vor.u32 %v1321_v1, %v1013_v2  ;;  %v1403_v14 = vunpack.c.l.bf16 %v1429_v13  ;;  %v1404_v15 = vunpack.c.h.bf16 %v1429_v13  ;;  %v1334_v36 = vld [vmem:[%s2034_s0 + $0x68] sm:$0xf0]  ;;  %v1061_v38 = vld [vmem:[%s2034_s0 + $0x6c] sm:$0xf0] }
  0x16   :  { %1451 = vmatpush.bf16.msra.mxu1 %v1363_v5  ;;  %1452 = vmatpush.bf16.msra.mxu2 %v1363_v5  ;;  %v1067_v39 = vld [vmem:[%s2034_s0 + $0x60] sm:$0xf]  ;;  %v1335_v40 = vld [vmem:[%s2034_s0 + $0x70] sm:$0xf0]  ;;  %v1060_v42 = vor.u32 %v1334_v36, %v1059_v35  ;;  %v1337_v53 = vld [vmem:[%s2034_s0 + $0x84] sm:$0xf] }
  0x17   :  { %1453 = vmatpush.bf16.msra.mxu3 %v1363_v5  ;;  %588 = vmatpush.bf16.msra.mxu0 %v1363_v5  ;;  %v1322_v5 = vld [vmem:[%s2034_s0 + $0xc] sm:$0xf]  ;;  %v1087_v55 = vld [vmem:[%s2034_s0 + $0x88] sm:$0xf]  ;;  %v1340_v56 = vld [vmem:[%s2034_s0 + $0x98] sm:$0xf0] }
  0x18   :  { %v1088_v60 = vor.u32 %v1340_v56, %v1087_v55  ;;  %v1342_v1 = vld [vmem:[%s2034_s0 + $0xac] sm:$0xf]  ;;  %v1101_v2 = vld [vmem:[%s2034_s0 + $0xbc] sm:$0xf0]  ;;  %v1107_v3 = vld [vmem:[%s2034_s0 + $0xb0] sm:$0xf] }
  0x19   :  { %v1345_v4 = vld [vmem:[%s2034_s0 + $0xc0] sm:$0xf0]  ;;  %v1347_v13 = vld [vmem:[%s2034_s0 + $0xd4] sm:$0xf]  ;;  %v1147_v35 = vld [vmem:[%s2034_s0 + $0x100] sm:$0xf] }
  0x1a   :  { %1454 = vmatpush.bf16.msra.mxu1 %v1362_v6  ;;  %1455 = vmatpush.bf16.msra.mxu2 %v1362_v6  ;;  %v1355_v36 = vld [vmem:[%s2034_s0 + $0x110] sm:$0xf0] }
  0x1b   :  { %1456 = vmatpush.bf16.msra.mxu3 %v1362_v6  ;;  %589 = vmatpush.bf16.msra.mxu0 %v1362_v6  ;;  %v1021_v6 = vld [vmem:[%s2034_s0 + $0x1c] sm:$0xf0] }
  0x1c   :  { %v1024_v11 = vor.u32 %v1322_v5, %v1021_v6 }
  0x1e   :  { %1457 = vmatpush.bf16.msra.mxu1 %v1361_v7  ;;  %1458 = vmatpush.bf16.msra.mxu2 %v1361_v7 }
  0x1f   :  { %1459 = vmatpush.bf16.msra.mxu3 %v1361_v7  ;;  %590 = vmatpush.bf16.msra.mxu0 %v1361_v7  ;;  %v1027_v7 = vld [vmem:[%s2034_s0 + $0x10] sm:$0xf] }
  0x20   :  { %v1028_v12 = vor.u32 %v1325_v8, %v1027_v7  ;;  %v1104_v7 = vor.u32 %v1342_v1, %v1101_v2  ;;  %v1108_v8 = vor.u32 %v1345_v4, %v1107_v3  ;;  %v1360_v1 = vld [vmem:[%s2034_s0 + $0x138] sm:$0xf0] }
  0x21   :  { %601 = vmatmul.bf16.vlgmr.msra.gmra.mxu1 %v1052_v18  ;;  %611 = vmatmul.bf16.vlgmr.msra.gmra.mxu2 %v1092_v19  ;;  %v1033_v18 = vld [vmem:[%s2034_s0 + $0x3c] sm:$0xf0]  ;;  %v1039_v19 = vld [vmem:[%s2034_s0 + $0x30] sm:$0xf] }
  0x22   :  { %681 = vmatpush.bf16.msrb.mxu2 %v1384_v16  ;;  %632 = vmatpush.bf16.msrb.mxu1 %v1376_v17  ;;  %v1467_v16 = vpack.i.bf16 %v1404_v15, %v1403_v14  ;;  %v1326_v17 = vld [vmem:[%s2034_s0 + $0x2c] sm:$0xf]  ;;  %v1121_v14 = vld [vmem:[%s2034_s0 + $0xe4] sm:$0xf0]  ;;  %v1127_v15 = vld [vmem:[%s2034_s0 + $0xd8] sm:$0xf] }
  0x23   :  { %621 = vmatmul.bf16.vlgmr.msra.gmra.mxu3 %v1132_v20  ;;  %591 = vmatmul.bf16.vlgmr.msra.gmra.mxu0 %v1012_v21  ;;  %v1329_v20 = vld [vmem:[%s2034_s0 + $0x40] sm:$0xf0]  ;;  %v1327_v21 = vld [vmem:[%s2034_s0 + $0x34] sm:$0xf] }
  0x24   :  { %730 = vmatpush.bf16.msrb.mxu3 %v1392_v22  ;;  %783 = vmatpush.bf16.msrb.mxu0 %v1396_v23  ;;  %v1041_v22 = vld [vmem:[%s2034_s0 + $0x44] sm:$0xf0]  ;;  %v1047_v23 = vld [vmem:[%s2034_s0 + $0x38] sm:$0xf] }
  0x25   :  { %1468 = vperm.xlu0 %1461, %v1467_v16   ;;  %v1350_v16 = vld [vmem:[%s2034_s0 + $0xe8] sm:$0xf0] }
  0x26   :  { %682 = vmatpush.bf16.msrb.mxu2 %v1383_v24  ;;  %633 = vmatpush.bf16.msrb.mxu1 %v1375_v25  ;;  %v1330_v24 = vld [vmem:[%s2034_s0 + $0x48] sm:$0xf0]  ;;  %v1036_v25 = vor.u32 %v1326_v17, %v1033_v18  ;;  %v1432_v17 = vld [vmem:[%s2035_s3 + $0x20] sm:$0xff]  }
  0x28   :  { %731 = vmatpush.bf16.msrb.mxu3 %v1391_v26  ;;  %784 = vmatpush.bf16.msrb.mxu0 %v1395_v27  ;;  %v1040_v26 = vor.u32 %v1329_v20, %v1039_v19  ;;  %v1044_v27 = vor.u32 %v1327_v21, %v1041_v22  ;;  %v1415_v20 = vunpack.c.l.bf16 %v1432_v17  ;;  %v1416_v21 = vunpack.c.h.bf16 %v1432_v17 }
  0x29   :  { %v1124_v22 = vor.u32 %v1347_v13, %v1121_v14 }
  0x2a   :  { %683 = vmatpush.bf16.msrb.mxu2 %v1382_v28  ;;  %634 = vmatpush.bf16.msrb.mxu1 %v1374_v29  ;;  %v1048_v28 = vor.u32 %v1330_v24, %v1047_v23  ;;  %v1430_v29 = vld [vmem:[%s2035_s3 + $0x10] sm:$0xff]   ;;  %v1128_v23 = vor.u32 %v1350_v16, %v1127_v15  ;;  %v1484_v24 = vpack.i.bf16 %v1416_v21, %v1415_v20 }
  0x2c   :  { %732 = vmatpush.bf16.msrb.mxu3 %v1390_v30  ;;  %785 = vmatpush.bf16.msrb.mxu0 %v1394_v31  ;;  %v1407_v30 = vunpack.c.l.bf16 %v1430_v29  ;;  %v1408_v31 = vunpack.c.h.bf16 %v1430_v29  ;;  %v1351_v29 = vld [vmem:[%s2034_s0 + $0xf4] sm:$0xf] }
  0x2d   :  { %1485 = vperm.xlu2 %1483, %v1484_v24  }
  0x2e   :  { %684 = vmatpush.bf16.msrb.mxu2 %v1381_v32  ;;  %635 = vmatpush.bf16.msrb.mxu1 %v1373_v33  ;;  %v1473_v32 = vpack.i.bf16 %v1408_v31, %v1407_v30  ;;  %v1331_v33 = vld [vmem:[%s2034_s0 + $0x54] sm:$0xf]  ;;  %v1133_v30 = vld [vmem:[%s2034_s0 + $0x104] sm:$0xf0]  ;;  %v1139_v31 = vld [vmem:[%s2034_s0 + $0xf8] sm:$0xf] }
  0x30   :  { %733 = vmatpush.bf16.msrb.mxu3 %v1389_v34  ;;  %786 = vmatpush.bf16.msrb.mxu0 %v1393_v43  ;;  %v1053_v34 = vld [vmem:[%s2034_s0 + $0x64] sm:$0xf0]  ;;  %v1064_v43 = vor.u32 %v1332_v37, %v1061_v38  ;;  %v1136_v37 = vor.u32 %v1351_v29, %v1133_v30 }
  0x31   :  { %606 = vmatmul.bf16.gmra.mxu1 %v1072_v46  ;;  %616 = vmatmul.bf16.gmra.mxu2 %v1112_v47  ;;  %v1056_v41 = vor.u32 %v1331_v33, %v1053_v34  ;;  %v1352_v33 = vld [vmem:[%s2034_s0 + $0xfc] sm:$0xf]  ;;  %v1141_v34 = vld [vmem:[%s2034_s0 + $0x10c] sm:$0xf0] }
  0x32   :  { %685 = vmatpush.bf16.msrb.mxu2 %v1380_v44  ;;  %636 = vmatpush.bf16.msrb.mxu1 %v1372_v45  ;;  %v1068_v44 = vor.u32 %v1335_v40, %v1067_v39  ;;  %v1431_v45 = vld [vmem:[%s2035_s3 + $0x18] sm:$0xff]   ;;  %v1433_v39 = vld [vmem:[%s2035_s3 + $0x28] sm:$0xff]  }
  0x33   :  { %626 = vmatmul.bf16.gmra.mxu3 %v1152_v48  ;;  %596 = vmatmul.bf16.gmra.mxu0 %v1032_v49  ;;  %v1411_v46 = vunpack.c.l.bf16 %v1431_v45  ;;  %v1412_v47 = vunpack.c.h.bf16 %v1431_v45  ;;  %v1336_v49 = vld [vmem:[%s2034_s0 + $0x7c] sm:$0xf] }
  0x34   :  { %734 = vmatpush.bf16.msrb.mxu3 %v1388_v50  ;;  %1474 = vperm.xlu1 %1472, %v1473_v32   ;;  %v1073_v50 = vld [vmem:[%s2034_s0 + $0x8c] sm:$0xf0]  ;;  %v1354_v32 = vld [vmem:[%s2034_s0 + $0x108] sm:$0xf0]  ;;  %v1435_v40 = vld [vmem:[%s2035_s3 + $0x38] sm:$0xff]  }
  0x35   :  { %v1478_v48 = vpack.i.bf16 %v1412_v47, %v1411_v46  ;;  %v1076_v57 = vor.u32 %v1336_v49, %v1073_v50  ;;  %v1140_v38 = vor.u32 %v1354_v32, %v1139_v31  ;;  %v1144_v46 = vor.u32 %v1352_v33, %v1141_v34 }
  0x36   :  { %686 = vmatpush.bf16.msrb.mxu2 %v1379_v51  ;;  %637 = vmatpush.bf16.msrb.mxu1 %v1371_v52  ;;  %v1079_v51 = vld [vmem:[%s2034_s0 + $0x80] sm:$0xf]  ;;  %v1339_v52 = vld [vmem:[%s2034_s0 + $0x90] sm:$0xf0]  ;;  %v1148_v47 = vor.u32 %v1355_v36, %v1147_v35 }
  0x38   :  { %735 = vmatpush.bf16.msrb.mxu3 %v1387_v54  ;;  %v1081_v54 = vld [vmem:[%s2034_s0 + $0x94] sm:$0xf0] }
  0x3a   :  { %687 = vmatpush.bf16.msrb.mxu2 %v1378_v58  ;;  %638 = vmatpush.bf16.msrb.mxu1 %v1370_v59  ;;  %v1080_v58 = vor.u32 %v1339_v52, %v1079_v51  ;;  %v1084_v59 = vor.u32 %v1337_v53, %v1081_v54  ;;  %v1891_v51 = vld [vmem:[%s2033_s2] ss:$0 sm:$0xff] }
  0x3c   :  { %736 = vmatpush.bf16.msrb.mxu3 %v1386_v61  ;;  %1479 = vperm.xlu1 %1472, %v1478_v48   ;;  %v1341_v61 = vld [vmem:[%s2034_s0 + $0xa4] sm:$0xf] }
  0x3e   :  { %688 = vmatpush.bf16.msrb.mxu2 %v1377_v62  ;;  %639 = vmatpush.bf16.msrb.mxu1 %v1369_v63  ;;  %v1093_v62 = vld [vmem:[%s2034_s0 + $0xb4] sm:$0xf0]  ;;  %v1099_v63 = vld [vmem:[%s2034_s0 + $0xa8] sm:$0xf] }
  0x3f   :  { %v1096_v5 = vor.u32 %v1341_v61, %v1093_v62  ;;  %v1359_v61 = vld [vmem:[%s2034_s0 + $0x130] sm:$0xf0]  ;;  %v1357_v62 = vld [vmem:[%s2034_s0 + $0x124] sm:$0xf] }
  0x40   :  { %737 = vmatpush.bf16.msrb.mxu3 %v1385_v0  ;;  %v1344_v0 = vld [vmem:[%s2034_s0 + $0xb8] sm:$0xf0] }
  0x41   :  { %640 = vmatmul.bf16.vlgmr.msrb.gmra.mxu1 %v1016_v9  ;;  %689 = vmatmul.bf16.vlgmr.msrb.gmra.mxu2 %v1020_v10  ;;  %v1100_v6 = vor.u32 %v1344_v0, %v1099_v63  ;;  %v1346_v9 = vld [vmem:[%s2034_s0 + $0xcc] sm:$0xf]  ;;  %v1113_v10 = vld [vmem:[%s2034_s0 + $0xdc] sm:$0xf0]  ;;  %v1161_v63 = vld [vmem:[%s2034_s0 + $0x134] sm:$0xf0] }
  0x42   :  { %v1116_v18 = vor.u32 %v1346_v9, %v1113_v10  ;;  %v1167_v0 = vld [vmem:[%s2034_s0 + $0x128] sm:$0xf]  ;;  %v1164_v9 = vor.u32 %v1357_v62, %v1161_v63 }
  0x43   :  { %738 = vmatmul.bf16.vlgmr.msrb.gmra.mxu3 %v1024_v11  ;;  %1313 = vmatmul.msk.bf16.vlgmr.msrb.gmra.mxu0 %vm558_vm0, %v1028_v12  ;;  %v1119_v11 = vld [vmem:[%s2034_s0 + $0xd0] sm:$0xf]  ;;  %v1349_v12 = vld [vmem:[%s2034_s0 + $0xe0] sm:$0xf0]  ;;  %v1168_v10 = vor.u32 %v1360_v1, %v1167_v0 }
  0x44   :  { %v1120_v19 = vor.u32 %v1349_v12, %v1119_v11 }
  0x51   :  { %645 = vmatmul.bf16.gmra.mxu1 %v1036_v25  ;;  %694 = vmatmul.bf16.gmra.mxu2 %v1040_v26  ;;  %v1434_v25 = vld [vmem:[%s2035_s3 + $0x30] sm:$0xff]  }
  0x52   :  { %v1423_v26 = vunpack.c.l.bf16 %v1434_v25 }
  0x53   :  { %743 = vmatmul.bf16.gmra.mxu3 %v1044_v27  ;;  %1314 = vmatmul.msk.bf16.gmra.mxu0 %vm558_vm0, %v1048_v28  ;;  %v1424_v27 = vunpack.c.h.bf16 %v1434_v25 }
  0x55   :  { %v1494_v28 = vpack.i.bf16 %v1424_v27, %v1423_v26 }
  0x57   :  { %1495 = vperm.xlu0 %1461, %v1494_v28  }
  0x61   :  { %650 = vmatmul.bf16.gmra.mxu1 %v1056_v41  ;;  %699 = vmatmul.bf16.gmra.mxu2 %v1060_v42  ;;  %v1419_v41 = vunpack.c.l.bf16 %v1433_v39  ;;  %v1420_v42 = vunpack.c.h.bf16 %v1433_v39 }
  0x63   :  { %748 = vmatmul.bf16.gmra.mxu3 %v1064_v43  ;;  %1315 = vmatmul.msk.bf16.gmra.mxu0 %vm558_vm0, %v1068_v44  ;;  %v1427_v43 = vunpack.c.l.bf16 %v1435_v40  ;;  %v1428_v44 = vunpack.c.h.bf16 %v1435_v40  ;;  %v1489_v49 = vpack.i.bf16 %v1420_v42, %v1419_v41 }
  0x65   :  { %v1499_v50 = vpack.i.bf16 %v1428_v44, %v1427_v43  ;;  %1490 = vperm.xlu2 %1483, %v1489_v49  }
  0x67   :  { %1500 = vperm.xlu1 %1472, %v1499_v50  }
  0x71   :  { %655 = vmatmul.bf16.gmra.mxu1 %v1076_v57  ;;  %704 = vmatmul.bf16.gmra.mxu2 %v1080_v58  ;;  %v1356_v58 = vld [vmem:[%s2034_s0 + $0x11c] sm:$0xf] }
  0x73   :  { %753 = vmatmul.bf16.gmra.mxu3 %v1084_v59  ;;  %1316 = vmatmul.msk.bf16.gmra.mxu0 %vm558_vm0, %v1088_v60  ;;  %v1153_v59 = vld [vmem:[%s2034_s0 + $0x12c] sm:$0xf0]  ;;  %v1159_v60 = vld [vmem:[%s2034_s0 + $0x120] sm:$0xf] }
  0x81   :  { %660 = vmatmul.bf16.gmra.mxu1 %v1096_v5  ;;  %709 = vmatmul.bf16.gmra.mxu2 %v1100_v6  ;;  %v1156_v5 = vor.u32 %v1356_v58, %v1153_v59  ;;  %v1160_v6 = vor.u32 %v1359_v61, %v1159_v60 }
  0x83   :  { %758 = vmatmul.bf16.gmra.mxu3 %v1104_v7  ;;  %1317 = vmatmul.msk.bf16.gmra.mxu0 %vm558_vm0, %v1108_v8 }
  0x86   :  { %v1464_v30 = vpop.permute.xlu0 %1463 }
  0x87   :  { %v1465_v35 = vunpack.i.l.bf16 %v1464_v30 }
  0x91   :  { %665 = vmatmul.bf16.gmra.mxu1 %v1116_v18  ;;  %714 = vmatmul.bf16.gmra.mxu2 %v1120_v19 }
  0x93   :  { %763 = vmatmul.bf16.gmra.mxu3 %v1124_v22  ;;  %1318 = vmatmul.msk.bf16.gmra.mxu0 %vm558_vm0, %v1128_v23 }
  0x97   :  { %v1469_v61 = vpop.permute.xlu0 %1468 }
  0x9e   :  { %v1885_v45 = vpop.f32.mrf.mxu1 }
  0xa0   :  { %v592_v48 = vpop.f32.mrf.mxu0 }
  0xa1   :  { %670 = vmatmul.bf16.gmra.mxu1 %v1136_v37  ;;  %719 = vmatmul.bf16.gmra.mxu2 %v1140_v38  ;;  %v593_v24 = vadd.f32 %v1891_v51, %v592_v48  ;;  %v1466_v48 = vunpack.i.h.bf16 %v1464_v30 }
  0xa3   :  { %768 = vmatmul.bf16.gmra.mxu3 %v1144_v46  ;;  %1319 = vmatmul.msk.bf16.gmra.mxu0 %vm558_vm0, %v1148_v47 }
  0xa4   :  { %v612_v52 = vpop.f32.mrf.mxu2 }
  0xa5   :  { %v1894_v53 = vadd.f32 %v1891_v51, %v612_v52 }
  0xa6   :  { %v622_v54 = vpop.f32.mrf.mxu3  ;;  %v1899_v56 = vpop.f32.mrf.mxu1 }
  0xa7   :  { %v1897_v55 = vadd.f32 %v1891_v51, %v622_v54 }
  0xa8   :  { %v594_v57 = vpop.f32.mrf.mxu0 }
  0xa9   :  { %v595_v33 = vadd.f32 %v1891_v51, %v594_v57 }
  0xac   :  { %v614_v2 = vpop.f32.mrf.mxu2 }
  0xad   :  { %v1926_v3 = vadd.f32 %v1891_v51, %v614_v2 }
  0xae   :  { %v624_v4 = vpop.f32.mrf.mxu3  ;;  %v1931_v8 = vpop.f32.mrf.mxu1 }
  0xaf   :  { %v1929_v7 = vadd.f32 %v1891_v51, %v624_v4  ;;  %v1470_v4 = vunpack.i.l.bf16 %v1469_v61 }
  0xb0   :  { %v597_v11 = vpop.f32.mrf.mxu0 }
  0xb1   :  { %675 = vmatmul.bf16.gmra.mxu1 %v1156_v5  ;;  %724 = vmatmul.bf16.gmra.mxu2 %v1160_v6  ;;  %v598_v47 = vadd.f32 %v1891_v51, %v597_v11 }
  0xb3   :  { %773 = vmatmul.bf16.gmra.mxu3 %v1164_v9  ;;  %1320 = vmatmul.msk.bf16.gmra.mxu0 %vm558_vm0, %v1168_v10 }
  0xb4   :  { %v617_v12 = vpop.f32.mrf.mxu2 }
  0xb5   :  { %v1935_v13 = vadd.f32 %v1891_v51, %v617_v12 }
  0xb6   :  { %v627_v14 = vpop.f32.mrf.mxu3  ;;  %v1940_v16 = vpop.f32.mrf.mxu1 }
  0xb7   :  { %v1938_v15 = vadd.f32 %v1891_v51, %v627_v14 }
  0xb8   :  { %v599_v17 = vpop.f32.mrf.mxu0 }
  0xb9   :  { %v600_v1 = vadd.f32 %v1891_v51, %v599_v17  ;;  %v603_v17 = vadd.f32 %v1891_v51, %v1885_v45  ;;  %v605_v45 = vadd.f32 %v1891_v51, %v1899_v56  ;;  %v608_v56 = vadd.f32 %v1891_v51, %v1931_v8 }
  0xba   :  { %v610_v8 = vadd.f32 %v1891_v51, %v1940_v16 }
  0xbc   :  { %v619_v18 = vpop.f32.mrf.mxu2 }
  0xbd   :  { %v1943_v19 = vadd.f32 %v1891_v51, %v619_v18 }
  0xbe   :  { %v629_v20 = vpop.f32.mrf.mxu3  ;;  %v641_v22 = vpop.f32.mrf.mxu1 }
  0xbf   :  { %v1946_v21 = vadd.f32 %v1891_v51, %v629_v20  ;;  %v642_v25 = vadd.f32 %v641_v22, %v593_v24 }
  0xc0   :  { %v788_v23 = vpop.f32.mrf.mxu0 }
  0xc4   :  { %v690_v26 = vpop.f32.mrf.mxu2 }
  0xc5   :  { %v691_v27 = vadd.f32 %v690_v26, %v642_v25 }
  0xc6   :  { %v739_v28 = vpop.f32.mrf.mxu3  ;;  %v643_v29 = vpop.f32.mrf.mxu1 }
  0xc7   :  { %v740_v31 = vadd.f32 %v739_v28, %v691_v27  ;;  %v644_v37 = vadd.f32 %v643_v29, %v595_v33 }
  0xc8   :  { %v790_v32 = vpop.f32.mrf.mxu0 }
  0xc9   :  { %v789_v34 = vadd.f32 %v788_v23, %v740_v31  ;;  %v1471_v23 = vunpack.i.h.bf16 %v1469_v61 }
  0xcb   :  { %v828_v36 = vmax.f32 %v789_v34, 0.0 }
  0xcc   :  { %v692_v38 = vpop.f32.mrf.mxu2 }
  0xcd   :  { %v956_v39 = vmul.f32 %v1465_v35, %v828_v36  ;;  %v693_v40 = vadd.f32 %v692_v38, %v644_v37 }
  0xce   :  { %v741_v41 = vpop.f32.mrf.mxu3  ;;  %v646_v42 = vpop.f32.mrf.mxu1 }
  0xcf   :  { %v972_v43 = vpack.c.bf16 %v956_v39, %v956_v39  ;;  %v742_v44 = vadd.f32 %v741_v41, %v693_v40  ;;  %v647_v52 = vadd.f32 %v646_v42, %v598_v47 }
  0xd0   :  { %v793_v46 = vpop.f32.mrf.mxu0 }
  0xd1   :  { %989 = vst.msk [vmem:[%s2036_s4] sm:$0xf] %vm988_vm1, %v972_v43  ;;  %v791_v49 = vadd.f32 %v790_v32, %v742_v44  ;;  %v1475_v32 = vpop.permute.xlu1 %1474 }
  0xd2   :  { %v1476_v37 = vunpack.i.l.bf16 %v1475_v32 }
  0xd3   :  { %v829_v50 = vmax.f32 %v791_v49, 0.0  ;;  %v1477_v49 = vunpack.i.h.bf16 %v1475_v32 }
  0xd4   :  { %v695_v54 = vpop.f32.mrf.mxu2 }
  0xd5   :  { %v957_v57 = vmul.f32 %v1466_v48, %v829_v50  ;;  %v696_v58 = vadd.f32 %v695_v54, %v647_v52 }
  0xd6   :  { %v744_v59 = vpop.f32.mrf.mxu3  ;;  %v648_v60 = vpop.f32.mrf.mxu1 }
  0xd7   :  { %v973_v62 = vpack.c.bf16 %v957_v57, %v957_v57  ;;  %v745_v63 = vadd.f32 %v744_v59, %v696_v58  ;;  %v649_v6 = vadd.f32 %v648_v60, %v600_v1 }
  0xd8   :  { %v795_v0 = vpop.f32.mrf.mxu0 }
  0xd9   :  { %990 = vst.msk [vmem:[%s2036_s4 + $0x4] sm:$0xf] %vm988_vm1, %v973_v62  ;;  %v794_v2 = vadd.f32 %v793_v46, %v745_v63  ;;  %v1480_v62 = vpop.permute.xlu1 %1479 }
  0xdb   :  { %v830_v5 = vmax.f32 %v794_v2, 0.0 }
  0xdc   :  { %v697_v9 = vpop.f32.mrf.mxu2 }
  0xdd   :  { %v958_v10 = vmul.f32 %v1470_v4, %v830_v5  ;;  %v698_v11 = vadd.f32 %v697_v9, %v649_v6  ;;  %v1481_v4 = vunpack.i.l.bf16 %v1480_v62 }
  0xde   :  { %v746_v12 = vpop.f32.mrf.mxu3  ;;  %v651_v14 = vpop.f32.mrf.mxu1 }
  0xdf   :  { %v974_v18 = vpack.c.bf16 %v958_v10, %v958_v10  ;;  %v747_v20 = vadd.f32 %v746_v12, %v698_v11  ;;  %v652_v26 = vadd.f32 %v651_v14, %v603_v17  ;;  %v1482_v17 = vunpack.i.h.bf16 %v1480_v62 }
  0xe0   :  { %v798_v22 = vpop.f32.mrf.mxu0 }
  0xe1   :  { %991 = vst.msk [vmem:[%s2036_s4 + $0x8] sm:$0xf] %vm988_vm1, %v974_v18  ;;  %v796_v24 = vadd.f32 %v795_v0, %v747_v20 }
  0xe3   :  { %v831_v25 = vmax.f32 %v796_v24, 0.0 }
  0xe4   :  { %v700_v27 = vpop.f32.mrf.mxu2 }
  0xe5   :  { %v959_v28 = vmul.f32 %v1471_v23, %v831_v25  ;;  %v701_v29 = vadd.f32 %v700_v27, %v652_v26 }
  0xe6   :  { %v749_v30 = vpop.f32.mrf.mxu3  ;;  %v653_v31 = vpop.f32.mrf.mxu1 }
  0xe7   :  { %v975_v33 = vpack.c.bf16 %v959_v28, %v959_v28  ;;  %v750_v34 = vadd.f32 %v749_v30, %v701_v29  ;;  %v654_v39 = vadd.f32 %v653_v31, %v605_v45  ;;  %v1486_v29 = vpop.permute.xlu2 %1485 }
  0xe8   :  { %v800_v35 = vpop.f32.mrf.mxu0 }
  0xe9   :  { %992 = vst.msk [vmem:[%s2036_s4 + $0xc] sm:$0xf] %vm988_vm1, %v975_v33  ;;  %v799_v36 = vadd.f32 %v798_v22, %v750_v34  ;;  %v1487_v34 = vunpack.i.l.bf16 %v1486_v29 }
  0xeb   :  { %v832_v38 = vmax.f32 %v799_v36, 0.0 }
  0xec   :  { %v702_v40 = vpop.f32.mrf.mxu2 }
  0xed   :  { %v960_v41 = vmul.f32 %v1476_v37, %v832_v38  ;;  %v703_v42 = vadd.f32 %v702_v40, %v654_v39 }
  0xee   :  { %v751_v43 = vpop.f32.mrf.mxu3  ;;  %v656_v44 = vpop.f32.mrf.mxu1 }
  0xef   :  { %v976_v46 = vpack.c.bf16 %v960_v41, %v960_v41  ;;  %v752_v47 = vadd.f32 %v751_v43, %v703_v42  ;;  %v657_v54 = vadd.f32 %v656_v44, %v608_v56  ;;  %v1488_v43 = vunpack.i.h.bf16 %v1486_v29 }
  0xf0   :  { %v803_v48 = vpop.f32.mrf.mxu0 }
  0xf1   :  { %993 = vst.msk [vmem:[%s2036_s4 + $0x10] sm:$0xf] %vm988_vm1, %v976_v46  ;;  %v801_v50 = vadd.f32 %v800_v35, %v752_v47 }
  0xf3   :  { %v833_v52 = vmax.f32 %v801_v50, 0.0 }
  0xf4   :  { %v705_v57 = vpop.f32.mrf.mxu2 }
  0xf5   :  { %v961_v58 = vmul.f32 %v1477_v49, %v833_v52  ;;  %v706_v59 = vadd.f32 %v705_v57, %v657_v54  ;;  %v1491_v52 = vpop.permute.xlu2 %1490 }
  0xf6   :  { %v754_v60 = vpop.f32.mrf.mxu3  ;;  %v658_v61 = vpop.f32.mrf.mxu1 }
  0xf7   :  { %v977_v63 = vpack.c.bf16 %v961_v58, %v961_v58  ;;  %v755_v0 = vadd.f32 %v754_v60, %v706_v59  ;;  %v659_v6 = vadd.f32 %v658_v61, %v610_v8  ;;  %v1492_v60 = vunpack.i.l.bf16 %v1491_v52 }
  0xf8   :  { %v805_v1 = vpop.f32.mrf.mxu0 }
  0xf9   :  { %994 = vst.msk [vmem:[%s2036_s4 + $0x14] sm:$0xf] %vm988_vm1, %v977_v63  ;;  %v804_v2 = vadd.f32 %v803_v48, %v755_v0 }
  0xfb   :  { %v834_v5 = vmax.f32 %v804_v2, 0.0 }
  0xfc   :  { %v707_v9 = vpop.f32.mrf.mxu2 }
  0xfd   :  { %v962_v10 = vmul.f32 %v1481_v4, %v834_v5  ;;  %v708_v11 = vadd.f32 %v707_v9, %v659_v6  ;;  %v1493_v5 = vunpack.i.h.bf16 %v1491_v52 }
  0xfe   :  { %v756_v12 = vpop.f32.mrf.mxu3  ;;  %v661_v14 = vpop.f32.mrf.mxu1 }
  0xff   :  { %v978_v18 = vpack.c.bf16 %v962_v10, %v962_v10  ;;  %v757_v20 = vadd.f32 %v756_v12, %v708_v11  ;;  %v662_v23 = vadd.f32 %v661_v14, %v1894_v53 }
 0x100   :  { %v808_v22 = vpop.f32.mrf.mxu0 }
 0x101   :  { %995 = vst.msk [vmem:[%s2036_s4 + $0x18] sm:$0xf] %vm988_vm1, %v978_v18  ;;  %v806_v51 = vadd.f32 %v805_v1, %v757_v20 }
 0x103   :  { %v835_v16 = vmax.f32 %v806_v51, 0.0 }
 0x104   :  { %v710_v24 = vpop.f32.mrf.mxu2 }
 0x105   :  { %v963_v25 = vmul.f32 %v1482_v17, %v835_v16  ;;  %v711_v26 = vadd.f32 %v710_v24, %v662_v23 }
 0x106   :  { %v759_v27 = vpop.f32.mrf.mxu3  ;;  %v663_v28 = vpop.f32.mrf.mxu1 }
 0x107   :  { %v979_v30 = vpack.c.bf16 %v963_v25, %v963_v25  ;;  %v760_v31 = vadd.f32 %v759_v27, %v711_v26  ;;  %v664_v45 = vadd.f32 %v663_v28, %v1926_v3 }
 0x108   :  { %v810_v32 = vpop.f32.mrf.mxu0 }
 0x109   :  { %996 = vst.msk [vmem:[%s2036_s4 + $0x1c] sm:$0xf] %vm988_vm1, %v979_v30  ;;  %v809_v33 = vadd.f32 %v808_v22, %v760_v31  ;;  %v1496_v22 = vpop.permute.xlu0 %1495 }
 0x10a   :  { %v1497_v23 = vunpack.i.l.bf16 %v1496_v22 }
 0x10b   :  { %v836_v35 = vmax.f32 %v809_v33, 0.0  ;;  %v1498_v33 = vunpack.i.h.bf16 %v1496_v22 }
 0x10c   :  { %v712_v53 = vpop.f32.mrf.mxu2 }
 0x10d   :  { %v964_v36 = vmul.f32 %v1487_v34, %v836_v35  ;;  %v713_v37 = vadd.f32 %v712_v53, %v664_v45 }
 0x10e   :  { %v761_v38 = vpop.f32.mrf.mxu3  ;;  %v666_v39 = vpop.f32.mrf.mxu1 }
 0x10f   :  { %v980_v40 = vpack.c.bf16 %v964_v36, %v964_v36  ;;  %v762_v41 = vadd.f32 %v761_v38, %v713_v37  ;;  %v667_v47 = vadd.f32 %v666_v39, %v1935_v13 }
 0x110   :  { %v813_v42 = vpop.f32.mrf.mxu0 }
 0x111   :  { %997 = vst.msk [vmem:[%s2036_s4 + $0x20] sm:$0xf] %vm988_vm1, %v980_v40  ;;  %v811_v44 = vadd.f32 %v810_v32, %v762_v41  ;;  %v1501_v41 = vpop.permute.xlu1 %1500 }
 0x113   :  { %v837_v46 = vmax.f32 %v811_v44, 0.0  ;;  %v1502_v44 = vunpack.i.l.bf16 %v1501_v41 }
 0x114   :  { %v715_v48 = vpop.f32.mrf.mxu2 }
 0x115   :  { %v965_v3 = vmul.f32 %v1488_v43, %v837_v46  ;;  %v716_v56 = vadd.f32 %v715_v48, %v667_v47 }
 0x116   :  { %v764_v49 = vpop.f32.mrf.mxu3  ;;  %v668_v50 = vpop.f32.mrf.mxu1 }
 0x117   :  { %v981_v54 = vpack.c.bf16 %v965_v3, %v965_v3  ;;  %v765_v57 = vadd.f32 %v764_v49, %v716_v56  ;;  %v669_v62 = vadd.f32 %v668_v50, %v1943_v19 }
 0x118   :  { %v815_v58 = vpop.f32.mrf.mxu0 }
 0x119   :  { %998 = vst.msk [vmem:[%s2036_s4 + $0x24] sm:$0xf] %vm988_vm1, %v981_v54  ;;  %v814_v59 = vadd.f32 %v813_v42, %v765_v57  ;;  %v1503_v57 = vunpack.i.h.bf16 %v1501_v41 }
 0x11b   :  { %v838_v61 = vmax.f32 %v814_v59, 0.0 }
 0x11c   :  { %v717_v13 = vpop.f32.mrf.mxu2 }
 0x11d   :  { %v966_v63 = vmul.f32 %v1492_v60, %v838_v61  ;;  %v718_v0 = vadd.f32 %v717_v13, %v669_v62 }
 0x11e   :  { %v766_v1 = vpop.f32.mrf.mxu3  ;;  %v671_v8 = vpop.f32.mrf.mxu1 }
 0x11f   :  { %v982_v2 = vpack.c.bf16 %v966_v63, %v966_v63  ;;  %v767_v4 = vadd.f32 %v766_v1, %v718_v0  ;;  %v672_v11 = vadd.f32 %v671_v8, %v1897_v55 }
 0x120   :  { %v818_v9 = vpop.f32.mrf.mxu0 }
 0x121   :  { %999 = vst.msk [vmem:[%s2036_s4 + $0x28] sm:$0xf] %vm988_vm1, %v982_v2  ;;  %v816_v6 = vadd.f32 %v815_v58, %v767_v4 }
 0x123   :  { %v839_v10 = vmax.f32 %v816_v6, 0.0 }
 0x124   :  { %v720_v12 = vpop.f32.mrf.mxu2 }
 0x125   :  { %v967_v19 = vmul.f32 %v1493_v5, %v839_v10  ;;  %v721_v14 = vadd.f32 %v720_v12, %v672_v11 }
 0x126   :  { %v769_v18 = vpop.f32.mrf.mxu3  ;;  %v673_v20 = vpop.f32.mrf.mxu1 }
 0x127   :  { %v983_v17 = vpack.c.bf16 %v967_v19, %v967_v19  ;;  %v770_v51 = vadd.f32 %v769_v18, %v721_v14  ;;  %v674_v25 = vadd.f32 %v673_v20, %v1929_v7 }
 0x128   :  { %v820_v26 = vpop.f32.mrf.mxu0 }
 0x129   :  { %1000 = vst.msk [vmem:[%s2036_s4 + $0x2c] sm:$0xf] %vm988_vm1, %v983_v17  ;;  %v819_v16 = vadd.f32 %v818_v9, %v770_v51 }
 0x12b   :  { %v840_v24 = vmax.f32 %v819_v16, 0.0 }
 0x12c   :  { %v722_v55 = vpop.f32.mrf.mxu2 }
 0x12d   :  { %v968_v27 = vmul.f32 %v1497_v23, %v840_v24  ;;  %v723_v28 = vadd.f32 %v722_v55, %v674_v25 }
 0x12e   :  { %v771_v29 = vpop.f32.mrf.mxu3  ;;  %v676_v30 = vpop.f32.mrf.mxu1 }
 0x12f   :  { %v984_v31 = vpack.c.bf16 %v968_v27, %v968_v27  ;;  %v772_v32 = vadd.f32 %v771_v29, %v723_v28  ;;  %v677_v45 = vadd.f32 %v676_v30, %v1938_v15 }
 0x130   :  { %v823_v38 = vpop.f32.mrf.mxu0 }
 0x131   :  { %1001 = vst.msk [vmem:[%s2036_s4 + $0x30] sm:$0xf] %vm988_vm1, %v984_v31  ;;  %v821_v34 = vadd.f32 %v820_v26, %v772_v32 }
 0x133   :  { %v841_v35 = vmax.f32 %v821_v34, 0.0 }
 0x134   :  { %v725_v53 = vpop.f32.mrf.mxu2 }
 0x135   :  { %v969_v7 = vmul.f32 %v1498_v33, %v841_v35  ;;  %v726_v36 = vadd.f32 %v725_v53, %v677_v45 }
 0x136   :  { %v774_v37 = vpop.f32.mrf.mxu3  ;;  %v678_v42 = vpop.f32.mrf.mxu1 }
 0x137   :  { %v985_v39 = vpack.c.bf16 %v969_v7, %v969_v7  ;;  %v775_v40 = vadd.f32 %v774_v37, %v726_v36  ;;  %v679_v47 = vadd.f32 %v678_v42, %v1946_v21 }
 0x138   :  { %v825_v52 = vpop.f32.mrf.mxu0 }
 0x139   :  { %1002 = vst.msk [vmem:[%s2036_s4 + $0x34] sm:$0xf] %vm988_vm1, %v985_v39  ;;  %v824_v43 = vadd.f32 %v823_v38, %v775_v40 }
 0x13b   :  { %v842_v46 = vmax.f32 %v824_v43, 0.0 }
 0x13c   :  { %v727_v15 = vpop.f32.mrf.mxu2 }
 0x13d   :  { %v970_v48 = vmul.f32 %v1502_v44, %v842_v46  ;;  %v728_v3 = vadd.f32 %v727_v15, %v679_v47 }
 0x13e   :  { %v776_v56 = vpop.f32.mrf.mxu3 }
 0x13f   :  { %v986_v49 = vpack.c.bf16 %v970_v48, %v970_v48  ;;  %v777_v50 = vadd.f32 %v776_v56, %v728_v3 }
 0x141   :  { %1003 = vst.msk [vmem:[%s2036_s4 + $0x38] sm:$0xf] %vm988_vm1, %v986_v49  ;;  %v826_v54 = vadd.f32 %v825_v52, %v777_v50 }
 0x143   :  { %v843_v58 = vmax.f32 %v826_v54, 0.0 }
 0x145   :  { %v971_v59 = vmul.f32 %v1503_v57, %v843_v58 }
 0x147   :  { %v987_v60 = vpack.c.bf16 %v971_v59, %v971_v59 }
 0x149   :  { %1004 = vst.msk [vmem:[%s2036_s4 + $0x3c] sm:$0xf] %vm988_vm1, %v987_v60 }

// kernel: pillar_backbone_forward.19
= control target key start
LH: loop header
LB: loop body
LE: loop exit
PB: predicated region body
PF: predicated region fallthrough
CT: control target
= control target key end

     0   :  { %v791_v49 = vmov 0   ;;  %vm372_vm0 = vcmask 523264   ;;  %s1000_s1 = inlined_call_operand.vmem [shape: bf16[576,128], index: 1, kind: input, shape index: {}]   ;;  %s1001_s2 = inlined_call_operand.vmem [shape: f32[1,128], index: 2, kind: input, shape index: {}]   ;;  %s1002_s0 = inlined_call_operand.vmem [shape: bf16[32,576], index: 0, kind: input, shape index: {}]   ;;  %s1003_s3 = inlined_call_operand.vmem [shape: bf16[32,1], index: 3, kind: input, shape index: {}]   ;;  %s1004_s4 = inlined_call_operand.vmem [shape: bf16[32,128], index: 4, kind: output, shape index: {}]  }
   0x1   :  { %v725_v0 = vld [vmem:[%s1000_s1 + $0x38] sm:$0xff]  ;;  %v724_v4 = vld [vmem:[%s1000_s1 + $0x30] sm:$0xff]  ;;  %v723_v8 = vld [vmem:[%s1000_s1 + $0x28] sm:$0xff]  ;;  %779 = vset.pattern.permute.xlu0 %v791_v49 }
   0x2   :  { %v733_v1 = vld [vmem:[%s1000_s1 + $0x78] sm:$0xff]  ;;  %379 = vmatpush.bf16.msra.mxu0 %v725_v0  ;;  %v732_v5 = vld [vmem:[%s1000_s1 + $0x70] sm:$0xff]  ;;  %v731_v9 = vld [vmem:[%s1000_s1 + $0x68] sm:$0xff] }
   0x3   :  { %v741_v2 = vld [vmem:[%s1000_s1 + $0xb8] sm:$0xff]  ;;  %398 = vmatpush.bf16.msra.mxu1 %v733_v1  ;;  %v740_v6 = vld [vmem:[%s1000_s1 + $0xb0] sm:$0xff]  ;;  %v739_v10 = vld [vmem:[%s1000_s1 + $0xa8] sm:$0xff] }
   0x4   :  { %v749_v3 = vld [vmem:[%s1000_s1 + $0xf8] sm:$0xff]  ;;  %417 = vmatpush.bf16.msra.mxu2 %v741_v2  ;;  %v748_v7 = vld [vmem:[%s1000_s1 + $0xf0] sm:$0xff]  ;;  %v747_v11 = vld [vmem:[%s1000_s1 + $0xe8] sm:$0xff] }
   0x5   :  { %436 = vmatpush.bf16.msra.mxu3 %v749_v3  ;;  %v722_v12 = vld [vmem:[%s1000_s1 + $0x20] sm:$0xff]  ;;  %v721_v16 = vld [vmem:[%s1000_s1 + $0x18] sm:$0xff]  ;;  %v720_v20 = vld [vmem:[%s1000_s1 + $0x10] sm:$0xff] }
   0x6   :  { %380 = vmatpush.bf16.msra.mxu0 %v724_v4  ;;  %v730_v13 = vld [vmem:[%s1000_s1 + $0x60] sm:$0xff]  ;;  %v729_v17 = vld [vmem:[%s1000_s1 + $0x58] sm:$0xff]  ;;  %v728_v21 = vld [vmem:[%s1000_s1 + $0x50] sm:$0xff] }
   0x7   :  { %399 = vmatpush.bf16.msra.mxu1 %v732_v5  ;;  %v738_v14 = vld [vmem:[%s1000_s1 + $0xa0] sm:$0xff]  ;;  %v737_v18 = vld [vmem:[%s1000_s1 + $0x98] sm:$0xff]  ;;  %v736_v22 = vld [vmem:[%s1000_s1 + $0x90] sm:$0xff] }
   0x8   :  { %418 = vmatpush.bf16.msra.mxu2 %v740_v6  ;;  %v746_v15 = vld [vmem:[%s1000_s1 + $0xe0] sm:$0xff]  ;;  %v745_v19 = vld [vmem:[%s1000_s1 + $0xd8] sm:$0xff]  ;;  %v744_v23 = vld [vmem:[%s1000_s1 + $0xd0] sm:$0xff] }
   0x9   :  { %437 = vmatpush.bf16.msra.mxu3 %v748_v7  ;;  %v719_v24 = vld [vmem:[%s1000_s1 + $0x8] sm:$0xff]  ;;  %v718_v28 = vld [vmem:[%s1000_s1] sm:$0xff]  ;;  %v710_v33 = vld [vmem:[%s1002_s0 + $0x10] sm:$0xf0] }
   0xa   :  { %381 = vmatpush.bf16.msra.mxu0 %v723_v8  ;;  %v727_v25 = vld [vmem:[%s1000_s1 + $0x48] sm:$0xff]  ;;  %v726_v29 = vld [vmem:[%s1000_s1 + $0x40] sm:$0xff]  ;;  %v526_v35 = vld [vmem:[%s1002_s0 + $0x14] sm:$0xf0] }
   0xb   :  { %400 = vmatpush.bf16.msra.mxu1 %v731_v9  ;;  %v735_v26 = vld [vmem:[%s1000_s1 + $0x88] sm:$0xff]  ;;  %v734_v30 = vld [vmem:[%s1000_s1 + $0x80] sm:$0xff]  ;;  %v711_v37 = vld [vmem:[%s1002_s0 + $0x18] sm:$0xf0] }
   0xc   :  { %419 = vmatpush.bf16.msra.mxu2 %v739_v10  ;;  %v743_v27 = vld [vmem:[%s1000_s1 + $0xc8] sm:$0xff]  ;;  %v742_v31 = vld [vmem:[%s1000_s1 + $0xc0] sm:$0xff]  ;;  %v753_v40 = vld [vmem:[%s1000_s1 + $0x118] sm:$0xff] }
   0xd   :  { %438 = vmatpush.bf16.msra.mxu3 %v747_v11  ;;  %v524_v32 = vld [vmem:[%s1002_s0] sm:$0xf]  ;;  %v708_v34 = vld [vmem:[%s1002_s0 + $0x4] sm:$0xf]  ;;  %v532_v36 = vld [vmem:[%s1002_s0 + $0x8] sm:$0xf] }
   0xe   :  { %382 = vmatpush.bf16.msra.mxu0 %v722_v12  ;;  %v709_v38 = vld [vmem:[%s1002_s0 + $0xc] sm:$0xf]  ;;  %v534_v39 = vld [vmem:[%s1002_s0 + $0x1c] sm:$0xf0]  ;;  %v525_v41 = vor.u32 %v710_v33, %v524_v32  ;;  %v529_v42 = vor.u32 %v708_v34, %v526_v35  ;;  %v533_v43 = vor.u32 %v711_v37, %v532_v36  ;;  %v752_v45 = vld [vmem:[%s1000_s1 + $0x110] sm:$0xff] }
   0xf   :  { %401 = vmatpush.bf16.msra.mxu1 %v730_v13  ;;  %v537_v44 = vor.u32 %v709_v38, %v534_v39  ;;  %v755_v46 = vld [vmem:[%s1003_s3] sm:$0xff]   ;;  %v772_v50 = vld [vmem:[%s1003_s3 + $0x8] sm:$0xff]   ;;  %v715_v57 = vld [vmem:[%s1002_s0 + $0x38] sm:$0xf0] }
  0x10   :  { %420 = vmatpush.bf16.msra.mxu2 %v738_v14  ;;  %v756_v47 = vunpack.c.l.bf16 %v755_v46  ;;  %v757_v48 = vunpack.c.h.bf16 %v755_v46  ;;  %v751_v51 = vld [vmem:[%s1000_s1 + $0x108] sm:$0xff]  ;;  %v760_v53 = vunpack.c.l.bf16 %v772_v50  ;;  %v761_v54 = vunpack.c.h.bf16 %v772_v50  ;;  %v750_v55 = vld [vmem:[%s1000_s1 + $0x100] sm:$0xff]  ;;  %v552_v60 = vld [vmem:[%s1002_s0 + $0x30] sm:$0xf] }
  0x11   :  { %439 = vmatpush.bf16.msra.mxu3 %v746_v15  ;;  %v544_v56 = vld [vmem:[%s1002_s0 + $0x28] sm:$0xf]  ;;  %v713_v58 = vld [vmem:[%s1002_s0 + $0x2c] sm:$0xf]  ;;  %v546_v59 = vld [vmem:[%s1002_s0 + $0x3c] sm:$0xf0] }
  0x12   :  { %383 = vmatpush.bf16.msra.mxu0 %v721_v16  ;;  %v780_v52 = vpack.i.bf16 %v757_v48, %v756_v47  ;;  %v785_v61 = vpack.i.bf16 %v761_v54, %v760_v53  ;;  %v716_v62 = vld [vmem:[%s1002_s0 + $0x40] sm:$0xf0]  ;;  %v714_v63 = vld [vmem:[%s1002_s0 + $0x34] sm:$0xf]  ;;  %v554_v0 = vld [vmem:[%s1002_s0 + $0x44] sm:$0xf0]  ;;  %v545_v1 = vor.u32 %v715_v57, %v544_v56  ;;  %v549_v2 = vor.u32 %v713_v58, %v546_v59 }
  0x13   :  { %402 = vmatpush.bf16.msra.mxu1 %v729_v17  ;;  %v553_v3 = vor.u32 %v716_v62, %v552_v60  ;;  %v557_v4 = vor.u32 %v714_v63, %v554_v0  ;;  %v540_v5 = vld [vmem:[%s1002_s0 + $0x10] sm:$0xf]  ;;  %v712_v6 = vld [vmem:[%s1002_s0 + $0x20] sm:$0xf0]  ;;  %v560_v7 = vld [vmem:[%s1002_s0 + $0x38] sm:$0xf] }
  0x14   :  { %421 = vmatpush.bf16.msra.mxu2 %v737_v18  ;;  %781 = vperm.xlu0 %779, %v780_v52   ;;  %v717_v8 = vld [vmem:[%s1002_s0 + $0x48] sm:$0xf0]  ;;  %v541_v9 = vor.u32 %v712_v6, %v540_v5 }
  0x15   :  { %440 = vmatpush.bf16.msra.mxu3 %v745_v19  ;;  %v561_v10 = vor.u32 %v717_v8, %v560_v7 }
  0x16   :  { %384 = vmatpush.bf16.msra.mxu0 %v720_v20 }
  0x17   :  { %403 = vmatpush.bf16.msra.mxu1 %v728_v21  ;;  %v790_v21 = vld [vmem:[%s1001_s2] ss:$0 sm:$0xff] }
  0x18   :  { %422 = vmatpush.bf16.msra.mxu2 %v736_v22 }
  0x19   :  { %441 = vmatpush.bf16.msra.mxu3 %v744_v23 }
  0x1a   :  { %385 = vmatpush.bf16.msra.mxu0 %v719_v24 }
  0x1b   :  { %404 = vmatpush.bf16.msra.mxu1 %v727_v25 }
  0x1c   :  { %423 = vmatpush.bf16.msra.mxu2 %v735_v26  ;;  %786 = vperm.xlu0 %779, %v785_v61  }
  0x1d   :  { %442 = vmatpush.bf16.msra.mxu3 %v743_v27 }
  0x1e   :  { %386 = vmatpush.bf16.msra.mxu0 %v718_v28 }
  0x1f   :  { %405 = vmatpush.bf16.msra.mxu1 %v726_v29 }
  0x20   :  { %424 = vmatpush.bf16.msra.mxu2 %v734_v30 }
  0x21   :  { %443 = vmatpush.bf16.msra.mxu3 %v742_v31  ;;  %387 = vmatmul.bf16.vlgmr.msra.gmra.mxu0 %v525_v41 }
  0x22   :  { %459 = vmatpush.bf16.msrb.mxu0 %v753_v40  ;;  %406 = vmatmul.bf16.vlgmr.msra.gmra.mxu1 %v529_v42 }
  0x23   :  { %774 = vmatpush.bf16.msrb.mxu1 %v753_v40  ;;  %425 = vmatmul.bf16.vlgmr.msra.gmra.mxu2 %v533_v43 }
  0x24   :  { %444 = vmatmul.bf16.vlgmr.msra.gmra.mxu3 %v537_v44 }
  0x26   :  { %460 = vmatpush.bf16.msrb.mxu0 %v752_v45 }
  0x27   :  { %775 = vmatpush.bf16.msrb.mxu1 %v752_v45 }
  0x2a   :  { %461 = vmatpush.bf16.msrb.mxu0 %v751_v51 }
  0x2b   :  { %776 = vmatpush.bf16.msrb.mxu1 %v751_v51 }
  0x2e   :  { %462 = vmatpush.bf16.msrb.mxu0 %v750_v55 }
  0x2f   :  { %777 = vmatpush.bf16.msrb.mxu1 %v750_v55 }
  0x31   :  { %392 = vmatmul.bf16.gmra.mxu0 %v545_v1 }
  0x32   :  { %411 = vmatmul.bf16.gmra.mxu1 %v549_v2 }
  0x33   :  { %430 = vmatmul.bf16.gmra.mxu2 %v553_v3 }
  0x34   :  { %449 = vmatmul.bf16.gmra.mxu3 %v557_v4 }
  0x41   :  { %706 = vmatmul.msk.bf16.vlgmr.msrb.gmra.mxu0 %vm372_vm0, %v541_v9 }
  0x42   :  { %707 = vmatmul.msk.bf16.vlgmr.msrb.gmra.mxu1 %vm372_vm0, %v561_v10 }
  0x86   :  { %v782_v27 = vpop.permute.xlu0 %781 }
  0x87   :  { %v783_v50 = vunpack.i.l.bf16 %v782_v27  ;;  %v784_v58 = vunpack.i.h.bf16 %v782_v27 }
  0x8e   :  { %v787_v46 = vpop.permute.xlu0 %786 }
  0x8f   :  { %v788_v51 = vunpack.i.l.bf16 %v787_v46  ;;  %v789_v59 = vunpack.i.h.bf16 %v787_v46 }
  0x9e   :  { %v388_v11 = vpop.f32.mrf.mxu0 }
  0x9f   :  { %v407_v12 = vpop.f32.mrf.mxu1  ;;  %v389_v25 = vadd.f32 %v790_v21, %v388_v11 }
  0xa1   :  { %v408_v29 = vadd.f32 %v407_v12, %v389_v25 }
  0xa6   :  { %v426_v13 = vpop.f32.mrf.mxu2  ;;  %v390_v15 = vpop.f32.mrf.mxu0 }
  0xa7   :  { %v445_v14 = vpop.f32.mrf.mxu3  ;;  %v409_v16 = vpop.f32.mrf.mxu1  ;;  %v391_v30 = vadd.f32 %v790_v21, %v390_v15  ;;  %v427_v33 = vadd.f32 %v426_v13, %v408_v29 }
  0xa9   :  { %v410_v38 = vadd.f32 %v409_v16, %v391_v30  ;;  %v446_v40 = vadd.f32 %v445_v14, %v427_v33 }
  0xae   :  { %v428_v17 = vpop.f32.mrf.mxu2  ;;  %v393_v18 = vpop.f32.mrf.mxu0 }
  0xaf   :  { %v412_v19 = vpop.f32.mrf.mxu1  ;;  %v447_v20 = vpop.f32.mrf.mxu3  ;;  %v394_v26 = vadd.f32 %v790_v21, %v393_v18  ;;  %v429_v41 = vadd.f32 %v428_v17, %v410_v38 }
  0xb1   :  { %v413_v31 = vadd.f32 %v412_v19, %v394_v26  ;;  %v448_v48 = vadd.f32 %v447_v20, %v429_v41 }
  0xb6   :  { %v431_v22 = vpop.f32.mrf.mxu2  ;;  %v395_v23 = vpop.f32.mrf.mxu0 }
  0xb7   :  { %v414_v24 = vpop.f32.mrf.mxu1  ;;  %v450_v28 = vpop.f32.mrf.mxu3  ;;  %v396_v32 = vadd.f32 %v790_v21, %v395_v23  ;;  %v432_v34 = vadd.f32 %v431_v22, %v413_v31 }
  0xb9   :  { %v415_v39 = vadd.f32 %v414_v24, %v396_v32  ;;  %v451_v42 = vadd.f32 %v450_v28, %v432_v34 }
  0xbe   :  { %v433_v35 = vpop.f32.mrf.mxu2  ;;  %v464_v36 = vpop.f32.mrf.mxu0 }
  0xbf   :  { %v469_v37 = vpop.f32.mrf.mxu1  ;;  %v434_v43 = vadd.f32 %v433_v35, %v415_v39  ;;  %v465_v44 = vadd.f32 %v464_v36, %v446_v40  ;;  %v452_v47 = vpop.f32.mrf.mxu3 }
  0xc0   :  { %v470_v45 = vadd.f32 %v469_v37, %v451_v42 }
  0xc1   :  { %v453_v49 = vadd.f32 %v452_v47, %v434_v43  ;;  %v474_v54 = vmax.f32 %v465_v44, 0.0 }
  0xc2   :  { %v476_v55 = vmax.f32 %v470_v45, 0.0 }
  0xc3   :  { %v506_v62 = vmul.f32 %v783_v50, %v474_v54 }
  0xc4   :  { %v508_v63 = vmul.f32 %v788_v51, %v476_v55 }
  0xc6   :  { %v466_v52 = vpop.f32.mrf.mxu0 }
  0xc7   :  { %v471_v53 = vpop.f32.mrf.mxu1  ;;  %v467_v56 = vadd.f32 %v466_v52, %v448_v48 }
  0xc8   :  { %v472_v57 = vadd.f32 %v471_v53, %v453_v49 }
  0xc9   :  { %v475_v60 = vmax.f32 %v467_v56, 0.0 }
  0xca   :  { %v477_v61 = vmax.f32 %v472_v57, 0.0 }
  0xcb   :  { %v507_v0 = vmul.f32 %v784_v58, %v475_v60 }
  0xcc   :  { %v509_v1 = vmul.f32 %v789_v59, %v477_v61 }
  0xcd   :  { %v765_v2 = vpack.c.bf16 %v507_v0, %v506_v62 }
  0xce   :  { %v770_v3 = vpack.c.bf16 %v509_v1, %v508_v63 }
  0xcf   :  { %766 = vst [vmem:[%s1004_s4] sm:$0xff] %v765_v2  }
  0xd0   :  { %773 = vst [vmem:[%s1004_s4 + $0x8] sm:$0xff] %v770_v3  }

// kernel: pillar_backbone_forward.20
= control target key start
LH: loop header
LB: loop body
LE: loop exit
PB: predicated region body
PF: predicated region fallthrough
CT: control target
= control target key end

     0   :  { %s1784_s1 = inlined_call_operand.vmem [shape: bf16[1152,128], index: 1, kind: input, shape index: {}]   ;;  %s1785_s0 = inlined_call_operand.vmem [shape: bf16[32,1152], index: 0, kind: input, shape index: {}]   ;;  %s1786_s2 = inlined_call_operand.vmem [shape: f32[1,128], index: 2, kind: input, shape index: {}]   ;;  %s1787_s3 = inlined_call_operand.vmem [shape: bf16[32,1], index: 3, kind: input, shape index: {}]   ;;  %s1788_s4 = inlined_call_operand.vmem [shape: bf16[32,128], index: 4, kind: output, shape index: {}]  }
   0x1   :  { %v1313_v0 = vld [vmem:[%s1784_s1 + $0x38] sm:$0xff]  ;;  %v1312_v4 = vld [vmem:[%s1784_s1 + $0x30] sm:$0xff]  ;;  %v1311_v8 = vld [vmem:[%s1784_s1 + $0x28] sm:$0xff] }
   0x2   :  { %v1321_v1 = vld [vmem:[%s1784_s1 + $0x78] sm:$0xff]  ;;  %709 = vmatpush.bf16.msra.mxu0 %v1313_v0  ;;  %v1320_v5 = vld [vmem:[%s1784_s1 + $0x70] sm:$0xff]  ;;  %v1319_v9 = vld [vmem:[%s1784_s1 + $0x68] sm:$0xff] }
   0x3   :  { %v1329_v2 = vld [vmem:[%s1784_s1 + $0xb8] sm:$0xff]  ;;  %728 = vmatpush.bf16.msra.mxu1 %v1321_v1  ;;  %v1328_v6 = vld [vmem:[%s1784_s1 + $0xb0] sm:$0xff]  ;;  %v1327_v10 = vld [vmem:[%s1784_s1 + $0xa8] sm:$0xff] }
   0x4   :  { %v1337_v3 = vld [vmem:[%s1784_s1 + $0xf8] sm:$0xff]  ;;  %747 = vmatpush.bf16.msra.mxu2 %v1329_v2  ;;  %v1336_v7 = vld [vmem:[%s1784_s1 + $0xf0] sm:$0xff]  ;;  %v1335_v11 = vld [vmem:[%s1784_s1 + $0xe8] sm:$0xff] }
   0x5   :  { %766 = vmatpush.bf16.msra.mxu3 %v1337_v3  ;;  %v1310_v12 = vld [vmem:[%s1784_s1 + $0x20] sm:$0xff]  ;;  %v1309_v16 = vld [vmem:[%s1784_s1 + $0x18] sm:$0xff]  ;;  %v1308_v20 = vld [vmem:[%s1784_s1 + $0x10] sm:$0xff] }
   0x6   :  { %710 = vmatpush.bf16.msra.mxu0 %v1312_v4  ;;  %v1318_v13 = vld [vmem:[%s1784_s1 + $0x60] sm:$0xff]  ;;  %v1317_v17 = vld [vmem:[%s1784_s1 + $0x58] sm:$0xff]  ;;  %v1316_v21 = vld [vmem:[%s1784_s1 + $0x50] sm:$0xff] }
   0x7   :  { %729 = vmatpush.bf16.msra.mxu1 %v1320_v5  ;;  %v1326_v14 = vld [vmem:[%s1784_s1 + $0xa0] sm:$0xff]  ;;  %v1325_v18 = vld [vmem:[%s1784_s1 + $0x98] sm:$0xff]  ;;  %v1324_v22 = vld [vmem:[%s1784_s1 + $0x90] sm:$0xff] }
   0x8   :  { %748 = vmatpush.bf16.msra.mxu2 %v1328_v6  ;;  %v1334_v15 = vld [vmem:[%s1784_s1 + $0xe0] sm:$0xff]  ;;  %v1333_v19 = vld [vmem:[%s1784_s1 + $0xd8] sm:$0xff]  ;;  %v1332_v23 = vld [vmem:[%s1784_s1 + $0xd0] sm:$0xff] }
   0x9   :  { %767 = vmatpush.bf16.msra.mxu3 %v1336_v7  ;;  %v1307_v24 = vld [vmem:[%s1784_s1 + $0x8] sm:$0xff]  ;;  %v1306_v28 = vld [vmem:[%s1784_s1] sm:$0xff]  ;;  %v940_v39 = vld [vmem:[%s1785_s0 + $0x2c] sm:$0xf0] }
   0xa   :  { %711 = vmatpush.bf16.msra.mxu0 %v1311_v8  ;;  %v1315_v25 = vld [vmem:[%s1784_s1 + $0x48] sm:$0xff]  ;;  %v1314_v29 = vld [vmem:[%s1784_s1 + $0x40] sm:$0xff]  ;;  %v1345_v40 = vld [vmem:[%s1784_s1 + $0x138] sm:$0xff] }
   0xb   :  { %730 = vmatpush.bf16.msra.mxu1 %v1319_v9  ;;  %v1323_v26 = vld [vmem:[%s1784_s1 + $0x88] sm:$0xff]  ;;  %v1322_v30 = vld [vmem:[%s1784_s1 + $0x80] sm:$0xff]  ;;  %v1353_v41 = vld [vmem:[%s1784_s1 + $0x178] sm:$0xff] }
   0xc   :  { %749 = vmatpush.bf16.msra.mxu2 %v1327_v10  ;;  %v1331_v27 = vld [vmem:[%s1784_s1 + $0xc8] sm:$0xff]  ;;  %v1330_v31 = vld [vmem:[%s1784_s1 + $0xc0] sm:$0xff]  ;;  %v1361_v46 = vld [vmem:[%s1784_s1 + $0x1b8] sm:$0xff] }
   0xd   :  { %768 = vmatpush.bf16.msra.mxu3 %v1335_v11  ;;  %v930_v32 = vld [vmem:[%s1785_s0] sm:$0xf]  ;;  %v1292_v33 = vld [vmem:[%s1785_s0 + $0x20] sm:$0xf0]  ;;  %v932_v35 = vld [vmem:[%s1785_s0 + $0x24] sm:$0xf0] }
   0xe   :  { %712 = vmatpush.bf16.msra.mxu0 %v1310_v12  ;;  %v1288_v34 = vld [vmem:[%s1785_s0 + $0x4] sm:$0xf]  ;;  %v938_v36 = vld [vmem:[%s1785_s0 + $0x8] sm:$0xf]  ;;  %v1293_v37 = vld [vmem:[%s1785_s0 + $0x28] sm:$0xf0]  ;;  %v931_v42 = vor.u32 %v1292_v33, %v930_v32 }
   0xf   :  { %731 = vmatpush.bf16.msra.mxu1 %v1318_v13  ;;  %v1289_v38 = vld [vmem:[%s1785_s0 + $0xc] sm:$0xf]  ;;  %v935_v43 = vor.u32 %v1288_v34, %v932_v35  ;;  %v939_v44 = vor.u32 %v1293_v37, %v938_v36  ;;  %v1369_v47 = vld [vmem:[%s1784_s1 + $0x1f8] sm:$0xff]  ;;  %v1344_v48 = vld [vmem:[%s1784_s1 + $0x130] sm:$0xff] }
  0x10   :  { %750 = vmatpush.bf16.msra.mxu2 %v1326_v14  ;;  %v943_v45 = vor.u32 %v1289_v38, %v940_v39  ;;  %v1352_v49 = vld [vmem:[%s1784_s1 + $0x170] sm:$0xff]  ;;  %v1343_v52 = vld [vmem:[%s1784_s1 + $0x128] sm:$0xff]  ;;  %v1342_v56 = vld [vmem:[%s1784_s1 + $0x120] sm:$0xff] }
  0x11   :  { %769 = vmatpush.bf16.msra.mxu3 %v1334_v15  ;;  %v1360_v50 = vld [vmem:[%s1784_s1 + $0x1b0] sm:$0xff]  ;;  %v1351_v53 = vld [vmem:[%s1784_s1 + $0x168] sm:$0xff]  ;;  %v1350_v57 = vld [vmem:[%s1784_s1 + $0x160] sm:$0xff] }
  0x12   :  { %713 = vmatpush.bf16.msra.mxu0 %v1309_v16  ;;  %v1368_v51 = vld [vmem:[%s1784_s1 + $0x1f0] sm:$0xff]  ;;  %v1359_v54 = vld [vmem:[%s1784_s1 + $0x1a8] sm:$0xff]  ;;  %v1358_v58 = vld [vmem:[%s1784_s1 + $0x1a0] sm:$0xff] }
  0x13   :  { %732 = vmatpush.bf16.msra.mxu1 %v1317_v17  ;;  %v1367_v55 = vld [vmem:[%s1784_s1 + $0x1e8] sm:$0xff]  ;;  %v1366_v59 = vld [vmem:[%s1784_s1 + $0x1e0] sm:$0xff]  ;;  %v968_v63 = vld [vmem:[%s1785_s0 + $0x6c] sm:$0xf0] }
  0x14   :  { %751 = vmatpush.bf16.msra.mxu2 %v1325_v18  ;;  %v966_v60 = vld [vmem:[%s1785_s0 + $0x48] sm:$0xf]  ;;  %v1301_v61 = vld [vmem:[%s1785_s0 + $0x68] sm:$0xf0]  ;;  %v974_v0 = vld [vmem:[%s1785_s0 + $0x50] sm:$0xf] }
  0x15   :  { %770 = vmatpush.bf16.msra.mxu3 %v1333_v19  ;;  %v1297_v62 = vld [vmem:[%s1785_s0 + $0x4c] sm:$0xf]  ;;  %v1302_v1 = vld [vmem:[%s1785_s0 + $0x70] sm:$0xf0]  ;;  %v976_v3 = vld [vmem:[%s1785_s0 + $0x74] sm:$0xf0]  ;;  %v967_v6 = vor.u32 %v1301_v61, %v966_v60 }
  0x16   :  { %714 = vmatpush.bf16.msra.mxu0 %v1308_v20  ;;  %v1298_v2 = vld [vmem:[%s1785_s0 + $0x54] sm:$0xf]  ;;  %v1341_v4 = vld [vmem:[%s1784_s1 + $0x118] sm:$0xff]  ;;  %v971_v7 = vor.u32 %v1297_v62, %v968_v63  ;;  %v975_v8 = vor.u32 %v1302_v1, %v974_v0  ;;  %v1339_v16 = vld [vmem:[%s1784_s1 + $0x108] sm:$0xff] }
  0x17   :  { %733 = vmatpush.bf16.msra.mxu1 %v1316_v21  ;;  %v1349_v5 = vld [vmem:[%s1784_s1 + $0x158] sm:$0xff]  ;;  %v979_v9 = vor.u32 %v1298_v2, %v976_v3  ;;  %v1340_v12 = vld [vmem:[%s1784_s1 + $0x110] sm:$0xff]  ;;  %v1347_v17 = vld [vmem:[%s1784_s1 + $0x148] sm:$0xff] }
  0x18   :  { %752 = vmatpush.bf16.msra.mxu2 %v1324_v22  ;;  %v1357_v10 = vld [vmem:[%s1784_s1 + $0x198] sm:$0xff]  ;;  %v1348_v13 = vld [vmem:[%s1784_s1 + $0x150] sm:$0xff]  ;;  %v1355_v18 = vld [vmem:[%s1784_s1 + $0x188] sm:$0xff] }
  0x19   :  { %771 = vmatpush.bf16.msra.mxu3 %v1332_v23  ;;  %v1365_v11 = vld [vmem:[%s1784_s1 + $0x1d8] sm:$0xff]  ;;  %v1356_v14 = vld [vmem:[%s1784_s1 + $0x190] sm:$0xff]  ;;  %v1363_v19 = vld [vmem:[%s1784_s1 + $0x1c8] sm:$0xff] }
  0x1a   :  { %715 = vmatpush.bf16.msra.mxu0 %v1307_v24  ;;  %v1364_v15 = vld [vmem:[%s1784_s1 + $0x1d0] sm:$0xff]  ;;  %v1338_v20 = vld [vmem:[%s1784_s1 + $0x100] sm:$0xff]  ;;  %v1371_v63 = vld [vmem:[%s1784_s1 + $0x208] sm:$0xff] }
  0x1b   :  { %734 = vmatpush.bf16.msra.mxu1 %v1315_v25  ;;  %v1346_v21 = vld [vmem:[%s1784_s1 + $0x140] sm:$0xff]  ;;  %v946_v24 = vld [vmem:[%s1785_s0 + $0x10] sm:$0xf]  ;;  %v1294_v25 = vld [vmem:[%s1785_s0 + $0x30] sm:$0xf0] }
  0x1c   :  { %753 = vmatpush.bf16.msra.mxu2 %v1323_v26  ;;  %v1354_v22 = vld [vmem:[%s1784_s1 + $0x180] sm:$0xff]  ;;  %v1377_v26 = vld [vmem:[%s1784_s1 + $0x238] sm:$0xff]  ;;  %v947_v33 = vor.u32 %v1294_v25, %v946_v24  ;;  %v1376_v37 = vld [vmem:[%s1784_s1 + $0x230] sm:$0xff] }
  0x1d   :  { %772 = vmatpush.bf16.msra.mxu3 %v1331_v27  ;;  %v1362_v23 = vld [vmem:[%s1784_s1 + $0x1c0] sm:$0xff]  ;;  %v1290_v27 = vld [vmem:[%s1785_s0 + $0x14] sm:$0xf]  ;;  %v998_v3 = vld [vmem:[%s1785_s0 + $0x68] sm:$0xf] }
  0x1e   :  { %716 = vmatpush.bf16.msra.mxu0 %v1306_v28  ;;  %v948_v28 = vld [vmem:[%s1785_s0 + $0x34] sm:$0xf0]  ;;  %v956_v32 = vld [vmem:[%s1785_s0 + $0x3c] sm:$0xf0]  ;;  %v1372_v62 = vld [vmem:[%s1784_s1 + $0x210] sm:$0xff] }
  0x1f   :  { %735 = vmatpush.bf16.msra.mxu1 %v1314_v29  ;;  %v954_v29 = vld [vmem:[%s1785_s0 + $0x18] sm:$0xf]  ;;  %v951_v34 = vor.u32 %v1290_v27, %v948_v28  ;;  %v1379_v38 = vld [vmem:[%s1787_s3] sm:$0xff]  }
  0x20   :  { %754 = vmatpush.bf16.msra.mxu2 %v1322_v30  ;;  %v1295_v30 = vld [vmem:[%s1785_s0 + $0x38] sm:$0xf0]  ;;  %v1380_v39 = vunpack.c.l.bf16 %v1379_v38  ;;  %v1370_v0 = vld [vmem:[%s1784_s1 + $0x200] sm:$0xff] }
  0x21   :  { %773 = vmatpush.bf16.msra.mxu3 %v1330_v31  ;;  %717 = vmatmul.bf16.vlgmr.msra.gmra.mxu0 %v931_v42  ;;  %v1291_v31 = vld [vmem:[%s1785_s0 + $0x1c] sm:$0xf]  ;;  %v955_v35 = vor.u32 %v1295_v30, %v954_v29  ;;  %v1396_v42 = vld [vmem:[%s1787_s3 + $0x8] sm:$0xff]   ;;  %v962_v1 = vld [vmem:[%s1785_s0 + $0x20] sm:$0xf] }
  0x22   :  { %785 = vmatpush.bf16.msrb.mxu0 %v1345_v40  ;;  %736 = vmatmul.bf16.vlgmr.msra.gmra.mxu1 %v935_v43  ;;  %v959_v36 = vor.u32 %v1291_v31, %v956_v32  ;;  %v1381_v40 = vunpack.c.h.bf16 %v1379_v38  ;;  %v1419_v43 = vmov 0   ;;  %v1296_v2 = vld [vmem:[%s1785_s0 + $0x40] sm:$0xf0]  ;;  %v1418_v29 = vld [vmem:[%s1786_s2] ss:$0 sm:$0xff] }
  0x23   :  { %804 = vmatpush.bf16.msrb.mxu1 %v1353_v41  ;;  %755 = vmatmul.bf16.vlgmr.msra.gmra.mxu2 %v939_v44  ;;  %v1375_v41 = vld [vmem:[%s1784_s1 + $0x228] sm:$0xff] }
  0x24   :  { %774 = vmatmul.bf16.vlgmr.msra.gmra.mxu3 %v943_v45  ;;  %823 = vmatpush.bf16.msrb.mxu2 %v1361_v46  ;;  %v1408_v44 = vpack.i.bf16 %v1381_v40, %v1380_v39  ;;  %v1384_v45 = vunpack.c.l.bf16 %v1396_v42  ;;  %v1385_v46 = vunpack.c.h.bf16 %v1396_v42 }
  0x25   :  { %842 = vmatpush.bf16.msrb.mxu3 %v1369_v47  ;;  %1407 = vset.pattern.permute.xlu0 %v1419_v43  ;;  %v1374_v47 = vld [vmem:[%s1784_s1 + $0x220] sm:$0xff] }
  0x26   :  { %786 = vmatpush.bf16.msrb.mxu0 %v1344_v48  ;;  %1409 = vperm.xlu0 %1407, %v1408_v44   ;;  %v982_v48 = vld [vmem:[%s1785_s0 + $0x58] sm:$0xf] }
  0x27   :  { %805 = vmatpush.bf16.msrb.mxu1 %v1352_v49  ;;  %v1303_v49 = vld [vmem:[%s1785_s0 + $0x78] sm:$0xf0] }
  0x28   :  { %824 = vmatpush.bf16.msrb.mxu2 %v1360_v50  ;;  %v1299_v50 = vld [vmem:[%s1785_s0 + $0x5c] sm:$0xf] }
  0x29   :  { %843 = vmatpush.bf16.msrb.mxu3 %v1368_v51  ;;  %v984_v51 = vld [vmem:[%s1785_s0 + $0x7c] sm:$0xf0] }
  0x2a   :  { %787 = vmatpush.bf16.msrb.mxu0 %v1343_v52  ;;  %v990_v52 = vld [vmem:[%s1785_s0 + $0x60] sm:$0xf] }
  0x2b   :  { %806 = vmatpush.bf16.msrb.mxu1 %v1351_v53  ;;  %v1304_v53 = vld [vmem:[%s1785_s0 + $0x80] sm:$0xf0] }
  0x2c   :  { %825 = vmatpush.bf16.msrb.mxu2 %v1359_v54  ;;  %v1413_v54 = vpack.i.bf16 %v1385_v46, %v1384_v45  ;;  %v991_v60 = vor.u32 %v1304_v53, %v990_v52 }
  0x2d   :  { %844 = vmatpush.bf16.msrb.mxu3 %v1367_v55  ;;  %v1300_v55 = vld [vmem:[%s1785_s0 + $0x64] sm:$0xf] }
  0x2e   :  { %788 = vmatpush.bf16.msrb.mxu0 %v1342_v56  ;;  %v992_v56 = vld [vmem:[%s1785_s0 + $0x84] sm:$0xf0]  ;;  %1414 = vperm.xlu0 %1407, %v1413_v54  }
  0x2f   :  { %807 = vmatpush.bf16.msrb.mxu1 %v1350_v57  ;;  %v1373_v57 = vld [vmem:[%s1784_s1 + $0x218] sm:$0xff]  ;;  %v995_v61 = vor.u32 %v1300_v55, %v992_v56 }
  0x30   :  { %826 = vmatpush.bf16.msrb.mxu2 %v1358_v58  ;;  %v983_v58 = vor.u32 %v1303_v49, %v982_v48 }
  0x31   :  { %845 = vmatpush.bf16.msrb.mxu3 %v1366_v59  ;;  %722 = vmatmul.bf16.gmra.mxu0 %v967_v6  ;;  %v987_v59 = vor.u32 %v1299_v50, %v984_v51 }
  0x32   :  { %789 = vmatpush.bf16.msrb.mxu0 %v1341_v4  ;;  %741 = vmatmul.bf16.gmra.mxu1 %v971_v7  ;;  %v1305_v4 = vld [vmem:[%s1785_s0 + $0x88] sm:$0xf0] }
  0x33   :  { %808 = vmatpush.bf16.msrb.mxu1 %v1349_v5  ;;  %760 = vmatmul.bf16.gmra.mxu2 %v975_v8  ;;  %v963_v5 = vor.u32 %v1296_v2, %v962_v1  ;;  %v999_v6 = vor.u32 %v1305_v4, %v998_v3 }
  0x34   :  { %779 = vmatmul.bf16.gmra.mxu3 %v979_v9  ;;  %827 = vmatpush.bf16.msrb.mxu2 %v1357_v10 }
  0x35   :  { %846 = vmatpush.bf16.msrb.mxu3 %v1365_v11 }
  0x36   :  { %790 = vmatpush.bf16.msrb.mxu0 %v1340_v12 }
  0x37   :  { %809 = vmatpush.bf16.msrb.mxu1 %v1348_v13 }
  0x38   :  { %828 = vmatpush.bf16.msrb.mxu2 %v1356_v14 }
  0x39   :  { %847 = vmatpush.bf16.msrb.mxu3 %v1364_v15 }
  0x3a   :  { %791 = vmatpush.bf16.msrb.mxu0 %v1339_v16 }
  0x3b   :  { %810 = vmatpush.bf16.msrb.mxu1 %v1347_v17 }
  0x3c   :  { %829 = vmatpush.bf16.msrb.mxu2 %v1355_v18 }
  0x3d   :  { %848 = vmatpush.bf16.msrb.mxu3 %v1363_v19 }
  0x3e   :  { %792 = vmatpush.bf16.msrb.mxu0 %v1338_v20 }
  0x3f   :  { %811 = vmatpush.bf16.msrb.mxu1 %v1346_v21 }
  0x40   :  { %830 = vmatpush.bf16.msrb.mxu2 %v1354_v22 }
  0x41   :  { %849 = vmatpush.bf16.msrb.mxu3 %v1362_v23  ;;  %793 = vmatmul.bf16.vlgmr.msrb.gmra.mxu0 %v947_v33 }
  0x42   :  { %861 = vmatpush.bf16.msra.mxu0 %v1377_v26  ;;  %812 = vmatmul.bf16.vlgmr.msrb.gmra.mxu1 %v951_v34 }
  0x43   :  { %1398 = vmatpush.bf16.msra.mxu1 %v1377_v26  ;;  %831 = vmatmul.bf16.vlgmr.msrb.gmra.mxu2 %v955_v35 }
  0x44   :  { %850 = vmatmul.bf16.vlgmr.msrb.gmra.mxu3 %v959_v36 }
  0x46   :  { %862 = vmatpush.bf16.msra.mxu0 %v1376_v37 }
  0x47   :  { %1399 = vmatpush.bf16.msra.mxu1 %v1376_v37 }
  0x4a   :  { %863 = vmatpush.bf16.msra.mxu0 %v1375_v41 }
  0x4b   :  { %1400 = vmatpush.bf16.msra.mxu1 %v1375_v41 }
  0x4e   :  { %864 = vmatpush.bf16.msra.mxu0 %v1374_v47 }
  0x4f   :  { %1401 = vmatpush.bf16.msra.mxu1 %v1374_v47 }
  0x51   :  { %798 = vmatmul.bf16.gmra.mxu0 %v983_v58 }
  0x52   :  { %865 = vmatpush.bf16.msra.mxu0 %v1373_v57  ;;  %817 = vmatmul.bf16.gmra.mxu1 %v987_v59 }
  0x53   :  { %1402 = vmatpush.bf16.msra.mxu1 %v1373_v57  ;;  %836 = vmatmul.bf16.gmra.mxu2 %v991_v60 }
  0x54   :  { %855 = vmatmul.bf16.gmra.mxu3 %v995_v61 }
  0x56   :  { %866 = vmatpush.bf16.msra.mxu0 %v1372_v62 }
  0x57   :  { %1403 = vmatpush.bf16.msra.mxu1 %v1372_v62 }
  0x5a   :  { %867 = vmatpush.bf16.msra.mxu0 %v1371_v63 }
  0x5b   :  { %1404 = vmatpush.bf16.msra.mxu1 %v1371_v63 }
  0x5e   :  { %868 = vmatpush.bf16.msra.mxu0 %v1370_v0 }
  0x5f   :  { %1405 = vmatpush.bf16.msra.mxu1 %v1370_v0 }
  0x61   :  { %869 = vmatmul.bf16.vlgmr.msra.gmra.mxu0 %v963_v5 }
  0x62   :  { %874 = vmatmul.bf16.vlgmr.msra.gmra.mxu1 %v999_v6 }
  0x98   :  { %v1410_v55 = vpop.permute.xlu0 %1409 }
  0x9e   :  { %v718_v7 = vpop.f32.mrf.mxu0 }
  0x9f   :  { %v737_v8 = vpop.f32.mrf.mxu1  ;;  %v719_v30 = vadd.f32 %v1418_v29, %v718_v7 }
  0xa1   :  { %v738_v35 = vadd.f32 %v737_v8, %v719_v30 }
  0xa6   :  { %v756_v9 = vpop.f32.mrf.mxu2  ;;  %v720_v11 = vpop.f32.mrf.mxu0 }
  0xa7   :  { %v775_v10 = vpop.f32.mrf.mxu3  ;;  %v739_v12 = vpop.f32.mrf.mxu1  ;;  %v721_v36 = vadd.f32 %v1418_v29, %v720_v11  ;;  %v757_v40 = vadd.f32 %v756_v9, %v738_v35 }
  0xa9   :  { %v740_v42 = vadd.f32 %v739_v12, %v721_v36  ;;  %v776_v44 = vadd.f32 %v775_v10, %v757_v40  ;;  %v1415_v10 = vpop.permute.xlu0 %1414 }
  0xae   :  { %v758_v13 = vpop.f32.mrf.mxu2  ;;  %v723_v15 = vpop.f32.mrf.mxu0 }
  0xaf   :  { %v777_v14 = vpop.f32.mrf.mxu3  ;;  %v742_v16 = vpop.f32.mrf.mxu1  ;;  %v724_v31 = vadd.f32 %v1418_v29, %v723_v15  ;;  %v759_v45 = vadd.f32 %v758_v13, %v740_v42  ;;  %v1416_v15 = vunpack.i.l.bf16 %v1415_v10 }
  0xb1   :  { %v743_v37 = vadd.f32 %v742_v16, %v724_v31  ;;  %v778_v53 = vadd.f32 %v777_v14, %v759_v45  ;;  %v1411_v14 = vunpack.i.l.bf16 %v1410_v55 }
  0xb6   :  { %v761_v17 = vpop.f32.mrf.mxu2  ;;  %v725_v19 = vpop.f32.mrf.mxu0 }
  0xb7   :  { %v780_v18 = vpop.f32.mrf.mxu3  ;;  %v744_v20 = vpop.f32.mrf.mxu1  ;;  %v726_v38 = vadd.f32 %v1418_v29, %v725_v19  ;;  %v762_v41 = vadd.f32 %v761_v17, %v743_v37 }
  0xb9   :  { %v745_v43 = vadd.f32 %v744_v20, %v726_v38  ;;  %v781_v46 = vadd.f32 %v780_v18, %v762_v41 }
  0xbe   :  { %v763_v21 = vpop.f32.mrf.mxu2  ;;  %v794_v23 = vpop.f32.mrf.mxu0 }
  0xbf   :  { %v782_v22 = vpop.f32.mrf.mxu3  ;;  %v813_v24 = vpop.f32.mrf.mxu1  ;;  %v764_v47 = vadd.f32 %v763_v21, %v745_v43  ;;  %v795_v51 = vadd.f32 %v794_v23, %v776_v44  ;;  %v1417_v23 = vunpack.i.h.bf16 %v1415_v10 }
  0xc1   :  { %v783_v54 = vadd.f32 %v782_v22, %v764_v47  ;;  %v814_v57 = vadd.f32 %v813_v24, %v795_v51  ;;  %v1412_v22 = vunpack.i.h.bf16 %v1410_v55 }
  0xc6   :  { %v832_v25 = vpop.f32.mrf.mxu2  ;;  %v796_v27 = vpop.f32.mrf.mxu0 }
  0xc7   :  { %v851_v26 = vpop.f32.mrf.mxu3  ;;  %v815_v28 = vpop.f32.mrf.mxu1  ;;  %v797_v58 = vadd.f32 %v796_v27, %v778_v53  ;;  %v833_v61 = vadd.f32 %v832_v25, %v814_v57 }
  0xc9   :  { %v816_v2 = vadd.f32 %v815_v28, %v797_v58  ;;  %v852_v4 = vadd.f32 %v851_v26, %v833_v61 }
  0xce   :  { %v834_v32 = vpop.f32.mrf.mxu2  ;;  %v799_v33 = vpop.f32.mrf.mxu0 }
  0xcf   :  { %v818_v34 = vpop.f32.mrf.mxu1  ;;  %v853_v39 = vpop.f32.mrf.mxu3  ;;  %v800_v52 = vadd.f32 %v799_v33, %v781_v46  ;;  %v835_v5 = vadd.f32 %v834_v32, %v816_v2 }
  0xd1   :  { %v819_v59 = vadd.f32 %v818_v34, %v800_v52  ;;  %v854_v12 = vadd.f32 %v853_v39, %v835_v5 }
  0xd6   :  { %v837_v48 = vpop.f32.mrf.mxu2  ;;  %v801_v49 = vpop.f32.mrf.mxu0 }
  0xd7   :  { %v820_v50 = vpop.f32.mrf.mxu1  ;;  %v856_v56 = vpop.f32.mrf.mxu3  ;;  %v802_v60 = vadd.f32 %v801_v49, %v783_v54  ;;  %v838_v62 = vadd.f32 %v837_v48, %v819_v59 }
  0xd9   :  { %v821_v3 = vadd.f32 %v820_v50, %v802_v60  ;;  %v857_v6 = vadd.f32 %v856_v56, %v838_v62 }
  0xde   :  { %v839_v63 = vpop.f32.mrf.mxu2  ;;  %v870_v0 = vpop.f32.mrf.mxu0 }
  0xdf   :  { %v875_v1 = vpop.f32.mrf.mxu1  ;;  %v840_v7 = vadd.f32 %v839_v63, %v821_v3  ;;  %v871_v8 = vadd.f32 %v870_v0, %v852_v4  ;;  %v858_v11 = vpop.f32.mrf.mxu3 }
  0xe0   :  { %v876_v9 = vadd.f32 %v875_v1, %v857_v6 }
  0xe1   :  { %v859_v13 = vadd.f32 %v858_v11, %v840_v7  ;;  %v880_v18 = vmax.f32 %v871_v8, 0.0 }
  0xe2   :  { %v882_v19 = vmax.f32 %v876_v9, 0.0 }
  0xe3   :  { %v912_v26 = vmul.f32 %v1411_v14, %v880_v18 }
  0xe4   :  { %v914_v27 = vmul.f32 %v1416_v15, %v882_v19 }
  0xe6   :  { %v872_v16 = vpop.f32.mrf.mxu0 }
  0xe7   :  { %v877_v17 = vpop.f32.mrf.mxu1  ;;  %v873_v20 = vadd.f32 %v872_v16, %v854_v12 }
  0xe8   :  { %v878_v21 = vadd.f32 %v877_v17, %v859_v13 }
  0xe9   :  { %v881_v24 = vmax.f32 %v873_v20, 0.0 }
  0xea   :  { %v883_v25 = vmax.f32 %v878_v21, 0.0 }
  0xeb   :  { %v913_v28 = vmul.f32 %v1412_v22, %v881_v24 }
  0xec   :  { %v915_v29 = vmul.f32 %v1417_v23, %v883_v25 }
  0xed   :  { %v1389_v30 = vpack.c.bf16 %v913_v28, %v912_v26 }
  0xee   :  { %v1394_v31 = vpack.c.bf16 %v915_v29, %v914_v27 }
  0xef   :  { %1390 = vst [vmem:[%s1788_s4] sm:$0xff] %v1389_v30  }
  0xf0   :  { %1397 = vst [vmem:[%s1788_s4 + $0x8] sm:$0xff] %v1394_v31  }

// kernel: pillar_backbone_forward.22
= control target key start
LH: loop header
LB: loop body
LE: loop exit
PB: predicated region body
PF: predicated region fallthrough
CT: control target
= control target key end

     0   :  { %s2847_s1 = inlined_call_operand.vmem [shape: bf16[1152,256], index: 1, kind: input, shape index: {}]   ;;  %s2848_s0 = inlined_call_operand.vmem [shape: bf16[8,1152], index: 0, kind: input, shape index: {}]   ;;  %s2849_s3 = inlined_call_operand.vmem [shape: bf16[8,1], index: 3, kind: input, shape index: {}]   ;;  %s2850_s2 = inlined_call_operand.vmem [shape: f32[1,256], index: 2, kind: input, shape index: {}]   ;;  %s2851_s4 = inlined_call_operand.vmem [shape: bf16[8,256], index: 4, kind: output, shape index: {}]  }
   0x1   :  { %v1233_v0 = vld [vmem:[%s2847_s1 + $0x70] sm:$0xf]  ;;  %v1766_v1 = vld [vmem:[%s2847_s1 + $0x74] sm:$0xf0]  ;;  %v1225_v9 = vld [vmem:[%s2847_s1 + $0x60] sm:$0xf] }
   0x2   :  { %v1297_v2 = vld [vmem:[%s2847_s1 + $0xf0] sm:$0xf]  ;;  %v1234_v3 = vor.u32 %v1766_v1, %v1233_v0  ;;  %v1782_v4 = vld [vmem:[%s2847_s1 + $0xf4] sm:$0xf0]  ;;  %v1764_v10 = vld [vmem:[%s2847_s1 + $0x64] sm:$0xf0] }
   0x3   :  { %v1361_v5 = vld [vmem:[%s2847_s1 + $0x170] sm:$0xf]  ;;  %v1798_v6 = vld [vmem:[%s2847_s1 + $0x174] sm:$0xf0]  ;;  %v1298_v7 = vor.u32 %v1782_v4, %v1297_v2  ;;  %v1289_v11 = vld [vmem:[%s2847_s1 + $0xe0] sm:$0xf]  ;;  %v1226_v12 = vor.u32 %v1764_v10, %v1225_v9 }
   0x4   :  { %v1362_v8 = vor.u32 %v1798_v6, %v1361_v5  ;;  %924 = vmatpush.bf16.msra.mxu0 %v1234_v3  ;;  %v1780_v13 = vld [vmem:[%s2847_s1 + $0xe4] sm:$0xf0]  ;;  %v1425_v14 = vld [vmem:[%s2847_s1 + $0x1f0] sm:$0xf]  ;;  %v1814_v15 = vld [vmem:[%s2847_s1 + $0x1f4] sm:$0xf0] }
   0x5   :  { %937 = vmatpush.bf16.msra.mxu1 %v1298_v7  ;;  %v1290_v16 = vor.u32 %v1780_v13, %v1289_v11  ;;  %v1426_v17 = vor.u32 %v1814_v15, %v1425_v14  ;;  %v1353_v18 = vld [vmem:[%s2847_s1 + $0x160] sm:$0xf]  ;;  %v1796_v19 = vld [vmem:[%s2847_s1 + $0x164] sm:$0xf0]  ;;  %v1217_v20 = vld [vmem:[%s2847_s1 + $0x50] sm:$0xf] }
   0x6   :  { %950 = vmatpush.bf16.msra.mxu2 %v1362_v8  ;;  %v1354_v21 = vor.u32 %v1796_v19, %v1353_v18  ;;  %v1762_v22 = vld [vmem:[%s2847_s1 + $0x54] sm:$0xf0]  ;;  %v1281_v23 = vld [vmem:[%s2847_s1 + $0xd0] sm:$0xf]  ;;  %v1417_v25 = vld [vmem:[%s2847_s1 + $0x1e0] sm:$0xf] }
   0x7   :  { %v1778_v24 = vld [vmem:[%s2847_s1 + $0xd4] sm:$0xf0]  ;;  %963 = vmatpush.bf16.msra.mxu3 %v1426_v17  ;;  %v1812_v26 = vld [vmem:[%s2847_s1 + $0x1e4] sm:$0xf0]  ;;  %v1345_v27 = vld [vmem:[%s2847_s1 + $0x150] sm:$0xf]  ;;  %v1218_v28 = vor.u32 %v1762_v22, %v1217_v20 }
   0x8   :  { %925 = vmatpush.bf16.msra.mxu0 %v1226_v12  ;;  %v1418_v29 = vor.u32 %v1812_v26, %v1417_v25  ;;  %v1794_v30 = vld [vmem:[%s2847_s1 + $0x154] sm:$0xf0]  ;;  %v1209_v31 = vld [vmem:[%s2847_s1 + $0x40] sm:$0xf]  ;;  %v1760_v32 = vld [vmem:[%s2847_s1 + $0x44] sm:$0xf0]  ;;  %v1282_v33 = vor.u32 %v1778_v24, %v1281_v23 }
   0x9   :  { %938 = vmatpush.bf16.msra.mxu1 %v1290_v16  ;;  %v1346_v34 = vor.u32 %v1794_v30, %v1345_v27  ;;  %v1273_v35 = vld [vmem:[%s2847_s1 + $0xc0] sm:$0xf]  ;;  %v1776_v36 = vld [vmem:[%s2847_s1 + $0xc4] sm:$0xf0]  ;;  %v1409_v37 = vld [vmem:[%s2847_s1 + $0x1d0] sm:$0xf]  ;;  %v1210_v42 = vor.u32 %v1760_v32, %v1209_v31 }
   0xa   :  { %951 = vmatpush.bf16.msra.mxu2 %v1354_v21  ;;  %v1810_v38 = vld [vmem:[%s2847_s1 + $0x1d4] sm:$0xf0]  ;;  %v1337_v39 = vld [vmem:[%s2847_s1 + $0x140] sm:$0xf]  ;;  %v1792_v40 = vld [vmem:[%s2847_s1 + $0x144] sm:$0xf0]  ;;  %v1274_v45 = vor.u32 %v1776_v36, %v1273_v35 }
   0xb   :  { %964 = vmatpush.bf16.msra.mxu3 %v1418_v29  ;;  %v1410_v41 = vor.u32 %v1810_v38, %v1409_v37  ;;  %v1401_v43 = vld [vmem:[%s2847_s1 + $0x1c0] sm:$0xf]  ;;  %v1808_v44 = vld [vmem:[%s2847_s1 + $0x1c4] sm:$0xf0]  ;;  %v1338_v46 = vor.u32 %v1792_v40, %v1337_v39  ;;  %v1201_v47 = vld [vmem:[%s2847_s1 + $0x30] sm:$0xf] }
   0xc   :  { %926 = vmatpush.bf16.msra.mxu0 %v1218_v28  ;;  %v1758_v48 = vld [vmem:[%s2847_s1 + $0x34] sm:$0xf0]  ;;  %v1265_v49 = vld [vmem:[%s2847_s1 + $0xb0] sm:$0xf]  ;;  %v1402_v53 = vor.u32 %v1808_v44, %v1401_v43  ;;  %v1193_v59 = vld [vmem:[%s2847_s1 + $0x20] sm:$0xf] }
   0xd   :  { %939 = vmatpush.bf16.msra.mxu1 %v1282_v33  ;;  %v1774_v50 = vld [vmem:[%s2847_s1 + $0xb4] sm:$0xf0]  ;;  %v1329_v51 = vld [vmem:[%s2847_s1 + $0x130] sm:$0xf]  ;;  %v1202_v54 = vor.u32 %v1758_v48, %v1201_v47  ;;  %v1756_v60 = vld [vmem:[%s2847_s1 + $0x24] sm:$0xf0] }
   0xe   :  { %952 = vmatpush.bf16.msra.mxu2 %v1346_v34  ;;  %v1790_v52 = vld [vmem:[%s2847_s1 + $0x134] sm:$0xf0]  ;;  %v1393_v55 = vld [vmem:[%s2847_s1 + $0x1b0] sm:$0xf]  ;;  %v1266_v57 = vor.u32 %v1774_v50, %v1265_v49  ;;  %v1257_v61 = vld [vmem:[%s2847_s1 + $0xa0] sm:$0xf]  ;;  %v1194_v2 = vor.u32 %v1756_v60, %v1193_v59 }
   0xf   :  { %965 = vmatpush.bf16.msra.mxu3 %v1410_v41  ;;  %v1806_v56 = vld [vmem:[%s2847_s1 + $0x1b4] sm:$0xf0]  ;;  %v1330_v58 = vor.u32 %v1790_v52, %v1329_v51  ;;  %v1772_v62 = vld [vmem:[%s2847_s1 + $0xa4] sm:$0xf0]  ;;  %v1321_v63 = vld [vmem:[%s2847_s1 + $0x120] sm:$0xf] }
  0x10   :  { %927 = vmatpush.bf16.msra.mxu0 %v1210_v42  ;;  %v1788_v0 = vld [vmem:[%s2847_s1 + $0x124] sm:$0xf0]  ;;  %v1394_v1 = vor.u32 %v1806_v56, %v1393_v55  ;;  %v1385_v3 = vld [vmem:[%s2847_s1 + $0x1a0] sm:$0xf]  ;;  %v1258_v5 = vor.u32 %v1772_v62, %v1257_v61  ;;  %v1185_v7 = vld [vmem:[%s2847_s1 + $0x10] sm:$0xf] }
  0x11   :  { %940 = vmatpush.bf16.msra.mxu1 %v1274_v45  ;;  %v1804_v4 = vld [vmem:[%s2847_s1 + $0x1a4] sm:$0xf0]  ;;  %v1322_v6 = vor.u32 %v1788_v0, %v1321_v63  ;;  %v1754_v8 = vld [vmem:[%s2847_s1 + $0x14] sm:$0xf0]  ;;  %v1249_v9 = vld [vmem:[%s2847_s1 + $0x90] sm:$0xf] }
  0x12   :  { %953 = vmatpush.bf16.msra.mxu2 %v1338_v46  ;;  %v1770_v10 = vld [vmem:[%s2847_s1 + $0x94] sm:$0xf0]  ;;  %v1313_v11 = vld [vmem:[%s2847_s1 + $0x110] sm:$0xf]  ;;  %v1386_v13 = vor.u32 %v1804_v4, %v1385_v3  ;;  %v1177_v14 = vld [vmem:[%s2847_s1] sm:$0xf]  ;;  %v1186_v15 = vor.u32 %v1754_v8, %v1185_v7 }
  0x13   :  { %966 = vmatpush.bf16.msra.mxu3 %v1402_v53  ;;  %v1786_v12 = vld [vmem:[%s2847_s1 + $0x114] sm:$0xf0]  ;;  %v1752_v16 = vld [vmem:[%s2847_s1 + $0x4] sm:$0xf0]  ;;  %v1377_v17 = vld [vmem:[%s2847_s1 + $0x190] sm:$0xf]  ;;  %v1250_v19 = vor.u32 %v1770_v10, %v1249_v9 }
  0x14   :  { %928 = vmatpush.bf16.msra.mxu0 %v1202_v54  ;;  %v1802_v18 = vld [vmem:[%s2847_s1 + $0x194] sm:$0xf0]  ;;  %v1314_v20 = vor.u32 %v1786_v12, %v1313_v11  ;;  %v1241_v21 = vld [vmem:[%s2847_s1 + $0x80] sm:$0xf]  ;;  %v1768_v22 = vld [vmem:[%s2847_s1 + $0x84] sm:$0xf0]  ;;  %v1178_v31 = vor.u32 %v1752_v16, %v1177_v14 }
  0x15   :  { %941 = vmatpush.bf16.msra.mxu1 %v1266_v57  ;;  %v1489_v23 = vld [vmem:[%s2847_s1 + $0x270] sm:$0xf]  ;;  %v1830_v24 = vld [vmem:[%s2847_s1 + $0x274] sm:$0xf0]  ;;  %v1378_v27 = vor.u32 %v1802_v18, %v1377_v17  ;;  %v1305_v28 = vld [vmem:[%s2847_s1 + $0x100] sm:$0xf]  ;;  %v1242_v35 = vor.u32 %v1768_v22, %v1241_v21 }
  0x16   :  { %954 = vmatpush.bf16.msra.mxu2 %v1330_v58  ;;  %v1553_v25 = vld [vmem:[%s2847_s1 + $0x2f0] sm:$0xf]  ;;  %v1846_v26 = vld [vmem:[%s2847_s1 + $0x2f4] sm:$0xf0]  ;;  %v1784_v29 = vld [vmem:[%s2847_s1 + $0x104] sm:$0xf0]  ;;  %v1490_v36 = vor.u32 %v1830_v24, %v1489_v23 }
  0x17   :  { %967 = vmatpush.bf16.msra.mxu3 %v1394_v1  ;;  %v1617_v30 = vld [vmem:[%s2847_s1 + $0x370] sm:$0xf]  ;;  %v1862_v32 = vld [vmem:[%s2847_s1 + $0x374] sm:$0xf0]  ;;  %v1369_v33 = vld [vmem:[%s2847_s1 + $0x180] sm:$0xf]  ;;  %v1554_v39 = vor.u32 %v1846_v26, %v1553_v25  ;;  %v1306_v40 = vor.u32 %v1784_v29, %v1305_v28 }
  0x18   :  { %929 = vmatpush.bf16.msra.mxu0 %v1194_v2  ;;  %v1800_v34 = vld [vmem:[%s2847_s1 + $0x184] sm:$0xf0]  ;;  %v1681_v37 = vld [vmem:[%s2847_s1 + $0x3f0] sm:$0xf]  ;;  %v1878_v38 = vld [vmem:[%s2847_s1 + $0x3f4] sm:$0xf0]  ;;  %v1618_v43 = vor.u32 %v1862_v32, %v1617_v30 }
  0x19   :  { %942 = vmatpush.bf16.msra.mxu1 %v1258_v5  ;;  %v1481_v41 = vld [vmem:[%s2847_s1 + $0x260] sm:$0xf]  ;;  %v1828_v42 = vld [vmem:[%s2847_s1 + $0x264] sm:$0xf0]  ;;  %v1370_v44 = vor.u32 %v1800_v34, %v1369_v33  ;;  %v1682_v47 = vor.u32 %v1878_v38, %v1681_v37  ;;  %v1473_v54 = vld [vmem:[%s2847_s1 + $0x250] sm:$0xf] }
  0x1a   :  { %955 = vmatpush.bf16.msra.mxu2 %v1322_v6  ;;  %v1545_v45 = vld [vmem:[%s2847_s1 + $0x2e0] sm:$0xf]  ;;  %v1844_v46 = vld [vmem:[%s2847_s1 + $0x2e4] sm:$0xf0]  ;;  %v1482_v50 = vor.u32 %v1828_v42, %v1481_v41  ;;  %v1826_v55 = vld [vmem:[%s2847_s1 + $0x254] sm:$0xf0] }
  0x1b   :  { %968 = vmatpush.bf16.msra.mxu3 %v1386_v13  ;;  %v1609_v48 = vld [vmem:[%s2847_s1 + $0x360] sm:$0xf]  ;;  %v1860_v49 = vld [vmem:[%s2847_s1 + $0x364] sm:$0xf0]  ;;  %v1546_v53 = vor.u32 %v1844_v46, %v1545_v45  ;;  %v1537_v58 = vld [vmem:[%s2847_s1 + $0x2d0] sm:$0xf]  ;;  %v1474_v2 = vor.u32 %v1826_v55, %v1473_v54 }
  0x1c   :  { %930 = vmatpush.bf16.msra.mxu0 %v1186_v15  ;;  %v1673_v51 = vld [vmem:[%s2847_s1 + $0x3e0] sm:$0xf]  ;;  %v1876_v52 = vld [vmem:[%s2847_s1 + $0x3e4] sm:$0xf0]  ;;  %v1610_v57 = vor.u32 %v1860_v49, %v1609_v48  ;;  %v1842_v59 = vld [vmem:[%s2847_s1 + $0x2d4] sm:$0xf0] }
  0x1d   :  { %943 = vmatpush.bf16.msra.mxu1 %v1250_v19  ;;  %v18_v56 = vld [vmem:[%s2848_s0 + $0x8] sm:$0xff]  ;;  %v1674_v62 = vor.u32 %v1876_v52, %v1673_v51  ;;  %v1601_v63 = vld [vmem:[%s2847_s1 + $0x350] sm:$0xf]  ;;  %v1858_v0 = vld [vmem:[%s2847_s1 + $0x354] sm:$0xf0]  ;;  %v1538_v8 = vor.u32 %v1842_v59, %v1537_v58 }
  0x1e   :  { %956 = vmatpush.bf16.msra.mxu2 %v1314_v20  ;;  %v179_v60 = vunpack.c.l.b16 %v18_v56  ;;  %v180_v61 = vunpack.c.h.b16 %v18_v56  ;;  %v17_v1 = vld [vmem:[%s2848_s0] sm:$0xff]  ;;  %v1665_v3 = vld [vmem:[%s2847_s1 + $0x3d0] sm:$0xf]  ;;  %v1874_v4 = vld [vmem:[%s2847_s1 + $0x3d4] sm:$0xf0]  ;;  %v1602_v12 = vor.u32 %v1858_v0, %v1601_v63 }
  0x1f   :  { %969 = vmatpush.bf16.msra.mxu3 %v1378_v27  ;;  %v177_v6 = vunpack.c.l.b16 %v17_v1  ;;  %v1465_v9 = vld [vmem:[%s2847_s1 + $0x240] sm:$0xf]  ;;  %v1824_v10 = vld [vmem:[%s2847_s1 + $0x244] sm:$0xf0]  ;;  %v178_v11 = vunpack.c.h.b16 %v17_v1  ;;  %v1666_v16 = vor.u32 %v1874_v4, %v1665_v3  ;;  %v1457_v24 = vld [vmem:[%s2847_s1 + $0x230] sm:$0xf] }
  0x20   :  { %931 = vmatpush.bf16.msra.mxu0 %v1178_v31  ;;  %v2193_v5 = vpack.c.b16 %v179_v60, %v179_v60  ;;  %v2195_v7 = vpack.c.b16 %v180_v61, %v180_v61  ;;  %v1529_v13 = vld [vmem:[%s2847_s1 + $0x2c0] sm:$0xf]  ;;  %v1840_v14 = vld [vmem:[%s2847_s1 + $0x2c4] sm:$0xf0]  ;;  %v1466_v20 = vor.u32 %v1824_v10, %v1465_v9  ;;  %v1822_v25 = vld [vmem:[%s2847_s1 + $0x234] sm:$0xf0] }
  0x21   :  { %944 = vmatpush.bf16.msra.mxu1 %v1242_v35  ;;  %v2209_v15 = vpack.c.b16 %v177_v6, %v177_v6  ;;  %v1593_v17 = vld [vmem:[%s2847_s1 + $0x340] sm:$0xf]  ;;  %v1856_v18 = vld [vmem:[%s2847_s1 + $0x344] sm:$0xf0]  ;;  %v2219_v19 = vpack.c.b16 %v178_v11, %v178_v11  ;;  %v1530_v23 = vor.u32 %v1840_v14, %v1529_v13  ;;  %v1521_v27 = vld [vmem:[%s2847_s1 + $0x2b0] sm:$0xf]  ;;  %v1458_v32 = vor.u32 %v1822_v25, %v1457_v24 }
  0x22   :  { %957 = vmatpush.bf16.msra.mxu2 %v1306_v40  ;;  %v1657_v21 = vld [vmem:[%s2847_s1 + $0x3c0] sm:$0xf]  ;;  %v1872_v22 = vld [vmem:[%s2847_s1 + $0x3c4] sm:$0xf0]  ;;  %v1594_v26 = vor.u32 %v1856_v18, %v1593_v17  ;;  %v1838_v28 = vld [vmem:[%s2847_s1 + $0x2b4] sm:$0xf0] }
  0x23   :  { %970 = vmatpush.bf16.msra.mxu3 %v1370_v44  ;;  %932 = vmatmul.bf16.vlgmr.msra.gmra.mxu0 %v2209_v15  ;;  %v1658_v29 = vor.u32 %v1872_v22, %v1657_v21  ;;  %v1585_v30 = vld [vmem:[%s2847_s1 + $0x330] sm:$0xf]  ;;  %v1854_v31 = vld [vmem:[%s2847_s1 + $0x334] sm:$0xf0]  ;;  %v1522_v35 = vor.u32 %v1838_v28, %v1521_v27  ;;  %v1820_v37 = vld [vmem:[%s2847_s1 + $0x224] sm:$0xf0] }
  0x24   :  { %976 = vmatpush.bf16.msrb.mxu0 %v1490_v36  ;;  %945 = vmatmul.bf16.vlgmr.msra.gmra.mxu1 %v2219_v19  ;;  %v1649_v33 = vld [vmem:[%s2847_s1 + $0x3b0] sm:$0xf]  ;;  %v1870_v34 = vld [vmem:[%s2847_s1 + $0x3b4] sm:$0xf0]  ;;  %v1449_v36 = vld [vmem:[%s2847_s1 + $0x220] sm:$0xf]  ;;  %v1586_v38 = vor.u32 %v1854_v31, %v1585_v30 }
  0x25   :  { %989 = vmatpush.bf16.msrb.mxu1 %v1554_v39  ;;  %958 = vmatmul.bf16.vlgmr.msra.gmra.mxu2 %v2193_v5  ;;  %v1513_v39 = vld [vmem:[%s2847_s1 + $0x2a0] sm:$0xf]  ;;  %v1836_v40 = vld [vmem:[%s2847_s1 + $0x2a4] sm:$0xf0]  ;;  %v1650_v41 = vor.u32 %v1870_v34, %v1649_v33  ;;  %v1450_v44 = vor.u32 %v1820_v37, %v1449_v36  ;;  %v1441_v48 = vld [vmem:[%s2847_s1 + $0x210] sm:$0xf] }
  0x26   :  { %1002 = vmatpush.bf16.msrb.mxu2 %v1618_v43  ;;  %971 = vmatmul.bf16.vlgmr.msra.gmra.mxu3 %v2195_v7  ;;  %v1577_v42 = vld [vmem:[%s2847_s1 + $0x320] sm:$0xf]  ;;  %v1852_v43 = vld [vmem:[%s2847_s1 + $0x324] sm:$0xf0]  ;;  %v1818_v49 = vld [vmem:[%s2847_s1 + $0x214] sm:$0xf0] }
  0x27   :  { %1015 = vmatpush.bf16.msrb.mxu3 %v1682_v47  ;;  %v1641_v45 = vld [vmem:[%s2847_s1 + $0x3a0] sm:$0xf]  ;;  %v1868_v46 = vld [vmem:[%s2847_s1 + $0x3a4] sm:$0xf0]  ;;  %v1514_v47 = vor.u32 %v1836_v40, %v1513_v39  ;;  %v1505_v51 = vld [vmem:[%s2847_s1 + $0x290] sm:$0xf]  ;;  %v1442_v58 = vor.u32 %v1818_v49, %v1441_v48 }
  0x28   :  { %977 = vmatpush.bf16.msrb.mxu0 %v1482_v50  ;;  %v1578_v50 = vor.u32 %v1852_v43, %v1577_v42  ;;  %v1834_v52 = vld [vmem:[%s2847_s1 + $0x294] sm:$0xf0]  ;;  %v1642_v54 = vor.u32 %v1868_v46, %v1641_v45  ;;  %v1433_v56 = vld [vmem:[%s2847_s1 + $0x200] sm:$0xf]  ;;  %v1832_v60 = vld [vmem:[%s2847_s1 + $0x284] sm:$0xf0] }
  0x29   :  { %990 = vmatpush.bf16.msrb.mxu1 %v1546_v53  ;;  %v1569_v53 = vld [vmem:[%s2847_s1 + $0x310] sm:$0xf]  ;;  %v1850_v55 = vld [vmem:[%s2847_s1 + $0x314] sm:$0xf0]  ;;  %v1497_v59 = vld [vmem:[%s2847_s1 + $0x280] sm:$0xf]  ;;  %v1506_v63 = vor.u32 %v1834_v52, %v1505_v51 }
  0x2a   :  { %1003 = vmatpush.bf16.msrb.mxu2 %v1610_v57  ;;  %v1816_v57 = vld [vmem:[%s2847_s1 + $0x204] sm:$0xf0]  ;;  %v1633_v61 = vld [vmem:[%s2847_s1 + $0x390] sm:$0xf]  ;;  %v1894_v1 = vld [vmem:[%s2847_s1 + $0x474] sm:$0xf0]  ;;  %v1570_v3 = vor.u32 %v1850_v55, %v1569_v53 }
  0x2b   :  { %1016 = vmatpush.bf16.msrb.mxu3 %v1674_v62  ;;  %v1866_v62 = vld [vmem:[%s2847_s1 + $0x394] sm:$0xf0]  ;;  %v1745_v0 = vld [vmem:[%s2847_s1 + $0x470] sm:$0xf]  ;;  %v1765_v4 = vld [vmem:[%s2847_s1 + $0x74] sm:$0xf]  ;;  %v1434_v13 = vor.u32 %v1816_v57, %v1433_v56 }
  0x2c   :  { %978 = vmatpush.bf16.msrb.mxu0 %v1474_v2  ;;  %v19_v2 = vld [vmem:[%s2848_s0 + $0x10] sm:$0xff]  ;;  %v1235_v6 = vld [vmem:[%s2847_s1 + $0x78] sm:$0xf0]  ;;  %v1634_v9 = vor.u32 %v1866_v62, %v1633_v61  ;;  %v1561_v10 = vld [vmem:[%s2847_s1 + $0x300] sm:$0xf]  ;;  %v1746_v21 = vor.u32 %v1894_v1, %v1745_v0 }
  0x2d   :  { %991 = vmatpush.bf16.msrb.mxu1 %v1538_v8  ;;  %v20_v8 = vld [vmem:[%s2848_s0 + $0x18] sm:$0xff]  ;;  %v1848_v11 = vld [vmem:[%s2847_s1 + $0x304] sm:$0xf0]  ;;  %v181_v18 = vunpack.c.l.b16 %v19_v2  ;;  %v1797_v22 = vld [vmem:[%s2847_s1 + $0x174] sm:$0xf]  ;;  %v1238_v25 = vor.u32 %v1765_v4, %v1235_v6  ;;  %v182_v34 = vunpack.c.h.b16 %v19_v2 }
  0x2e   :  { %1004 = vmatpush.bf16.msrb.mxu2 %v1602_v12  ;;  %v1781_v12 = vld [vmem:[%s2847_s1 + $0xf4] sm:$0xf]  ;;  %v1299_v14 = vld [vmem:[%s2847_s1 + $0xf8] sm:$0xf0]  ;;  %v1864_v17 = vld [vmem:[%s2847_s1 + $0x384] sm:$0xf0]  ;;  %v183_v24 = vunpack.c.l.b16 %v20_v8 }
  0x2f   :  { %1017 = vmatpush.bf16.msrb.mxu3 %v1666_v16  ;;  %v1625_v16 = vld [vmem:[%s2847_s1 + $0x380] sm:$0xf]  ;;  %v1892_v28 = vld [vmem:[%s2847_s1 + $0x464] sm:$0xf0]  ;;  %v1302_v30 = vor.u32 %v1781_v12, %v1299_v14  ;;  %v1227_v33 = vld [vmem:[%s2847_s1 + $0x68] sm:$0xf0] }
  0x30   :  { %979 = vmatpush.bf16.msrb.mxu0 %v1466_v20  ;;  %v1498_v20 = vor.u32 %v1832_v60, %v1497_v59  ;;  %v1737_v27 = vld [vmem:[%s2847_s1 + $0x460] sm:$0xf]  ;;  %v1626_v31 = vor.u32 %v1864_v17, %v1625_v16  ;;  %v1779_v36 = vld [vmem:[%s2847_s1 + $0xe4] sm:$0xf]  ;;  %v1291_v37 = vld [vmem:[%s2847_s1 + $0xe8] sm:$0xf0]  ;;  %v2375_v40 = vpack.c.b16 %v183_v24, %v183_v24 }
  0x31   :  { %992 = vmatpush.bf16.msrb.mxu1 %v1530_v23  ;;  %v1363_v23 = vld [vmem:[%s2847_s1 + $0x178] sm:$0xf0]  ;;  %v1738_v39 = vor.u32 %v1892_v28, %v1737_v27  ;;  %v1355_v42 = vld [vmem:[%s2847_s1 + $0x168] sm:$0xf0]  ;;  %v1729_v45 = vld [vmem:[%s2847_s1 + $0x450] sm:$0xf] }
  0x32   :  { %1005 = vmatpush.bf16.msrb.mxu2 %v1594_v26  ;;  %v1562_v26 = vor.u32 %v1848_v11, %v1561_v10  ;;  %v1890_v46 = vld [vmem:[%s2847_s1 + $0x454] sm:$0xf0]  ;;  %v1761_v48 = vld [vmem:[%s2847_s1 + $0x54] sm:$0xf]  ;;  %v1219_v49 = vld [vmem:[%s2847_s1 + $0x58] sm:$0xf0] }
  0x33   :  { %1018 = vmatpush.bf16.msrb.mxu3 %v1658_v29  ;;  %v184_v29 = vunpack.c.h.b16 %v20_v8  ;;  %v1777_v52 = vld [vmem:[%s2847_s1 + $0xd4] sm:$0xf]  ;;  %v1283_v53 = vld [vmem:[%s2847_s1 + $0xd8] sm:$0xf0]  ;;  %v1222_v57 = vor.u32 %v1761_v48, %v1219_v49  ;;  %v1888_v59 = vld [vmem:[%s2847_s1 + $0x444] sm:$0xf0] }
  0x34   :  { %980 = vmatpush.bf16.msrb.mxu0 %v1458_v32  ;;  %v1763_v32 = vld [vmem:[%s2847_s1 + $0x64] sm:$0xf]  ;;  %v1793_v55 = vld [vmem:[%s2847_s1 + $0x154] sm:$0xf]  ;;  %v1347_v56 = vld [vmem:[%s2847_s1 + $0x158] sm:$0xf0]  ;;  %v1286_v60 = vor.u32 %v1777_v52, %v1283_v53 }
  0x35   :  { %993 = vmatpush.bf16.msrb.mxu1 %v1522_v35  ;;  %v1366_v35 = vor.u32 %v1797_v22, %v1363_v23  ;;  %v1230_v43 = vor.u32 %v1763_v32, %v1227_v33  ;;  %v1759_v61 = vld [vmem:[%s2847_s1 + $0x44] sm:$0xf]  ;;  %v1211_v62 = vld [vmem:[%s2847_s1 + $0x48] sm:$0xf0]  ;;  %v1713_v8 = vld [vmem:[%s2847_s1 + $0x430] sm:$0xf] }
  0x36   :  { %1006 = vmatpush.bf16.msrb.mxu2 %v1586_v38  ;;  %v2373_v38 = vpack.c.b16 %v181_v18, %v181_v18  ;;  %v1775_v0 = vld [vmem:[%s2847_s1 + $0xc4] sm:$0xf]  ;;  %v1275_v1 = vld [vmem:[%s2847_s1 + $0xc8] sm:$0xf0]  ;;  %v1214_v6 = vor.u32 %v1759_v61, %v1211_v62  ;;  %v1757_v11 = vld [vmem:[%s2847_s1 + $0x34] sm:$0xf] }
  0x37   :  { %1019 = vmatpush.bf16.msrb.mxu3 %v1650_v41  ;;  %v1795_v41 = vld [vmem:[%s2847_s1 + $0x164] sm:$0xf]  ;;  %v1339_v4 = vld [vmem:[%s2847_s1 + $0x148] sm:$0xf0]  ;;  %v1278_v10 = vor.u32 %v1775_v0, %v1275_v1  ;;  %v1203_v12 = vld [vmem:[%s2847_s1 + $0x38] sm:$0xf0] }
  0x38   :  { %981 = vmatpush.bf16.msrb.mxu0 %v1450_v44  ;;  %v2383_v44 = vpack.c.b16 %v184_v29, %v184_v29  ;;  %v1358_v51 = vor.u32 %v1795_v41, %v1355_v42  ;;  %v1773_v14 = vld [vmem:[%s2847_s1 + $0xb4] sm:$0xf]  ;;  %v1267_v16 = vld [vmem:[%s2847_s1 + $0xb8] sm:$0xf0]  ;;  %v1705_v22 = vld [vmem:[%s2847_s1 + $0x420] sm:$0xf] }
  0x39   :  { %994 = vmatpush.bf16.msrb.mxu1 %v1514_v47  ;;  %v1294_v47 = vor.u32 %v1779_v36, %v1291_v37  ;;  %v1789_v18 = vld [vmem:[%s2847_s1 + $0x134] sm:$0xf]  ;;  %v1884_v23 = vld [vmem:[%s2847_s1 + $0x424] sm:$0xf0]  ;;  %v1270_v24 = vor.u32 %v1773_v14, %v1267_v16  ;;  %v1771_v28 = vld [vmem:[%s2847_s1 + $0xa4] sm:$0xf] }
  0x3a   :  { %1007 = vmatpush.bf16.msrb.mxu2 %v1578_v50  ;;  %v2397_v50 = vpack.c.b16 %v182_v34, %v182_v34  ;;  %v1259_v29 = vld [vmem:[%s2847_s1 + $0xa8] sm:$0xf0]  ;;  %v1787_v32 = vld [vmem:[%s2847_s1 + $0x124] sm:$0xf]  ;;  %v1160_v34 = vld [vmem:[%s2849_s3] sm:$0xf] }
  0x3b   :  { %1020 = vmatpush.bf16.msrb.mxu3 %v1642_v54  ;;  %v1730_v54 = vor.u32 %v1890_v46, %v1729_v45  ;;  %v1323_v33 = vld [vmem:[%s2847_s1 + $0x128] sm:$0xf0]  ;;  %v1697_v36 = vld [vmem:[%s2847_s1 + $0x410] sm:$0xf]  ;;  %v1882_v37 = vld [vmem:[%s2847_s1 + $0x414] sm:$0xf0]  ;;  %v1262_v41 = vor.u32 %v1771_v28, %v1259_v29 }
  0x3c   :  { %982 = vmatpush.bf16.msrb.mxu0 %v1442_v58  ;;  %v1721_v58 = vld [vmem:[%s2847_s1 + $0x440] sm:$0xf]  ;;  %v1753_v42 = vld [vmem:[%s2847_s1 + $0x14] sm:$0xf]  ;;  %v1326_v45 = vor.u32 %v1787_v32, %v1323_v33  ;;  %v1698_v49 = vor.u32 %v1882_v37, %v1697_v36  ;;  %v1315_v52 = vld [vmem:[%s2847_s1 + $0x118] sm:$0xf0] }
  0x3d   :  { %995 = vmatpush.bf16.msrb.mxu1 %v1506_v63  ;;  %v1350_v63 = vor.u32 %v1793_v55, %v1347_v56  ;;  %v1722_v2 = vor.u32 %v1888_v59, %v1721_v58  ;;  %v1769_v46 = vld [vmem:[%s2847_s1 + $0x94] sm:$0xf]  ;;  %v1689_v48 = vld [vmem:[%s2847_s1 + $0x400] sm:$0xf]  ;;  %v1880_v55 = vld [vmem:[%s2847_s1 + $0x404] sm:$0xf0] }
  0x3e   :  { %1008 = vmatpush.bf16.msrb.mxu2 %v1570_v3  ;;  %v1791_v3 = vld [vmem:[%s2847_s1 + $0x144] sm:$0xf]  ;;  %v21_v53 = vld [vmem:[%s2848_s0 + $0x20] sm:$0xf]  ;;  %v1813_v59 = vld [vmem:[%s2847_s1 + $0x1f4] sm:$0xf] }
  0x3f   :  { %1021 = vmatpush.bf16.msrb.mxu3 %v1634_v9  ;;  %v1886_v9 = vld [vmem:[%s2847_s1 + $0x434] sm:$0xf0]  ;;  %v1751_v56 = vld [vmem:[%s2847_s1 + $0x4] sm:$0xf]  ;;  %v1829_v61 = vld [vmem:[%s2847_s1 + $0x274] sm:$0xf]  ;;  %v185_v0 = vunpack.c.l.b16 %v21_v53 }
  0x40   :  { %983 = vmatpush.bf16.msrb.mxu0 %v1434_v13  ;;  %v1342_v13 = vor.u32 %v1791_v3, %v1339_v4  ;;  %v1714_v17 = vor.u32 %v1886_v9, %v1713_v8  ;;  %v1767_v1 = vld [vmem:[%s2847_s1 + $0x84] sm:$0xf]  ;;  %v1690_v3 = vor.u32 %v1880_v55, %v1689_v48  ;;  %v1845_v4 = vld [vmem:[%s2847_s1 + $0x2f4] sm:$0xf]  ;;  %v1419_v16 = vld [vmem:[%s2847_s1 + $0x1e8] sm:$0xf0] }
  0x41   :  { %996 = vmatpush.bf16.msrb.mxu1 %v1498_v20  ;;  %v1331_v20 = vld [vmem:[%s2847_s1 + $0x138] sm:$0xf0]  ;;  %v1809_v29 = vld [vmem:[%s2847_s1 + $0x1d4] sm:$0xf]  ;;  %v1859_v32 = vld [vmem:[%s2847_s1 + $0x364] sm:$0xf] }
  0x42   :  { %1009 = vmatpush.bf16.msrb.mxu2 %v1562_v26  ;;  %v1195_v26 = vld [vmem:[%s2847_s1 + $0x28] sm:$0xf0]  ;;  %v1334_v27 = vor.u32 %v1789_v18, %v1331_v20  ;;  %v1619_v18 = vld [vmem:[%s2847_s1 + $0x378] sm:$0xf0]  ;;  %v2571_v20 = vpack.c.b16 %v185_v0, %v185_v0  ;;  %v1841_v37 = vld [vmem:[%s2847_s1 + $0x2d4] sm:$0xf] }
  0x43   :  { %1022 = vmatpush.bf16.msrb.mxu3 %v1626_v31  ;;  %984 = vmatmul.bf16.vlgmr.msrb.gmra.mxu0 %v2373_v38  ;;  %v1706_v31 = vor.u32 %v1884_v23, %v1705_v22  ;;  %v1827_v22 = vld [vmem:[%s2847_s1 + $0x264] sm:$0xf]  ;;  %v1483_v23 = vld [vmem:[%s2847_s1 + $0x268] sm:$0xf0]  ;;  %v1475_v36 = vld [vmem:[%s2847_s1 + $0x258] sm:$0xf0] }
  0x44   :  { %1028 = vmatpush.bf16.msra.mxu0 %v1746_v21  ;;  %997 = vmatmul.bf16.vlgmr.msrb.gmra.mxu1 %v2397_v50  ;;  %v1206_v21 = vor.u32 %v1757_v11, %v1203_v12  ;;  %v1307_v11 = vld [vmem:[%s2847_s1 + $0x108] sm:$0xf0]  ;;  %v1811_v12 = vld [vmem:[%s2847_s1 + $0x1e4] sm:$0xf]  ;;  %v1805_v55 = vld [vmem:[%s2847_s1 + $0x1b4] sm:$0xf] }
  0x45   :  { %1041 = vmatpush.bf16.msra.mxu1 %v1238_v25  ;;  %1010 = vmatmul.bf16.vlgmr.msrb.gmra.mxu2 %v2375_v40  ;;  %v1755_v25 = vld [vmem:[%s2847_s1 + $0x24] sm:$0xf]  ;;  %v1611_v33 = vld [vmem:[%s2847_s1 + $0x368] sm:$0xf0] }
  0x46   :  { %1054 = vmatpush.bf16.msra.mxu2 %v1302_v30  ;;  %1023 = vmatmul.bf16.vlgmr.msrb.gmra.mxu3 %v2383_v44  ;;  %v1897_v30 = vmov 0  }
  0x47   :  { %1067 = vmatpush.bf16.msra.mxu3 %v1366_v35  ;;  %1896 = vset.pattern.permute.xlu0 %v1897_v30  ;;  %v1198_v35 = vor.u32 %v1755_v25, %v1195_v26  ;;  %v1843_v25 = vld [vmem:[%s2847_s1 + $0x2e4] sm:$0xf]  ;;  %v1547_v26 = vld [vmem:[%s2847_s1 + $0x2e8] sm:$0xf0]  ;;  %v1486_v30 = vor.u32 %v1827_v22, %v1483_v23 }
  0x48   :  { %1029 = vmatpush.bf16.msra.mxu0 %v1738_v39  ;;  %v1161_v39 = vunpack.c.l.bf16 %v1160_v34  ;;  %v1550_v34 = vor.u32 %v1843_v25, %v1547_v26  ;;  %v1851_v22 = vld [vmem:[%s2847_s1 + $0x324] sm:$0xf]  ;;  %v1579_v23 = vld [vmem:[%s2847_s1 + $0x328] sm:$0xf0]  ;;  %v1817_v25 = vld [vmem:[%s2847_s1 + $0x214] sm:$0xf] }
  0x49   :  { %1042 = vmatpush.bf16.msra.mxu1 %v1230_v43  ;;  %v1187_v43 = vld [vmem:[%s2847_s1 + $0x18] sm:$0xf0] }
  0x4a   :  { %1055 = vmatpush.bf16.msra.mxu2 %v1294_v47  ;;  %v1251_v47 = vld [vmem:[%s2847_s1 + $0x98] sm:$0xf0]  ;;  %1164 = vperm.xlu0 %1896, %v1161_v39  }
  0x4b   :  { %1068 = vmatpush.bf16.msra.mxu3 %v1358_v51  ;;  %v1785_v51 = vld [vmem:[%s2847_s1 + $0x114] sm:$0xf]  ;;  %v1254_v58 = vor.u32 %v1769_v46, %v1251_v47  ;;  %v1539_v39 = vld [vmem:[%s2847_s1 + $0x2d8] sm:$0xf0]  ;;  %v1403_v46 = vld [vmem:[%s2847_s1 + $0x1c8] sm:$0xf0] }
  0x4c   :  { %1030 = vmatpush.bf16.msra.mxu0 %v1730_v54  ;;  %v1190_v54 = vor.u32 %v1753_v42, %v1187_v43  ;;  %v1318_v62 = vor.u32 %v1785_v51, %v1315_v52  ;;  %v1614_v42 = vor.u32 %v1859_v32, %v1611_v33  ;;  %v1807_v43 = vld [vmem:[%s2847_s1 + $0x1c4] sm:$0xf]  ;;  %v1857_v47 = vld [vmem:[%s2847_s1 + $0x354] sm:$0xf]  ;;  %v1542_v48 = vor.u32 %v1841_v37, %v1539_v39  ;;  %v1467_v51 = vld [vmem:[%s2847_s1 + $0x248] sm:$0xf0] }
  0x4d   :  { %1043 = vmatpush.bf16.msra.mxu1 %v1222_v57  ;;  %v1179_v57 = vld [vmem:[%s2847_s1 + $0x8] sm:$0xf0]  ;;  %v1839_v52 = vld [vmem:[%s2847_s1 + $0x2c4] sm:$0xf]  ;;  %v1406_v53 = vor.u32 %v1807_v43, %v1403_v46  ;;  %v1443_v26 = vld [vmem:[%s2847_s1 + $0x218] sm:$0xf0] }
  0x4e   :  { %1056 = vmatpush.bf16.msra.mxu2 %v1286_v60  ;;  %v1427_v60 = vld [vmem:[%s2847_s1 + $0x1f8] sm:$0xf0]  ;;  %v1182_v8 = vor.u32 %v1751_v56, %v1179_v57  ;;  %v1855_v57 = vld [vmem:[%s2847_s1 + $0x344] sm:$0xf]  ;;  %v1371_v32 = vld [vmem:[%s2847_s1 + $0x188] sm:$0xf0] }
  0x4f   :  { %1069 = vmatpush.bf16.msra.mxu3 %v1350_v63  ;;  %v1491_v63 = vld [vmem:[%s2847_s1 + $0x278] sm:$0xf0]  ;;  %v1430_v9 = vor.u32 %v1813_v59, %v1427_v60  ;;  %v1821_v60 = vld [vmem:[%s2847_s1 + $0x234] sm:$0xf]  ;;  %v1815_v33 = vld [vmem:[%s2847_s1 + $0x204] sm:$0xf] }
  0x50   :  { %1031 = vmatpush.bf16.msra.mxu0 %v1722_v2  ;;  %v1243_v2 = vld [vmem:[%s2847_s1 + $0x88] sm:$0xf0]  ;;  %v1571_v37 = vld [vmem:[%s2847_s1 + $0x318] sm:$0xf0]  ;;  %v1893_v43 = vld [vmem:[%s2847_s1 + $0x474] sm:$0xf] }
  0x51   :  { %1044 = vmatpush.bf16.msra.mxu1 %v1214_v6  ;;  %v1555_v6 = vld [vmem:[%s2847_s1 + $0x2f8] sm:$0xf0]  ;;  %v1246_v14 = vor.u32 %v1767_v1, %v1243_v2  ;;  %v1803_v2 = vld [vmem:[%s2847_s1 + $0x1a4] sm:$0xf] }
  0x52   :  { %1057 = vmatpush.bf16.msra.mxu2 %v1278_v10  ;;  %v1783_v10 = vld [vmem:[%s2847_s1 + $0x104] sm:$0xf] }
  0x53   :  { %1070 = vmatpush.bf16.msra.mxu3 %v1342_v13  ;;  %v1494_v13 = vor.u32 %v1829_v61, %v1491_v63  ;;  %v1459_v61 = vld [vmem:[%s2847_s1 + $0x238] sm:$0xf0]  ;;  %v1831_v46 = vld [vmem:[%s2847_s1 + $0x284] sm:$0xf] }
  0x54   :  { %1032 = vmatpush.bf16.msra.mxu0 %v1714_v17  ;;  %v1861_v17 = vld [vmem:[%s2847_s1 + $0x374] sm:$0xf]  ;;  %v1523_v63 = vld [vmem:[%s2847_s1 + $0x2b8] sm:$0xf0] }
  0x55   :  { %1045 = vmatpush.bf16.msra.mxu1 %v1206_v21  ;;  %v1558_v21 = vor.u32 %v1845_v4, %v1555_v6  ;;  %v1622_v28 = vor.u32 %v1861_v17, %v1619_v18  ;;  %v1387_v4 = vld [vmem:[%s2847_s1 + $0x1a8] sm:$0xf0]  ;;  %v1853_v6 = vld [vmem:[%s2847_s1 + $0x334] sm:$0xf] }
  0x56   :  { %1058 = vmatpush.bf16.msra.mxu2 %v1270_v24  ;;  %v1310_v24 = vor.u32 %v1783_v10, %v1307_v11  ;;  %v1819_v10 = vld [vmem:[%s2847_s1 + $0x224] sm:$0xf]  ;;  %v1451_v11 = vld [vmem:[%s2847_s1 + $0x228] sm:$0xf0]  ;;  %v1801_v17 = vld [vmem:[%s2847_s1 + $0x194] sm:$0xf] }
  0x57   :  { %1071 = vmatpush.bf16.msra.mxu3 %v1334_v27  ;;  %v1422_v27 = vor.u32 %v1811_v12, %v1419_v16  ;;  %v1835_v12 = vld [vmem:[%s2847_s1 + $0x2a4] sm:$0xf]  ;;  %v1454_v18 = vor.u32 %v1819_v10, %v1451_v11  ;;  %v1715_v10 = vld [vmem:[%s2847_s1 + $0x438] sm:$0xf0] }
  0x58   :  { %1033 = vmatpush.bf16.msra.mxu0 %v1706_v31  ;;  %v1411_v31 = vld [vmem:[%s2847_s1 + $0x1d8] sm:$0xf0] }
  0x59   :  { %1046 = vmatpush.bf16.msra.mxu1 %v1198_v35  ;;  %v1825_v35 = vld [vmem:[%s2847_s1 + $0x254] sm:$0xf] }
  0x5a   :  { %1059 = vmatpush.bf16.msra.mxu2 %v1262_v41  ;;  %v1414_v41 = vor.u32 %v1809_v29, %v1411_v31  ;;  %v1799_v31 = vld [vmem:[%s2847_s1 + $0x184] sm:$0xf] }
  0x5b   :  { %1072 = vmatpush.bf16.msra.mxu3 %v1326_v45  ;;  %v1478_v45 = vor.u32 %v1825_v35, %v1475_v36  ;;  %v1435_v35 = vld [vmem:[%s2847_s1 + $0x208] sm:$0xf0]  ;;  %v1849_v36 = vld [vmem:[%s2847_s1 + $0x314] sm:$0xf] }
  0x5c   :  { %1034 = vmatpush.bf16.msra.mxu0 %v1698_v49  ;;  %v1823_v49 = vld [vmem:[%s2847_s1 + $0x244] sm:$0xf] }
  0x5d   :  { %1047 = vmatpush.bf16.msra.mxu1 %v1190_v54  ;;  %v1470_v56 = vor.u32 %v1823_v49, %v1467_v51  ;;  %v1438_v49 = vor.u32 %v1815_v33, %v1435_v35 }
  0x5e   :  { %1060 = vmatpush.bf16.msra.mxu2 %v1254_v58  ;;  %v1595_v58 = vld [vmem:[%s2847_s1 + $0x348] sm:$0xf0] }
  0x5f   :  { %1073 = vmatpush.bf16.msra.mxu3 %v1318_v62  ;;  %v1837_v62 = vld [vmem:[%s2847_s1 + $0x2b4] sm:$0xf]  ;;  %v1598_v1 = vor.u32 %v1855_v57, %v1595_v58  ;;  %v1739_v57 = vld [vmem:[%s2847_s1 + $0x468] sm:$0xf0] }
  0x60   :  { %1035 = vmatpush.bf16.msra.mxu0 %v1690_v3  ;;  %v1462_v3 = vor.u32 %v1821_v60, %v1459_v61  ;;  %v1873_v61 = vld [vmem:[%s2847_s1 + $0x3d4] sm:$0xf] }
  0x61   :  { %1048 = vmatpush.bf16.msra.mxu1 %v1182_v8  ;;  %v1587_v8 = vld [vmem:[%s2847_s1 + $0x338] sm:$0xf0] }
  0x62   :  { %1061 = vmatpush.bf16.msra.mxu2 %v1246_v14  ;;  %v1390_v14 = vor.u32 %v1803_v2, %v1387_v4  ;;  %v1590_v16 = vor.u32 %v1853_v6, %v1587_v8  ;;  %v1869_v8 = vld [vmem:[%s2847_s1 + $0x3b4] sm:$0xf] }
  0x63   :  { %1036 = vmatmul.bf16.vlgmr.msra.gmra.mxu0 %v2571_v20  ;;  %1074 = vmatpush.bf16.msra.mxu3 %v1310_v24 }
  0x64   :  { %1080 = vmatpush.bf16.msrb.mxu0 %v1430_v9  ;;  %1049 = vmatmul.bf16.vlgmr.msra.gmra.mxu1 %v2209_v15  ;;  %v1603_v15 = vld [vmem:[%s2847_s1 + $0x358] sm:$0xf0]  ;;  %v1526_v9 = vor.u32 %v1837_v62, %v1523_v63  ;;  %v1889_v63 = vld [vmem:[%s2847_s1 + $0x454] sm:$0xf] }
  0x65   :  { %1093 = vmatpush.bf16.msrb.mxu1 %v1494_v13  ;;  %1062 = vmatmul.bf16.vlgmr.msra.gmra.mxu2 %v2219_v19  ;;  %v1531_v19 = vld [vmem:[%s2847_s1 + $0x2c8] sm:$0xf0]  ;;  %v1606_v54 = vor.u32 %v1857_v47, %v1603_v15  ;;  %v1374_v15 = vor.u32 %v1799_v31, %v1371_v32  ;;  %v1667_v62 = vld [vmem:[%s2847_s1 + $0x3d8] sm:$0xf0] }
  0x66   :  { %1106 = vmatpush.bf16.msrb.mxu2 %v1558_v21  ;;  %1075 = vmatmul.bf16.vlgmr.msra.gmra.mxu3 %v2193_v5  ;;  %v1395_v5 = vld [vmem:[%s2847_s1 + $0x1b8] sm:$0xf0]  ;;  %v1534_v59 = vor.u32 %v1839_v52, %v1531_v19  ;;  %v1515_v13 = vld [vmem:[%s2847_s1 + $0x2a8] sm:$0xf0]  ;;  %v1847_v52 = vld [vmem:[%s2847_s1 + $0x304] sm:$0xf] }
  0x67   :  { %1119 = vmatpush.bf16.msrb.mxu3 %v1622_v28  ;;  %v1398_v0 = vor.u32 %v1805_v55, %v1395_v5  ;;  %v1379_v21 = vld [vmem:[%s2847_s1 + $0x198] sm:$0xf0]  ;;  %v1518_v24 = vor.u32 %v1835_v12, %v1515_v13  ;;  %v1499_v47 = vld [vmem:[%s2847_s1 + $0x288] sm:$0xf0]  ;;  %v1875_v55 = vld [vmem:[%s2847_s1 + $0x3e4] sm:$0xf] }
  0x68   :  { %1081 = vmatpush.bf16.msrb.mxu0 %v1422_v27  ;;  %v1833_v27 = vld [vmem:[%s2847_s1 + $0x294] sm:$0xf]  ;;  %v1507_v28 = vld [vmem:[%s2847_s1 + $0x298] sm:$0xf0]  ;;  %v1382_v29 = vor.u32 %v1801_v17, %v1379_v21  ;;  %v1563_v19 = vld [vmem:[%s2847_s1 + $0x308] sm:$0xf0] }
  0x69   :  { %1094 = vmatpush.bf16.msrb.mxu1 %v1486_v30  ;;  %v1582_v30 = vor.u32 %v1851_v22, %v1579_v23  ;;  %v1510_v39 = vor.u32 %v1833_v27, %v1507_v28  ;;  %v1891_v5 = vld [vmem:[%s2847_s1 + $0x464] sm:$0xf]  ;;  %v1566_v58 = vor.u32 %v1847_v52, %v1563_v19  ;;  %v1707_v17 = vld [vmem:[%s2847_s1 + $0x428] sm:$0xf0]  ;;  %v1865_v22 = vld [vmem:[%s2847_s1 + $0x394] sm:$0xf] }
  0x6a   :  { %1107 = vmatpush.bf16.msrb.mxu2 %v1550_v34  ;;  %v1446_v34 = vor.u32 %v1817_v25, %v1443_v26  ;;  %v1742_v60 = vor.u32 %v1891_v5, %v1739_v57  ;;  %v1867_v13 = vld [vmem:[%s2847_s1 + $0x3a4] sm:$0xf]  ;;  %v1635_v23 = vld [vmem:[%s2847_s1 + $0x398] sm:$0xf0]  ;;  %v1691_v31 = vld [vmem:[%s2847_s1 + $0x408] sm:$0xf0] }
  0x6b   :  { %1120 = vmatpush.bf16.msrb.mxu3 %v1614_v42  ;;  %v1683_v42 = vld [vmem:[%s2847_s1 + $0x3f8] sm:$0xf0]  ;;  %v1638_v26 = vor.u32 %v1865_v22, %v1635_v23  ;;  %v1863_v28 = vld [vmem:[%s2847_s1 + $0x384] sm:$0xf] }
  0x6c   :  { %1082 = vmatpush.bf16.msrb.mxu0 %v1414_v41  ;;  %v1877_v41 = vld [vmem:[%s2847_s1 + $0x3f4] sm:$0xf]  ;;  %v1699_v25 = vld [vmem:[%s2847_s1 + $0x418] sm:$0xf0] }
  0x6d   :  { %1095 = vmatpush.bf16.msrb.mxu1 %v1478_v45  ;;  %v1747_v45 = vld [vmem:[%s2847_s1 + $0x478] sm:$0xf0]  ;;  %v1686_v51 = vor.u32 %v1877_v41, %v1683_v42 }
  0x6e   :  { %1108 = vmatpush.bf16.msrb.mxu2 %v1542_v48  ;;  %v1574_v48 = vor.u32 %v1849_v36, %v1571_v37 }
  0x6f   :  { %1121 = vmatpush.bf16.msrb.mxu3 %v1606_v54  ;;  %v1502_v54 = vor.u32 %v1831_v46, %v1499_v47 }
  0x70   :  { %1083 = vmatpush.bf16.msrb.mxu0 %v1406_v53  ;;  %v1750_v53 = vor.u32 %v1893_v43, %v1747_v45 }
  0x71   :  { %1096 = vmatpush.bf16.msrb.mxu1 %v1470_v56  ;;  %v1675_v56 = vld [vmem:[%s2847_s1 + $0x3e8] sm:$0xf0] }
  0x72   :  { %1109 = vmatpush.bf16.msrb.mxu2 %v1534_v59  ;;  %v1678_v59 = vor.u32 %v1875_v55, %v1675_v56 }
  0x73   :  { %1122 = vmatpush.bf16.msrb.mxu3 %v1598_v1  ;;  %v1670_v1 = vor.u32 %v1873_v61, %v1667_v62 }
  0x74   :  { %1084 = vmatpush.bf16.msrb.mxu0 %v1398_v0  ;;  %v1731_v0 = vld [vmem:[%s2847_s1 + $0x458] sm:$0xf0] }
  0x75   :  { %1097 = vmatpush.bf16.msrb.mxu1 %v1462_v3  ;;  %v1734_v2 = vor.u32 %v1889_v63, %v1731_v0  ;;  %v1659_v3 = vld [vmem:[%s2847_s1 + $0x3c8] sm:$0xf0] }
  0x76   :  { %1110 = vmatpush.bf16.msrb.mxu2 %v1526_v9  ;;  %v1885_v9 = vld [vmem:[%s2847_s1 + $0x434] sm:$0xf] }
  0x77   :  { %1123 = vmatpush.bf16.msrb.mxu3 %v1590_v16  ;;  %v1718_v12 = vor.u32 %v1885_v9, %v1715_v10  ;;  %v1883_v16 = vld [vmem:[%s2847_s1 + $0x424] sm:$0xf] }
  0x78   :  { %1085 = vmatpush.bf16.msrb.mxu0 %v1390_v14  ;;  %v1643_v14 = vld [vmem:[%s2847_s1 + $0x3a8] sm:$0xf0]  ;;  %v1710_v21 = vor.u32 %v1883_v16, %v1707_v17 }
  0x79   :  { %1098 = vmatpush.bf16.msrb.mxu1 %v1454_v18  ;;  %v1646_v18 = vor.u32 %v1867_v13, %v1643_v14 }
  0x7a   :  { %1111 = vmatpush.bf16.msrb.mxu2 %v1518_v24  ;;  %v1881_v24 = vld [vmem:[%s2847_s1 + $0x414] sm:$0xf] }
  0x7b   :  { %1124 = vmatpush.bf16.msrb.mxu3 %v1582_v30  ;;  %v1702_v27 = vor.u32 %v1881_v24, %v1699_v25  ;;  %v1879_v30 = vld [vmem:[%s2847_s1 + $0x404] sm:$0xf] }
  0x7c   :  { %1086 = vmatpush.bf16.msrb.mxu0 %v1382_v29  ;;  %v1627_v29 = vld [vmem:[%s2847_s1 + $0x388] sm:$0xf0]  ;;  %v1694_v33 = vor.u32 %v1879_v30, %v1691_v31 }
  0x7d   :  { %1099 = vmatpush.bf16.msrb.mxu1 %v1446_v34  ;;  %v1630_v32 = vor.u32 %v1863_v28, %v1627_v29  ;;  %v166_v34 = vld [vmem:[%s2850_s2] sm:$0x3] }
  0x7e   :  { %1112 = vmatpush.bf16.msrb.mxu2 %v1510_v39  ;;  %v168_v35 = vperm.slane %v166_v34, 0 }
  0x7f   :  { %1125 = vmatpush.bf16.msrb.mxu3 %v1574_v48 }
  0x80   :  { %1087 = vmatpush.bf16.msrb.mxu0 %v1374_v15 }
  0x81   :  { %1100 = vmatpush.bf16.msrb.mxu1 %v1438_v49 }
  0x82   :  { %1113 = vmatpush.bf16.msrb.mxu2 %v1502_v54 }
  0x83   :  { %1088 = vmatmul.bf16.vlgmr.msrb.gmra.mxu0 %v2195_v7  ;;  %1126 = vmatpush.bf16.msrb.mxu3 %v1566_v58  ;;  %v1871_v7 = vld [vmem:[%s2847_s1 + $0x3c4] sm:$0xf] }
  0x84   :  { %1132 = vmatpush.bf16.msra.mxu0 %v1686_v51  ;;  %1101 = vmatmul.bf16.vlgmr.msrb.gmra.mxu1 %v2373_v38  ;;  %v1887_v38 = vld [vmem:[%s2847_s1 + $0x444] sm:$0xf]  ;;  %v1662_v4 = vor.u32 %v1871_v7, %v1659_v3  ;;  %v169_v7 = vperm.slane %v166_v34, 1 }
  0x85   :  { %1145 = vmatpush.bf16.msra.mxu1 %v1750_v53  ;;  %1114 = vmatmul.bf16.vlgmr.msrb.gmra.mxu2 %v2397_v50  ;;  %v1723_v50 = vld [vmem:[%s2847_s1 + $0x448] sm:$0xf0] }
  0x86   :  { %1127 = vmatmul.bf16.vlgmr.msrb.gmra.mxu3 %v2375_v40  ;;  %v1726_v6 = vor.u32 %v1887_v38, %v1723_v50  ;;  %v1651_v40 = vld [vmem:[%s2847_s1 + $0x3b8] sm:$0xf0] }
  0x87   :  { %v1654_v11 = vor.u32 %v1869_v8, %v1651_v40 }
  0x88   :  { %1133 = vmatpush.bf16.msra.mxu0 %v1678_v59 }
  0x89   :  { %1146 = vmatpush.bf16.msra.mxu1 %v1742_v60 }
  0x8c   :  { %1134 = vmatpush.bf16.msra.mxu0 %v1670_v1 }
  0x8d   :  { %1147 = vmatpush.bf16.msra.mxu1 %v1734_v2 }
  0x90   :  { %1135 = vmatpush.bf16.msra.mxu0 %v1662_v4 }
  0x91   :  { %1148 = vmatpush.bf16.msra.mxu1 %v1726_v6 }
  0x94   :  { %1136 = vmatpush.bf16.msra.mxu0 %v1654_v11 }
  0x95   :  { %1149 = vmatpush.bf16.msra.mxu1 %v1718_v12 }
  0x98   :  { %1137 = vmatpush.bf16.msra.mxu0 %v1646_v18 }
  0x99   :  { %1150 = vmatpush.bf16.msra.mxu1 %v1710_v21 }
  0x9c   :  { %1138 = vmatpush.bf16.msra.mxu0 %v1638_v26 }
  0x9d   :  { %1151 = vmatpush.bf16.msra.mxu1 %v1702_v27 }
  0xa0   :  { %1139 = vmatpush.bf16.msra.mxu0 %v1630_v32  ;;  %v933_v36 = vpop.f32.mrf.mxu0 }
  0xa1   :  { %1152 = vmatpush.bf16.msra.mxu1 %v1694_v33  ;;  %v934_v37 = vadd.f32 %v933_v36, %v168_v35  ;;  %v946_v39 = vpop.f32.mrf.mxu1 }
  0xa3   :  { %1140 = vmatmul.bf16.vlgmr.msra.gmra.mxu0 %v2383_v44  ;;  %v947_v41 = vadd.f32 %v946_v39, %v934_v37 }
  0xa4   :  { %1153 = vmatmul.bf16.vlgmr.msra.gmra.mxu1 %v2571_v20 }
  0xa8   :  { %v959_v43 = vpop.f32.mrf.mxu2  ;;  %v935_v47 = vpop.f32.mrf.mxu0 }
  0xa9   :  { %v972_v42 = vpop.f32.mrf.mxu3  ;;  %v960_v45 = vadd.f32 %v959_v43, %v947_v41  ;;  %v948_v15 = vpop.f32.mrf.mxu1 }
  0xab   :  { %v973_v46 = vadd.f32 %v972_v42, %v960_v45 }
  0xb0   :  { %v961_v49 = vpop.f32.mrf.mxu2 }
  0xb1   :  { %v974_v48 = vpop.f32.mrf.mxu3 }
  0xbc   :  { %v1165_v26 = vpop.permute.xlu0 %1164 }
  0xc0   :  { %v985_v44 = vpop.f32.mrf.mxu0 }
  0xc1   :  { %v986_v51 = vadd.f32 %v985_v44, %v973_v46  ;;  %v998_v20 = vpop.f32.mrf.mxu1 }
  0xc3   :  { %v999_v52 = vadd.f32 %v998_v20, %v986_v51 }
  0xc8   :  { %v1011_v19 = vpop.f32.mrf.mxu2  ;;  %v987_v55 = vpop.f32.mrf.mxu0 }
  0xc9   :  { %v1012_v53 = vadd.f32 %v1011_v19, %v999_v52  ;;  %v1024_v54 = vpop.f32.mrf.mxu3  ;;  %v1000_v5 = vpop.f32.mrf.mxu1 }
  0xcb   :  { %v1025_v56 = vadd.f32 %v1024_v54, %v1012_v53 }
  0xd0   :  { %v1013_v57 = vpop.f32.mrf.mxu2 }
  0xd1   :  { %v1026_v58 = vpop.f32.mrf.mxu3 }
  0xe0   :  { %v1037_v59 = vpop.f32.mrf.mxu0 }
  0xe1   :  { %v1050_v60 = vpop.f32.mrf.mxu1  ;;  %v1038_v17 = vadd.f32 %v1037_v59, %v1025_v56 }
  0xe2   :  { %v1051_v50 = vadd.f32 %v1050_v60, %v169_v7 }
  0xe3   :  { %v1158_v24 = vmax.f32 %v1038_v17, 0.0 }
  0xe5   :  { %v1167_v28 = vmul.f32 %v1165_v26, %v1158_v24 }
  0xe8   :  { %v1039_v61 = vpop.f32.mrf.mxu0  ;;  %v1063_v62 = vpop.f32.mrf.mxu2 }
  0xe9   :  { %v1052_v63 = vpop.f32.mrf.mxu1  ;;  %v1076_v0 = vpop.f32.mrf.mxu3  ;;  %v1064_v4 = vadd.f32 %v1063_v62, %v1051_v50 }
  0xeb   :  { %v1077_v10 = vadd.f32 %v1076_v0, %v1064_v4 }
  0xf0   :  { %v1065_v1 = vpop.f32.mrf.mxu2 }
  0xf1   :  { %v1078_v2 = vpop.f32.mrf.mxu3 }
 0x100   :  { %v1089_v3 = vpop.f32.mrf.mxu0 }
 0x101   :  { %v1102_v38 = vpop.f32.mrf.mxu1  ;;  %v1090_v11 = vadd.f32 %v1089_v3, %v1077_v10 }
 0x103   :  { %v1103_v14 = vadd.f32 %v1102_v38, %v1090_v11 }
 0x108   :  { %v1115_v6 = vpop.f32.mrf.mxu2  ;;  %v1091_v8 = vpop.f32.mrf.mxu0 }
 0x109   :  { %v1104_v40 = vpop.f32.mrf.mxu1  ;;  %v1128_v9 = vpop.f32.mrf.mxu3  ;;  %v1116_v16 = vadd.f32 %v1115_v6, %v1103_v14 }
 0x10b   :  { %v1129_v18 = vadd.f32 %v1128_v9, %v1116_v16 }
 0x110   :  { %v1117_v12 = vpop.f32.mrf.mxu2 }
 0x111   :  { %v1130_v13 = vpop.f32.mrf.mxu3 }
 0x120   :  { %v1141_v21 = vpop.f32.mrf.mxu0 }
 0x121   :  { %v1142_v22 = vadd.f32 %v1141_v21, %v1129_v18  ;;  %v1154_v23 = vpop.f32.mrf.mxu1 }
 0x123   :  { %v1155_v25 = vadd.f32 %v1154_v23, %v1142_v22 }
 0x125   :  { %v1159_v27 = vmax.f32 %v1155_v25, 0.0 }
 0x127   :  { %v1168_v29 = vmul.f32 %v1165_v26, %v1159_v27 }
 0x128   :  { %v1143_v30 = vpop.f32.mrf.mxu0 }
 0x129   :  { %v1169_v31 = vpack.c.bf16 %v1168_v29, %v1167_v28  ;;  %v1156_v32 = vpop.f32.mrf.mxu1 }
 0x12b   :  { %1170 = vst [vmem:[%s2851_s4] sm:$0xff] %v1169_v31 }

// kernel: pillar_backbone_forward.25
= control target key start
LH: loop header
LB: loop body
LE: loop exit
PB: predicated region body
PF: predicated region fallthrough
CT: control target
= control target key end

     0   :  { %s5602_s1 = inlined_call_operand.vmem [shape: bf16[2304,256], index: 1, kind: input, shape index: {}]   ;;  %s5603_s0 = inlined_call_operand.vmem [shape: bf16[8,2304], index: 0, kind: input, shape index: {}]   ;;  %s5604_s2 = inlined_call_operand.vmem [shape: f32[1,256], index: 2, kind: input, shape index: {}]   ;;  %s5605_s3 = inlined_call_operand.vmem [shape: bf16[8,256], index: 3, kind: output, shape index: {}]  }
   0x1   :  { %v2354_v0 = vld [vmem:[%s5602_s1 + $0x70] sm:$0xf]  ;;  %v3463_v1 = vld [vmem:[%s5602_s1 + $0x74] sm:$0xf0]  ;;  %v2346_v11 = vld [vmem:[%s5602_s1 + $0x60] sm:$0xf] }
   0x2   :  { %v2418_v2 = vld [vmem:[%s5602_s1 + $0xf0] sm:$0xf]  ;;  %v2355_v3 = vor.u32 %v3463_v1, %v2354_v0  ;;  %v3479_v4 = vld [vmem:[%s5602_s1 + $0xf4] sm:$0xf0]  ;;  %v3461_v13 = vld [vmem:[%s5602_s1 + $0x64] sm:$0xf0] }
   0x3   :  { %v2482_v5 = vld [vmem:[%s5602_s1 + $0x170] sm:$0xf]  ;;  %v3495_v6 = vld [vmem:[%s5602_s1 + $0x174] sm:$0xf0]  ;;  %v2419_v7 = vor.u32 %v3479_v4, %v2418_v2  ;;  %v2410_v14 = vld [vmem:[%s5602_s1 + $0xe0] sm:$0xf]  ;;  %v2347_v16 = vor.u32 %v3461_v13, %v2346_v11 }
   0x4   :  { %v2483_v8 = vor.u32 %v3495_v6, %v2482_v5  ;;  %v2546_v9 = vld [vmem:[%s5602_s1 + $0x1f0] sm:$0xf]  ;;  %v3511_v10 = vld [vmem:[%s5602_s1 + $0x1f4] sm:$0xf0]  ;;  %1820 = vmatpush.bf16.msra.mxu0 %v2355_v3  ;;  %v3477_v15 = vld [vmem:[%s5602_s1 + $0xe4] sm:$0xf0] }
   0x5   :  { %v2547_v12 = vor.u32 %v3511_v10, %v2546_v9  ;;  %1833 = vmatpush.bf16.msra.mxu1 %v2419_v7  ;;  %v2411_v17 = vor.u32 %v3477_v15, %v2410_v14  ;;  %v2474_v18 = vld [vmem:[%s5602_s1 + $0x160] sm:$0xf]  ;;  %v3493_v19 = vld [vmem:[%s5602_s1 + $0x164] sm:$0xf0]  ;;  %v2338_v23 = vld [vmem:[%s5602_s1 + $0x50] sm:$0xf] }
   0x6   :  { %1846 = vmatpush.bf16.msra.mxu2 %v2483_v8  ;;  %v2538_v20 = vld [vmem:[%s5602_s1 + $0x1e0] sm:$0xf]  ;;  %v2475_v21 = vor.u32 %v3493_v19, %v2474_v18  ;;  %v3509_v22 = vld [vmem:[%s5602_s1 + $0x1e4] sm:$0xf0]  ;;  %v3459_v24 = vld [vmem:[%s5602_s1 + $0x54] sm:$0xf0] }
   0x7   :  { %1859 = vmatpush.bf16.msra.mxu3 %v2547_v12  ;;  %v2539_v25 = vor.u32 %v3509_v22, %v2538_v20  ;;  %v2402_v26 = vld [vmem:[%s5602_s1 + $0xd0] sm:$0xf]  ;;  %v3475_v27 = vld [vmem:[%s5602_s1 + $0xd4] sm:$0xf0]  ;;  %v2339_v29 = vor.u32 %v3459_v24, %v2338_v23  ;;  %v2330_v35 = vld [vmem:[%s5602_s1 + $0x40] sm:$0xf] }
   0x8   :  { %v2466_v28 = vld [vmem:[%s5602_s1 + $0x150] sm:$0xf]  ;;  %1821 = vmatpush.bf16.msra.mxu0 %v2347_v16  ;;  %v3491_v30 = vld [vmem:[%s5602_s1 + $0x154] sm:$0xf0]  ;;  %v2403_v33 = vor.u32 %v3475_v27, %v2402_v26  ;;  %v3457_v36 = vld [vmem:[%s5602_s1 + $0x44] sm:$0xf0] }
   0x9   :  { %v2530_v31 = vld [vmem:[%s5602_s1 + $0x1d0] sm:$0xf]  ;;  %v3507_v32 = vld [vmem:[%s5602_s1 + $0x1d4] sm:$0xf0]  ;;  %1834 = vmatpush.bf16.msra.mxu1 %v2411_v17  ;;  %v2467_v34 = vor.u32 %v3491_v30, %v2466_v28  ;;  %v2394_v37 = vld [vmem:[%s5602_s1 + $0xc0] sm:$0xf]  ;;  %v2331_v44 = vor.u32 %v3457_v36, %v2330_v35 }
   0xa   :  { %1847 = vmatpush.bf16.msra.mxu2 %v2475_v21  ;;  %v2531_v38 = vor.u32 %v3507_v32, %v2530_v31  ;;  %v3473_v39 = vld [vmem:[%s5602_s1 + $0xc4] sm:$0xf0]  ;;  %v2458_v40 = vld [vmem:[%s5602_s1 + $0x140] sm:$0xf]  ;;  %v2322_v47 = vld [vmem:[%s5602_s1 + $0x30] sm:$0xf] }
   0xb   :  { %1860 = vmatpush.bf16.msra.mxu3 %v2539_v25  ;;  %v3489_v41 = vld [vmem:[%s5602_s1 + $0x144] sm:$0xf0]  ;;  %v2522_v42 = vld [vmem:[%s5602_s1 + $0x1c0] sm:$0xf]  ;;  %v2395_v45 = vor.u32 %v3473_v39, %v2394_v37  ;;  %v3455_v48 = vld [vmem:[%s5602_s1 + $0x34] sm:$0xf0] }
   0xc   :  { %v3505_v43 = vld [vmem:[%s5602_s1 + $0x1c4] sm:$0xf0]  ;;  %1822 = vmatpush.bf16.msra.mxu0 %v2339_v29  ;;  %v2459_v46 = vor.u32 %v3489_v41, %v2458_v40  ;;  %v2386_v49 = vld [vmem:[%s5602_s1 + $0xb0] sm:$0xf]  ;;  %v3471_v51 = vld [vmem:[%s5602_s1 + $0xb4] sm:$0xf0]  ;;  %v2323_v56 = vor.u32 %v3455_v48, %v2322_v47 }
   0xd   :  { %1835 = vmatpush.bf16.msra.mxu1 %v2403_v33  ;;  %v2523_v50 = vor.u32 %v3505_v43, %v2522_v42  ;;  %v2450_v52 = vld [vmem:[%s5602_s1 + $0x130] sm:$0xf]  ;;  %v3487_v53 = vld [vmem:[%s5602_s1 + $0x134] sm:$0xf0]  ;;  %v2387_v57 = vor.u32 %v3471_v51, %v2386_v49  ;;  %v2314_v59 = vld [vmem:[%s5602_s1 + $0x20] sm:$0xf] }
   0xe   :  { %1848 = vmatpush.bf16.msra.mxu2 %v2467_v34  ;;  %v2514_v54 = vld [vmem:[%s5602_s1 + $0x1b0] sm:$0xf]  ;;  %v3503_v55 = vld [vmem:[%s5602_s1 + $0x1b4] sm:$0xf0]  ;;  %v2451_v58 = vor.u32 %v3487_v53, %v2450_v52  ;;  %v3453_v60 = vld [vmem:[%s5602_s1 + $0x24] sm:$0xf0] }
   0xf   :  { %1861 = vmatpush.bf16.msra.mxu3 %v2531_v38  ;;  %v2378_v61 = vld [vmem:[%s5602_s1 + $0xa0] sm:$0xf]  ;;  %v2515_v62 = vor.u32 %v3503_v55, %v2514_v54  ;;  %v3469_v63 = vld [vmem:[%s5602_s1 + $0xa4] sm:$0xf0]  ;;  %v2315_v4 = vor.u32 %v3453_v60, %v2314_v59  ;;  %v2306_v7 = vld [vmem:[%s5602_s1 + $0x10] sm:$0xf] }
  0x10   :  { %1823 = vmatpush.bf16.msra.mxu0 %v2331_v44  ;;  %v2442_v0 = vld [vmem:[%s5602_s1 + $0x120] sm:$0xf]  ;;  %v3485_v1 = vld [vmem:[%s5602_s1 + $0x124] sm:$0xf0]  ;;  %v2379_v5 = vor.u32 %v3469_v63, %v2378_v61  ;;  %v3451_v8 = vld [vmem:[%s5602_s1 + $0x14] sm:$0xf0] }
  0x11   :  { %1836 = vmatpush.bf16.msra.mxu1 %v2395_v45  ;;  %v2506_v2 = vld [vmem:[%s5602_s1 + $0x1a0] sm:$0xf]  ;;  %v3501_v3 = vld [vmem:[%s5602_s1 + $0x1a4] sm:$0xf0]  ;;  %v2443_v6 = vor.u32 %v3485_v1, %v2442_v0  ;;  %v2370_v9 = vld [vmem:[%s5602_s1 + $0x90] sm:$0xf]  ;;  %v2307_v16 = vor.u32 %v3451_v8, %v2306_v7 }
  0x12   :  { %1849 = vmatpush.bf16.msra.mxu2 %v2459_v46  ;;  %v2507_v10 = vor.u32 %v3501_v3, %v2506_v2  ;;  %v3467_v11 = vld [vmem:[%s5602_s1 + $0x94] sm:$0xf0]  ;;  %v2434_v12 = vld [vmem:[%s5602_s1 + $0x110] sm:$0xf]  ;;  %v2298_v17 = vld [vmem:[%s5602_s1] sm:$0xf] }
  0x13   :  { %1862 = vmatpush.bf16.msra.mxu3 %v2523_v50  ;;  %v3483_v13 = vld [vmem:[%s5602_s1 + $0x114] sm:$0xf0]  ;;  %v2498_v14 = vld [vmem:[%s5602_s1 + $0x190] sm:$0xf]  ;;  %v3449_v18 = vld [vmem:[%s5602_s1 + $0x4] sm:$0xf0]  ;;  %v2371_v19 = vor.u32 %v3467_v11, %v2370_v9 }
  0x14   :  { %1824 = vmatpush.bf16.msra.mxu0 %v2323_v56  ;;  %v3499_v15 = vld [vmem:[%s5602_s1 + $0x194] sm:$0xf0]  ;;  %v2435_v20 = vor.u32 %v3483_v13, %v2434_v12  ;;  %v2362_v21 = vld [vmem:[%s5602_s1 + $0x80] sm:$0xf]  ;;  %v3465_v22 = vld [vmem:[%s5602_s1 + $0x84] sm:$0xf0]  ;;  %v2299_v31 = vor.u32 %v3449_v18, %v2298_v17 }
  0x15   :  { %1837 = vmatpush.bf16.msra.mxu1 %v2387_v57  ;;  %v2426_v23 = vld [vmem:[%s5602_s1 + $0x100] sm:$0xf]  ;;  %v2499_v24 = vor.u32 %v3499_v15, %v2498_v14  ;;  %v3481_v25 = vld [vmem:[%s5602_s1 + $0x104] sm:$0xf0]  ;;  %v2610_v28 = vld [vmem:[%s5602_s1 + $0x270] sm:$0xf]  ;;  %v2363_v35 = vor.u32 %v3465_v22, %v2362_v21 }
  0x16   :  { %1850 = vmatpush.bf16.msra.mxu2 %v2451_v58  ;;  %v2490_v26 = vld [vmem:[%s5602_s1 + $0x180] sm:$0xf]  ;;  %v3497_v27 = vld [vmem:[%s5602_s1 + $0x184] sm:$0xf0]  ;;  %v3527_v29 = vld [vmem:[%s5602_s1 + $0x274] sm:$0xf0]  ;;  %v2427_v36 = vor.u32 %v3481_v25, %v2426_v23 }
  0x17   :  { %1863 = vmatpush.bf16.msra.mxu3 %v2515_v62  ;;  %v2674_v30 = vld [vmem:[%s5602_s1 + $0x2f0] sm:$0xf]  ;;  %v3543_v32 = vld [vmem:[%s5602_s1 + $0x2f4] sm:$0xf0]  ;;  %v2491_v39 = vor.u32 %v3497_v27, %v2490_v26  ;;  %v2611_v40 = vor.u32 %v3527_v29, %v2610_v28  ;;  %v2602_v43 = vld [vmem:[%s5602_s1 + $0x260] sm:$0xf] }
  0x18   :  { %1825 = vmatpush.bf16.msra.mxu0 %v2315_v4  ;;  %v2738_v33 = vld [vmem:[%s5602_s1 + $0x370] sm:$0xf]  ;;  %v3559_v34 = vld [vmem:[%s5602_s1 + $0x374] sm:$0xf0]  ;;  %v2675_v41 = vor.u32 %v3543_v32, %v2674_v30  ;;  %v3525_v44 = vld [vmem:[%s5602_s1 + $0x264] sm:$0xf0] }
  0x19   :  { %1838 = vmatpush.bf16.msra.mxu1 %v2379_v5  ;;  %v2802_v37 = vld [vmem:[%s5602_s1 + $0x3f0] sm:$0xf]  ;;  %v3575_v38 = vld [vmem:[%s5602_s1 + $0x3f4] sm:$0xf0]  ;;  %v2739_v42 = vor.u32 %v3559_v34, %v2738_v33  ;;  %v2666_v45 = vld [vmem:[%s5602_s1 + $0x2e0] sm:$0xf]  ;;  %v2603_v52 = vor.u32 %v3525_v44, %v2602_v43 }
  0x1a   :  { %1851 = vmatpush.bf16.msra.mxu2 %v2443_v6  ;;  %v2803_v46 = vor.u32 %v3575_v38, %v2802_v37  ;;  %v3541_v47 = vld [vmem:[%s5602_s1 + $0x2e4] sm:$0xf0]  ;;  %v2730_v48 = vld [vmem:[%s5602_s1 + $0x360] sm:$0xf]  ;;  %v2594_v53 = vld [vmem:[%s5602_s1 + $0x250] sm:$0xf] }
  0x1b   :  { %1864 = vmatpush.bf16.msra.mxu3 %v2507_v10  ;;  %v3557_v49 = vld [vmem:[%s5602_s1 + $0x364] sm:$0xf0]  ;;  %v2794_v50 = vld [vmem:[%s5602_s1 + $0x3e0] sm:$0xf]  ;;  %v2667_v54 = vor.u32 %v3541_v47, %v2666_v45  ;;  %v3523_v56 = vld [vmem:[%s5602_s1 + $0x254] sm:$0xf0] }
  0x1c   :  { %1826 = vmatpush.bf16.msra.mxu0 %v2307_v16  ;;  %v3573_v51 = vld [vmem:[%s5602_s1 + $0x3e4] sm:$0xf0]  ;;  %v2731_v55 = vor.u32 %v3557_v49, %v2730_v48  ;;  %v2658_v57 = vld [vmem:[%s5602_s1 + $0x2d0] sm:$0xf]  ;;  %v3539_v60 = vld [vmem:[%s5602_s1 + $0x2d4] sm:$0xf0]  ;;  %v2595_v3 = vor.u32 %v3523_v56, %v2594_v53 }
  0x1d   :  { %1839 = vmatpush.bf16.msra.mxu1 %v2371_v19  ;;  %v15_v58 = vld [vmem:[%s5603_s0 + $0x8] sm:$0xff]  ;;  %v2795_v59 = vor.u32 %v3573_v51, %v2794_v50  ;;  %v2722_v61 = vld [vmem:[%s5602_s1 + $0x350] sm:$0xf]  ;;  %v3555_v62 = vld [vmem:[%s5602_s1 + $0x354] sm:$0xf0]  ;;  %v2659_v7 = vor.u32 %v3539_v60, %v2658_v57 }
  0x1e   :  { %1852 = vmatpush.bf16.msra.mxu2 %v2435_v20  ;;  %v328_v63 = vunpack.c.l.b16 %v15_v58  ;;  %v329_v0 = vunpack.c.h.b16 %v15_v58  ;;  %v2786_v1 = vld [vmem:[%s5602_s1 + $0x3d0] sm:$0xf]  ;;  %v3571_v2 = vld [vmem:[%s5602_s1 + $0x3d4] sm:$0xf0]  ;;  %v14_v5 = vld [vmem:[%s5603_s0] sm:$0xff]  ;;  %v2723_v8 = vor.u32 %v3555_v62, %v2722_v61 }
  0x1f   :  { %1865 = vmatpush.bf16.msra.mxu3 %v2499_v24  ;;  %v2586_v9 = vld [vmem:[%s5602_s1 + $0x240] sm:$0xf]  ;;  %v3521_v10 = vld [vmem:[%s5602_s1 + $0x244] sm:$0xf0]  ;;  %v326_v12 = vunpack.c.l.b16 %v14_v5  ;;  %v327_v13 = vunpack.c.h.b16 %v14_v5  ;;  %v2787_v14 = vor.u32 %v3571_v2, %v2786_v1  ;;  %v2578_v25 = vld [vmem:[%s5602_s1 + $0x230] sm:$0xf] }
  0x20   :  { %1827 = vmatpush.bf16.msra.mxu0 %v2299_v31  ;;  %v4024_v4 = vpack.c.b16 %v328_v63, %v328_v63  ;;  %v4029_v6 = vpack.c.b16 %v329_v0, %v329_v0  ;;  %v2650_v11 = vld [vmem:[%s5602_s1 + $0x2c0] sm:$0xf]  ;;  %v3537_v15 = vld [vmem:[%s5602_s1 + $0x2c4] sm:$0xf0]  ;;  %v2587_v22 = vor.u32 %v3521_v10, %v2586_v9  ;;  %v3519_v26 = vld [vmem:[%s5602_s1 + $0x234] sm:$0xf0] }
  0x21   :  { %1840 = vmatpush.bf16.msra.mxu1 %v2363_v35  ;;  %v2714_v16 = vld [vmem:[%s5602_s1 + $0x340] sm:$0xf]  ;;  %v3553_v17 = vld [vmem:[%s5602_s1 + $0x344] sm:$0xf0]  ;;  %v4056_v20 = vpack.c.b16 %v326_v12, %v326_v12  ;;  %v4059_v21 = vpack.c.b16 %v327_v13, %v327_v13  ;;  %v2651_v23 = vor.u32 %v3537_v15, %v2650_v11  ;;  %v2642_v27 = vld [vmem:[%s5602_s1 + $0x2b0] sm:$0xf]  ;;  %v2579_v34 = vor.u32 %v3519_v26, %v2578_v25 }
  0x22   :  { %1853 = vmatpush.bf16.msra.mxu2 %v2427_v36  ;;  %v2778_v18 = vld [vmem:[%s5602_s1 + $0x3c0] sm:$0xf]  ;;  %v3569_v19 = vld [vmem:[%s5602_s1 + $0x3c4] sm:$0xf0]  ;;  %v2715_v24 = vor.u32 %v3553_v17, %v2714_v16  ;;  %v3535_v29 = vld [vmem:[%s5602_s1 + $0x2b4] sm:$0xf0] }
  0x23   :  { %1866 = vmatpush.bf16.msra.mxu3 %v2491_v39  ;;  %v2779_v28 = vor.u32 %v3569_v19, %v2778_v18  ;;  %v2706_v30 = vld [vmem:[%s5602_s1 + $0x330] sm:$0xf]  ;;  %v3551_v31 = vld [vmem:[%s5602_s1 + $0x334] sm:$0xf0]  ;;  %1828 = vmatmul.bf16.vlgmr.msra.gmra.mxu0 %v4056_v20  ;;  %v2643_v35 = vor.u32 %v3535_v29, %v2642_v27  ;;  %v2570_v37 = vld [vmem:[%s5602_s1 + $0x220] sm:$0xf] }
  0x24   :  { %1872 = vmatpush.bf16.msrb.mxu0 %v2611_v40  ;;  %v2770_v32 = vld [vmem:[%s5602_s1 + $0x3b0] sm:$0xf]  ;;  %v3567_v33 = vld [vmem:[%s5602_s1 + $0x3b4] sm:$0xf0]  ;;  %1841 = vmatmul.bf16.vlgmr.msra.gmra.mxu1 %v4059_v21  ;;  %v2707_v36 = vor.u32 %v3551_v31, %v2706_v30  ;;  %v3517_v38 = vld [vmem:[%s5602_s1 + $0x224] sm:$0xf0] }
  0x25   :  { %1885 = vmatpush.bf16.msrb.mxu1 %v2675_v41  ;;  %1854 = vmatmul.bf16.vlgmr.msra.gmra.mxu2 %v4024_v4  ;;  %v2634_v39 = vld [vmem:[%s5602_s1 + $0x2a0] sm:$0xf]  ;;  %v2771_v40 = vor.u32 %v3567_v33, %v2770_v32  ;;  %v3533_v41 = vld [vmem:[%s5602_s1 + $0x2a4] sm:$0xf0]  ;;  %v2562_v49 = vld [vmem:[%s5602_s1 + $0x210] sm:$0xf] }
  0x26   :  { %1898 = vmatpush.bf16.msrb.mxu2 %v2739_v42  ;;  %1867 = vmatmul.bf16.vlgmr.msra.gmra.mxu3 %v4029_v6  ;;  %v2698_v42 = vld [vmem:[%s5602_s1 + $0x320] sm:$0xf]  ;;  %v3549_v43 = vld [vmem:[%s5602_s1 + $0x324] sm:$0xf0]  ;;  %v2635_v47 = vor.u32 %v3533_v41, %v2634_v39  ;;  %v3515_v50 = vld [vmem:[%s5602_s1 + $0x214] sm:$0xf0] }
  0x27   :  { %1911 = vmatpush.bf16.msrb.mxu3 %v2803_v46  ;;  %v2762_v44 = vld [vmem:[%s5602_s1 + $0x3a0] sm:$0xf]  ;;  %v3565_v45 = vld [vmem:[%s5602_s1 + $0x3a4] sm:$0xf0]  ;;  %v2571_v46 = vor.u32 %v3517_v38, %v2570_v37  ;;  %v2699_v48 = vor.u32 %v3549_v43, %v2698_v42  ;;  %v2626_v51 = vld [vmem:[%s5602_s1 + $0x290] sm:$0xf] }
  0x28   :  { %1873 = vmatpush.bf16.msrb.mxu0 %v2603_v52  ;;  %v2763_v52 = vor.u32 %v3565_v45, %v2762_v44  ;;  %v3531_v53 = vld [vmem:[%s5602_s1 + $0x294] sm:$0xf0]  ;;  %v2754_v56 = vld [vmem:[%s5602_s1 + $0x390] sm:$0xf]  ;;  %v2554_v58 = vld [vmem:[%s5602_s1 + $0x200] sm:$0xf] }
  0x29   :  { %1886 = vmatpush.bf16.msrb.mxu1 %v2667_v54  ;;  %v2690_v54 = vld [vmem:[%s5602_s1 + $0x310] sm:$0xf]  ;;  %v3563_v57 = vld [vmem:[%s5602_s1 + $0x394] sm:$0xf0]  ;;  %v3513_v60 = vld [vmem:[%s5602_s1 + $0x204] sm:$0xf0]  ;;  %v2627_v63 = vor.u32 %v3531_v53, %v2626_v51 }
  0x2a   :  { %1899 = vmatpush.bf16.msrb.mxu2 %v2731_v55  ;;  %v3547_v55 = vld [vmem:[%s5602_s1 + $0x314] sm:$0xf0]  ;;  %v2618_v61 = vld [vmem:[%s5602_s1 + $0x280] sm:$0xf]  ;;  %v3529_v62 = vld [vmem:[%s5602_s1 + $0x284] sm:$0xf0]  ;;  %v2755_v5 = vor.u32 %v3563_v57, %v2754_v56  ;;  %v2555_v13 = vor.u32 %v3513_v60, %v2554_v58 }
  0x2b   :  { %1912 = vmatpush.bf16.msrb.mxu3 %v2795_v59  ;;  %v2563_v59 = vor.u32 %v3515_v50, %v2562_v49  ;;  %v2691_v0 = vor.u32 %v3547_v55, %v2690_v54  ;;  %v2682_v1 = vld [vmem:[%s5602_s1 + $0x300] sm:$0xf]  ;;  %v3545_v2 = vld [vmem:[%s5602_s1 + $0x304] sm:$0xf0]  ;;  %v16_v9 = vld [vmem:[%s5603_s0 + $0x10] sm:$0xff]  ;;  %v2619_v18 = vor.u32 %v3529_v62, %v2618_v61 }
  0x2c   :  { %1874 = vmatpush.bf16.msrb.mxu0 %v2595_v3  ;;  %v17_v3 = vld [vmem:[%s5603_s0 + $0x18] sm:$0xff]  ;;  %v2866_v10 = vld [vmem:[%s5602_s1 + $0x470] sm:$0xf]  ;;  %v2683_v19 = vor.u32 %v3545_v2, %v2682_v1  ;;  %v2858_v31 = vld [vmem:[%s5602_s1 + $0x460] sm:$0xf] }
  0x2d   :  { %1887 = vmatpush.bf16.msrb.mxu1 %v2659_v7  ;;  %v2746_v7 = vld [vmem:[%s5602_s1 + $0x380] sm:$0xf]  ;;  %v3591_v11 = vld [vmem:[%s5602_s1 + $0x474] sm:$0xf0]  ;;  %v2930_v12 = vld [vmem:[%s5602_s1 + $0x4f0] sm:$0xf]  ;;  %v332_v17 = vunpack.c.l.b16 %v17_v3  ;;  %v333_v25 = vunpack.c.h.b16 %v17_v3 }
  0x2e   :  { %1900 = vmatpush.bf16.msrb.mxu2 %v2723_v8  ;;  %v3561_v8 = vld [vmem:[%s5602_s1 + $0x384] sm:$0xf0]  ;;  %v2994_v15 = vld [vmem:[%s5602_s1 + $0x570] sm:$0xf]  ;;  %v3623_v16 = vld [vmem:[%s5602_s1 + $0x574] sm:$0xf0]  ;;  %v2867_v27 = vor.u32 %v3591_v11, %v2866_v10 }
  0x2f   :  { %1913 = vmatpush.bf16.msrb.mxu3 %v2787_v14  ;;  %v3607_v14 = vld [vmem:[%s5602_s1 + $0x4f4] sm:$0xf0]  ;;  %v2747_v26 = vor.u32 %v3561_v8, %v2746_v7  ;;  %v2995_v30 = vor.u32 %v3623_v16, %v2994_v15  ;;  %v3589_v32 = vld [vmem:[%s5602_s1 + $0x464] sm:$0xf0]  ;;  %v2922_v33 = vld [vmem:[%s5602_s1 + $0x4e0] sm:$0xf]  ;;  %v4207_v38 = vpack.c.b16 %v332_v17, %v332_v17  ;;  %v4217_v42 = vpack.c.b16 %v333_v25, %v333_v25 }
  0x30   :  { %1875 = vmatpush.bf16.msrb.mxu0 %v2587_v22  ;;  %v3058_v22 = vld [vmem:[%s5602_s1 + $0x5f0] sm:$0xf]  ;;  %v2931_v29 = vor.u32 %v3607_v14, %v2930_v12  ;;  %v3621_v37 = vld [vmem:[%s5602_s1 + $0x564] sm:$0xf0]  ;;  %v3050_v39 = vld [vmem:[%s5602_s1 + $0x5e0] sm:$0xf]  ;;  %v2859_v43 = vor.u32 %v3589_v32, %v2858_v31 }
  0x31   :  { %1888 = vmatpush.bf16.msrb.mxu1 %v2651_v23  ;;  %v3639_v23 = vld [vmem:[%s5602_s1 + $0x5f4] sm:$0xf0]  ;;  %v2914_v49 = vld [vmem:[%s5602_s1 + $0x4d0] sm:$0xf]  ;;  %v3585_v60 = vld [vmem:[%s5602_s1 + $0x444] sm:$0xf0] }
  0x32   :  { %1901 = vmatpush.bf16.msrb.mxu2 %v2715_v24  ;;  %v330_v24 = vunpack.c.l.b16 %v16_v9  ;;  %v3603_v51 = vld [vmem:[%s5602_s1 + $0x4d4] sm:$0xf0]  ;;  %v3042_v54 = vld [vmem:[%s5602_s1 + $0x5d0] sm:$0xf]  ;;  %v2906_v61 = vld [vmem:[%s5602_s1 + $0x4c0] sm:$0xf] }
  0x33   :  { %1914 = vmatpush.bf16.msrb.mxu3 %v2779_v28  ;;  %v331_v28 = vunpack.c.h.b16 %v16_v9  ;;  %v3619_v53 = vld [vmem:[%s5602_s1 + $0x554] sm:$0xf0]  ;;  %v2915_v57 = vor.u32 %v3603_v51, %v2914_v49  ;;  %v3617_v1 = vld [vmem:[%s5602_s1 + $0x544] sm:$0xf0]  ;;  %v3034_v2 = vld [vmem:[%s5602_s1 + $0x5c0] sm:$0xf] }
  0x34   :  { %1876 = vmatpush.bf16.msrb.mxu0 %v2579_v34  ;;  %v3059_v34 = vor.u32 %v3639_v23, %v3058_v22  ;;  %v4215_v41 = vpack.c.b16 %v330_v24, %v330_v24  ;;  %v3635_v55 = vld [vmem:[%s5602_s1 + $0x5d4] sm:$0xf0]  ;;  %v3633_v3 = vld [vmem:[%s5602_s1 + $0x5c4] sm:$0xf0]  ;;  %v2834_v9 = vld [vmem:[%s5602_s1 + $0x430] sm:$0xf] }
  0x35   :  { %1889 = vmatpush.bf16.msrb.mxu1 %v2643_v35  ;;  %v3605_v35 = vld [vmem:[%s5602_s1 + $0x4e4] sm:$0xf0]  ;;  %v4219_v44 = vpack.c.b16 %v331_v28, %v331_v28  ;;  %v3043_v62 = vor.u32 %v3635_v55, %v3042_v54  ;;  %v3583_v10 = vld [vmem:[%s5602_s1 + $0x434] sm:$0xf0]  ;;  %v2898_v11 = vld [vmem:[%s5602_s1 + $0x4b0] sm:$0xf]  ;;  %v3035_v12 = vor.u32 %v3633_v3, %v3034_v2 }
  0x36   :  { %1902 = vmatpush.bf16.msrb.mxu2 %v2707_v36  ;;  %v2986_v36 = vld [vmem:[%s5602_s1 + $0x560] sm:$0xf]  ;;  %v2923_v45 = vor.u32 %v3605_v35, %v2922_v33  ;;  %v2962_v14 = vld [vmem:[%s5602_s1 + $0x530] sm:$0xf]  ;;  %v3615_v15 = vld [vmem:[%s5602_s1 + $0x534] sm:$0xf0] }
  0x37   :  { %1915 = vmatpush.bf16.msrb.mxu3 %v2771_v40  ;;  %v3637_v40 = vld [vmem:[%s5602_s1 + $0x5e4] sm:$0xf0]  ;;  %v3026_v16 = vld [vmem:[%s5602_s1 + $0x5b0] sm:$0xf]  ;;  %v3631_v17 = vld [vmem:[%s5602_s1 + $0x5b4] sm:$0xf0]  ;;  %v2963_v22 = vor.u32 %v3615_v15, %v2962_v14 }
  0x38   :  { %1877 = vmatpush.bf16.msrb.mxu0 %v2571_v46  ;;  %v2987_v46 = vor.u32 %v3621_v37, %v2986_v36  ;;  %v3051_v50 = vor.u32 %v3637_v40, %v3050_v39  ;;  %v2826_v23 = vld [vmem:[%s5602_s1 + $0x420] sm:$0xf]  ;;  %v3581_v24 = vld [vmem:[%s5602_s1 + $0x424] sm:$0xf0]  ;;  %v2818_v35 = vld [vmem:[%s5602_s1 + $0x410] sm:$0xf] }
  0x39   :  { %1890 = vmatpush.bf16.msrb.mxu1 %v2635_v47  ;;  %v2850_v47 = vld [vmem:[%s5602_s1 + $0x450] sm:$0xf]  ;;  %v2890_v25 = vld [vmem:[%s5602_s1 + $0x4a0] sm:$0xf]  ;;  %v3629_v31 = vld [vmem:[%s5602_s1 + $0x5a4] sm:$0xf0]  ;;  %v2827_v32 = vor.u32 %v3581_v24, %v2826_v23 }
  0x3a   :  { %1903 = vmatpush.bf16.msrb.mxu2 %v2699_v48  ;;  %v3587_v48 = vld [vmem:[%s5602_s1 + $0x454] sm:$0xf0]  ;;  %v2954_v28 = vld [vmem:[%s5602_s1 + $0x520] sm:$0xf]  ;;  %v2882_v37 = vld [vmem:[%s5602_s1 + $0x490] sm:$0xf] }
  0x3b   :  { %1916 = vmatpush.bf16.msrb.mxu3 %v2763_v52  ;;  %v2978_v52 = vld [vmem:[%s5602_s1 + $0x550] sm:$0xf]  ;;  %v2851_v56 = vor.u32 %v3587_v48, %v2850_v47  ;;  %v3579_v36 = vld [vmem:[%s5602_s1 + $0x414] sm:$0xf0]  ;;  %v2810_v48 = vld [vmem:[%s5602_s1 + $0x400] sm:$0xf] }
  0x3c   :  { %1878 = vmatpush.bf16.msrb.mxu0 %v2563_v59  ;;  %v2979_v58 = vor.u32 %v3619_v53, %v2978_v52  ;;  %v2842_v59 = vld [vmem:[%s5602_s1 + $0x440] sm:$0xf]  ;;  %v3595_v40 = vld [vmem:[%s5602_s1 + $0x494] sm:$0xf0]  ;;  %v2819_v49 = vor.u32 %v3579_v36, %v2818_v35  ;;  %v3593_v52 = vld [vmem:[%s5602_s1 + $0x484] sm:$0xf0] }
  0x3d   :  { %1891 = vmatpush.bf16.msrb.mxu1 %v2627_v63  ;;  %v3601_v63 = vld [vmem:[%s5602_s1 + $0x4c4] sm:$0xf0]  ;;  %v3627_v47 = vld [vmem:[%s5602_s1 + $0x594] sm:$0xf0]  ;;  %v2874_v51 = vld [vmem:[%s5602_s1 + $0x480] sm:$0xf]  ;;  %v2883_v53 = vor.u32 %v3595_v40, %v2882_v37 }
  0x3e   :  { %1904 = vmatpush.bf16.msrb.mxu2 %v2691_v0  ;;  %v2970_v0 = vld [vmem:[%s5602_s1 + $0x540] sm:$0xf]  ;;  %v2907_v7 = vor.u32 %v3601_v63, %v2906_v61  ;;  %v19_v61 = vld [vmem:[%s5603_s0 + $0x28] sm:$0xff]  ;;  %v3655_v63 = vld [vmem:[%s5602_s1 + $0x674] sm:$0xf0] }
  0x3f   :  { %1917 = vmatpush.bf16.msrb.mxu3 %v2755_v5  ;;  %v2843_v5 = vor.u32 %v3585_v60, %v2842_v59  ;;  %v2971_v8 = vor.u32 %v3617_v1, %v2970_v0  ;;  %v2938_v55 = vld [vmem:[%s5602_s1 + $0x500] sm:$0xf]  ;;  %v3625_v60 = vld [vmem:[%s5602_s1 + $0x584] sm:$0xf0]  ;;  %v3186_v0 = vld [vmem:[%s5602_s1 + $0x6f0] sm:$0xf] }
  0x40   :  { %1879 = vmatpush.bf16.msrb.mxu0 %v2555_v13  ;;  %v3599_v13 = vld [vmem:[%s5602_s1 + $0x4b4] sm:$0xf0]  ;;  %v3002_v59 = vld [vmem:[%s5602_s1 + $0x580] sm:$0xf]  ;;  %v3250_v3 = vld [vmem:[%s5602_s1 + $0x770] sm:$0xf] }
  0x41   :  { %1892 = vmatpush.bf16.msrb.mxu1 %v2619_v18  ;;  %v2835_v18 = vor.u32 %v3583_v10, %v2834_v9  ;;  %v3671_v2 = vld [vmem:[%s5602_s1 + $0x6f4] sm:$0xf0]  ;;  %v3314_v10 = vld [vmem:[%s5602_s1 + $0x7f0] sm:$0xf]  ;;  %v3003_v14 = vor.u32 %v3625_v60, %v3002_v59  ;;  %v3178_v23 = vld [vmem:[%s5602_s1 + $0x6e0] sm:$0xf] }
  0x42   :  { %1905 = vmatpush.bf16.msrb.mxu2 %v2683_v19  ;;  %v2899_v19 = vor.u32 %v3599_v13, %v2898_v11  ;;  %v3703_v11 = vld [vmem:[%s5602_s1 + $0x7f4] sm:$0xf0]  ;;  %v3106_v37 = vld [vmem:[%s5602_s1 + $0x650] sm:$0xf]  ;;  %v3681_v59 = vld [vmem:[%s5602_s1 + $0x744] sm:$0xf0] }
  0x43   :  { %1918 = vmatpush.bf16.msrb.mxu3 %v2747_v26  ;;  %1880 = vmatmul.bf16.vlgmr.msrb.gmra.mxu0 %v4215_v41  ;;  %v3027_v26 = vor.u32 %v3631_v17, %v3026_v16  ;;  %v337_v16 = vunpack.c.h.b16 %v19_v61  ;;  %v3187_v17 = vor.u32 %v3671_v2, %v3186_v0  ;;  %v3315_v24 = vor.u32 %v3703_v11, %v3314_v10  ;;  %v3170_v40 = vld [vmem:[%s5602_s1 + $0x6d0] sm:$0xf]  ;;  %v3290_v60 = vld [vmem:[%s5602_s1 + $0x7c0] sm:$0xf]  ;;  %v3647_v2 = vld [vmem:[%s5602_s1 + $0x634] sm:$0xf0] }
  0x44   :  { %1924 = vmatpush.bf16.msra.mxu0 %v2867_v27  ;;  %1893 = vmatmul.bf16.vlgmr.msrb.gmra.mxu1 %v4219_v44  ;;  %v3597_v27 = vld [vmem:[%s5602_s1 + $0x4a4] sm:$0xf0]  ;;  %v3282_v10 = vld [vmem:[%s5602_s1 + $0x7b0] sm:$0xf]  ;;  %v3695_v11 = vld [vmem:[%s5602_s1 + $0x7b4] sm:$0xf0] }
  0x45   :  { %1937 = vmatpush.bf16.msra.mxu1 %v2931_v29  ;;  %1906 = vmatmul.bf16.vlgmr.msrb.gmra.mxu2 %v4207_v38  ;;  %v3613_v29 = vld [vmem:[%s5602_s1 + $0x524] sm:$0xf0]  ;;  %v2891_v33 = vor.u32 %v3597_v27, %v2890_v25  ;;  %v3242_v27 = vld [vmem:[%s5602_s1 + $0x760] sm:$0xf] }
  0x46   :  { %1950 = vmatpush.bf16.msra.mxu2 %v2995_v30  ;;  %1919 = vmatmul.bf16.vlgmr.msrb.gmra.mxu3 %v4217_v42  ;;  %v3018_v30 = vld [vmem:[%s5602_s1 + $0x5a0] sm:$0xf] }
  0x47   :  { %1963 = vmatpush.bf16.msra.mxu3 %v3059_v34  ;;  %v2955_v34 = vor.u32 %v3613_v29, %v2954_v28  ;;  %v3019_v39 = vor.u32 %v3629_v31, %v3018_v30  ;;  %v3685_v28 = vld [vmem:[%s5602_s1 + $0x764] sm:$0xf0]  ;;  %v3306_v31 = vld [vmem:[%s5602_s1 + $0x7e0] sm:$0xf] }
  0x48   :  { %1925 = vmatpush.bf16.msra.mxu0 %v2859_v43  ;;  %v2946_v43 = vld [vmem:[%s5602_s1 + $0x510] sm:$0xf]  ;;  %v3243_v36 = vor.u32 %v3685_v28, %v3242_v27 }
  0x49   :  { %1938 = vmatpush.bf16.msra.mxu1 %v2923_v45  ;;  %v3611_v45 = vld [vmem:[%s5602_s1 + $0x514] sm:$0xf0] }
  0x4a   :  { %1951 = vmatpush.bf16.msra.mxu2 %v2987_v46  ;;  %v3010_v46 = vld [vmem:[%s5602_s1 + $0x590] sm:$0xf]  ;;  %v2947_v54 = vor.u32 %v3611_v45, %v2946_v43  ;;  %v3667_v45 = vld [vmem:[%s5602_s1 + $0x6d4] sm:$0xf0] }
  0x4b   :  { %1964 = vmatpush.bf16.msra.mxu3 %v3051_v50  ;;  %v3577_v50 = vld [vmem:[%s5602_s1 + $0x404] sm:$0xf0] }
  0x4c   :  { %1926 = vmatpush.bf16.msra.mxu0 %v2851_v56  ;;  %v3609_v56 = vld [vmem:[%s5602_s1 + $0x504] sm:$0xf0]  ;;  %v2811_v1 = vor.u32 %v3577_v50, %v2810_v48  ;;  %v3298_v48 = vld [vmem:[%s5602_s1 + $0x7d0] sm:$0xf] }
  0x4d   :  { %1939 = vmatpush.bf16.msra.mxu1 %v2915_v57  ;;  %v18_v57 = vld [vmem:[%s5603_s0 + $0x20] sm:$0xff]  ;;  %v2939_v9 = vor.u32 %v3609_v56, %v2938_v55 }
  0x4e   :  { %1952 = vmatpush.bf16.msra.mxu2 %v2979_v58  ;;  %v3011_v58 = vor.u32 %v3627_v47, %v3010_v46  ;;  %v335_v13 = vunpack.c.h.b16 %v18_v57  ;;  %v3234_v46 = vld [vmem:[%s5602_s1 + $0x750] sm:$0xf]  ;;  %v3683_v47 = vld [vmem:[%s5602_s1 + $0x754] sm:$0xf0]  ;;  %v3162_v55 = vld [vmem:[%s5602_s1 + $0x6c0] sm:$0xf] }
  0x4f   :  { %1965 = vmatpush.bf16.msra.mxu3 %v3043_v62  ;;  %v3122_v62 = vld [vmem:[%s5602_s1 + $0x670] sm:$0xf] }
  0x50   :  { %1927 = vmatpush.bf16.msra.mxu0 %v2843_v5  ;;  %v3687_v5 = vld [vmem:[%s5602_s1 + $0x774] sm:$0xf0]  ;;  %v3123_v15 = vor.u32 %v3655_v63, %v3122_v62  ;;  %v4421_v30 = vpack.c.b16 %v335_v13, %v335_v13 }
  0x51   :  { %1940 = vmatpush.bf16.msra.mxu1 %v2907_v7  ;;  %v334_v7 = vunpack.c.l.b16 %v18_v57  ;;  %v3665_v57 = vld [vmem:[%s5602_s1 + $0x6c4] sm:$0xf0] }
  0x52   :  { %1953 = vmatpush.bf16.msra.mxu2 %v2971_v8  ;;  %v2875_v8 = vor.u32 %v3593_v52, %v2874_v51  ;;  %v3171_v51 = vor.u32 %v3667_v45, %v3170_v40  ;;  %v3235_v52 = vor.u32 %v3683_v47, %v3234_v46  ;;  %v3163_v63 = vor.u32 %v3665_v57, %v3162_v55  ;;  %v3675_v40 = vld [vmem:[%s5602_s1 + $0x714] sm:$0xf0]  ;;  %v3066_v46 = vld [vmem:[%s5602_s1 + $0x600] sm:$0xf]  ;;  %v20_v55 = vld [vmem:[%s5603_s0 + $0x30] sm:$0xff] }
  0x53   :  { %1966 = vmatpush.bf16.msra.mxu3 %v3035_v12  ;;  %v336_v12 = vunpack.c.l.b16 %v19_v61  ;;  %v4408_v25 = vpack.c.b16 %v334_v7, %v334_v7  ;;  %v3697_v61 = vld [vmem:[%s5602_s1 + $0x7c4] sm:$0xf0]  ;;  %v3663_v7 = vld [vmem:[%s5602_s1 + $0x6b4] sm:$0xf0]  ;;  %v3258_v57 = vld [vmem:[%s5602_s1 + $0x780] sm:$0xf] }
  0x54   :  { %1928 = vmatpush.bf16.msra.mxu0 %v2835_v18  ;;  %v3251_v18 = vor.u32 %v3687_v5, %v3250_v3  ;;  %v3154_v3 = vld [vmem:[%s5602_s1 + $0x6b0] sm:$0xf]  ;;  %v3291_v5 = vor.u32 %v3697_v61, %v3290_v60  ;;  %v3691_v45 = vld [vmem:[%s5602_s1 + $0x794] sm:$0xf0] }
  0x55   :  { %1941 = vmatpush.bf16.msra.mxu1 %v2899_v19  ;;  %v3114_v19 = vld [vmem:[%s5602_s1 + $0x660] sm:$0xf]  ;;  %v4419_v29 = vpack.c.b16 %v336_v12, %v336_v12  ;;  %v3155_v13 = vor.u32 %v3663_v7, %v3154_v3  ;;  %v3378_v60 = vld [vmem:[%s5602_s1 + $0x870] sm:$0xf]  ;;  %v3719_v61 = vld [vmem:[%s5602_s1 + $0x874] sm:$0xf0]  ;;  %v338_v3 = vunpack.c.l.b16 %v20_v55 }
  0x56   :  { %1954 = vmatpush.bf16.msra.mxu2 %v2963_v22  ;;  %v3653_v22 = vld [vmem:[%s5602_s1 + $0x664] sm:$0xf0] }
  0x57   :  { %1967 = vmatpush.bf16.msra.mxu3 %v3027_v26  ;;  %v3669_v26 = vld [vmem:[%s5602_s1 + $0x6e4] sm:$0xf0] }
  0x58   :  { %1929 = vmatpush.bf16.msra.mxu0 %v2827_v32  ;;  %v3701_v32 = vld [vmem:[%s5602_s1 + $0x7e4] sm:$0xf0]  ;;  %v3179_v35 = vor.u32 %v3669_v26, %v3178_v23 }
  0x59   :  { %1942 = vmatpush.bf16.msra.mxu1 %v2891_v33  ;;  %v4429_v33 = vpack.c.b16 %v337_v16, %v337_v16  ;;  %v3307_v43 = vor.u32 %v3701_v32, %v3306_v31  ;;  %v3645_v16 = vld [vmem:[%s5602_s1 + $0x624] sm:$0xf0]  ;;  %v3074_v32 = vld [vmem:[%s5602_s1 + $0x610] sm:$0xf] }
  0x5a   :  { %1955 = vmatpush.bf16.msra.mxu2 %v2955_v34  ;;  %v3115_v34 = vor.u32 %v3653_v22, %v3114_v19  ;;  %v3661_v19 = vld [vmem:[%s5602_s1 + $0x6a4] sm:$0xf0]  ;;  %v3210_v22 = vld [vmem:[%s5602_s1 + $0x720] sm:$0xf] }
  0x5b   :  { %1968 = vmatpush.bf16.msra.mxu3 %v3019_v39  ;;  %v3651_v39 = vld [vmem:[%s5602_s1 + $0x654] sm:$0xf0]  ;;  %v3677_v23 = vld [vmem:[%s5602_s1 + $0x724] sm:$0xf0] }
  0x5c   :  { %1930 = vmatpush.bf16.msra.mxu0 %v2819_v49  ;;  %v3699_v49 = vld [vmem:[%s5602_s1 + $0x7d4] sm:$0xf0]  ;;  %v3107_v50 = vor.u32 %v3651_v39, %v3106_v37  ;;  %v3693_v26 = vld [vmem:[%s5602_s1 + $0x7a4] sm:$0xf0]  ;;  %v3211_v31 = vor.u32 %v3677_v23, %v3210_v22  ;;  %v3202_v39 = vld [vmem:[%s5602_s1 + $0x710] sm:$0xf]  ;;  %v4618_v23 = vpack.c.b16 %v338_v3, %v338_v3 }
  0x5d   :  { %1943 = vmatpush.bf16.msra.mxu1 %v2883_v53  ;;  %v3098_v53 = vld [vmem:[%s5602_s1 + $0x640] sm:$0xf]  ;;  %v3299_v56 = vor.u32 %v3699_v49, %v3298_v48  ;;  %v3659_v37 = vld [vmem:[%s5602_s1 + $0x694] sm:$0xf0]  ;;  %v3641_v48 = vld [vmem:[%s5602_s1 + $0x604] sm:$0xf0] }
  0x5e   :  { %1956 = vmatpush.bf16.msra.mxu2 %v2947_v54  ;;  %v3649_v54 = vld [vmem:[%s5602_s1 + $0x644] sm:$0xf0]  ;;  %v3130_v49 = vld [vmem:[%s5602_s1 + $0x680] sm:$0xf]  ;;  %v3346_v3 = vld [vmem:[%s5602_s1 + $0x830] sm:$0xf] }
  0x5f   :  { %1969 = vmatpush.bf16.msra.mxu3 %v3011_v58  ;;  %v3226_v58 = vld [vmem:[%s5602_s1 + $0x740] sm:$0xf]  ;;  %v3099_v62 = vor.u32 %v3649_v54, %v3098_v53  ;;  %v3673_v54 = vld [vmem:[%s5602_s1 + $0x704] sm:$0xf0] }
  0x60   :  { %1931 = vmatpush.bf16.msra.mxu0 %v2811_v1  ;;  %v3227_v0 = vor.u32 %v3681_v59, %v3226_v58  ;;  %v3090_v1 = vld [vmem:[%s5602_s1 + $0x630] sm:$0xf]  ;;  %v3194_v53 = vld [vmem:[%s5602_s1 + $0x700] sm:$0xf]  ;;  %v3689_v58 = vld [vmem:[%s5602_s1 + $0x784] sm:$0xf0] }
  0x61   :  { %1944 = vmatpush.bf16.msra.mxu1 %v2875_v8  ;;  %v3218_v8 = vld [vmem:[%s5602_s1 + $0x730] sm:$0xf]  ;;  %v3091_v12 = vor.u32 %v3647_v2, %v3090_v1  ;;  %v21_v59 = vld [vmem:[%s5603_s0 + $0x38] sm:$0xff]  ;;  %v3462_v1 = vld [vmem:[%s5602_s1 + $0x74] sm:$0xf]  ;;  %v3195_v7 = vor.u32 %v3673_v54, %v3194_v53 }
  0x62   :  { %1957 = vmatpush.bf16.msra.mxu2 %v2939_v9  ;;  %v3679_v9 = vld [vmem:[%s5602_s1 + $0x734] sm:$0xf0]  ;;  %v2356_v2 = vld [vmem:[%s5602_s1 + $0x78] sm:$0xf0] }
  0x63   :  { %1970 = vmatpush.bf16.msra.mxu3 %v3003_v14  ;;  %1932 = vmatmul.bf16.vlgmr.msra.gmra.mxu0 %v4408_v25  ;;  %v3219_v14 = vor.u32 %v3679_v9, %v3218_v8  ;;  %v3478_v8 = vld [vmem:[%s5602_s1 + $0xf4] sm:$0xf]  ;;  %v2420_v9 = vld [vmem:[%s5602_s1 + $0xf8] sm:$0xf0] }
  0x64   :  { %1976 = vmatpush.bf16.msrb.mxu0 %v3123_v15  ;;  %1945 = vmatmul.bf16.vlgmr.msra.gmra.mxu1 %v4421_v30  ;;  %v3082_v15 = vld [vmem:[%s5602_s1 + $0x620] sm:$0xf]  ;;  %v2423_v22 = vor.u32 %v3478_v8, %v2420_v9  ;;  %v3727_v9 = vld [vmem:[%s5602_s1 + $0x8b4] sm:$0xf0] }
  0x65   :  { %1989 = vmatpush.bf16.msrb.mxu1 %v3187_v17  ;;  %1958 = vmatmul.bf16.vlgmr.msra.gmra.mxu2 %v4419_v29  ;;  %v3146_v17 = vld [vmem:[%s5602_s1 + $0x6a0] sm:$0xf]  ;;  %v3083_v27 = vor.u32 %v3645_v16, %v3082_v15  ;;  %v2359_v16 = vor.u32 %v3462_v1, %v2356_v2 }
  0x66   :  { %2002 = vmatpush.bf16.msrb.mxu2 %v3251_v18  ;;  %1971 = vmatmul.bf16.vlgmr.msra.gmra.mxu3 %v4429_v33  ;;  %v3283_v18 = vor.u32 %v3695_v11, %v3282_v10  ;;  %v3147_v28 = vor.u32 %v3661_v19, %v3146_v17  ;;  %v340_v10 = vunpack.c.l.b16 %v21_v59  ;;  %v339_v11 = vunpack.c.h.b16 %v20_v55  ;;  %v3370_v17 = vld [vmem:[%s5602_s1 + $0x860] sm:$0xf] }
  0x67   :  { %2015 = vmatpush.bf16.msrb.mxu3 %v3315_v24  ;;  %v3274_v24 = vld [vmem:[%s5602_s1 + $0x7a0] sm:$0xf] }
  0x68   :  { %1977 = vmatpush.bf16.msrb.mxu0 %v3115_v34  ;;  %v3643_v34 = vld [vmem:[%s5602_s1 + $0x614] sm:$0xf0]  ;;  %v3434_v19 = vld [vmem:[%s5602_s1 + $0x8e0] sm:$0xf] }
  0x69   :  { %1990 = vmatpush.bf16.msrb.mxu1 %v3179_v35  ;;  %v3138_v35 = vld [vmem:[%s5602_s1 + $0x690] sm:$0xf]  ;;  %v3075_v47 = vor.u32 %v3643_v34, %v3074_v32  ;;  %v3476_v32 = vld [vmem:[%s5602_s1 + $0xe4] sm:$0xf]  ;;  %v2412_v34 = vld [vmem:[%s5602_s1 + $0xe8] sm:$0xf0] }
  0x6a   :  { %2003 = vmatpush.bf16.msrb.mxu2 %v3243_v36  ;;  %v3275_v36 = vor.u32 %v3693_v26, %v3274_v24  ;;  %v3733_v24 = vld [vmem:[%s5602_s1 + $0x8e4] sm:$0xf0]  ;;  %v3460_v26 = vld [vmem:[%s5602_s1 + $0x64] sm:$0xf]  ;;  %v3354_v55 = vld [vmem:[%s5602_s1 + $0x840] sm:$0xf] }
  0x6b   :  { %2016 = vmatpush.bf16.msrb.mxu3 %v3307_v43  ;;  %v3266_v43 = vld [vmem:[%s5602_s1 + $0x790] sm:$0xf] }
  0x6c   :  { %1978 = vmatpush.bf16.msrb.mxu0 %v3107_v50  ;;  %v3657_v50 = vld [vmem:[%s5602_s1 + $0x684] sm:$0xf0] }
  0x6d   :  { %1991 = vmatpush.bf16.msrb.mxu1 %v3171_v51  ;;  %v3139_v51 = vor.u32 %v3659_v37, %v3138_v35  ;;  %v3435_v37 = vor.u32 %v3733_v24, %v3434_v19  ;;  %v3402_v19 = vld [vmem:[%s5602_s1 + $0x8a0] sm:$0xf]  ;;  %v3725_v24 = vld [vmem:[%s5602_s1 + $0x8a4] sm:$0xf0] }
  0x6e   :  { %2004 = vmatpush.bf16.msrb.mxu2 %v3235_v52  ;;  %v3203_v52 = vor.u32 %v3675_v40, %v3202_v39  ;;  %v3362_v40 = vld [vmem:[%s5602_s1 + $0x850] sm:$0xf] }
  0x6f   :  { %2017 = vmatpush.bf16.msrb.mxu3 %v3299_v56  ;;  %v3267_v56 = vor.u32 %v3691_v45, %v3266_v43  ;;  %v3715_v43 = vld [vmem:[%s5602_s1 + $0x854] sm:$0xf0]  ;;  %v3426_v45 = vld [vmem:[%s5602_s1 + $0x8d0] sm:$0xf] }
  0x70   :  { %1979 = vmatpush.bf16.msrb.mxu0 %v3099_v62  ;;  %v3442_v62 = vld [vmem:[%s5602_s1 + $0x8f0] sm:$0xf] }
  0x71   :  { %1992 = vmatpush.bf16.msrb.mxu1 %v3163_v63  ;;  %v3067_v63 = vor.u32 %v3641_v48, %v3066_v46  ;;  %v2415_v46 = vor.u32 %v3476_v32, %v2412_v34  ;;  %v3458_v48 = vld [vmem:[%s5602_s1 + $0x54] sm:$0xf]  ;;  %v3468_v32 = vld [vmem:[%s5602_s1 + $0xa4] sm:$0xf]  ;;  %v2380_v34 = vld [vmem:[%s5602_s1 + $0xa8] sm:$0xf0] }
  0x72   :  { %2005 = vmatpush.bf16.msrb.mxu2 %v3227_v0  ;;  %v3735_v0 = vld [vmem:[%s5602_s1 + $0x8f4] sm:$0xf0] }
  0x73   :  { %2018 = vmatpush.bf16.msrb.mxu3 %v3291_v5  ;;  %v3131_v5 = vor.u32 %v3657_v50, %v3130_v49  ;;  %v3443_v15 = vor.u32 %v3735_v0, %v3442_v62  ;;  %v2340_v49 = vld [vmem:[%s5602_s1 + $0x58] sm:$0xf0]  ;;  %v3474_v50 = vld [vmem:[%s5602_s1 + $0xd4] sm:$0xf]  ;;  %v3472_v62 = vld [vmem:[%s5602_s1 + $0xc4] sm:$0xf] }
  0x74   :  { %1980 = vmatpush.bf16.msrb.mxu0 %v3091_v12  ;;  %v3259_v12 = vor.u32 %v3689_v58, %v3258_v57  ;;  %v2343_v54 = vor.u32 %v3458_v48, %v2340_v49  ;;  %v3418_v57 = vld [vmem:[%s5602_s1 + $0x8c0] sm:$0xf]  ;;  %v3450_v48 = vld [vmem:[%s5602_s1 + $0x14] sm:$0xf]  ;;  %v2308_v49 = vld [vmem:[%s5602_s1 + $0x18] sm:$0xf0] }
  0x75   :  { %1993 = vmatpush.bf16.msrb.mxu1 %v3155_v13  ;;  %v3379_v13 = vor.u32 %v3719_v61, %v3378_v60  ;;  %v3456_v60 = vld [vmem:[%s5602_s1 + $0x44] sm:$0xf]  ;;  %v2332_v61 = vld [vmem:[%s5602_s1 + $0x48] sm:$0xf0] }
  0x76   :  { %2006 = vmatpush.bf16.msrb.mxu2 %v3219_v14  ;;  %v341_v14 = vunpack.c.h.b16 %v21_v59  ;;  %v3729_v59 = vld [vmem:[%s5602_s1 + $0x8c4] sm:$0xf0]  ;;  %v2335_v2 = vor.u32 %v3456_v60, %v2332_v61  ;;  %v22_v60 = vld [vmem:[%s5603_s0 + $0x40] sm:$0xff] }
  0x77   :  { %2019 = vmatpush.bf16.msrb.mxu3 %v3283_v18  ;;  %v3717_v18 = vld [vmem:[%s5602_s1 + $0x864] sm:$0xf0]  ;;  %v3419_v1 = vor.u32 %v3729_v59, %v3418_v57  ;;  %v2311_v57 = vor.u32 %v3450_v48, %v2308_v49  ;;  %v3448_v59 = vld [vmem:[%s5602_s1 + $0x4] sm:$0xf]  ;;  %v3490_v48 = vld [vmem:[%s5602_s1 + $0x154] sm:$0xf] }
  0x78   :  { %1981 = vmatpush.bf16.msrb.mxu0 %v3083_v27  ;;  %v2348_v27 = vld [vmem:[%s5602_s1 + $0x68] sm:$0xf0]  ;;  %v4639_v35 = vpack.c.b16 %v341_v14, %v341_v14  ;;  %v2468_v49 = vld [vmem:[%s5602_s1 + $0x158] sm:$0xf0] }
  0x79   :  { %1994 = vmatpush.bf16.msrb.mxu1 %v3147_v28  ;;  %v4629_v28 = vpack.c.b16 %v340_v10, %v340_v10  ;;  %v2351_v39 = vor.u32 %v3460_v26, %v2348_v27  ;;  %v3454_v10 = vld [vmem:[%s5602_s1 + $0x34] sm:$0xf]  ;;  %v3452_v26 = vld [vmem:[%s5602_s1 + $0x24] sm:$0xf]  ;;  %v2316_v27 = vld [vmem:[%s5602_s1 + $0x28] sm:$0xf0] }
  0x7a   :  { %2007 = vmatpush.bf16.msrb.mxu2 %v3211_v31  ;;  %v4631_v31 = vpack.c.b16 %v339_v11, %v339_v11  ;;  %v2324_v11 = vld [vmem:[%s5602_s1 + $0x38] sm:$0xf0] }
  0x7b   :  { %2020 = vmatpush.bf16.msrb.mxu3 %v3275_v36  ;;  %v3371_v36 = vor.u32 %v3717_v18, %v3370_v17  ;;  %v3338_v17 = vld [vmem:[%s5602_s1 + $0x820] sm:$0xf]  ;;  %v3709_v18 = vld [vmem:[%s5602_s1 + $0x824] sm:$0xf0] }
  0x7c   :  { %1982 = vmatpush.bf16.msrb.mxu0 %v3075_v47  ;;  %v3731_v47 = vld [vmem:[%s5602_s1 + $0x8d4] sm:$0xf0] }
  0x7d   :  { %1995 = vmatpush.bf16.msrb.mxu1 %v3139_v51  ;;  %v2404_v51 = vld [vmem:[%s5602_s1 + $0xd8] sm:$0xf0]  ;;  %v3427_v53 = vor.u32 %v3731_v47, %v3426_v45  ;;  %v3394_v45 = vld [vmem:[%s5602_s1 + $0x890] sm:$0xf]  ;;  %v3723_v47 = vld [vmem:[%s5602_s1 + $0x894] sm:$0xf0] }
  0x7e   :  { %2008 = vmatpush.bf16.msrb.mxu2 %v3203_v52  ;;  %v3363_v52 = vor.u32 %v3715_v43, %v3362_v40  ;;  %v2407_v58 = vor.u32 %v3474_v50, %v2404_v51  ;;  %v3330_v40 = vld [vmem:[%s5602_s1 + $0x810] sm:$0xf]  ;;  %v3707_v43 = vld [vmem:[%s5602_s1 + $0x814] sm:$0xf0]  ;;  %v3466_v50 = vld [vmem:[%s5602_s1 + $0x94] sm:$0xf] }
  0x7f   :  { %2021 = vmatpush.bf16.msrb.mxu3 %v3267_v56  ;;  %v3713_v56 = vld [vmem:[%s5602_s1 + $0x844] sm:$0xf0]  ;;  %v2372_v51 = vld [vmem:[%s5602_s1 + $0x98] sm:$0xf0] }
  0x80   :  { %1983 = vmatpush.bf16.msrb.mxu0 %v3067_v63  ;;  %v2396_v63 = vld [vmem:[%s5602_s1 + $0xc8] sm:$0xf0]  ;;  %v3355_v0 = vor.u32 %v3713_v56, %v3354_v55  ;;  %v3386_v55 = vld [vmem:[%s5602_s1 + $0x880] sm:$0xf]  ;;  %v3395_v56 = vor.u32 %v3723_v47, %v3394_v45  ;;  %v2375_v61 = vor.u32 %v3466_v50, %v2372_v51  ;;  %v3506_v50 = vld [vmem:[%s5602_s1 + $0x1d4] sm:$0xf] }
  0x81   :  { %1996 = vmatpush.bf16.msrb.mxu1 %v3131_v5  ;;  %v3711_v5 = vld [vmem:[%s5602_s1 + $0x834] sm:$0xf0]  ;;  %v2399_v8 = vor.u32 %v3472_v62, %v2396_v63  ;;  %v2300_v62 = vld [vmem:[%s5602_s1 + $0x8] sm:$0xf0]  ;;  %v3464_v63 = vld [vmem:[%s5602_s1 + $0x84] sm:$0xf] }
  0x82   :  { %2009 = vmatpush.bf16.msrb.mxu2 %v3195_v7  ;;  %v3410_v7 = vld [vmem:[%s5602_s1 + $0x8b0] sm:$0xf]  ;;  %v3347_v14 = vor.u32 %v3711_v5, %v3346_v3  ;;  %v3510_v3 = vld [vmem:[%s5602_s1 + $0x1f4] sm:$0xf] }
  0x83   :  { %2022 = vmatpush.bf16.msrb.mxu3 %v3259_v12  ;;  %1984 = vmatmul.bf16.vlgmr.msrb.gmra.mxu0 %v4618_v23  ;;  %v3470_v12 = vld [vmem:[%s5602_s1 + $0xb4] sm:$0xf] }
  0x84   :  { %2028 = vmatpush.bf16.msra.mxu0 %v3379_v13  ;;  %1997 = vmatmul.bf16.vlgmr.msrb.gmra.mxu1 %v4631_v31  ;;  %v2388_v13 = vld [vmem:[%s5602_s1 + $0xb8] sm:$0xf0] }
  0x85   :  { %2041 = vmatpush.bf16.msra.mxu1 %v3443_v15  ;;  %2010 = vmatmul.bf16.vlgmr.msrb.gmra.mxu2 %v4629_v28  ;;  %v3411_v15 = vor.u32 %v3727_v9, %v3410_v7  ;;  %v2548_v7 = vld [vmem:[%s5602_s1 + $0x1f8] sm:$0xf0] }
  0x86   :  { %2054 = vmatpush.bf16.msra.mxu2 %v2359_v16  ;;  %2023 = vmatmul.bf16.vlgmr.msrb.gmra.mxu3 %v4639_v35  ;;  %v2327_v16 = vor.u32 %v3454_v10, %v2324_v11  ;;  %v2612_v9 = vld [vmem:[%s5602_s1 + $0x278] sm:$0xf0]  ;;  %v342_v10 = vunpack.c.l.b16 %v22_v60 }
  0x87   :  { %2067 = vmatpush.bf16.msra.mxu3 %v2423_v22  ;;  %v2391_v22 = vor.u32 %v3470_v12, %v2388_v13  ;;  %v2303_v12 = vor.u32 %v3448_v59, %v2300_v62  ;;  %v3542_v13 = vld [vmem:[%s5602_s1 + $0x2f4] sm:$0xf] }
  0x88   :  { %2029 = vmatpush.bf16.msra.mxu0 %v3371_v36  ;;  %v3339_v36 = vor.u32 %v3709_v18, %v3338_v17  ;;  %v2551_v18 = vor.u32 %v3510_v3, %v2548_v7 }
  0x89   :  { %2042 = vmatpush.bf16.msra.mxu1 %v3435_v37  ;;  %v3403_v37 = vor.u32 %v3725_v24, %v3402_v19  ;;  %v2476_v24 = vld [vmem:[%s5602_s1 + $0x168] sm:$0xf0] }
  0x8a   :  { %2055 = vmatpush.bf16.msra.mxu2 %v2351_v39  ;;  %v2319_v39 = vor.u32 %v3452_v26, %v2316_v27  ;;  %v3508_v26 = vld [vmem:[%s5602_s1 + $0x1e4] sm:$0xf] }
  0x8b   :  { %2068 = vmatpush.bf16.msra.mxu3 %v2415_v46  ;;  %v2383_v46 = vor.u32 %v3468_v32, %v2380_v34  ;;  %v4825_v32 = vpack.c.b16 %v342_v10, %v342_v10  ;;  %v2540_v34 = vld [vmem:[%s5602_s1 + $0x1e8] sm:$0xf0]  ;;  %v3502_v10 = vld [vmem:[%s5602_s1 + $0x1b4] sm:$0xf] }
  0x8c   :  { %2030 = vmatpush.bf16.msra.mxu0 %v3363_v52  ;;  %v3331_v52 = vor.u32 %v3707_v43, %v3330_v40  ;;  %v3540_v40 = vld [vmem:[%s5602_s1 + $0x2e4] sm:$0xf]  ;;  %v2668_v43 = vld [vmem:[%s5602_s1 + $0x2e8] sm:$0xf0] }
  0x8d   :  { %2043 = vmatpush.bf16.msra.mxu1 %v3427_v53  ;;  %v3322_v53 = vld [vmem:[%s5602_s1 + $0x800] sm:$0xf]  ;;  %v2671_v51 = vor.u32 %v3540_v40, %v2668_v43  ;;  %v3516_v40 = vld [vmem:[%s5602_s1 + $0x224] sm:$0xf]  ;;  %v2572_v43 = vld [vmem:[%s5602_s1 + $0x228] sm:$0xf0] }
  0x8e   :  { %2056 = vmatpush.bf16.msra.mxu2 %v2343_v54  ;;  %v3705_v54 = vld [vmem:[%s5602_s1 + $0x804] sm:$0xf0] }
  0x8f   :  { %2069 = vmatpush.bf16.msra.mxu3 %v2407_v58  ;;  %v3721_v58 = vld [vmem:[%s5602_s1 + $0x884] sm:$0xf0]  ;;  %v3323_v5 = vor.u32 %v3705_v54, %v3322_v53  ;;  %v3522_v53 = vld [vmem:[%s5602_s1 + $0x254] sm:$0xf]  ;;  %v2596_v54 = vld [vmem:[%s5602_s1 + $0x258] sm:$0xf0] }
  0x90   :  { %2031 = vmatpush.bf16.msra.mxu0 %v3355_v0  ;;  %v2364_v0 = vld [vmem:[%s5602_s1 + $0x88] sm:$0xf0]  ;;  %v3387_v11 = vor.u32 %v3721_v58, %v3386_v55  ;;  %v3538_v55 = vld [vmem:[%s5602_s1 + $0x2d4] sm:$0xf]  ;;  %v2599_v59 = vor.u32 %v3522_v53, %v2596_v54  ;;  %v2436_v54 = vld [vmem:[%s5602_s1 + $0x118] sm:$0xf0] }
  0x91   :  { %2044 = vmatpush.bf16.msra.mxu1 %v3419_v1  ;;  %v3494_v1 = vld [vmem:[%s5602_s1 + $0x174] sm:$0xf] }
  0x92   :  { %2057 = vmatpush.bf16.msra.mxu2 %v2335_v2  ;;  %v2484_v2 = vld [vmem:[%s5602_s1 + $0x178] sm:$0xf0]  ;;  %v3482_v53 = vld [vmem:[%s5602_s1 + $0x114] sm:$0xf] }
  0x93   :  { %2070 = vmatpush.bf16.msra.mxu3 %v2399_v8  ;;  %v3526_v8 = vld [vmem:[%s5602_s1 + $0x274] sm:$0xf]  ;;  %v2487_v17 = vor.u32 %v3494_v1, %v2484_v2  ;;  %v3536_v1 = vld [vmem:[%s5602_s1 + $0x2c4] sm:$0xf]  ;;  %v2652_v2 = vld [vmem:[%s5602_s1 + $0x2c8] sm:$0xf0] }
  0x94   :  { %2032 = vmatpush.bf16.msra.mxu0 %v3347_v14  ;;  %v2676_v14 = vld [vmem:[%s5602_s1 + $0x2f8] sm:$0xf0]  ;;  %v2615_v19 = vor.u32 %v3526_v8, %v2612_v9 }
  0x95   :  { %2045 = vmatpush.bf16.msra.mxu1 %v3411_v15  ;;  %v343_v15 = vunpack.c.h.b16 %v22_v60  ;;  %v2679_v27 = vor.u32 %v3542_v13, %v2676_v14  ;;  %v3488_v60 = vld [vmem:[%s5602_s1 + $0x144] sm:$0xf]  ;;  %v2452_v9 = vld [vmem:[%s5602_s1 + $0x138] sm:$0xf0]  ;;  %v3518_v14 = vld [vmem:[%s5602_s1 + $0x234] sm:$0xf] }
  0x96   :  { %2058 = vmatpush.bf16.msra.mxu2 %v2327_v16  ;;  %v2367_v16 = vor.u32 %v3464_v63, %v2364_v0  ;;  %v3520_v63 = vld [vmem:[%s5602_s1 + $0x244] sm:$0xf]  ;;  %v2588_v0 = vld [vmem:[%s5602_s1 + $0x248] sm:$0xf0]  ;;  %v2516_v13 = vld [vmem:[%s5602_s1 + $0x1b8] sm:$0xf0] }
  0x97   :  { %2071 = vmatpush.bf16.msra.mxu3 %v2391_v22  ;;  %v3492_v22 = vld [vmem:[%s5602_s1 + $0x164] sm:$0xf]  ;;  %v2591_v8 = vor.u32 %v3520_v63, %v2588_v0  ;;  %v2439_v63 = vor.u32 %v3482_v53, %v2436_v54  ;;  %v2796_v54 = vld [vmem:[%s5602_s1 + $0x3e8] sm:$0xf0] }
  0x98   :  { %2033 = vmatpush.bf16.msra.mxu0 %v3339_v36  ;;  %v3524_v36 = vld [vmem:[%s5602_s1 + $0x264] sm:$0xf]  ;;  %v2479_v45 = vor.u32 %v3492_v22, %v2476_v24  ;;  %v2519_v22 = vor.u32 %v3502_v10, %v2516_v13  ;;  %v2620_v13 = vld [vmem:[%s5602_s1 + $0x288] sm:$0xf0] }
  0x99   :  { %2046 = vmatpush.bf16.msra.mxu1 %v3403_v37  ;;  %v2604_v37 = vld [vmem:[%s5602_s1 + $0x268] sm:$0xf0]  ;;  %v3480_v0 = vld [vmem:[%s5602_s1 + $0x104] sm:$0xf] }
  0x9a   :  { %2059 = vmatpush.bf16.msra.mxu2 %v2319_v39  ;;  %v4836_v39 = vpack.c.b16 %v343_v15, %v343_v15  ;;  %v2607_v47 = vor.u32 %v3524_v36, %v2604_v37  ;;  %v2580_v15 = vld [vmem:[%s5602_s1 + $0x238] sm:$0xf0]  ;;  %v2508_v37 = vld [vmem:[%s5602_s1 + $0x1a8] sm:$0xf0] }
  0x9b   :  { %2072 = vmatpush.bf16.msra.mxu3 %v2383_v46  ;;  %v2543_v46 = vor.u32 %v3508_v26, %v2540_v34  ;;  %v2583_v24 = vor.u32 %v3518_v14, %v2580_v15  ;;  %v3484_v26 = vld [vmem:[%s5602_s1 + $0x124] sm:$0xf]  ;;  %v3558_v15 = vld [vmem:[%s5602_s1 + $0x374] sm:$0xf] }
  0x9c   :  { %2034 = vmatpush.bf16.msra.mxu0 %v3331_v52  ;;  %v2532_v52 = vld [vmem:[%s5602_s1 + $0x1d8] sm:$0xf0]  ;;  %v3500_v34 = vld [vmem:[%s5602_s1 + $0x1a4] sm:$0xf] }
  0x9d   :  { %2047 = vmatpush.bf16.msra.mxu1 %v3395_v56  ;;  %v2660_v56 = vld [vmem:[%s5602_s1 + $0x2d8] sm:$0xf0]  ;;  %v2535_v58 = vor.u32 %v3506_v50, %v2532_v52  ;;  %v2575_v52 = vor.u32 %v3516_v40, %v2572_v43 }
  0x9e   :  { %2060 = vmatpush.bf16.msra.mxu2 %v2311_v57  ;;  %v2471_v57 = vor.u32 %v3490_v48, %v2468_v49  ;;  %v2663_v62 = vor.u32 %v3538_v55, %v2660_v56  ;;  %v3498_v55 = vld [vmem:[%s5602_s1 + $0x194] sm:$0xf]  ;;  %v2932_v40 = vld [vmem:[%s5602_s1 + $0x4f8] sm:$0xf0] }
  0x9f   :  { %2073 = vmatpush.bf16.msra.mxu3 %v2375_v61  ;;  %v2460_v61 = vld [vmem:[%s5602_s1 + $0x148] sm:$0xf0] }
  0xa0   :  { %2035 = vmatpush.bf16.msra.mxu0 %v3323_v5  ;;  %v2463_v3 = vor.u32 %v3488_v60, %v2460_v61  ;;  %v3486_v5 = vld [vmem:[%s5602_s1 + $0x134] sm:$0xf]  ;;  %v2564_v60 = vld [vmem:[%s5602_s1 + $0x218] sm:$0xf0] }
  0xa1   :  { %2048 = vmatpush.bf16.msra.mxu1 %v3387_v11  ;;  %v311_v11 = vld [vmem:[%s5604_s2] sm:$0x3]  ;;  %v1842_v50 = vpop.f32.mrf.mxu1 }
  0xa2   :  { %2061 = vmatpush.bf16.msra.mxu2 %v2303_v12  ;;  %v2655_v12 = vor.u32 %v3536_v1, %v2652_v2  ;;  %v2428_v1 = vld [vmem:[%s5602_s1 + $0x108] sm:$0xf0] }
  0xa3   :  { %2074 = vmatpush.bf16.msra.mxu3 %v2367_v16  ;;  %2036 = vmatmul.bf16.vlgmr.msra.gmra.mxu0 %v4825_v32  ;;  %v3534_v16 = vld [vmem:[%s5602_s1 + $0x2b4] sm:$0xf] }
  0xa4   :  { %2080 = vmatpush.bf16.msrb.mxu0 %v2487_v17  ;;  %2049 = vmatmul.bf16.vlgmr.msra.gmra.mxu1 %v4836_v39  ;;  %v2644_v17 = vld [vmem:[%s5602_s1 + $0x2b8] sm:$0xf0] }
  0xa5   :  { %2093 = vmatpush.bf16.msrb.mxu1 %v2551_v18  ;;  %2062 = vmatmul.bf16.vlgmr.msra.gmra.mxu2 %v4056_v20  ;;  %v3504_v20 = vld [vmem:[%s5602_s1 + $0x1c4] sm:$0xf]  ;;  %v2455_v18 = vor.u32 %v3486_v5, %v2452_v9  ;;  %v2647_v36 = vor.u32 %v3534_v16, %v2644_v17  ;;  %v2740_v16 = vld [vmem:[%s5602_s1 + $0x378] sm:$0xf0]  ;;  %v3574_v17 = vld [vmem:[%s5602_s1 + $0x3f4] sm:$0xf] }
  0xa6   :  { %2106 = vmatpush.bf16.msrb.mxu2 %v2615_v19  ;;  %2075 = vmatmul.bf16.vlgmr.msra.gmra.mxu3 %v4059_v21  ;;  %v2524_v21 = vld [vmem:[%s5602_s1 + $0x1c8] sm:$0xf0]  ;;  %v313_v19 = vperm.slane %v311_v11, 0  ;;  %v3512_v9 = vld [vmem:[%s5602_s1 + $0x204] sm:$0xf] }
  0xa7   :  { %2119 = vmatpush.bf16.msrb.mxu3 %v2679_v27  ;;  %v2527_v7 = vor.u32 %v3504_v20, %v2524_v21  ;;  %v2444_v27 = vld [vmem:[%s5602_s1 + $0x128] sm:$0xf0]  ;;  %v2628_v21 = vld [vmem:[%s5602_s1 + $0x298] sm:$0xf0] }
  0xa8   :  { %2081 = vmatpush.bf16.msrb.mxu0 %v2479_v45  ;;  %v3532_v45 = vld [vmem:[%s5602_s1 + $0x2a4] sm:$0xf]  ;;  %v2447_v48 = vor.u32 %v3484_v26, %v2444_v27  ;;  %v1855_v56 = vpop.f32.mrf.mxu2  ;;  %v2556_v11 = vld [vmem:[%s5602_s1 + $0x208] sm:$0xf0]  ;;  %v2868_v26 = vld [vmem:[%s5602_s1 + $0x478] sm:$0xf0] }
  0xa9   :  { %2094 = vmatpush.bf16.msrb.mxu1 %v2543_v46  ;;  %v2636_v46 = vld [vmem:[%s5602_s1 + $0x2a8] sm:$0xf0]  ;;  %v1868_v20 = vpop.f32.mrf.mxu3  ;;  %v1844_v27 = vpop.f32.mrf.mxu1 }
  0xaa   :  { %2107 = vmatpush.bf16.msrb.mxu2 %v2607_v47  ;;  %v1829_v47 = vpop.f32.mrf.mxu0 }
  0xab   :  { %2120 = vmatpush.bf16.msrb.mxu3 %v2671_v51  ;;  %v1830_v49 = vadd.f32 %v1829_v47, %v313_v19  ;;  %v2511_v51 = vor.u32 %v3500_v34, %v2508_v37  ;;  %v2431_v19 = vor.u32 %v3480_v0, %v2428_v1  ;;  %v3606_v37 = vld [vmem:[%s5602_s1 + $0x4f4] sm:$0xf]  ;;  %v2788_v0 = vld [vmem:[%s5602_s1 + $0x3d8] sm:$0xf0] }
  0xac   :  { %2082 = vmatpush.bf16.msrb.mxu0 %v2471_v57  ;;  %v2639_v57 = vor.u32 %v3532_v45, %v2636_v46  ;;  %v2743_v46 = vor.u32 %v3558_v15, %v2740_v16  ;;  %v2935_v53 = vor.u32 %v3606_v37, %v2932_v40  ;;  %v3586_v1 = vld [vmem:[%s5602_s1 + $0x454] sm:$0xf]  ;;  %v2908_v15 = vld [vmem:[%s5602_s1 + $0x4c8] sm:$0xf0]  ;;  %v2772_v37 = vld [vmem:[%s5602_s1 + $0x3b8] sm:$0xf0] }
  0xad   :  { %2095 = vmatpush.bf16.msrb.mxu1 %v2535_v58  ;;  %v2500_v58 = vld [vmem:[%s5602_s1 + $0x198] sm:$0xf0]  ;;  %v1843_v61 = vadd.f32 %v1842_v50, %v1830_v49  ;;  %v3556_v50 = vld [vmem:[%s5602_s1 + $0x364] sm:$0xf]  ;;  %v3582_v40 = vld [vmem:[%s5602_s1 + $0x434] sm:$0xf] }
  0xae   :  { %2108 = vmatpush.bf16.msrb.mxu2 %v2599_v59  ;;  %v3514_v59 = vld [vmem:[%s5602_s1 + $0x214] sm:$0xf] }
  0xaf   :  { %2121 = vmatpush.bf16.msrb.mxu3 %v2663_v62  ;;  %v3530_v62 = vld [vmem:[%s5602_s1 + $0x294] sm:$0xf]  ;;  %v1856_v2 = vadd.f32 %v1855_v56, %v1843_v61  ;;  %v2567_v5 = vor.u32 %v3514_v59, %v2564_v60  ;;  %v2860_v56 = vld [vmem:[%s5602_s1 + $0x468] sm:$0xf0] }
  0xb0   :  { %2083 = vmatpush.bf16.msrb.mxu0 %v2463_v3  ;;  %v2503_v3 = vor.u32 %v3498_v55, %v2500_v58  ;;  %v2631_v10 = vor.u32 %v3530_v62, %v2628_v21  ;;  %v1857_v43 = vpop.f32.mrf.mxu2  ;;  %v3588_v55 = vld [vmem:[%s5602_s1 + $0x464] sm:$0xf]  ;;  %v2924_v58 = vld [vmem:[%s5602_s1 + $0x4e8] sm:$0xf0]  ;;  %v2724_v62 = vld [vmem:[%s5602_s1 + $0x358] sm:$0xf0] }
  0xb1   :  { %2096 = vmatpush.bf16.msrb.mxu1 %v2527_v7  ;;  %v3496_v7 = vld [vmem:[%s5602_s1 + $0x184] sm:$0xf]  ;;  %v4995_v14 = vadd.f32 %v1868_v20, %v1856_v2  ;;  %v1870_v47 = vpop.f32.mrf.mxu3  ;;  %v2863_v61 = vor.u32 %v3588_v55, %v2860_v56  ;;  %v3554_v20 = vld [vmem:[%s5602_s1 + $0x354] sm:$0xf]  ;;  %v2852_v2 = vld [vmem:[%s5602_s1 + $0x458] sm:$0xf0] }
  0xb2   :  { %2109 = vmatpush.bf16.msrb.mxu2 %v2591_v8  ;;  %v2492_v8 = vld [vmem:[%s5602_s1 + $0x188] sm:$0xf0]  ;;  %v3570_v21 = vld [vmem:[%s5602_s1 + $0x3d4] sm:$0xf]  ;;  %v2836_v43 = vld [vmem:[%s5602_s1 + $0x438] sm:$0xf0] }
  0xb3   :  { %2122 = vmatpush.bf16.msrb.mxu3 %v2655_v12  ;;  %v3528_v12 = vld [vmem:[%s5602_s1 + $0x284] sm:$0xf]  ;;  %v2495_v34 = vor.u32 %v3496_v7, %v2492_v8  ;;  %v2791_v7 = vor.u32 %v3570_v21, %v2788_v0  ;;  %v2855_v8 = vor.u32 %v3586_v1, %v2852_v2  ;;  %v2764_v55 = vld [vmem:[%s5602_s1 + $0x3a8] sm:$0xf0]  ;;  %v3546_v1 = vld [vmem:[%s5602_s1 + $0x314] sm:$0xf] }
  0xb4   :  { %2084 = vmatpush.bf16.msrb.mxu0 %v2455_v18  ;;  %v1831_v18 = vpop.f32.mrf.mxu0  ;;  %v2623_v45 = vor.u32 %v3528_v12, %v2620_v13  ;;  %v2844_v12 = vld [vmem:[%s5602_s1 + $0x448] sm:$0xf0]  ;;  %v3600_v13 = vld [vmem:[%s5602_s1 + $0x4c4] sm:$0xf]  ;;  %v2692_v2 = vld [vmem:[%s5602_s1 + $0x318] sm:$0xf0] }
  0xb5   :  { %2097 = vmatpush.bf16.msrb.mxu1 %v2519_v22  ;;  %v2804_v22 = vld [vmem:[%s5602_s1 + $0x3f8] sm:$0xf0]  ;;  %v3580_v56 = vld [vmem:[%s5602_s1 + $0x424] sm:$0xf] }
  0xb6   :  { %2110 = vmatpush.bf16.msrb.mxu2 %v2583_v24  ;;  %v3590_v24 = vld [vmem:[%s5602_s1 + $0x474] sm:$0xf] }
  0xb7   :  { %2123 = vmatpush.bf16.msrb.mxu3 %v2647_v36  ;;  %v2559_v36 = vor.u32 %v3512_v9, %v2556_v11  ;;  %v2871_v49 = vor.u32 %v3590_v24, %v2868_v26  ;;  %v3552_v9 = vld [vmem:[%s5602_s1 + $0x344] sm:$0xf]  ;;  %v2708_v24 = vld [vmem:[%s5602_s1 + $0x338] sm:$0xf0]  ;;  %v3566_v26 = vld [vmem:[%s5602_s1 + $0x3b4] sm:$0xf] }
  0xb8   :  { %2085 = vmatpush.bf16.msrb.mxu0 %v2447_v48  ;;  %v2807_v48 = vor.u32 %v3574_v17, %v2804_v22  ;;  %v3584_v11 = vld [vmem:[%s5602_s1 + $0x444] sm:$0xf]  ;;  %v3550_v22 = vld [vmem:[%s5602_s1 + $0x334] sm:$0xf] }
  0xb9   :  { %2098 = vmatpush.bf16.msrb.mxu1 %v2511_v51  ;;  %v2732_v51 = vld [vmem:[%s5602_s1 + $0x368] sm:$0xf0]  ;;  %v2711_v47 = vor.u32 %v3550_v22, %v2708_v24  ;;  %v3592_v24 = vld [vmem:[%s5602_s1 + $0x484] sm:$0xf] }
  0xba   :  { %2111 = vmatpush.bf16.msrb.mxu2 %v2575_v52  ;;  %v3572_v52 = vld [vmem:[%s5602_s1 + $0x3e4] sm:$0xf]  ;;  %v2735_v59 = vor.u32 %v3556_v50, %v2732_v51  ;;  %v2700_v51 = vld [vmem:[%s5602_s1 + $0x328] sm:$0xf0] }
  0xbb   :  { %2124 = vmatpush.bf16.msrb.mxu3 %v2639_v57  ;;  %v3604_v57 = vld [vmem:[%s5602_s1 + $0x4e4] sm:$0xf]  ;;  %v2799_v60 = vor.u32 %v3572_v52, %v2796_v54  ;;  %v2812_v22 = vld [vmem:[%s5602_s1 + $0x408] sm:$0xf0] }
  0xbc   :  { %2086 = vmatpush.bf16.msrb.mxu0 %v2439_v63  ;;  %v2927_v63 = vor.u32 %v3604_v57, %v2924_v58  ;;  %v3548_v50 = vld [vmem:[%s5602_s1 + $0x324] sm:$0xf]  ;;  %v2828_v57 = vld [vmem:[%s5602_s1 + $0x428] sm:$0xf0] }
  0xbd   :  { %2099 = vmatpush.bf16.msrb.mxu1 %v2503_v3  ;;  %v3602_v3 = vld [vmem:[%s5602_s1 + $0x4d4] sm:$0xf]  ;;  %v3564_v52 = vld [vmem:[%s5602_s1 + $0x3a4] sm:$0xf]  ;;  %v2831_v0 = vor.u32 %v3580_v56, %v2828_v57 }
  0xbe   :  { %2112 = vmatpush.bf16.msrb.mxu2 %v2567_v5  ;;  %v2727_v5 = vor.u32 %v3554_v20, %v2724_v62  ;;  %v2703_v20 = vor.u32 %v3548_v50, %v2700_v51  ;;  %v3636_v56 = vld [vmem:[%s5602_s1 + $0x5e4] sm:$0xf] }
  0xbf   :  { %2125 = vmatpush.bf16.msrb.mxu3 %v2631_v10  ;;  %v2716_v10 = vld [vmem:[%s5602_s1 + $0x348] sm:$0xf0] }
  0xc0   :  { %2087 = vmatpush.bf16.msrb.mxu0 %v2431_v19  ;;  %v2719_v16 = vor.u32 %v3552_v9, %v2716_v10  ;;  %v1881_v17 = vpop.f32.mrf.mxu0  ;;  %v2847_v19 = vor.u32 %v3584_v11, %v2844_v12  ;;  %v2820_v9 = vld [vmem:[%s5602_s1 + $0x418] sm:$0xf0]  ;;  %v3594_v10 = vld [vmem:[%s5602_s1 + $0x494] sm:$0xf]  ;;  %v2684_v11 = vld [vmem:[%s5602_s1 + $0x308] sm:$0xf0] }
  0xc1   :  { %2100 = vmatpush.bf16.msrb.mxu1 %v2495_v34  ;;  %v1882_v27 = vadd.f32 %v1881_v17, %v4995_v14  ;;  %v1894_v34 = vpop.f32.mrf.mxu1  ;;  %v2900_v14 = vld [vmem:[%s5602_s1 + $0x4b8] sm:$0xf0]  ;;  %v3576_v17 = vld [vmem:[%s5602_s1 + $0x404] sm:$0xf] }
  0xc2   :  { %2113 = vmatpush.bf16.msrb.mxu2 %v2559_v36  ;;  %v2911_v36 = vor.u32 %v3600_v13, %v2908_v15  ;;  %v3560_v15 = vld [vmem:[%s5602_s1 + $0x384] sm:$0xf] }
  0xc3   :  { %2126 = vmatpush.bf16.msrb.mxu3 %v2623_v45  ;;  %2088 = vmatmul.bf16.vlgmr.msrb.gmra.mxu0 %v4024_v4  ;;  %v3568_v4 = vld [vmem:[%s5602_s1 + $0x3c4] sm:$0xf]  ;;  %v3598_v45 = vld [vmem:[%s5602_s1 + $0x4b4] sm:$0xf] }
  0xc4   :  { %2132 = vmatpush.bf16.msra.mxu0 %v2743_v46  ;;  %2101 = vmatmul.bf16.vlgmr.msrb.gmra.mxu1 %v4029_v6  ;;  %v2780_v6 = vld [vmem:[%s5602_s1 + $0x3c8] sm:$0xf0]  ;;  %v1895_v46 = vadd.f32 %v1894_v34, %v1882_v27  ;;  %v2903_v54 = vor.u32 %v3598_v45, %v2900_v14  ;;  %v3622_v34 = vld [vmem:[%s5602_s1 + $0x574] sm:$0xf]  ;;  %v3124_v14 = vld [vmem:[%s5602_s1 + $0x678] sm:$0xf0] }
  0xc5   :  { %2145 = vmatpush.bf16.msra.mxu1 %v2807_v48  ;;  %2114 = vmatmul.bf16.vlgmr.msrb.gmra.mxu2 %v4215_v41  ;;  %v2916_v41 = vld [vmem:[%s5602_s1 + $0x4d8] sm:$0xf0]  ;;  %v2783_v18 = vor.u32 %v3568_v4, %v2780_v6  ;;  %v2775_v48 = vor.u32 %v3566_v26, %v2772_v37  ;;  %v3544_v6 = vld [vmem:[%s5602_s1 + $0x304] sm:$0xf]  ;;  %v2876_v26 = vld [vmem:[%s5602_s1 + $0x488] sm:$0xf0] }
  0xc6   :  { %2158 = vmatpush.bf16.msra.mxu2 %v2871_v49  ;;  %2127 = vmatmul.bf16.vlgmr.msrb.gmra.mxu3 %v4219_v44  ;;  %v2919_v44 = vor.u32 %v3602_v3, %v2916_v41  ;;  %v2839_v49 = vor.u32 %v3582_v40, %v2836_v43  ;;  %v3562_v3 = vld [vmem:[%s5602_s1 + $0x394] sm:$0xf]  ;;  %v2884_v4 = vld [vmem:[%s5602_s1 + $0x498] sm:$0xf0]  ;;  %v2687_v40 = vor.u32 %v3544_v6, %v2684_v11  ;;  %v3632_v6 = vld [vmem:[%s5602_s1 + $0x5c4] sm:$0xf] }
  0xc7   :  { %2171 = vmatpush.bf16.msra.mxu3 %v2935_v53  ;;  %v3638_v37 = vld [vmem:[%s5602_s1 + $0x5f4] sm:$0xf]  ;;  %v3060_v43 = vld [vmem:[%s5602_s1 + $0x5f8] sm:$0xf0]  ;;  %v2879_v50 = vor.u32 %v3592_v24, %v2876_v26  ;;  %v3036_v11 = vld [vmem:[%s5602_s1 + $0x5c8] sm:$0xf0] }
  0xc8   :  { %2133 = vmatpush.bf16.msra.mxu0 %v2735_v59  ;;  %v1907_v53 = vpop.f32.mrf.mxu2  ;;  %v1883_v21 = vpop.f32.mrf.mxu0  ;;  %v3654_v45 = vld [vmem:[%s5602_s1 + $0x674] sm:$0xf]  ;;  %v3039_v24 = vor.u32 %v3632_v6, %v3036_v11  ;;  %v3624_v11 = vld [vmem:[%s5602_s1 + $0x584] sm:$0xf] }
  0xc9   :  { %2146 = vmatpush.bf16.msra.mxu1 %v2799_v60  ;;  %v1908_v58 = vadd.f32 %v1907_v53, %v1895_v46  ;;  %v1920_v59 = vpop.f32.mrf.mxu3  ;;  %v3596_v60 = vld [vmem:[%s5602_s1 + $0x4a4] sm:$0xf]  ;;  %v1896_v41 = vpop.f32.mrf.mxu1  ;;  %v3127_v53 = vor.u32 %v3654_v45, %v3124_v14  ;;  %v3092_v45 = vld [vmem:[%s5602_s1 + $0x638] sm:$0xf0]  ;;  %v3662_v14 = vld [vmem:[%s5602_s1 + $0x6b4] sm:$0xf] }
  0xca   :  { %2159 = vmatpush.bf16.msra.mxu2 %v2863_v61  ;;  %v2892_v61 = vld [vmem:[%s5602_s1 + $0x4a8] sm:$0xf0] }
  0xcb   :  { %2172 = vmatpush.bf16.msra.mxu3 %v2927_v63  ;;  %v5146_v62 = vadd.f32 %v1920_v59, %v1908_v58  ;;  %v2767_v63 = vor.u32 %v3564_v52, %v2764_v55  ;;  %v3063_v52 = vor.u32 %v3638_v37, %v3060_v43  ;;  %v2988_v55 = vld [vmem:[%s5602_s1 + $0x568] sm:$0xf0]  ;;  %v3652_v59 = vld [vmem:[%s5602_s1 + $0x664] sm:$0xf]  ;;  %v3646_v43 = vld [vmem:[%s5602_s1 + $0x634] sm:$0xf] }
  0xcc   :  { %2134 = vmatpush.bf16.msra.mxu0 %v2727_v5  ;;  %v2895_v5 = vor.u32 %v3596_v60, %v2892_v61  ;;  %v3052_v58 = vld [vmem:[%s5602_s1 + $0x5e8] sm:$0xf0]  ;;  %v3668_v61 = vld [vmem:[%s5602_s1 + $0x6e4] sm:$0xf] }
  0xcd   :  { %2147 = vmatpush.bf16.msra.mxu1 %v2791_v7  ;;  %v2756_v7 = vld [vmem:[%s5602_s1 + $0x398] sm:$0xf0]  ;;  %v3116_v60 = vld [vmem:[%s5602_s1 + $0x668] sm:$0xf0] }
  0xce   :  { %2160 = vmatpush.bf16.msra.mxu2 %v2855_v8  ;;  %v3578_v8 = vld [vmem:[%s5602_s1 + $0x414] sm:$0xf]  ;;  %v2759_v12 = vor.u32 %v3562_v3, %v2756_v7 }
  0xcf   :  { %2173 = vmatpush.bf16.msra.mxu3 %v2919_v44  ;;  %v2695_v44 = vor.u32 %v3546_v1, %v2692_v2  ;;  %v2823_v13 = vor.u32 %v3578_v8, %v2820_v9  ;;  %v3618_v1 = vld [vmem:[%s5602_s1 + $0x554] sm:$0xf]  ;;  %v2980_v2 = vld [vmem:[%s5602_s1 + $0x558] sm:$0xf0] }
  0xd0   :  { %2135 = vmatpush.bf16.msra.mxu0 %v2719_v16  ;;  %v2748_v16 = vld [vmem:[%s5602_s1 + $0x388] sm:$0xf0]  ;;  %v3634_v3 = vld [vmem:[%s5602_s1 + $0x5d4] sm:$0xf]  ;;  %v3108_v8 = vld [vmem:[%s5602_s1 + $0x658] sm:$0xf0] }
  0xd1   :  { %2148 = vmatpush.bf16.msra.mxu1 %v2783_v18  ;;  %v1909_v18 = vpop.f32.mrf.mxu2  ;;  %v1922_v27 = vpop.f32.mrf.mxu3  ;;  %v2751_v46 = vor.u32 %v3560_v15, %v2748_v16  ;;  %v3650_v7 = vld [vmem:[%s5602_s1 + $0x654] sm:$0xf]  ;;  %v3172_v9 = vld [vmem:[%s5602_s1 + $0x6d8] sm:$0xf0]  ;;  %v3664_v16 = vld [vmem:[%s5602_s1 + $0x6c4] sm:$0xf] }
  0xd2   :  { %2161 = vmatpush.bf16.msra.mxu2 %v2847_v19  ;;  %v2887_v19 = vor.u32 %v3594_v10, %v2884_v4  ;;  %v2983_v10 = vor.u32 %v3618_v1, %v2980_v2  ;;  %v3614_v27 = vld [vmem:[%s5602_s1 + $0x534] sm:$0xf] }
  0xd3   :  { %2174 = vmatpush.bf16.msra.mxu3 %v2911_v36  ;;  %v2996_v36 = vld [vmem:[%s5602_s1 + $0x578] sm:$0xf0] }
  0xd4   :  { %2136 = vmatpush.bf16.msra.mxu0 %v2711_v47  ;;  %v2815_v47 = vor.u32 %v3576_v17, %v2812_v22  ;;  %v2999_v51 = vor.u32 %v3622_v34, %v2996_v36  ;;  %v3164_v17 = vld [vmem:[%s5602_s1 + $0x6c8] sm:$0xf0]  ;;  %v2964_v34 = vld [vmem:[%s5602_s1 + $0x538] sm:$0xf0]  ;;  %v3630_v36 = vld [vmem:[%s5602_s1 + $0x5b4] sm:$0xf] }
  0xd5   :  { %2149 = vmatpush.bf16.msra.mxu1 %v2775_v48  ;;  %v3670_v48 = vld [vmem:[%s5602_s1 + $0x6f4] sm:$0xf] }
  0xd6   :  { %2162 = vmatpush.bf16.msra.mxu2 %v2839_v49  ;;  %v3188_v49 = vld [vmem:[%s5602_s1 + $0x6f8] sm:$0xf0] }
  0xd7   :  { %2175 = vmatpush.bf16.msra.mxu3 %v2903_v54  ;;  %v3620_v54 = vld [vmem:[%s5602_s1 + $0x564] sm:$0xf]  ;;  %v3191_v57 = vor.u32 %v3670_v48, %v3188_v49  ;;  %v3095_v49 = vor.u32 %v3646_v43, %v3092_v45  ;;  %v3734_v45 = vld [vmem:[%s5602_s1 + $0x8f4] sm:$0xf] }
  0xd8   :  { %2137 = vmatpush.bf16.msra.mxu0 %v2703_v20  ;;  %v3180_v20 = vld [vmem:[%s5602_s1 + $0x6e8] sm:$0xf0]  ;;  %v2991_v21 = vor.u32 %v3620_v54, %v2988_v55 }
  0xd9   :  { %2150 = vmatpush.bf16.msra.mxu1 %v2767_v63  ;;  %v3055_v63 = vor.u32 %v3636_v56, %v3052_v58  ;;  %v3183_v41 = vor.u32 %v3668_v61, %v3180_v20  ;;  %v3020_v55 = vld [vmem:[%s5602_s1 + $0x5a8] sm:$0xf0]  ;;  %v3644_v56 = vld [vmem:[%s5602_s1 + $0x624] sm:$0xf] }
  0xda   :  { %2163 = vmatpush.bf16.msra.mxu2 %v2831_v0  ;;  %v3119_v0 = vor.u32 %v3652_v59, %v3116_v60  ;;  %v3660_v60 = vld [vmem:[%s5602_s1 + $0x6a4] sm:$0xf]  ;;  %v3148_v61 = vld [vmem:[%s5602_s1 + $0x6a8] sm:$0xf0] }
  0xdb   :  { %2176 = vmatpush.bf16.msra.mxu3 %v2895_v5  ;;  %v3044_v5 = vld [vmem:[%s5602_s1 + $0x5d8] sm:$0xf0] }
  0xdc   :  { %2138 = vmatpush.bf16.msra.mxu0 %v2695_v44  ;;  %v3047_v4 = vor.u32 %v3634_v3, %v3044_v5  ;;  %v3111_v44 = vor.u32 %v3650_v7, %v3108_v8  ;;  %v3610_v3 = vld [vmem:[%s5602_s1 + $0x514] sm:$0xf]  ;;  %v3151_v7 = vor.u32 %v3660_v60, %v3148_v61  ;;  %v3012_v8 = vld [vmem:[%s5602_s1 + $0x598] sm:$0xf0] }
  0xdd   :  { %2151 = vmatpush.bf16.msra.mxu1 %v2759_v12  ;;  %v3648_v12 = vld [vmem:[%s5602_s1 + $0x644] sm:$0xf]  ;;  %v3626_v5 = vld [vmem:[%s5602_s1 + $0x594] sm:$0xf] }
  0xde   :  { %2164 = vmatpush.bf16.msra.mxu2 %v2823_v13  ;;  %v3100_v13 = vld [vmem:[%s5602_s1 + $0x648] sm:$0xf0]  ;;  %v3015_v6 = vor.u32 %v3626_v5, %v3012_v8  ;;  %v3428_v5 = vld [vmem:[%s5602_s1 + $0x8d8] sm:$0xf0] }
  0xdf   :  { %2177 = vmatpush.bf16.msra.mxu3 %v2887_v19  ;;  %v3103_v26 = vor.u32 %v3648_v12, %v3100_v13  ;;  %v3004_v12 = vld [vmem:[%s5602_s1 + $0x588] sm:$0xf0]  ;;  %v3640_v13 = vld [vmem:[%s5602_s1 + $0x604] sm:$0xf] }
  0xe0   :  { %2139 = vmatpush.bf16.msra.mxu0 %v2687_v40  ;;  %v1933_v15 = vpop.f32.mrf.mxu0  ;;  %v3028_v40 = vld [vmem:[%s5602_s1 + $0x5b8] sm:$0xf0] }
  0xe1   :  { %2152 = vmatpush.bf16.msra.mxu1 %v2751_v46  ;;  %v1934_v18 = vadd.f32 %v1933_v15, %v5146_v62  ;;  %v1946_v22 = vpop.f32.mrf.mxu1  ;;  %v3167_v62 = vor.u32 %v3664_v16, %v3164_v17  ;;  %v3156_v46 = vld [vmem:[%s5602_s1 + $0x6b8] sm:$0xf0]  ;;  %v3031_v48 = vor.u32 %v3630_v36, %v3028_v40  ;;  %v3068_v16 = vld [vmem:[%s5602_s1 + $0x608] sm:$0xf0]  ;;  %v3656_v17 = vld [vmem:[%s5602_s1 + $0x684] sm:$0xf]  ;;  %v3007_v40 = vor.u32 %v3624_v11, %v3004_v12 }
  0xe2   :  { %2165 = vmatpush.bf16.msra.mxu2 %v2815_v47  ;;  %v2967_v47 = vor.u32 %v3614_v27, %v2964_v34  ;;  %v3316_v36 = vld [vmem:[%s5602_s1 + $0x7f8] sm:$0xf0]  ;;  %v3071_v43 = vor.u32 %v3640_v13, %v3068_v16  ;;  %v3678_v16 = vld [vmem:[%s5602_s1 + $0x734] sm:$0xf] }
  0xe3   :  { %2178 = vmatpush.bf16.msra.mxu3 %v2879_v50  ;;  %2140 = vmatmul.bf16.vlgmr.msra.gmra.mxu0 %v4207_v38  ;;  %v3666_v38 = vld [vmem:[%s5602_s1 + $0x6d4] sm:$0xf]  ;;  %v1947_v37 = vadd.f32 %v1946_v22, %v1934_v18  ;;  %v3612_v50 = vld [vmem:[%s5602_s1 + $0x524] sm:$0xf]  ;;  %v3132_v18 = vld [vmem:[%s5602_s1 + $0x688] sm:$0xf0] }
  0xe4   :  { %2184 = vmatpush.bf16.msrb.mxu0 %v2999_v51  ;;  %2153 = vmatmul.bf16.vlgmr.msra.gmra.mxu1 %v4217_v42  ;;  %v3616_v42 = vld [vmem:[%s5602_s1 + $0x544] sm:$0xf]  ;;  %v2956_v51 = vld [vmem:[%s5602_s1 + $0x528] sm:$0xf0]  ;;  %v3686_v22 = vld [vmem:[%s5602_s1 + $0x774] sm:$0xf] }
  0xe5   :  { %2197 = vmatpush.bf16.msrb.mxu1 %v3063_v52  ;;  %2166 = vmatmul.bf16.vlgmr.msra.gmra.mxu2 %v4408_v25  ;;  %v2972_v25 = vld [vmem:[%s5602_s1 + $0x548] sm:$0xf0]  ;;  %v3628_v52 = vld [vmem:[%s5602_s1 + $0x5a4] sm:$0xf] }
  0xe6   :  { %2210 = vmatpush.bf16.msrb.mxu2 %v3127_v53  ;;  %2179 = vmatmul.bf16.vlgmr.msra.gmra.mxu3 %v4421_v30  ;;  %v3175_v30 = vor.u32 %v3666_v38, %v3172_v9  ;;  %v2975_v19 = vor.u32 %v3616_v42, %v2972_v25  ;;  %v3159_v53 = vor.u32 %v3662_v14, %v3156_v46  ;;  %v3642_v38 = vld [vmem:[%s5602_s1 + $0x614] sm:$0xf]  ;;  %v3076_v9 = vld [vmem:[%s5602_s1 + $0x618] sm:$0xf0]  ;;  %v3608_v42 = vld [vmem:[%s5602_s1 + $0x504] sm:$0xf] }
  0xe7   :  { %2223 = vmatpush.bf16.msrb.mxu3 %v3191_v57  ;;  %v3084_v57 = vld [vmem:[%s5602_s1 + $0x628] sm:$0xf0]  ;;  %v3023_v1 = vor.u32 %v3628_v52, %v3020_v55  ;;  %v3444_v14 = vld [vmem:[%s5602_s1 + $0x8f8] sm:$0xf0]  ;;  %v3135_v46 = vor.u32 %v3656_v17, %v3132_v18  ;;  %v3700_v52 = vld [vmem:[%s5602_s1 + $0x7e4] sm:$0xf] }
  0xe8   :  { %2185 = vmatpush.bf16.msrb.mxu0 %v2991_v21  ;;  %v1959_v54 = vpop.f32.mrf.mxu2  ;;  %v1935_v20 = vpop.f32.mrf.mxu0  ;;  %v2959_v21 = vor.u32 %v3612_v50, %v2956_v51  ;;  %v3087_v2 = vor.u32 %v3644_v56, %v3084_v57  ;;  %v2940_v25 = vld [vmem:[%s5602_s1 + $0x508] sm:$0xf0]  ;;  %v3684_v50 = vld [vmem:[%s5602_s1 + $0x764] sm:$0xf]  ;;  %v3220_v17 = vld [vmem:[%s5602_s1 + $0x738] sm:$0xf0] }
  0xe9   :  { %2198 = vmatpush.bf16.msrb.mxu1 %v3055_v63  ;;  %v1960_v58 = vadd.f32 %v1959_v54, %v1947_v37  ;;  %v1972_v59 = vpop.f32.mrf.mxu3  ;;  %v1948_v63 = vpop.f32.mrf.mxu1  ;;  %v2943_v34 = vor.u32 %v3608_v42, %v2940_v25  ;;  %v3380_v37 = vld [vmem:[%s5602_s1 + $0x878] sm:$0xf0]  ;;  %v3244_v51 = vld [vmem:[%s5602_s1 + $0x768] sm:$0xf0]  ;;  %v3716_v55 = vld [vmem:[%s5602_s1 + $0x864] sm:$0xf] }
  0xea   :  { %2211 = vmatpush.bf16.msrb.mxu2 %v3119_v0  ;;  %v3308_v54 = vld [vmem:[%s5602_s1 + $0x7e8] sm:$0xf0]  ;;  %v3732_v57 = vld [vmem:[%s5602_s1 + $0x8e4] sm:$0xf]  ;;  %v3682_v20 = vld [vmem:[%s5602_s1 + $0x754] sm:$0xf] }
  0xeb   :  { %2224 = vmatpush.bf16.msrb.mxu3 %v3183_v41  ;;  %v5345_v0 = vadd.f32 %v1972_v59, %v1960_v58  ;;  %v2948_v41 = vld [vmem:[%s5602_s1 + $0x518] sm:$0xf0]  ;;  %v3372_v56 = vld [vmem:[%s5602_s1 + $0x868] sm:$0xf0]  ;;  %v3247_v59 = vor.u32 %v3684_v50, %v3244_v51  ;;  %v3311_v60 = vor.u32 %v3700_v52, %v3308_v54  ;;  %v3698_v63 = vld [vmem:[%s5602_s1 + $0x7d4] sm:$0xf] }
  0xec   :  { %2186 = vmatpush.bf16.msrb.mxu0 %v2983_v10  ;;  %v3658_v10 = vld [vmem:[%s5602_s1 + $0x694] sm:$0xf]  ;;  %v3436_v58 = vld [vmem:[%s5602_s1 + $0x8e8] sm:$0xf0]  ;;  %v3375_v61 = vor.u32 %v3716_v55, %v3372_v56  ;;  %v3728_v25 = vld [vmem:[%s5602_s1 + $0x8c4] sm:$0xf] }
  0xed   :  { %2199 = vmatpush.bf16.msrb.mxu1 %v3047_v4  ;;  %v3140_v4 = vld [vmem:[%s5602_s1 + $0x698] sm:$0xf0]  ;;  %v3694_v18 = vld [vmem:[%s5602_s1 + $0x7b4] sm:$0xf]  ;;  %v3724_v52 = vld [vmem:[%s5602_s1 + $0x8a4] sm:$0xf] }
  0xee   :  { %2212 = vmatpush.bf16.msrb.mxu2 %v3111_v44  ;;  %v2951_v44 = vor.u32 %v3610_v3, %v2948_v41  ;;  %v3143_v15 = vor.u32 %v3658_v10, %v3140_v4  ;;  %v3714_v3 = vld [vmem:[%s5602_s1 + $0x854] sm:$0xf]  ;;  %v3364_v41 = vld [vmem:[%s5602_s1 + $0x858] sm:$0xf0]  ;;  %v3292_v10 = vld [vmem:[%s5602_s1 + $0x7c8] sm:$0xf0] }
  0xef   :  { %2225 = vmatpush.bf16.msrb.mxu3 %v3175_v30  ;;  %v3079_v30 = vor.u32 %v3642_v38, %v3076_v9  ;;  %v3367_v38 = vor.u32 %v3714_v3, %v3364_v41  ;;  %v3696_v9 = vld [vmem:[%s5602_s1 + $0x7c4] sm:$0xf]  ;;  %v3722_v3 = vld [vmem:[%s5602_s1 + $0x894] sm:$0xf]  ;;  %v3396_v41 = vld [vmem:[%s5602_s1 + $0x898] sm:$0xf0] }
  0xf0   :  { %2187 = vmatpush.bf16.msrb.mxu0 %v2975_v19  ;;  %v1961_v19 = vpop.f32.mrf.mxu2  ;;  %v3712_v4 = vld [vmem:[%s5602_s1 + $0x844] sm:$0xf]  ;;  %v3295_v13 = vor.u32 %v3696_v9, %v3292_v10  ;;  %v3260_v9 = vld [vmem:[%s5602_s1 + $0x788] sm:$0xf0] }
  0xf1   :  { %2200 = vmatpush.bf16.msrb.mxu1 %v3039_v24  ;;  %v3252_v24 = vld [vmem:[%s5602_s1 + $0x778] sm:$0xf0]  ;;  %v1974_v27 = vpop.f32.mrf.mxu3  ;;  %v3324_v10 = vld [vmem:[%s5602_s1 + $0x808] sm:$0xf0] }
  0xf2   :  { %2213 = vmatpush.bf16.msrb.mxu2 %v3103_v26  ;;  %v3702_v26 = vld [vmem:[%s5602_s1 + $0x7f4] sm:$0xf] }
  0xf3   :  { %2226 = vmatpush.bf16.msrb.mxu3 %v3167_v62  ;;  %v3718_v62 = vld [vmem:[%s5602_s1 + $0x874] sm:$0xf] }
  0xf4   :  { %2188 = vmatpush.bf16.msrb.mxu0 %v2967_v47  ;;  %v3255_v47 = vor.u32 %v3686_v22, %v3252_v24  ;;  %v3284_v22 = vld [vmem:[%s5602_s1 + $0x7b8] sm:$0xf0]  ;;  %v3710_v24 = vld [vmem:[%s5602_s1 + $0x834] sm:$0xf] }
  0xf5   :  { %2201 = vmatpush.bf16.msrb.mxu1 %v3031_v48  ;;  %v3319_v48 = vor.u32 %v3702_v26, %v3316_v36  ;;  %v3348_v26 = vld [vmem:[%s5602_s1 + $0x838] sm:$0xf0]  ;;  %v3726_v27 = vld [vmem:[%s5602_s1 + $0x8b4] sm:$0xf]  ;;  %v3223_v36 = vor.u32 %v3678_v16, %v3220_v17 }
  0xf6   :  { %2214 = vmatpush.bf16.msrb.mxu2 %v3095_v49  ;;  %v3383_v49 = vor.u32 %v3718_v62, %v3380_v37  ;;  %v3287_v62 = vor.u32 %v3694_v18, %v3284_v22  ;;  %v3351_v37 = vor.u32 %v3710_v24, %v3348_v26  ;;  %v3736_v18 = vld [vmem:[%s5604_s2] sm:$0x3] }
  0xf7   :  { %2227 = vmatpush.bf16.msrb.mxu3 %v3159_v53  ;;  %v3447_v53 = vor.u32 %v3734_v45, %v3444_v14  ;;  %v3692_v45 = vld [vmem:[%s5602_s1 + $0x7a4] sm:$0xf] }
  0xf8   :  { %2189 = vmatpush.bf16.msrb.mxu0 %v2959_v21  ;;  %v3236_v21 = vld [vmem:[%s5602_s1 + $0x758] sm:$0xf0] }
  0xf9   :  { %2202 = vmatpush.bf16.msrb.mxu1 %v3023_v1  ;;  %v3439_v1 = vor.u32 %v3732_v57, %v3436_v58 }
  0xfa   :  { %2215 = vmatpush.bf16.msrb.mxu2 %v3087_v2  ;;  %v3300_v2 = vld [vmem:[%s5602_s1 + $0x7d8] sm:$0xf0] }
  0xfb   :  { %2228 = vmatpush.bf16.msrb.mxu3 %v3151_v7  ;;  %v3239_v7 = vor.u32 %v3682_v20, %v3236_v21  ;;  %v3303_v8 = vor.u32 %v3698_v63, %v3300_v2  ;;  %v3690_v20 = vld [vmem:[%s5602_s1 + $0x794] sm:$0xf]  ;;  %v3268_v63 = vld [vmem:[%s5602_s1 + $0x798] sm:$0xf0] }
  0xfc   :  { %2190 = vmatpush.bf16.msrb.mxu0 %v2951_v44  ;;  %v3356_v44 = vld [vmem:[%s5602_s1 + $0x848] sm:$0xf0]  ;;  %v3332_v2 = vld [vmem:[%s5602_s1 + $0x818] sm:$0xf0] }
  0xfd   :  { %2203 = vmatpush.bf16.msrb.mxu1 %v3015_v6  ;;  %v3420_v6 = vld [vmem:[%s5602_s1 + $0x8c8] sm:$0xf0] }
  0xfe   :  { %2216 = vmatpush.bf16.msrb.mxu2 %v3079_v30 }
  0xff   :  { %2229 = vmatpush.bf16.msrb.mxu3 %v3143_v15  ;;  %v3359_v15 = vor.u32 %v3712_v4, %v3356_v44  ;;  %v3720_v44 = vld [vmem:[%s5602_s1 + $0x884] sm:$0xf] }
 0x100   :  { %2191 = vmatpush.bf16.msrb.mxu0 %v2943_v34  ;;  %v1985_v42 = vpop.f32.mrf.mxu0  ;;  %v3412_v34 = vld [vmem:[%s5602_s1 + $0x8b8] sm:$0xf0] }
 0x101   :  { %2204 = vmatpush.bf16.msrb.mxu1 %v3007_v40  ;;  %v1986_v30 = vadd.f32 %v1985_v42, %v5345_v0  ;;  %v1998_v12 = vpop.f32.mrf.mxu1  ;;  %v3423_v0 = vor.u32 %v3728_v25, %v3420_v6  ;;  %v3676_v40 = vld [vmem:[%s5602_s1 + $0x724] sm:$0xf]  ;;  %v3415_v14 = vor.u32 %v3726_v27, %v3412_v34  ;;  %v3388_v42 = vld [vmem:[%s5602_s1 + $0x888] sm:$0xf0] }
 0x102   :  { %2217 = vmatpush.bf16.msrb.mxu2 %v3071_v43  ;;  %v3212_v43 = vld [vmem:[%s5602_s1 + $0x728] sm:$0xf0] }
 0x103   :  { %2230 = vmatpush.bf16.msrb.mxu3 %v3135_v46  ;;  %2192 = vmatmul.bf16.vlgmr.msrb.gmra.mxu0 %v4419_v29  ;;  %v3730_v29 = vld [vmem:[%s5602_s1 + $0x8d4] sm:$0xf]  ;;  %v1999_v19 = vadd.f32 %v1998_v12, %v1986_v30  ;;  %v3215_v55 = vor.u32 %v3676_v40, %v3212_v43  ;;  %v3391_v12 = vor.u32 %v3720_v44, %v3388_v42 }
 0x104   :  { %2236 = vmatpush.bf16.msra.mxu0 %v3255_v47  ;;  %2205 = vmatmul.bf16.vlgmr.msrb.gmra.mxu1 %v4429_v33  ;;  %v3680_v33 = vld [vmem:[%s5602_s1 + $0x744] sm:$0xf]  ;;  %v3276_v47 = vld [vmem:[%s5602_s1 + $0x7a8] sm:$0xf0] }
 0x105   :  { %2249 = vmatpush.bf16.msra.mxu1 %v3319_v48  ;;  %2218 = vmatmul.bf16.vlgmr.msrb.gmra.mxu2 %v4618_v23  ;;  %v3228_v23 = vld [vmem:[%s5602_s1 + $0x748] sm:$0xf0]  ;;  %v3708_v48 = vld [vmem:[%s5602_s1 + $0x824] sm:$0xf]  ;;  %v3279_v58 = vor.u32 %v3692_v45, %v3276_v47 }
 0x106   :  { %2262 = vmatpush.bf16.msra.mxu2 %v3383_v49  ;;  %2231 = vmatmul.bf16.vlgmr.msrb.gmra.mxu3 %v4631_v31  ;;  %v3431_v31 = vor.u32 %v3730_v29, %v3428_v5  ;;  %v3231_v11 = vor.u32 %v3680_v33, %v3228_v23  ;;  %v3340_v49 = vld [vmem:[%s5602_s1 + $0x828] sm:$0xf0]  ;;  %v3271_v5 = vor.u32 %v3690_v20, %v3268_v63  ;;  %v3688_v33 = vld [vmem:[%s5602_s1 + $0x784] sm:$0xf] }
 0x107   :  { %2275 = vmatpush.bf16.msra.mxu3 %v3447_v53  ;;  %v3404_v53 = vld [vmem:[%s5602_s1 + $0x8a8] sm:$0xf0]  ;;  %v3399_v23 = vor.u32 %v3722_v3, %v3396_v41  ;;  %v3263_v30 = vor.u32 %v3688_v33, %v3260_v9 }
 0x108   :  { %2237 = vmatpush.bf16.msra.mxu0 %v3247_v59  ;;  %v2011_v46 = vpop.f32.mrf.mxu2  ;;  %v1987_v54 = vpop.f32.mrf.mxu0  ;;  %v3343_v59 = vor.u32 %v3708_v48, %v3340_v49  ;;  %v3407_v21 = vor.u32 %v3724_v52, %v3404_v53 }
 0x109   :  { %2250 = vmatpush.bf16.msra.mxu1 %v3311_v60  ;;  %v2012_v50 = vadd.f32 %v2011_v46, %v1999_v19  ;;  %v2024_v51 = vpop.f32.mrf.mxu3  ;;  %v2000_v56 = vpop.f32.mrf.mxu1  ;;  %v3674_v60 = vld [vmem:[%s5602_s1 + $0x714] sm:$0xf] }
 0x10a   :  { %2263 = vmatpush.bf16.msra.mxu2 %v3375_v61  ;;  %v3204_v61 = vld [vmem:[%s5602_s1 + $0x718] sm:$0xf0] }
 0x10b   :  { %2276 = vmatpush.bf16.msra.mxu3 %v3439_v1  ;;  %v2025_v57 = vadd.f32 %v2024_v51, %v2012_v50  ;;  %v3706_v1 = vld [vmem:[%s5602_s1 + $0x814] sm:$0xf]  ;;  %v3207_v29 = vor.u32 %v3674_v60, %v3204_v61 }
 0x10c   :  { %2238 = vmatpush.bf16.msra.mxu0 %v3239_v7  ;;  %v3335_v7 = vor.u32 %v3706_v1, %v3332_v2 }
 0x10d   :  { %2251 = vmatpush.bf16.msra.mxu1 %v3303_v8  ;;  %v3672_v8 = vld [vmem:[%s5602_s1 + $0x704] sm:$0xf] }
 0x10e   :  { %2264 = vmatpush.bf16.msra.mxu2 %v3367_v38  ;;  %v3196_v38 = vld [vmem:[%s5602_s1 + $0x708] sm:$0xf0] }
 0x10f   :  { %2277 = vmatpush.bf16.msra.mxu3 %v3431_v31  ;;  %v3704_v31 = vld [vmem:[%s5602_s1 + $0x804] sm:$0xf]  ;;  %v3199_v6 = vor.u32 %v3672_v8, %v3196_v38 }
 0x110   :  { %2239 = vmatpush.bf16.msra.mxu0 %v3231_v11  ;;  %v2013_v4 = vpop.f32.mrf.mxu2  ;;  %v3327_v11 = vor.u32 %v3704_v31, %v3324_v10 }
 0x111   :  { %2252 = vmatpush.bf16.msra.mxu1 %v3295_v13  ;;  %v2026_v25 = vpop.f32.mrf.mxu3 }
 0x112   :  { %2265 = vmatpush.bf16.msra.mxu2 %v3359_v15 }
 0x113   :  { %2278 = vmatpush.bf16.msra.mxu3 %v3423_v0  ;;  %v314_v0 = vperm.slane %v3736_v18, 1 }
 0x114   :  { %2240 = vmatpush.bf16.msra.mxu0 %v3223_v36 }
 0x115   :  { %2253 = vmatpush.bf16.msra.mxu1 %v3287_v62 }
 0x116   :  { %2266 = vmatpush.bf16.msra.mxu2 %v3351_v37 }
 0x117   :  { %2279 = vmatpush.bf16.msra.mxu3 %v3415_v14 }
 0x118   :  { %2241 = vmatpush.bf16.msra.mxu0 %v3215_v55 }
 0x119   :  { %2254 = vmatpush.bf16.msra.mxu1 %v3279_v58 }
 0x11a   :  { %2267 = vmatpush.bf16.msra.mxu2 %v3343_v59 }
 0x11b   :  { %2280 = vmatpush.bf16.msra.mxu3 %v3407_v21 }
 0x11c   :  { %2242 = vmatpush.bf16.msra.mxu0 %v3207_v29 }
 0x11d   :  { %2255 = vmatpush.bf16.msra.mxu1 %v3271_v5 }
 0x11e   :  { %2268 = vmatpush.bf16.msra.mxu2 %v3335_v7 }
 0x11f   :  { %2281 = vmatpush.bf16.msra.mxu3 %v3399_v23 }
 0x120   :  { %2243 = vmatpush.bf16.msra.mxu0 %v3199_v6  ;;  %v2037_v13 = vpop.f32.mrf.mxu0 }
 0x121   :  { %2256 = vmatpush.bf16.msra.mxu1 %v3263_v30  ;;  %v2038_v15 = vadd.f32 %v2037_v13, %v2025_v57  ;;  %v2050_v16 = vpop.f32.mrf.mxu1 }
 0x122   :  { %2269 = vmatpush.bf16.msra.mxu2 %v3327_v11 }
 0x123   :  { %2282 = vmatpush.bf16.msra.mxu3 %v3391_v12  ;;  %2244 = vmatmul.bf16.vlgmr.msra.gmra.mxu0 %v4629_v28  ;;  %v2051_v17 = vadd.f32 %v2050_v16, %v2038_v15 }
 0x124   :  { %2257 = vmatmul.bf16.vlgmr.msra.gmra.mxu1 %v4639_v35 }
 0x125   :  { %2270 = vmatmul.bf16.vlgmr.msra.gmra.mxu2 %v4825_v32  ;;  %v2288_v6 = vmax.f32 %v2051_v17, 0.0 }
 0x126   :  { %2283 = vmatmul.bf16.vlgmr.msra.gmra.mxu3 %v4836_v39 }
 0x128   :  { %v2063_v19 = vpop.f32.mrf.mxu2  ;;  %v2039_v26 = vpop.f32.mrf.mxu0 }
 0x129   :  { %v2064_v22 = vadd.f32 %v2063_v19, %v314_v0  ;;  %v2076_v24 = vpop.f32.mrf.mxu3  ;;  %v2052_v28 = vpop.f32.mrf.mxu1 }
 0x12b   :  { %v2077_v27 = vadd.f32 %v2076_v24, %v2064_v22 }
 0x130   :  { %v2065_v35 = vpop.f32.mrf.mxu2 }
 0x131   :  { %v2078_v34 = vpop.f32.mrf.mxu3 }
 0x140   :  { %v2089_v32 = vpop.f32.mrf.mxu0 }
 0x141   :  { %v2090_v36 = vadd.f32 %v2089_v32, %v2077_v27  ;;  %v2102_v39 = vpop.f32.mrf.mxu1 }
 0x143   :  { %v2103_v62 = vadd.f32 %v2102_v39, %v2090_v36 }
 0x148   :  { %v2115_v37 = vpop.f32.mrf.mxu2  ;;  %v2091_v14 = vpop.f32.mrf.mxu0 }
 0x149   :  { %v2116_v40 = vadd.f32 %v2115_v37, %v2103_v62  ;;  %v2128_v43 = vpop.f32.mrf.mxu3  ;;  %v2104_v46 = vpop.f32.mrf.mxu1 }
 0x14b   :  { %v2129_v45 = vadd.f32 %v2128_v43, %v2116_v40 }
 0x150   :  { %v2117_v47 = vpop.f32.mrf.mxu2 }
 0x151   :  { %v2130_v48 = vpop.f32.mrf.mxu3 }
 0x160   :  { %v2141_v49 = vpop.f32.mrf.mxu0 }
 0x161   :  { %v2154_v50 = vpop.f32.mrf.mxu1  ;;  %v2142_v59 = vadd.f32 %v2141_v49, %v2129_v45 }
 0x163   :  { %v2155_v63 = vadd.f32 %v2154_v50, %v2142_v59 }
 0x168   :  { %v2167_v51 = vpop.f32.mrf.mxu2  ;;  %v2143_v53 = vpop.f32.mrf.mxu0 }
 0x169   :  { %v2180_v52 = vpop.f32.mrf.mxu3  ;;  %v2156_v54 = vpop.f32.mrf.mxu1  ;;  %v2168_v1 = vadd.f32 %v2167_v51, %v2155_v63 }
 0x16b   :  { %v2181_v41 = vadd.f32 %v2180_v52, %v2168_v1 }
 0x170   :  { %v2169_v55 = vpop.f32.mrf.mxu2 }
 0x171   :  { %v2182_v56 = vpop.f32.mrf.mxu3 }
 0x180   :  { %v2193_v57 = vpop.f32.mrf.mxu0 }
 0x181   :  { %v2206_v58 = vpop.f32.mrf.mxu1  ;;  %v2194_v29 = vadd.f32 %v2193_v57, %v2181_v41 }
 0x183   :  { %v2207_v5 = vadd.f32 %v2206_v58, %v2194_v29 }
 0x188   :  { %v2219_v60 = vpop.f32.mrf.mxu2  ;;  %v2195_v20 = vpop.f32.mrf.mxu0 }
 0x189   :  { %v2232_v61 = vpop.f32.mrf.mxu3  ;;  %v2208_v21 = vpop.f32.mrf.mxu1  ;;  %v2220_v7 = vadd.f32 %v2219_v60, %v2207_v5 }
 0x18b   :  { %v2233_v8 = vadd.f32 %v2232_v61, %v2220_v7 }
 0x190   :  { %v2221_v2 = vpop.f32.mrf.mxu2 }
 0x191   :  { %v2234_v3 = vpop.f32.mrf.mxu3 }
 0x1a0   :  { %v2245_v38 = vpop.f32.mrf.mxu0 }
 0x1a1   :  { %v2258_v33 = vpop.f32.mrf.mxu1  ;;  %v2246_v23 = vadd.f32 %v2245_v38, %v2233_v8 }
 0x1a3   :  { %v2259_v9 = vadd.f32 %v2258_v33, %v2246_v23 }
 0x1a8   :  { %v2271_v31 = vpop.f32.mrf.mxu2  ;;  %v2247_v44 = vpop.f32.mrf.mxu0 }
 0x1a9   :  { %v2272_v10 = vadd.f32 %v2271_v31, %v2259_v9  ;;  %v2284_v4 = vpop.f32.mrf.mxu3  ;;  %v2260_v42 = vpop.f32.mrf.mxu1 }
 0x1ab   :  { %v2285_v25 = vadd.f32 %v2284_v4, %v2272_v10 }
 0x1ad   :  { %v2289_v30 = vmax.f32 %v2285_v25, 0.0 }
 0x1af   :  { %v2290_v11 = vpack.c.bf16 %v2289_v30, %v2288_v6 }
 0x1b0   :  { %v2273_v12 = vpop.f32.mrf.mxu2 }
 0x1b1   :  { %2291 = vst [vmem:[%s5605_s3] sm:$0xff] %v2290_v11  ;;  %v2286_v13 = vpop.f32.mrf.mxu3 }

// kernel: pillar_backbone_forward.23
= control target key start
LH: loop header
LB: loop body
LE: loop exit
PB: predicated region body
PF: predicated region fallthrough
CT: control target
= control target key end

     0   :  { %s5625_s1 = inlined_call_operand.vmem [shape: bf16[2304,256], index: 1, kind: input, shape index: {}]   ;;  %s5626_s0 = inlined_call_operand.vmem [shape: bf16[8,2304], index: 0, kind: input, shape index: {}]   ;;  %s5627_s3 = inlined_call_operand.vmem [shape: bf16[8,1], index: 3, kind: input, shape index: {}]   ;;  %s5628_s2 = inlined_call_operand.vmem [shape: f32[1,256], index: 2, kind: input, shape index: {}]   ;;  %s5629_s4 = inlined_call_operand.vmem [shape: bf16[8,256], index: 4, kind: output, shape index: {}]  }
   0x1   :  { %v2366_v0 = vld [vmem:[%s5625_s1 + $0x70] sm:$0xf]  ;;  %v3475_v1 = vld [vmem:[%s5625_s1 + $0x74] sm:$0xf0]  ;;  %v2358_v11 = vld [vmem:[%s5625_s1 + $0x60] sm:$0xf] }
   0x2   :  { %v2430_v2 = vld [vmem:[%s5625_s1 + $0xf0] sm:$0xf]  ;;  %v2367_v3 = vor.u32 %v3475_v1, %v2366_v0  ;;  %v3491_v4 = vld [vmem:[%s5625_s1 + $0xf4] sm:$0xf0]  ;;  %v3473_v13 = vld [vmem:[%s5625_s1 + $0x64] sm:$0xf0] }
   0x3   :  { %v2494_v5 = vld [vmem:[%s5625_s1 + $0x170] sm:$0xf]  ;;  %v3507_v6 = vld [vmem:[%s5625_s1 + $0x174] sm:$0xf0]  ;;  %v2431_v7 = vor.u32 %v3491_v4, %v2430_v2  ;;  %v2422_v14 = vld [vmem:[%s5625_s1 + $0xe0] sm:$0xf]  ;;  %v2359_v16 = vor.u32 %v3473_v13, %v2358_v11 }
   0x4   :  { %v2495_v8 = vor.u32 %v3507_v6, %v2494_v5  ;;  %v2558_v9 = vld [vmem:[%s5625_s1 + $0x1f0] sm:$0xf]  ;;  %v3523_v10 = vld [vmem:[%s5625_s1 + $0x1f4] sm:$0xf0]  ;;  %1823 = vmatpush.bf16.msra.mxu0 %v2367_v3  ;;  %v3489_v15 = vld [vmem:[%s5625_s1 + $0xe4] sm:$0xf0] }
   0x5   :  { %v2559_v12 = vor.u32 %v3523_v10, %v2558_v9  ;;  %1836 = vmatpush.bf16.msra.mxu1 %v2431_v7  ;;  %v2423_v17 = vor.u32 %v3489_v15, %v2422_v14  ;;  %v2486_v18 = vld [vmem:[%s5625_s1 + $0x160] sm:$0xf]  ;;  %v3505_v19 = vld [vmem:[%s5625_s1 + $0x164] sm:$0xf0]  ;;  %v2350_v23 = vld [vmem:[%s5625_s1 + $0x50] sm:$0xf] }
   0x6   :  { %1849 = vmatpush.bf16.msra.mxu2 %v2495_v8  ;;  %v2550_v20 = vld [vmem:[%s5625_s1 + $0x1e0] sm:$0xf]  ;;  %v2487_v21 = vor.u32 %v3505_v19, %v2486_v18  ;;  %v3521_v22 = vld [vmem:[%s5625_s1 + $0x1e4] sm:$0xf0]  ;;  %v3471_v24 = vld [vmem:[%s5625_s1 + $0x54] sm:$0xf0] }
   0x7   :  { %1862 = vmatpush.bf16.msra.mxu3 %v2559_v12  ;;  %v2551_v25 = vor.u32 %v3521_v22, %v2550_v20  ;;  %v2414_v26 = vld [vmem:[%s5625_s1 + $0xd0] sm:$0xf]  ;;  %v3487_v27 = vld [vmem:[%s5625_s1 + $0xd4] sm:$0xf0]  ;;  %v2351_v29 = vor.u32 %v3471_v24, %v2350_v23  ;;  %v2342_v35 = vld [vmem:[%s5625_s1 + $0x40] sm:$0xf] }
   0x8   :  { %v2478_v28 = vld [vmem:[%s5625_s1 + $0x150] sm:$0xf]  ;;  %1824 = vmatpush.bf16.msra.mxu0 %v2359_v16  ;;  %v3503_v30 = vld [vmem:[%s5625_s1 + $0x154] sm:$0xf0]  ;;  %v2415_v33 = vor.u32 %v3487_v27, %v2414_v26  ;;  %v3469_v36 = vld [vmem:[%s5625_s1 + $0x44] sm:$0xf0] }
   0x9   :  { %v2542_v31 = vld [vmem:[%s5625_s1 + $0x1d0] sm:$0xf]  ;;  %v3519_v32 = vld [vmem:[%s5625_s1 + $0x1d4] sm:$0xf0]  ;;  %1837 = vmatpush.bf16.msra.mxu1 %v2423_v17  ;;  %v2479_v34 = vor.u32 %v3503_v30, %v2478_v28  ;;  %v2406_v37 = vld [vmem:[%s5625_s1 + $0xc0] sm:$0xf]  ;;  %v2343_v44 = vor.u32 %v3469_v36, %v2342_v35 }
   0xa   :  { %1850 = vmatpush.bf16.msra.mxu2 %v2487_v21  ;;  %v2543_v38 = vor.u32 %v3519_v32, %v2542_v31  ;;  %v3485_v39 = vld [vmem:[%s5625_s1 + $0xc4] sm:$0xf0]  ;;  %v2470_v40 = vld [vmem:[%s5625_s1 + $0x140] sm:$0xf]  ;;  %v2334_v47 = vld [vmem:[%s5625_s1 + $0x30] sm:$0xf] }
   0xb   :  { %1863 = vmatpush.bf16.msra.mxu3 %v2551_v25  ;;  %v3501_v41 = vld [vmem:[%s5625_s1 + $0x144] sm:$0xf0]  ;;  %v2534_v42 = vld [vmem:[%s5625_s1 + $0x1c0] sm:$0xf]  ;;  %v2407_v45 = vor.u32 %v3485_v39, %v2406_v37  ;;  %v3467_v48 = vld [vmem:[%s5625_s1 + $0x34] sm:$0xf0] }
   0xc   :  { %v3517_v43 = vld [vmem:[%s5625_s1 + $0x1c4] sm:$0xf0]  ;;  %1825 = vmatpush.bf16.msra.mxu0 %v2351_v29  ;;  %v2471_v46 = vor.u32 %v3501_v41, %v2470_v40  ;;  %v2398_v49 = vld [vmem:[%s5625_s1 + $0xb0] sm:$0xf]  ;;  %v3483_v51 = vld [vmem:[%s5625_s1 + $0xb4] sm:$0xf0]  ;;  %v2335_v56 = vor.u32 %v3467_v48, %v2334_v47 }
   0xd   :  { %1838 = vmatpush.bf16.msra.mxu1 %v2415_v33  ;;  %v2535_v50 = vor.u32 %v3517_v43, %v2534_v42  ;;  %v2462_v52 = vld [vmem:[%s5625_s1 + $0x130] sm:$0xf]  ;;  %v3499_v53 = vld [vmem:[%s5625_s1 + $0x134] sm:$0xf0]  ;;  %v2399_v57 = vor.u32 %v3483_v51, %v2398_v49  ;;  %v2326_v59 = vld [vmem:[%s5625_s1 + $0x20] sm:$0xf] }
   0xe   :  { %1851 = vmatpush.bf16.msra.mxu2 %v2479_v34  ;;  %v2526_v54 = vld [vmem:[%s5625_s1 + $0x1b0] sm:$0xf]  ;;  %v3515_v55 = vld [vmem:[%s5625_s1 + $0x1b4] sm:$0xf0]  ;;  %v2463_v58 = vor.u32 %v3499_v53, %v2462_v52  ;;  %v3465_v60 = vld [vmem:[%s5625_s1 + $0x24] sm:$0xf0] }
   0xf   :  { %1864 = vmatpush.bf16.msra.mxu3 %v2543_v38  ;;  %v2390_v61 = vld [vmem:[%s5625_s1 + $0xa0] sm:$0xf]  ;;  %v2527_v62 = vor.u32 %v3515_v55, %v2526_v54  ;;  %v3481_v63 = vld [vmem:[%s5625_s1 + $0xa4] sm:$0xf0]  ;;  %v2327_v4 = vor.u32 %v3465_v60, %v2326_v59  ;;  %v2318_v7 = vld [vmem:[%s5625_s1 + $0x10] sm:$0xf] }
  0x10   :  { %1826 = vmatpush.bf16.msra.mxu0 %v2343_v44  ;;  %v2454_v0 = vld [vmem:[%s5625_s1 + $0x120] sm:$0xf]  ;;  %v3497_v1 = vld [vmem:[%s5625_s1 + $0x124] sm:$0xf0]  ;;  %v2391_v5 = vor.u32 %v3481_v63, %v2390_v61  ;;  %v3463_v8 = vld [vmem:[%s5625_s1 + $0x14] sm:$0xf0] }
  0x11   :  { %1839 = vmatpush.bf16.msra.mxu1 %v2407_v45  ;;  %v2518_v2 = vld [vmem:[%s5625_s1 + $0x1a0] sm:$0xf]  ;;  %v3513_v3 = vld [vmem:[%s5625_s1 + $0x1a4] sm:$0xf0]  ;;  %v2455_v6 = vor.u32 %v3497_v1, %v2454_v0  ;;  %v2382_v9 = vld [vmem:[%s5625_s1 + $0x90] sm:$0xf]  ;;  %v2319_v16 = vor.u32 %v3463_v8, %v2318_v7 }
  0x12   :  { %1852 = vmatpush.bf16.msra.mxu2 %v2471_v46  ;;  %v2519_v10 = vor.u32 %v3513_v3, %v2518_v2  ;;  %v3479_v11 = vld [vmem:[%s5625_s1 + $0x94] sm:$0xf0]  ;;  %v2446_v12 = vld [vmem:[%s5625_s1 + $0x110] sm:$0xf]  ;;  %v2310_v17 = vld [vmem:[%s5625_s1] sm:$0xf] }
  0x13   :  { %1865 = vmatpush.bf16.msra.mxu3 %v2535_v50  ;;  %v3495_v13 = vld [vmem:[%s5625_s1 + $0x114] sm:$0xf0]  ;;  %v2510_v14 = vld [vmem:[%s5625_s1 + $0x190] sm:$0xf]  ;;  %v3461_v18 = vld [vmem:[%s5625_s1 + $0x4] sm:$0xf0]  ;;  %v2383_v19 = vor.u32 %v3479_v11, %v2382_v9 }
  0x14   :  { %1827 = vmatpush.bf16.msra.mxu0 %v2335_v56  ;;  %v3511_v15 = vld [vmem:[%s5625_s1 + $0x194] sm:$0xf0]  ;;  %v2447_v20 = vor.u32 %v3495_v13, %v2446_v12  ;;  %v2374_v21 = vld [vmem:[%s5625_s1 + $0x80] sm:$0xf]  ;;  %v3477_v22 = vld [vmem:[%s5625_s1 + $0x84] sm:$0xf0]  ;;  %v2311_v31 = vor.u32 %v3461_v18, %v2310_v17 }
  0x15   :  { %1840 = vmatpush.bf16.msra.mxu1 %v2399_v57  ;;  %v2438_v23 = vld [vmem:[%s5625_s1 + $0x100] sm:$0xf]  ;;  %v2511_v24 = vor.u32 %v3511_v15, %v2510_v14  ;;  %v3493_v25 = vld [vmem:[%s5625_s1 + $0x104] sm:$0xf0]  ;;  %v2622_v28 = vld [vmem:[%s5625_s1 + $0x270] sm:$0xf]  ;;  %v2375_v35 = vor.u32 %v3477_v22, %v2374_v21 }
  0x16   :  { %1853 = vmatpush.bf16.msra.mxu2 %v2463_v58  ;;  %v2502_v26 = vld [vmem:[%s5625_s1 + $0x180] sm:$0xf]  ;;  %v3509_v27 = vld [vmem:[%s5625_s1 + $0x184] sm:$0xf0]  ;;  %v3539_v29 = vld [vmem:[%s5625_s1 + $0x274] sm:$0xf0]  ;;  %v2439_v36 = vor.u32 %v3493_v25, %v2438_v23 }
  0x17   :  { %1866 = vmatpush.bf16.msra.mxu3 %v2527_v62  ;;  %v2686_v30 = vld [vmem:[%s5625_s1 + $0x2f0] sm:$0xf]  ;;  %v3555_v32 = vld [vmem:[%s5625_s1 + $0x2f4] sm:$0xf0]  ;;  %v2503_v39 = vor.u32 %v3509_v27, %v2502_v26  ;;  %v2623_v40 = vor.u32 %v3539_v29, %v2622_v28  ;;  %v2614_v43 = vld [vmem:[%s5625_s1 + $0x260] sm:$0xf] }
  0x18   :  { %1828 = vmatpush.bf16.msra.mxu0 %v2327_v4  ;;  %v2750_v33 = vld [vmem:[%s5625_s1 + $0x370] sm:$0xf]  ;;  %v3571_v34 = vld [vmem:[%s5625_s1 + $0x374] sm:$0xf0]  ;;  %v2687_v41 = vor.u32 %v3555_v32, %v2686_v30  ;;  %v3537_v44 = vld [vmem:[%s5625_s1 + $0x264] sm:$0xf0] }
  0x19   :  { %1841 = vmatpush.bf16.msra.mxu1 %v2391_v5  ;;  %v2814_v37 = vld [vmem:[%s5625_s1 + $0x3f0] sm:$0xf]  ;;  %v3587_v38 = vld [vmem:[%s5625_s1 + $0x3f4] sm:$0xf0]  ;;  %v2751_v42 = vor.u32 %v3571_v34, %v2750_v33  ;;  %v2678_v45 = vld [vmem:[%s5625_s1 + $0x2e0] sm:$0xf]  ;;  %v2615_v52 = vor.u32 %v3537_v44, %v2614_v43 }
  0x1a   :  { %1854 = vmatpush.bf16.msra.mxu2 %v2455_v6  ;;  %v2815_v46 = vor.u32 %v3587_v38, %v2814_v37  ;;  %v3553_v47 = vld [vmem:[%s5625_s1 + $0x2e4] sm:$0xf0]  ;;  %v2742_v48 = vld [vmem:[%s5625_s1 + $0x360] sm:$0xf]  ;;  %v2606_v53 = vld [vmem:[%s5625_s1 + $0x250] sm:$0xf] }
  0x1b   :  { %1867 = vmatpush.bf16.msra.mxu3 %v2519_v10  ;;  %v3569_v49 = vld [vmem:[%s5625_s1 + $0x364] sm:$0xf0]  ;;  %v2806_v50 = vld [vmem:[%s5625_s1 + $0x3e0] sm:$0xf]  ;;  %v2679_v54 = vor.u32 %v3553_v47, %v2678_v45  ;;  %v3535_v56 = vld [vmem:[%s5625_s1 + $0x254] sm:$0xf0] }
  0x1c   :  { %1829 = vmatpush.bf16.msra.mxu0 %v2319_v16  ;;  %v3585_v51 = vld [vmem:[%s5625_s1 + $0x3e4] sm:$0xf0]  ;;  %v2743_v55 = vor.u32 %v3569_v49, %v2742_v48  ;;  %v2670_v57 = vld [vmem:[%s5625_s1 + $0x2d0] sm:$0xf]  ;;  %v3551_v58 = vld [vmem:[%s5625_s1 + $0x2d4] sm:$0xf0]  ;;  %v2607_v0 = vor.u32 %v3535_v56, %v2606_v53 }
  0x1d   :  { %1842 = vmatpush.bf16.msra.mxu1 %v2383_v19  ;;  %v2807_v59 = vor.u32 %v3585_v51, %v2806_v50  ;;  %v2734_v60 = vld [vmem:[%s5625_s1 + $0x350] sm:$0xf]  ;;  %v3567_v61 = vld [vmem:[%s5625_s1 + $0x354] sm:$0xf0]  ;;  %v2671_v1 = vor.u32 %v3551_v58, %v2670_v57  ;;  %v18_v2 = vld [vmem:[%s5626_s0 + $0x8] sm:$0xff] }
  0x1e   :  { %1855 = vmatpush.bf16.msra.mxu2 %v2447_v20  ;;  %v2798_v62 = vld [vmem:[%s5625_s1 + $0x3d0] sm:$0xf]  ;;  %v3583_v63 = vld [vmem:[%s5625_s1 + $0x3d4] sm:$0xf0]  ;;  %v17_v3 = vld [vmem:[%s5626_s0] sm:$0xff]  ;;  %v2735_v4 = vor.u32 %v3567_v61, %v2734_v60  ;;  %v331_v8 = vunpack.c.l.b16 %v18_v2  ;;  %v332_v10 = vunpack.c.h.b16 %v18_v2 }
  0x1f   :  { %1868 = vmatpush.bf16.msra.mxu3 %v2511_v24  ;;  %v2598_v5 = vld [vmem:[%s5625_s1 + $0x240] sm:$0xf]  ;;  %v3533_v6 = vld [vmem:[%s5625_s1 + $0x244] sm:$0xf0]  ;;  %v329_v9 = vunpack.c.l.b16 %v17_v3  ;;  %v2799_v11 = vor.u32 %v3583_v63, %v2798_v62  ;;  %v330_v15 = vunpack.c.h.b16 %v17_v3  ;;  %v2590_v25 = vld [vmem:[%s5625_s1 + $0x230] sm:$0xf] }
  0x20   :  { %1830 = vmatpush.bf16.msra.mxu0 %v2311_v31  ;;  %v2662_v7 = vld [vmem:[%s5625_s1 + $0x2c0] sm:$0xf]  ;;  %v3549_v12 = vld [vmem:[%s5625_s1 + $0x2c4] sm:$0xf0]  ;;  %v4071_v18 = vpack.c.b16 %v331_v8, %v331_v8  ;;  %v4075_v20 = vpack.c.b16 %v332_v10, %v332_v10  ;;  %v2599_v21 = vor.u32 %v3533_v6, %v2598_v5  ;;  %v3531_v26 = vld [vmem:[%s5625_s1 + $0x234] sm:$0xf0] }
  0x21   :  { %1843 = vmatpush.bf16.msra.mxu1 %v2375_v35  ;;  %v2726_v13 = vld [vmem:[%s5625_s1 + $0x340] sm:$0xf]  ;;  %v3565_v14 = vld [vmem:[%s5625_s1 + $0x344] sm:$0xf0]  ;;  %v4073_v19 = vpack.c.b16 %v329_v9, %v329_v9  ;;  %v4077_v22 = vpack.c.b16 %v330_v15, %v330_v15  ;;  %v2663_v23 = vor.u32 %v3549_v12, %v2662_v7  ;;  %v2654_v27 = vld [vmem:[%s5625_s1 + $0x2b0] sm:$0xf]  ;;  %v2591_v34 = vor.u32 %v3531_v26, %v2590_v25 }
  0x22   :  { %1856 = vmatpush.bf16.msra.mxu2 %v2439_v36  ;;  %v2790_v16 = vld [vmem:[%s5625_s1 + $0x3c0] sm:$0xf]  ;;  %v3581_v17 = vld [vmem:[%s5625_s1 + $0x3c4] sm:$0xf0]  ;;  %v2727_v24 = vor.u32 %v3565_v14, %v2726_v13  ;;  %v3547_v29 = vld [vmem:[%s5625_s1 + $0x2b4] sm:$0xf0] }
  0x23   :  { %1869 = vmatpush.bf16.msra.mxu3 %v2503_v39  ;;  %v2791_v28 = vor.u32 %v3581_v17, %v2790_v16  ;;  %v2718_v30 = vld [vmem:[%s5625_s1 + $0x330] sm:$0xf]  ;;  %v3563_v31 = vld [vmem:[%s5625_s1 + $0x334] sm:$0xf0]  ;;  %1831 = vmatmul.bf16.vlgmr.msra.gmra.mxu0 %v4073_v19  ;;  %v2655_v35 = vor.u32 %v3547_v29, %v2654_v27  ;;  %v2582_v37 = vld [vmem:[%s5625_s1 + $0x220] sm:$0xf] }
  0x24   :  { %1875 = vmatpush.bf16.msrb.mxu0 %v2623_v40  ;;  %v2782_v32 = vld [vmem:[%s5625_s1 + $0x3b0] sm:$0xf]  ;;  %v3579_v33 = vld [vmem:[%s5625_s1 + $0x3b4] sm:$0xf0]  ;;  %1844 = vmatmul.bf16.vlgmr.msra.gmra.mxu1 %v4077_v22  ;;  %v2719_v36 = vor.u32 %v3563_v31, %v2718_v30  ;;  %v3529_v38 = vld [vmem:[%s5625_s1 + $0x224] sm:$0xf0] }
  0x25   :  { %1888 = vmatpush.bf16.msrb.mxu1 %v2687_v41  ;;  %1857 = vmatmul.bf16.vlgmr.msra.gmra.mxu2 %v4071_v18  ;;  %v2646_v39 = vld [vmem:[%s5625_s1 + $0x2a0] sm:$0xf]  ;;  %v2783_v40 = vor.u32 %v3579_v33, %v2782_v32  ;;  %v3545_v41 = vld [vmem:[%s5625_s1 + $0x2a4] sm:$0xf0]  ;;  %v2574_v49 = vld [vmem:[%s5625_s1 + $0x210] sm:$0xf] }
  0x26   :  { %1901 = vmatpush.bf16.msrb.mxu2 %v2751_v42  ;;  %1870 = vmatmul.bf16.vlgmr.msra.gmra.mxu3 %v4075_v20  ;;  %v2710_v42 = vld [vmem:[%s5625_s1 + $0x320] sm:$0xf]  ;;  %v3561_v43 = vld [vmem:[%s5625_s1 + $0x324] sm:$0xf0]  ;;  %v2647_v47 = vor.u32 %v3545_v41, %v2646_v39  ;;  %v3527_v50 = vld [vmem:[%s5625_s1 + $0x214] sm:$0xf0] }
  0x27   :  { %1914 = vmatpush.bf16.msrb.mxu3 %v2815_v46  ;;  %v2774_v44 = vld [vmem:[%s5625_s1 + $0x3a0] sm:$0xf]  ;;  %v3577_v45 = vld [vmem:[%s5625_s1 + $0x3a4] sm:$0xf0]  ;;  %v2583_v46 = vor.u32 %v3529_v38, %v2582_v37  ;;  %v2711_v48 = vor.u32 %v3561_v43, %v2710_v42  ;;  %v2638_v51 = vld [vmem:[%s5625_s1 + $0x290] sm:$0xf] }
  0x28   :  { %1876 = vmatpush.bf16.msrb.mxu0 %v2615_v52  ;;  %v2775_v52 = vor.u32 %v3577_v45, %v2774_v44  ;;  %v3543_v53 = vld [vmem:[%s5625_s1 + $0x294] sm:$0xf0]  ;;  %v2766_v56 = vld [vmem:[%s5625_s1 + $0x390] sm:$0xf]  ;;  %v2566_v58 = vld [vmem:[%s5625_s1 + $0x200] sm:$0xf] }
  0x29   :  { %1889 = vmatpush.bf16.msrb.mxu1 %v2679_v54  ;;  %v2702_v54 = vld [vmem:[%s5625_s1 + $0x310] sm:$0xf]  ;;  %v3575_v57 = vld [vmem:[%s5625_s1 + $0x394] sm:$0xf0]  ;;  %v3525_v60 = vld [vmem:[%s5625_s1 + $0x204] sm:$0xf0]  ;;  %v2639_v63 = vor.u32 %v3543_v53, %v2638_v51 }
  0x2a   :  { %1902 = vmatpush.bf16.msrb.mxu2 %v2743_v55  ;;  %v3559_v55 = vld [vmem:[%s5625_s1 + $0x314] sm:$0xf0]  ;;  %v2630_v61 = vld [vmem:[%s5625_s1 + $0x280] sm:$0xf]  ;;  %v3541_v62 = vld [vmem:[%s5625_s1 + $0x284] sm:$0xf0] }
  0x2b   :  { %1915 = vmatpush.bf16.msrb.mxu3 %v2807_v59  ;;  %v2575_v59 = vor.u32 %v3527_v50, %v2574_v49  ;;  %v3557_v2 = vld [vmem:[%s5625_s1 + $0x304] sm:$0xf0]  ;;  %v20_v3 = vld [vmem:[%s5626_s0 + $0x18] sm:$0xff]  ;;  %v2758_v5 = vld [vmem:[%s5625_s1 + $0x380] sm:$0xf]  ;;  %v2631_v16 = vor.u32 %v3541_v62, %v2630_v61 }
  0x2c   :  { %1877 = vmatpush.bf16.msrb.mxu0 %v2607_v0  ;;  %v2703_v0 = vor.u32 %v3559_v55, %v2702_v54  ;;  %v3573_v6 = vld [vmem:[%s5625_s1 + $0x384] sm:$0xf0]  ;;  %v19_v7 = vld [vmem:[%s5626_s0 + $0x10] sm:$0xff]  ;;  %v3603_v9 = vld [vmem:[%s5625_s1 + $0x474] sm:$0xf0]  ;;  %v335_v15 = vunpack.c.l.b16 %v20_v3  ;;  %v336_v25 = vunpack.c.h.b16 %v20_v3 }
  0x2d   :  { %1890 = vmatpush.bf16.msrb.mxu1 %v2671_v1  ;;  %v2694_v1 = vld [vmem:[%s5625_s1 + $0x300] sm:$0xf]  ;;  %v2878_v8 = vld [vmem:[%s5625_s1 + $0x470] sm:$0xf]  ;;  %v3619_v12 = vld [vmem:[%s5625_s1 + $0x4f4] sm:$0xf0]  ;;  %v2759_v26 = vor.u32 %v3573_v6, %v2758_v5 }
  0x2e   :  { %1903 = vmatpush.bf16.msrb.mxu2 %v2735_v4  ;;  %v2767_v4 = vor.u32 %v3575_v57, %v2766_v56  ;;  %v2942_v10 = vld [vmem:[%s5625_s1 + $0x4f0] sm:$0xf]  ;;  %v3635_v14 = vld [vmem:[%s5625_s1 + $0x574] sm:$0xf0]  ;;  %v2695_v17 = vor.u32 %v3557_v2, %v2694_v1  ;;  %v2879_v27 = vor.u32 %v3603_v9, %v2878_v8  ;;  %v2870_v31 = vld [vmem:[%s5625_s1 + $0x460] sm:$0xf]  ;;  %v4227_v38 = vpack.c.b16 %v335_v15, %v335_v15 }
  0x2f   :  { %1916 = vmatpush.bf16.msrb.mxu3 %v2799_v11  ;;  %v2567_v11 = vor.u32 %v3525_v60, %v2566_v58  ;;  %v3006_v13 = vld [vmem:[%s5625_s1 + $0x570] sm:$0xf]  ;;  %v2943_v29 = vor.u32 %v3619_v12, %v2942_v10  ;;  %v3601_v32 = vld [vmem:[%s5625_s1 + $0x464] sm:$0xf0]  ;;  %v2934_v33 = vld [vmem:[%s5625_s1 + $0x4e0] sm:$0xf]  ;;  %v4237_v42 = vpack.c.b16 %v336_v25, %v336_v25 }
  0x30   :  { %1878 = vmatpush.bf16.msrb.mxu0 %v2599_v21  ;;  %v3070_v21 = vld [vmem:[%s5625_s1 + $0x5f0] sm:$0xf]  ;;  %v3007_v30 = vor.u32 %v3635_v14, %v3006_v13  ;;  %v3633_v37 = vld [vmem:[%s5625_s1 + $0x564] sm:$0xf0]  ;;  %v3062_v39 = vld [vmem:[%s5625_s1 + $0x5e0] sm:$0xf]  ;;  %v2871_v43 = vor.u32 %v3601_v32, %v2870_v31 }
  0x31   :  { %1891 = vmatpush.bf16.msrb.mxu1 %v2663_v23  ;;  %v3651_v23 = vld [vmem:[%s5625_s1 + $0x5f4] sm:$0xf0]  ;;  %v2926_v49 = vld [vmem:[%s5625_s1 + $0x4d0] sm:$0xf]  ;;  %v3597_v60 = vld [vmem:[%s5625_s1 + $0x444] sm:$0xf0] }
  0x32   :  { %1904 = vmatpush.bf16.msrb.mxu2 %v2727_v24  ;;  %v333_v24 = vunpack.c.l.b16 %v19_v7  ;;  %v3615_v51 = vld [vmem:[%s5625_s1 + $0x4d4] sm:$0xf0]  ;;  %v3054_v54 = vld [vmem:[%s5625_s1 + $0x5d0] sm:$0xf]  ;;  %v2918_v61 = vld [vmem:[%s5625_s1 + $0x4c0] sm:$0xf] }
  0x33   :  { %1917 = vmatpush.bf16.msrb.mxu3 %v2791_v28  ;;  %v334_v28 = vunpack.c.h.b16 %v19_v7  ;;  %v3631_v53 = vld [vmem:[%s5625_s1 + $0x554] sm:$0xf0]  ;;  %v2927_v57 = vor.u32 %v3615_v51, %v2926_v49  ;;  %v3629_v1 = vld [vmem:[%s5625_s1 + $0x544] sm:$0xf0]  ;;  %v3046_v2 = vld [vmem:[%s5625_s1 + $0x5c0] sm:$0xf] }
  0x34   :  { %1879 = vmatpush.bf16.msrb.mxu0 %v2591_v34  ;;  %v3071_v34 = vor.u32 %v3651_v23, %v3070_v21  ;;  %v4235_v41 = vpack.c.b16 %v333_v24, %v333_v24  ;;  %v3647_v55 = vld [vmem:[%s5625_s1 + $0x5d4] sm:$0xf0]  ;;  %v3645_v3 = vld [vmem:[%s5625_s1 + $0x5c4] sm:$0xf0]  ;;  %v2846_v7 = vld [vmem:[%s5625_s1 + $0x430] sm:$0xf] }
  0x35   :  { %1892 = vmatpush.bf16.msrb.mxu1 %v2655_v35  ;;  %v3617_v35 = vld [vmem:[%s5625_s1 + $0x4e4] sm:$0xf0]  ;;  %v4239_v44 = vpack.c.b16 %v334_v28, %v334_v28  ;;  %v3055_v62 = vor.u32 %v3647_v55, %v3054_v54  ;;  %v3595_v8 = vld [vmem:[%s5625_s1 + $0x434] sm:$0xf0]  ;;  %v2910_v9 = vld [vmem:[%s5625_s1 + $0x4b0] sm:$0xf]  ;;  %v3047_v10 = vor.u32 %v3645_v3, %v3046_v2 }
  0x36   :  { %1905 = vmatpush.bf16.msrb.mxu2 %v2719_v36  ;;  %v2998_v36 = vld [vmem:[%s5625_s1 + $0x560] sm:$0xf]  ;;  %v2935_v45 = vor.u32 %v3617_v35, %v2934_v33  ;;  %v2974_v12 = vld [vmem:[%s5625_s1 + $0x530] sm:$0xf]  ;;  %v3627_v13 = vld [vmem:[%s5625_s1 + $0x534] sm:$0xf0] }
  0x37   :  { %1918 = vmatpush.bf16.msrb.mxu3 %v2783_v40  ;;  %v3649_v40 = vld [vmem:[%s5625_s1 + $0x5e4] sm:$0xf0]  ;;  %v3038_v14 = vld [vmem:[%s5625_s1 + $0x5b0] sm:$0xf]  ;;  %v3643_v15 = vld [vmem:[%s5625_s1 + $0x5b4] sm:$0xf0]  ;;  %v2975_v21 = vor.u32 %v3627_v13, %v2974_v12 }
  0x38   :  { %1880 = vmatpush.bf16.msrb.mxu0 %v2583_v46  ;;  %v2999_v46 = vor.u32 %v3633_v37, %v2998_v36  ;;  %v3063_v50 = vor.u32 %v3649_v40, %v3062_v39  ;;  %v2838_v23 = vld [vmem:[%s5625_s1 + $0x420] sm:$0xf]  ;;  %v3593_v24 = vld [vmem:[%s5625_s1 + $0x424] sm:$0xf0]  ;;  %v2830_v35 = vld [vmem:[%s5625_s1 + $0x410] sm:$0xf] }
  0x39   :  { %1893 = vmatpush.bf16.msrb.mxu1 %v2647_v47  ;;  %v2862_v47 = vld [vmem:[%s5625_s1 + $0x450] sm:$0xf]  ;;  %v2902_v25 = vld [vmem:[%s5625_s1 + $0x4a0] sm:$0xf]  ;;  %v3641_v31 = vld [vmem:[%s5625_s1 + $0x5a4] sm:$0xf0]  ;;  %v2839_v32 = vor.u32 %v3593_v24, %v2838_v23 }
  0x3a   :  { %1906 = vmatpush.bf16.msrb.mxu2 %v2711_v48  ;;  %v3599_v48 = vld [vmem:[%s5625_s1 + $0x454] sm:$0xf0]  ;;  %v2966_v28 = vld [vmem:[%s5625_s1 + $0x520] sm:$0xf]  ;;  %v2894_v37 = vld [vmem:[%s5625_s1 + $0x490] sm:$0xf] }
  0x3b   :  { %1919 = vmatpush.bf16.msrb.mxu3 %v2775_v52  ;;  %v2990_v52 = vld [vmem:[%s5625_s1 + $0x550] sm:$0xf]  ;;  %v2863_v56 = vor.u32 %v3599_v48, %v2862_v47  ;;  %v3591_v36 = vld [vmem:[%s5625_s1 + $0x414] sm:$0xf0]  ;;  %v2822_v48 = vld [vmem:[%s5625_s1 + $0x400] sm:$0xf] }
  0x3c   :  { %1881 = vmatpush.bf16.msrb.mxu0 %v2575_v59  ;;  %v2991_v58 = vor.u32 %v3631_v53, %v2990_v52  ;;  %v2854_v59 = vld [vmem:[%s5625_s1 + $0x440] sm:$0xf]  ;;  %v3607_v40 = vld [vmem:[%s5625_s1 + $0x494] sm:$0xf0]  ;;  %v2831_v49 = vor.u32 %v3591_v36, %v2830_v35  ;;  %v3605_v52 = vld [vmem:[%s5625_s1 + $0x484] sm:$0xf0] }
  0x3d   :  { %1894 = vmatpush.bf16.msrb.mxu1 %v2639_v63  ;;  %v3613_v63 = vld [vmem:[%s5625_s1 + $0x4c4] sm:$0xf0]  ;;  %v3639_v47 = vld [vmem:[%s5625_s1 + $0x594] sm:$0xf0]  ;;  %v2886_v51 = vld [vmem:[%s5625_s1 + $0x480] sm:$0xf]  ;;  %v2895_v53 = vor.u32 %v3607_v40, %v2894_v37 }
  0x3e   :  { %1907 = vmatpush.bf16.msrb.mxu2 %v2703_v0  ;;  %v2982_v0 = vld [vmem:[%s5625_s1 + $0x540] sm:$0xf]  ;;  %v2919_v5 = vor.u32 %v3613_v63, %v2918_v61  ;;  %v22_v61 = vld [vmem:[%s5626_s0 + $0x28] sm:$0xff]  ;;  %v3667_v63 = vld [vmem:[%s5625_s1 + $0x674] sm:$0xf0] }
  0x3f   :  { %1920 = vmatpush.bf16.msrb.mxu3 %v2767_v4  ;;  %v2855_v4 = vor.u32 %v3597_v60, %v2854_v59  ;;  %v2983_v6 = vor.u32 %v3629_v1, %v2982_v0  ;;  %v2950_v55 = vld [vmem:[%s5625_s1 + $0x500] sm:$0xf]  ;;  %v3637_v60 = vld [vmem:[%s5625_s1 + $0x584] sm:$0xf0]  ;;  %v3198_v0 = vld [vmem:[%s5625_s1 + $0x6f0] sm:$0xf] }
  0x40   :  { %1882 = vmatpush.bf16.msrb.mxu0 %v2567_v11  ;;  %v3611_v11 = vld [vmem:[%s5625_s1 + $0x4b4] sm:$0xf0]  ;;  %v3014_v59 = vld [vmem:[%s5625_s1 + $0x580] sm:$0xf]  ;;  %v3262_v3 = vld [vmem:[%s5625_s1 + $0x770] sm:$0xf] }
  0x41   :  { %1895 = vmatpush.bf16.msrb.mxu1 %v2631_v16  ;;  %v2847_v16 = vor.u32 %v3595_v8, %v2846_v7  ;;  %v3683_v2 = vld [vmem:[%s5625_s1 + $0x6f4] sm:$0xf0]  ;;  %v3326_v8 = vld [vmem:[%s5625_s1 + $0x7f0] sm:$0xf]  ;;  %v3015_v12 = vor.u32 %v3637_v60, %v3014_v59  ;;  %v3190_v23 = vld [vmem:[%s5625_s1 + $0x6e0] sm:$0xf] }
  0x42   :  { %1908 = vmatpush.bf16.msrb.mxu2 %v2695_v17  ;;  %v2911_v17 = vor.u32 %v3611_v11, %v2910_v9  ;;  %v3715_v9 = vld [vmem:[%s5625_s1 + $0x7f4] sm:$0xf0]  ;;  %v3118_v37 = vld [vmem:[%s5625_s1 + $0x650] sm:$0xf]  ;;  %v3693_v59 = vld [vmem:[%s5625_s1 + $0x744] sm:$0xf0] }
  0x43   :  { %1921 = vmatpush.bf16.msrb.mxu3 %v2759_v26  ;;  %1883 = vmatmul.bf16.vlgmr.msrb.gmra.mxu0 %v4235_v41  ;;  %v3039_v26 = vor.u32 %v3643_v15, %v3038_v14  ;;  %v340_v14 = vunpack.c.h.b16 %v22_v61  ;;  %v3199_v15 = vor.u32 %v3683_v2, %v3198_v0  ;;  %v3327_v24 = vor.u32 %v3715_v9, %v3326_v8  ;;  %v3182_v40 = vld [vmem:[%s5625_s1 + $0x6d0] sm:$0xf]  ;;  %v3302_v60 = vld [vmem:[%s5625_s1 + $0x7c0] sm:$0xf]  ;;  %v3659_v2 = vld [vmem:[%s5625_s1 + $0x634] sm:$0xf0] }
  0x44   :  { %1927 = vmatpush.bf16.msra.mxu0 %v2879_v27  ;;  %1896 = vmatmul.bf16.vlgmr.msrb.gmra.mxu1 %v4239_v44  ;;  %v3609_v27 = vld [vmem:[%s5625_s1 + $0x4a4] sm:$0xf0]  ;;  %v3294_v8 = vld [vmem:[%s5625_s1 + $0x7b0] sm:$0xf]  ;;  %v3707_v9 = vld [vmem:[%s5625_s1 + $0x7b4] sm:$0xf0] }
  0x45   :  { %1940 = vmatpush.bf16.msra.mxu1 %v2943_v29  ;;  %1909 = vmatmul.bf16.vlgmr.msrb.gmra.mxu2 %v4227_v38  ;;  %v3625_v29 = vld [vmem:[%s5625_s1 + $0x524] sm:$0xf0]  ;;  %v2903_v33 = vor.u32 %v3609_v27, %v2902_v25  ;;  %v3254_v27 = vld [vmem:[%s5625_s1 + $0x760] sm:$0xf] }
  0x46   :  { %1953 = vmatpush.bf16.msra.mxu2 %v3007_v30  ;;  %1922 = vmatmul.bf16.vlgmr.msrb.gmra.mxu3 %v4237_v42  ;;  %v3030_v30 = vld [vmem:[%s5625_s1 + $0x5a0] sm:$0xf] }
  0x47   :  { %1966 = vmatpush.bf16.msra.mxu3 %v3071_v34  ;;  %v2967_v34 = vor.u32 %v3625_v29, %v2966_v28  ;;  %v3031_v39 = vor.u32 %v3641_v31, %v3030_v30  ;;  %v3697_v28 = vld [vmem:[%s5625_s1 + $0x764] sm:$0xf0]  ;;  %v3318_v31 = vld [vmem:[%s5625_s1 + $0x7e0] sm:$0xf] }
  0x48   :  { %1928 = vmatpush.bf16.msra.mxu0 %v2871_v43  ;;  %v2958_v43 = vld [vmem:[%s5625_s1 + $0x510] sm:$0xf]  ;;  %v3255_v36 = vor.u32 %v3697_v28, %v3254_v27 }
  0x49   :  { %1941 = vmatpush.bf16.msra.mxu1 %v2935_v45  ;;  %v3623_v45 = vld [vmem:[%s5625_s1 + $0x514] sm:$0xf0] }
  0x4a   :  { %1954 = vmatpush.bf16.msra.mxu2 %v2999_v46  ;;  %v3022_v46 = vld [vmem:[%s5625_s1 + $0x590] sm:$0xf]  ;;  %v2959_v54 = vor.u32 %v3623_v45, %v2958_v43  ;;  %v3679_v45 = vld [vmem:[%s5625_s1 + $0x6d4] sm:$0xf0] }
  0x4b   :  { %1967 = vmatpush.bf16.msra.mxu3 %v3063_v50  ;;  %v3589_v50 = vld [vmem:[%s5625_s1 + $0x404] sm:$0xf0] }
  0x4c   :  { %1929 = vmatpush.bf16.msra.mxu0 %v2863_v56  ;;  %v3621_v56 = vld [vmem:[%s5625_s1 + $0x504] sm:$0xf0]  ;;  %v2823_v1 = vor.u32 %v3589_v50, %v2822_v48  ;;  %v3310_v48 = vld [vmem:[%s5625_s1 + $0x7d0] sm:$0xf] }
  0x4d   :  { %1942 = vmatpush.bf16.msra.mxu1 %v2927_v57  ;;  %v21_v57 = vld [vmem:[%s5626_s0 + $0x20] sm:$0xff]  ;;  %v2951_v7 = vor.u32 %v3621_v56, %v2950_v55 }
  0x4e   :  { %1955 = vmatpush.bf16.msra.mxu2 %v2991_v58  ;;  %v3023_v58 = vor.u32 %v3639_v47, %v3022_v46  ;;  %v338_v11 = vunpack.c.h.b16 %v21_v57  ;;  %v3246_v46 = vld [vmem:[%s5625_s1 + $0x750] sm:$0xf]  ;;  %v3695_v47 = vld [vmem:[%s5625_s1 + $0x754] sm:$0xf0]  ;;  %v3174_v55 = vld [vmem:[%s5625_s1 + $0x6c0] sm:$0xf] }
  0x4f   :  { %1968 = vmatpush.bf16.msra.mxu3 %v3055_v62  ;;  %v3134_v62 = vld [vmem:[%s5625_s1 + $0x670] sm:$0xf] }
  0x50   :  { %1930 = vmatpush.bf16.msra.mxu0 %v2855_v4  ;;  %v3699_v4 = vld [vmem:[%s5625_s1 + $0x774] sm:$0xf0]  ;;  %v3135_v13 = vor.u32 %v3667_v63, %v3134_v62  ;;  %v4441_v30 = vpack.c.b16 %v338_v11, %v338_v11 }
  0x51   :  { %1943 = vmatpush.bf16.msra.mxu1 %v2919_v5  ;;  %v337_v5 = vunpack.c.l.b16 %v21_v57  ;;  %v3677_v57 = vld [vmem:[%s5625_s1 + $0x6c4] sm:$0xf0] }
  0x52   :  { %1956 = vmatpush.bf16.msra.mxu2 %v2983_v6  ;;  %v2887_v6 = vor.u32 %v3605_v52, %v2886_v51  ;;  %v3183_v51 = vor.u32 %v3679_v45, %v3182_v40  ;;  %v3247_v52 = vor.u32 %v3695_v47, %v3246_v46  ;;  %v3175_v63 = vor.u32 %v3677_v57, %v3174_v55  ;;  %v3687_v40 = vld [vmem:[%s5625_s1 + $0x714] sm:$0xf0]  ;;  %v3078_v46 = vld [vmem:[%s5625_s1 + $0x600] sm:$0xf]  ;;  %v23_v55 = vld [vmem:[%s5626_s0 + $0x30] sm:$0xff] }
  0x53   :  { %1969 = vmatpush.bf16.msra.mxu3 %v3047_v10  ;;  %v339_v10 = vunpack.c.l.b16 %v22_v61  ;;  %v4428_v25 = vpack.c.b16 %v337_v5, %v337_v5  ;;  %v3709_v61 = vld [vmem:[%s5625_s1 + $0x7c4] sm:$0xf0]  ;;  %v3675_v5 = vld [vmem:[%s5625_s1 + $0x6b4] sm:$0xf0]  ;;  %v3270_v57 = vld [vmem:[%s5625_s1 + $0x780] sm:$0xf] }
  0x54   :  { %1931 = vmatpush.bf16.msra.mxu0 %v2847_v16  ;;  %v3263_v16 = vor.u32 %v3699_v4, %v3262_v3  ;;  %v3166_v3 = vld [vmem:[%s5625_s1 + $0x6b0] sm:$0xf]  ;;  %v3303_v4 = vor.u32 %v3709_v61, %v3302_v60  ;;  %v3703_v45 = vld [vmem:[%s5625_s1 + $0x794] sm:$0xf0] }
  0x55   :  { %1944 = vmatpush.bf16.msra.mxu1 %v2911_v17  ;;  %v3126_v17 = vld [vmem:[%s5625_s1 + $0x660] sm:$0xf]  ;;  %v4439_v29 = vpack.c.b16 %v339_v10, %v339_v10  ;;  %v3167_v11 = vor.u32 %v3675_v5, %v3166_v3  ;;  %v3390_v60 = vld [vmem:[%s5625_s1 + $0x870] sm:$0xf]  ;;  %v3731_v61 = vld [vmem:[%s5625_s1 + $0x874] sm:$0xf0]  ;;  %v341_v3 = vunpack.c.l.b16 %v23_v55 }
  0x56   :  { %1957 = vmatpush.bf16.msra.mxu2 %v2975_v21  ;;  %v3665_v21 = vld [vmem:[%s5625_s1 + $0x664] sm:$0xf0] }
  0x57   :  { %1970 = vmatpush.bf16.msra.mxu3 %v3039_v26  ;;  %v3681_v26 = vld [vmem:[%s5625_s1 + $0x6e4] sm:$0xf0] }
  0x58   :  { %1932 = vmatpush.bf16.msra.mxu0 %v2839_v32  ;;  %v3713_v32 = vld [vmem:[%s5625_s1 + $0x7e4] sm:$0xf0]  ;;  %v3191_v35 = vor.u32 %v3681_v26, %v3190_v23 }
  0x59   :  { %1945 = vmatpush.bf16.msra.mxu1 %v2903_v33  ;;  %v4449_v33 = vpack.c.b16 %v340_v14, %v340_v14  ;;  %v3319_v43 = vor.u32 %v3713_v32, %v3318_v31  ;;  %v3657_v14 = vld [vmem:[%s5625_s1 + $0x624] sm:$0xf0]  ;;  %v3086_v32 = vld [vmem:[%s5625_s1 + $0x610] sm:$0xf] }
  0x5a   :  { %1958 = vmatpush.bf16.msra.mxu2 %v2967_v34  ;;  %v3127_v34 = vor.u32 %v3665_v21, %v3126_v17  ;;  %v3673_v17 = vld [vmem:[%s5625_s1 + $0x6a4] sm:$0xf0]  ;;  %v3222_v21 = vld [vmem:[%s5625_s1 + $0x720] sm:$0xf] }
  0x5b   :  { %1971 = vmatpush.bf16.msra.mxu3 %v3031_v39  ;;  %v3663_v39 = vld [vmem:[%s5625_s1 + $0x654] sm:$0xf0]  ;;  %v3689_v23 = vld [vmem:[%s5625_s1 + $0x724] sm:$0xf0] }
  0x5c   :  { %1933 = vmatpush.bf16.msra.mxu0 %v2831_v49  ;;  %v3711_v49 = vld [vmem:[%s5625_s1 + $0x7d4] sm:$0xf0]  ;;  %v3119_v50 = vor.u32 %v3663_v39, %v3118_v37  ;;  %v3705_v26 = vld [vmem:[%s5625_s1 + $0x7a4] sm:$0xf0]  ;;  %v3223_v31 = vor.u32 %v3689_v23, %v3222_v21  ;;  %v3214_v39 = vld [vmem:[%s5625_s1 + $0x710] sm:$0xf]  ;;  %v4638_v23 = vpack.c.b16 %v341_v3, %v341_v3 }
  0x5d   :  { %1946 = vmatpush.bf16.msra.mxu1 %v2895_v53  ;;  %v3110_v53 = vld [vmem:[%s5625_s1 + $0x640] sm:$0xf]  ;;  %v3311_v56 = vor.u32 %v3711_v49, %v3310_v48  ;;  %v3671_v37 = vld [vmem:[%s5625_s1 + $0x694] sm:$0xf0]  ;;  %v3653_v48 = vld [vmem:[%s5625_s1 + $0x604] sm:$0xf0] }
  0x5e   :  { %1959 = vmatpush.bf16.msra.mxu2 %v2959_v54  ;;  %v3661_v54 = vld [vmem:[%s5625_s1 + $0x644] sm:$0xf0]  ;;  %v3142_v49 = vld [vmem:[%s5625_s1 + $0x680] sm:$0xf]  ;;  %v3358_v3 = vld [vmem:[%s5625_s1 + $0x830] sm:$0xf] }
  0x5f   :  { %1972 = vmatpush.bf16.msra.mxu3 %v3023_v58  ;;  %v3238_v58 = vld [vmem:[%s5625_s1 + $0x740] sm:$0xf]  ;;  %v3111_v62 = vor.u32 %v3661_v54, %v3110_v53  ;;  %v3685_v54 = vld [vmem:[%s5625_s1 + $0x704] sm:$0xf0] }
  0x60   :  { %1934 = vmatpush.bf16.msra.mxu0 %v2823_v1  ;;  %v3239_v0 = vor.u32 %v3693_v59, %v3238_v58  ;;  %v3102_v1 = vld [vmem:[%s5625_s1 + $0x630] sm:$0xf]  ;;  %v3206_v53 = vld [vmem:[%s5625_s1 + $0x700] sm:$0xf]  ;;  %v3701_v58 = vld [vmem:[%s5625_s1 + $0x784] sm:$0xf0] }
  0x61   :  { %1947 = vmatpush.bf16.msra.mxu1 %v2887_v6  ;;  %v3230_v6 = vld [vmem:[%s5625_s1 + $0x730] sm:$0xf]  ;;  %v3103_v10 = vor.u32 %v3659_v2, %v3102_v1  ;;  %v24_v59 = vld [vmem:[%s5626_s0 + $0x38] sm:$0xff]  ;;  %v3474_v1 = vld [vmem:[%s5625_s1 + $0x74] sm:$0xf]  ;;  %v3207_v5 = vor.u32 %v3685_v54, %v3206_v53 }
  0x62   :  { %1960 = vmatpush.bf16.msra.mxu2 %v2951_v7  ;;  %v3691_v7 = vld [vmem:[%s5625_s1 + $0x734] sm:$0xf0]  ;;  %v2368_v2 = vld [vmem:[%s5625_s1 + $0x78] sm:$0xf0] }
  0x63   :  { %1973 = vmatpush.bf16.msra.mxu3 %v3015_v12  ;;  %1935 = vmatmul.bf16.vlgmr.msra.gmra.mxu0 %v4428_v25  ;;  %v3231_v12 = vor.u32 %v3691_v7, %v3230_v6  ;;  %v3490_v6 = vld [vmem:[%s5625_s1 + $0xf4] sm:$0xf]  ;;  %v2432_v7 = vld [vmem:[%s5625_s1 + $0xf8] sm:$0xf0] }
  0x64   :  { %1979 = vmatpush.bf16.msrb.mxu0 %v3135_v13  ;;  %1948 = vmatmul.bf16.vlgmr.msra.gmra.mxu1 %v4441_v30  ;;  %v3094_v13 = vld [vmem:[%s5625_s1 + $0x620] sm:$0xf]  ;;  %v2435_v21 = vor.u32 %v3490_v6, %v2432_v7  ;;  %v3739_v7 = vld [vmem:[%s5625_s1 + $0x8b4] sm:$0xf0] }
  0x65   :  { %1992 = vmatpush.bf16.msrb.mxu1 %v3199_v15  ;;  %1961 = vmatmul.bf16.vlgmr.msra.gmra.mxu2 %v4439_v29  ;;  %v3158_v15 = vld [vmem:[%s5625_s1 + $0x6a0] sm:$0xf]  ;;  %v3095_v27 = vor.u32 %v3657_v14, %v3094_v13  ;;  %v2371_v14 = vor.u32 %v3474_v1, %v2368_v2 }
  0x66   :  { %2005 = vmatpush.bf16.msrb.mxu2 %v3263_v16  ;;  %1974 = vmatmul.bf16.vlgmr.msra.gmra.mxu3 %v4449_v33  ;;  %v3295_v16 = vor.u32 %v3707_v9, %v3294_v8  ;;  %v3159_v28 = vor.u32 %v3673_v17, %v3158_v15  ;;  %v343_v8 = vunpack.c.l.b16 %v24_v59  ;;  %v342_v9 = vunpack.c.h.b16 %v23_v55  ;;  %v3382_v15 = vld [vmem:[%s5625_s1 + $0x860] sm:$0xf] }
  0x67   :  { %2018 = vmatpush.bf16.msrb.mxu3 %v3327_v24  ;;  %v3286_v24 = vld [vmem:[%s5625_s1 + $0x7a0] sm:$0xf] }
  0x68   :  { %1980 = vmatpush.bf16.msrb.mxu0 %v3127_v34  ;;  %v3655_v34 = vld [vmem:[%s5625_s1 + $0x614] sm:$0xf0]  ;;  %v3446_v17 = vld [vmem:[%s5625_s1 + $0x8e0] sm:$0xf] }
  0x69   :  { %1993 = vmatpush.bf16.msrb.mxu1 %v3191_v35  ;;  %v3150_v35 = vld [vmem:[%s5625_s1 + $0x690] sm:$0xf]  ;;  %v3087_v47 = vor.u32 %v3655_v34, %v3086_v32  ;;  %v3488_v32 = vld [vmem:[%s5625_s1 + $0xe4] sm:$0xf]  ;;  %v2424_v34 = vld [vmem:[%s5625_s1 + $0xe8] sm:$0xf0] }
  0x6a   :  { %2006 = vmatpush.bf16.msrb.mxu2 %v3255_v36  ;;  %v3287_v36 = vor.u32 %v3705_v26, %v3286_v24  ;;  %v3745_v24 = vld [vmem:[%s5625_s1 + $0x8e4] sm:$0xf0]  ;;  %v3472_v26 = vld [vmem:[%s5625_s1 + $0x64] sm:$0xf]  ;;  %v3366_v55 = vld [vmem:[%s5625_s1 + $0x840] sm:$0xf] }
  0x6b   :  { %2019 = vmatpush.bf16.msrb.mxu3 %v3319_v43  ;;  %v3278_v43 = vld [vmem:[%s5625_s1 + $0x790] sm:$0xf] }
  0x6c   :  { %1981 = vmatpush.bf16.msrb.mxu0 %v3119_v50  ;;  %v3669_v50 = vld [vmem:[%s5625_s1 + $0x684] sm:$0xf0] }
  0x6d   :  { %1994 = vmatpush.bf16.msrb.mxu1 %v3183_v51  ;;  %v3151_v51 = vor.u32 %v3671_v37, %v3150_v35  ;;  %v3447_v37 = vor.u32 %v3745_v24, %v3446_v17  ;;  %v3414_v17 = vld [vmem:[%s5625_s1 + $0x8a0] sm:$0xf]  ;;  %v3737_v24 = vld [vmem:[%s5625_s1 + $0x8a4] sm:$0xf0] }
  0x6e   :  { %2007 = vmatpush.bf16.msrb.mxu2 %v3247_v52  ;;  %v3215_v52 = vor.u32 %v3687_v40, %v3214_v39  ;;  %v3374_v40 = vld [vmem:[%s5625_s1 + $0x850] sm:$0xf] }
  0x6f   :  { %2020 = vmatpush.bf16.msrb.mxu3 %v3311_v56  ;;  %v3279_v56 = vor.u32 %v3703_v45, %v3278_v43  ;;  %v3727_v43 = vld [vmem:[%s5625_s1 + $0x854] sm:$0xf0]  ;;  %v3438_v45 = vld [vmem:[%s5625_s1 + $0x8d0] sm:$0xf] }
  0x70   :  { %1982 = vmatpush.bf16.msrb.mxu0 %v3111_v62  ;;  %v3454_v62 = vld [vmem:[%s5625_s1 + $0x8f0] sm:$0xf] }
  0x71   :  { %1995 = vmatpush.bf16.msrb.mxu1 %v3175_v63  ;;  %v3079_v63 = vor.u32 %v3653_v48, %v3078_v46  ;;  %v2427_v46 = vor.u32 %v3488_v32, %v2424_v34  ;;  %v3470_v48 = vld [vmem:[%s5625_s1 + $0x54] sm:$0xf]  ;;  %v3480_v32 = vld [vmem:[%s5625_s1 + $0xa4] sm:$0xf]  ;;  %v2392_v34 = vld [vmem:[%s5625_s1 + $0xa8] sm:$0xf0] }
  0x72   :  { %2008 = vmatpush.bf16.msrb.mxu2 %v3239_v0  ;;  %v3747_v0 = vld [vmem:[%s5625_s1 + $0x8f4] sm:$0xf0] }
  0x73   :  { %2021 = vmatpush.bf16.msrb.mxu3 %v3303_v4  ;;  %v3143_v4 = vor.u32 %v3669_v50, %v3142_v49  ;;  %v3455_v13 = vor.u32 %v3747_v0, %v3454_v62  ;;  %v2352_v49 = vld [vmem:[%s5625_s1 + $0x58] sm:$0xf0]  ;;  %v3486_v50 = vld [vmem:[%s5625_s1 + $0xd4] sm:$0xf]  ;;  %v3484_v62 = vld [vmem:[%s5625_s1 + $0xc4] sm:$0xf] }
  0x74   :  { %1983 = vmatpush.bf16.msrb.mxu0 %v3103_v10  ;;  %v3271_v10 = vor.u32 %v3701_v58, %v3270_v57  ;;  %v2355_v54 = vor.u32 %v3470_v48, %v2352_v49  ;;  %v3430_v57 = vld [vmem:[%s5625_s1 + $0x8c0] sm:$0xf]  ;;  %v2395_v48 = vor.u32 %v3480_v32, %v2392_v34  ;;  %v3735_v49 = vld [vmem:[%s5625_s1 + $0x894] sm:$0xf0]  ;;  %v2488_v32 = vld [vmem:[%s5625_s1 + $0x168] sm:$0xf0] }
  0x75   :  { %1996 = vmatpush.bf16.msrb.mxu1 %v3167_v11  ;;  %v3391_v11 = vor.u32 %v3731_v61, %v3390_v60  ;;  %v3468_v60 = vld [vmem:[%s5625_s1 + $0x44] sm:$0xf]  ;;  %v2344_v61 = vld [vmem:[%s5625_s1 + $0x48] sm:$0xf0] }
  0x76   :  { %2009 = vmatpush.bf16.msrb.mxu2 %v3231_v12  ;;  %v344_v12 = vunpack.c.h.b16 %v24_v59  ;;  %v3741_v59 = vld [vmem:[%s5625_s1 + $0x8c4] sm:$0xf0]  ;;  %v2347_v2 = vor.u32 %v3468_v60, %v2344_v61  ;;  %v3520_v34 = vld [vmem:[%s5625_s1 + $0x1e4] sm:$0xf] }
  0x77   :  { %2022 = vmatpush.bf16.msrb.mxu3 %v3295_v16  ;;  %v3729_v16 = vld [vmem:[%s5625_s1 + $0x864] sm:$0xf0]  ;;  %v3431_v1 = vor.u32 %v3741_v59, %v3430_v57 }
  0x78   :  { %1984 = vmatpush.bf16.msrb.mxu0 %v3095_v27  ;;  %v2360_v27 = vld [vmem:[%s5625_s1 + $0x68] sm:$0xf0]  ;;  %v4659_v35 = vpack.c.b16 %v344_v12, %v344_v12  ;;  %v3717_v57 = vld [vmem:[%s5625_s1 + $0x804] sm:$0xf0] }
  0x79   :  { %1997 = vmatpush.bf16.msrb.mxu1 %v3159_v28  ;;  %v4649_v28 = vpack.c.b16 %v343_v8, %v343_v8  ;;  %v2363_v39 = vor.u32 %v3472_v26, %v2360_v27  ;;  %v3466_v8 = vld [vmem:[%s5625_s1 + $0x34] sm:$0xf]  ;;  %v3464_v26 = vld [vmem:[%s5625_s1 + $0x24] sm:$0xf]  ;;  %v2328_v27 = vld [vmem:[%s5625_s1 + $0x28] sm:$0xf0] }
  0x7a   :  { %2010 = vmatpush.bf16.msrb.mxu2 %v3223_v31  ;;  %v4651_v31 = vpack.c.b16 %v342_v9, %v342_v9  ;;  %v2336_v9 = vld [vmem:[%s5625_s1 + $0x38] sm:$0xf0]  ;;  %v3733_v61 = vld [vmem:[%s5625_s1 + $0x884] sm:$0xf0] }
  0x7b   :  { %2023 = vmatpush.bf16.msrb.mxu3 %v3287_v36  ;;  %v3383_v36 = vor.u32 %v3729_v16, %v3382_v15  ;;  %v3350_v15 = vld [vmem:[%s5625_s1 + $0x820] sm:$0xf]  ;;  %v3721_v16 = vld [vmem:[%s5625_s1 + $0x824] sm:$0xf0] }
  0x7c   :  { %1985 = vmatpush.bf16.msrb.mxu0 %v3087_v47  ;;  %v3743_v47 = vld [vmem:[%s5625_s1 + $0x8d4] sm:$0xf0] }
  0x7d   :  { %1998 = vmatpush.bf16.msrb.mxu1 %v3151_v51  ;;  %v2416_v51 = vld [vmem:[%s5625_s1 + $0xd8] sm:$0xf0]  ;;  %v3439_v53 = vor.u32 %v3743_v47, %v3438_v45  ;;  %v3719_v45 = vld [vmem:[%s5625_s1 + $0x814] sm:$0xf0] }
  0x7e   :  { %2011 = vmatpush.bf16.msrb.mxu2 %v3215_v52  ;;  %v3375_v52 = vor.u32 %v3727_v43, %v3374_v40  ;;  %v2419_v58 = vor.u32 %v3486_v50, %v2416_v51  ;;  %v2331_v40 = vor.u32 %v3464_v26, %v2328_v27  ;;  %v3342_v43 = vld [vmem:[%s5625_s1 + $0x810] sm:$0xf]  ;;  %v3462_v50 = vld [vmem:[%s5625_s1 + $0x14] sm:$0xf]  ;;  %v2320_v51 = vld [vmem:[%s5625_s1 + $0x18] sm:$0xf0] }
  0x7f   :  { %2024 = vmatpush.bf16.msrb.mxu3 %v3279_v56  ;;  %v3725_v56 = vld [vmem:[%s5625_s1 + $0x844] sm:$0xf0]  ;;  %v2323_v60 = vor.u32 %v3462_v50, %v2320_v51  ;;  %v3504_v27 = vld [vmem:[%s5625_s1 + $0x164] sm:$0xf]  ;;  %v3502_v51 = vld [vmem:[%s5625_s1 + $0x154] sm:$0xf] }
  0x80   :  { %1986 = vmatpush.bf16.msrb.mxu0 %v3079_v63  ;;  %v2408_v63 = vld [vmem:[%s5625_s1 + $0xc8] sm:$0xf0]  ;;  %v3367_v0 = vor.u32 %v3725_v56, %v3366_v55  ;;  %v3343_v55 = vor.u32 %v3719_v45, %v3342_v43  ;;  %v3334_v56 = vld [vmem:[%s5625_s1 + $0x800] sm:$0xf] }
  0x81   :  { %1999 = vmatpush.bf16.msrb.mxu1 %v3143_v4  ;;  %v3723_v4 = vld [vmem:[%s5625_s1 + $0x834] sm:$0xf0]  ;;  %v2411_v6 = vor.u32 %v3484_v62, %v2408_v63  ;;  %v3460_v62 = vld [vmem:[%s5625_s1 + $0x4] sm:$0xf]  ;;  %v2616_v43 = vld [vmem:[%s5625_s1 + $0x268] sm:$0xf0] }
  0x82   :  { %2012 = vmatpush.bf16.msrb.mxu2 %v3207_v5  ;;  %v3422_v5 = vld [vmem:[%s5625_s1 + $0x8b0] sm:$0xf]  ;;  %v3359_v12 = vor.u32 %v3723_v4, %v3358_v3  ;;  %v25_v63 = vld [vmem:[%s5626_s0 + $0x40] sm:$0xff]  ;;  %v2376_v3 = vld [vmem:[%s5625_s1 + $0x88] sm:$0xf0] }
  0x83   :  { %2025 = vmatpush.bf16.msrb.mxu3 %v3271_v10  ;;  %1987 = vmatmul.bf16.vlgmr.msrb.gmra.mxu0 %v4638_v23  ;;  %v3482_v10 = vld [vmem:[%s5625_s1 + $0xb4] sm:$0xf] }
  0x84   :  { %2031 = vmatpush.bf16.msra.mxu0 %v3391_v11  ;;  %2000 = vmatmul.bf16.vlgmr.msrb.gmra.mxu1 %v4651_v31  ;;  %v2400_v11 = vld [vmem:[%s5625_s1 + $0xb8] sm:$0xf0]  ;;  %v3506_v4 = vld [vmem:[%s5625_s1 + $0x174] sm:$0xf] }
  0x85   :  { %2044 = vmatpush.bf16.msra.mxu1 %v3455_v13  ;;  %2013 = vmatmul.bf16.vlgmr.msrb.gmra.mxu2 %v4649_v28  ;;  %v3423_v13 = vor.u32 %v3739_v7, %v3422_v5  ;;  %v2496_v5 = vld [vmem:[%s5625_s1 + $0x178] sm:$0xf0]  ;;  %v3335_v7 = vor.u32 %v3717_v57, %v3334_v56  ;;  %v3534_v56 = vld [vmem:[%s5625_s1 + $0x254] sm:$0xf] }
  0x86   :  { %2057 = vmatpush.bf16.msra.mxu2 %v2371_v14  ;;  %2026 = vmatmul.bf16.vlgmr.msrb.gmra.mxu3 %v4659_v35  ;;  %v2339_v14 = vor.u32 %v3466_v8, %v2336_v9  ;;  %v2560_v8 = vld [vmem:[%s5625_s1 + $0x1f8] sm:$0xf0]  ;;  %v3538_v9 = vld [vmem:[%s5625_s1 + $0x274] sm:$0xf] }
  0x87   :  { %2070 = vmatpush.bf16.msra.mxu3 %v2435_v21  ;;  %v2403_v21 = vor.u32 %v3482_v10, %v2400_v11  ;;  %v2624_v10 = vld [vmem:[%s5625_s1 + $0x278] sm:$0xf0]  ;;  %v345_v11 = vunpack.c.l.b16 %v25_v63 }
  0x88   :  { %2032 = vmatpush.bf16.msra.mxu0 %v3383_v36  ;;  %v3351_v36 = vor.u32 %v3721_v16, %v3350_v15  ;;  %v2688_v15 = vld [vmem:[%s5625_s1 + $0x2f8] sm:$0xf0]  ;;  %v346_v16 = vunpack.c.h.b16 %v25_v63  ;;  %v2627_v26 = vor.u32 %v3538_v9, %v2624_v10  ;;  %v3500_v63 = vld [vmem:[%s5625_s1 + $0x144] sm:$0xf] }
  0x89   :  { %2045 = vmatpush.bf16.msra.mxu1 %v3447_v37  ;;  %v2293_v37 = vld [vmem:[%s5627_s3] sm:$0xf]  ;;  %v2608_v57 = vld [vmem:[%s5625_s1 + $0x258] sm:$0xf0] }
  0x8a   :  { %2058 = vmatpush.bf16.msra.mxu2 %v2363_v39  ;;  %v3415_v39 = vor.u32 %v3737_v24, %v3414_v17  ;;  %v2294_v47 = vunpack.c.l.bf16 %v2293_v37  ;;  %v4848_v37 = vpack.c.b16 %v345_v11, %v345_v11  ;;  %v4859_v45 = vpack.c.b16 %v346_v16, %v346_v16  ;;  %v2464_v10 = vld [vmem:[%s5625_s1 + $0x138] sm:$0xf0]  ;;  %v3514_v11 = vld [vmem:[%s5625_s1 + $0x1b4] sm:$0xf]  ;;  %v314_v16 = vld [vmem:[%s5628_s2] sm:$0x3] }
  0x8b   :  { %2071 = vmatpush.bf16.msra.mxu3 %v2427_v46  ;;  %v3406_v46 = vld [vmem:[%s5625_s1 + $0x890] sm:$0xf] }
  0x8c   :  { %2033 = vmatpush.bf16.msra.mxu0 %v3375_v52  ;;  %v3751_v52 = vmov 0   ;;  %v3407_v59 = vor.u32 %v3735_v49, %v3406_v46  ;;  %v3552_v46 = vld [vmem:[%s5625_s1 + $0x2e4] sm:$0xf] }
  0x8d   :  { %2046 = vmatpush.bf16.msra.mxu1 %v3439_v53  ;;  %3749 = vset.pattern.permute.xlu0 %v3751_v52  ;;  %v3478_v53 = vld [vmem:[%s5625_s1 + $0x94] sm:$0xf]  ;;  %v2480_v52 = vld [vmem:[%s5625_s1 + $0x158] sm:$0xf0] }
  0x8e   :  { %2059 = vmatpush.bf16.msra.mxu2 %v2355_v54  ;;  %v2384_v54 = vld [vmem:[%s5625_s1 + $0x98] sm:$0xf0]  ;;  %2297 = vperm.xlu0 %3749, %v2294_v47   ;;  %v2680_v47 = vld [vmem:[%s5625_s1 + $0x2e8] sm:$0xf0] }
  0x8f   :  { %2072 = vmatpush.bf16.msra.mxu3 %v2419_v58  ;;  %v3398_v58 = vld [vmem:[%s5625_s1 + $0x880] sm:$0xf] }
  0x90   :  { %2034 = vmatpush.bf16.msra.mxu0 %v3367_v0  ;;  %v2387_v0 = vor.u32 %v3478_v53, %v2384_v54  ;;  %v3518_v53 = vld [vmem:[%s5625_s1 + $0x1d4] sm:$0xf]  ;;  %v2683_v54 = vor.u32 %v3552_v46, %v2680_v47  ;;  %v3528_v46 = vld [vmem:[%s5625_s1 + $0x224] sm:$0xf]  ;;  %v2584_v47 = vld [vmem:[%s5625_s1 + $0x228] sm:$0xf0] }
  0x91   :  { %2047 = vmatpush.bf16.msra.mxu1 %v3431_v1  ;;  %v2312_v1 = vld [vmem:[%s5625_s1 + $0x8] sm:$0xf0] }
  0x92   :  { %2060 = vmatpush.bf16.msra.mxu2 %v2347_v2  ;;  %v3476_v2 = vld [vmem:[%s5625_s1 + $0x84] sm:$0xf] }
  0x93   :  { %2073 = vmatpush.bf16.msra.mxu3 %v2411_v6  ;;  %v3522_v6 = vld [vmem:[%s5625_s1 + $0x1f4] sm:$0xf]  ;;  %v2379_v17 = vor.u32 %v3476_v2, %v2376_v3  ;;  %v3532_v2 = vld [vmem:[%s5625_s1 + $0x244] sm:$0xf]  ;;  %v2600_v3 = vld [vmem:[%s5625_s1 + $0x248] sm:$0xf0] }
  0x94   :  { %2035 = vmatpush.bf16.msra.mxu0 %v3359_v12  ;;  %v3399_v12 = vor.u32 %v3733_v61, %v3398_v58  ;;  %v2563_v24 = vor.u32 %v3522_v6, %v2560_v8  ;;  %v3550_v58 = vld [vmem:[%s5625_s1 + $0x2d4] sm:$0xf]  ;;  %v2603_v9 = vor.u32 %v3532_v2, %v2600_v3  ;;  %v2440_v2 = vld [vmem:[%s5625_s1 + $0x108] sm:$0xf0] }
  0x95   :  { %2048 = vmatpush.bf16.msra.mxu1 %v3423_v13  ;;  %v2315_v13 = vor.u32 %v3460_v62, %v2312_v1  ;;  %v2611_v62 = vor.u32 %v3534_v56, %v2608_v57  ;;  %v3510_v56 = vld [vmem:[%s5625_s1 + $0x194] sm:$0xf] }
  0x96   :  { %2061 = vmatpush.bf16.msra.mxu2 %v2339_v14  ;;  %v3554_v14 = vld [vmem:[%s5625_s1 + $0x2f4] sm:$0xf] }
  0x97   :  { %2074 = vmatpush.bf16.msra.mxu3 %v2403_v21  ;;  %v2499_v21 = vor.u32 %v3506_v4, %v2496_v5  ;;  %v3548_v4 = vld [vmem:[%s5625_s1 + $0x2c4] sm:$0xf]  ;;  %v2664_v5 = vld [vmem:[%s5625_s1 + $0x2c8] sm:$0xf0] }
  0x98   :  { %2036 = vmatpush.bf16.msra.mxu0 %v3351_v36  ;;  %v2691_v36 = vor.u32 %v3554_v14, %v2688_v15  ;;  %v3530_v14 = vld [vmem:[%s5625_s1 + $0x234] sm:$0xf]  ;;  %v2592_v15 = vld [vmem:[%s5625_s1 + $0x238] sm:$0xf0] }
  0x99   :  { %2049 = vmatpush.bf16.msra.mxu1 %v3415_v39  ;;  %v2552_v39 = vld [vmem:[%s5625_s1 + $0x1e8] sm:$0xf0] }
  0x9a   :  { %2062 = vmatpush.bf16.msra.mxu2 %v2331_v40  ;;  %v3536_v40 = vld [vmem:[%s5625_s1 + $0x264] sm:$0xf]  ;;  %v2555_v49 = vor.u32 %v3520_v34, %v2552_v39  ;;  %v2456_v34 = vld [vmem:[%s5625_s1 + $0x128] sm:$0xf0]  ;;  %v316_v39 = vperm.slane %v314_v16, 0 }
  0x9b   :  { %2075 = vmatpush.bf16.msra.mxu3 %v2395_v48  ;;  %v2491_v48 = vor.u32 %v3504_v27, %v2488_v32  ;;  %v2619_v50 = vor.u32 %v3536_v40, %v2616_v43  ;;  %v2595_v32 = vor.u32 %v3530_v14, %v2592_v15  ;;  %v2520_v43 = vld [vmem:[%s5625_s1 + $0x1a8] sm:$0xf0]  ;;  %v3570_v15 = vld [vmem:[%s5625_s1 + $0x374] sm:$0xf]  ;;  %v2752_v16 = vld [vmem:[%s5625_s1 + $0x378] sm:$0xf0] }
  0x9c   :  { %2037 = vmatpush.bf16.msra.mxu0 %v3343_v55  ;;  %v2544_v55 = vld [vmem:[%s5625_s1 + $0x1d8] sm:$0xf0] }
  0x9d   :  { %2050 = vmatpush.bf16.msra.mxu1 %v3407_v59  ;;  %v2672_v59 = vld [vmem:[%s5625_s1 + $0x2d8] sm:$0xf0]  ;;  %v2547_v61 = vor.u32 %v3518_v53, %v2544_v55  ;;  %v2587_v53 = vor.u32 %v3528_v46, %v2584_v47 }
  0x9e   :  { %2063 = vmatpush.bf16.msra.mxu2 %v2323_v60  ;;  %v2483_v60 = vor.u32 %v3502_v51, %v2480_v52  ;;  %v2675_v1 = vor.u32 %v3550_v58, %v2672_v59  ;;  %v2448_v55 = vld [vmem:[%s5625_s1 + $0x118] sm:$0xf0] }
  0x9f   :  { %2076 = vmatpush.bf16.msra.mxu3 %v2387_v0  ;;  %v2472_v0 = vld [vmem:[%s5625_s1 + $0x148] sm:$0xf0] }
  0xa0   :  { %2038 = vmatpush.bf16.msra.mxu0 %v3335_v7  ;;  %v2475_v6 = vor.u32 %v3500_v63, %v2472_v0  ;;  %v3498_v7 = vld [vmem:[%s5625_s1 + $0x134] sm:$0xf]  ;;  %v1832_v51 = vpop.f32.mrf.mxu0  ;;  %v2640_v0 = vld [vmem:[%s5625_s1 + $0x298] sm:$0xf0] }
  0xa1   :  { %2051 = vmatpush.bf16.msra.mxu1 %v3399_v12  ;;  %v2528_v12 = vld [vmem:[%s5625_s1 + $0x1b8] sm:$0xf0]  ;;  %v1833_v57 = vadd.f32 %v1832_v51, %v316_v39  ;;  %v1845_v58 = vpop.f32.mrf.mxu1  ;;  %v3542_v63 = vld [vmem:[%s5625_s1 + $0x294] sm:$0xf]  ;;  %v3568_v51 = vld [vmem:[%s5625_s1 + $0x364] sm:$0xf] }
  0xa2   :  { %2064 = vmatpush.bf16.msra.mxu2 %v2315_v13  ;;  %v2667_v13 = vor.u32 %v3548_v4, %v2664_v5  ;;  %v2531_v27 = vor.u32 %v3514_v11, %v2528_v12  ;;  %v3508_v5 = vld [vmem:[%s5625_s1 + $0x184] sm:$0xf]  ;;  %v2632_v12 = vld [vmem:[%s5625_s1 + $0x288] sm:$0xf0] }
  0xa3   :  { %2077 = vmatpush.bf16.msra.mxu3 %v2379_v17  ;;  %2039 = vmatmul.bf16.vlgmr.msra.gmra.mxu0 %v4848_v37  ;;  %v3546_v17 = vld [vmem:[%s5625_s1 + $0x2b4] sm:$0xf]  ;;  %v3540_v11 = vld [vmem:[%s5625_s1 + $0x284] sm:$0xf] }
  0xa4   :  { %2083 = vmatpush.bf16.msrb.mxu0 %v2499_v21  ;;  %2052 = vmatmul.bf16.vlgmr.msra.gmra.mxu1 %v4859_v45  ;;  %v2656_v21 = vld [vmem:[%s5625_s1 + $0x2b8] sm:$0xf0]  ;;  %v2635_v47 = vor.u32 %v3540_v11, %v2632_v12  ;;  %v2728_v11 = vld [vmem:[%s5625_s1 + $0x348] sm:$0xf0]  ;;  %v3596_v12 = vld [vmem:[%s5625_s1 + $0x444] sm:$0xf] }
  0xa5   :  { %2096 = vmatpush.bf16.msrb.mxu1 %v2563_v24  ;;  %2065 = vmatmul.bf16.vlgmr.msra.gmra.mxu2 %v4073_v19  ;;  %v3516_v19 = vld [vmem:[%s5625_s1 + $0x1c4] sm:$0xf]  ;;  %v2467_v24 = vor.u32 %v3498_v7, %v2464_v10  ;;  %v2659_v40 = vor.u32 %v3546_v17, %v2656_v21  ;;  %v2568_v10 = vld [vmem:[%s5625_s1 + $0x208] sm:$0xf0]  ;;  %v3586_v17 = vld [vmem:[%s5625_s1 + $0x3f4] sm:$0xf] }
  0xa6   :  { %2109 = vmatpush.bf16.msrb.mxu2 %v2627_v26  ;;  %2078 = vmatmul.bf16.vlgmr.msra.gmra.mxu3 %v4077_v22  ;;  %v2536_v22 = vld [vmem:[%s5625_s1 + $0x1c8] sm:$0xf0]  ;;  %v3496_v26 = vld [vmem:[%s5625_s1 + $0x124] sm:$0xf] }
  0xa7   :  { %2122 = vmatpush.bf16.msrb.mxu3 %v2691_v36  ;;  %v2539_v8 = vor.u32 %v3516_v19, %v2536_v22  ;;  %v3512_v36 = vld [vmem:[%s5625_s1 + $0x1a4] sm:$0xf]  ;;  %v1846_v19 = vadd.f32 %v1845_v58, %v1833_v57  ;;  %v2872_v57 = vld [vmem:[%s5625_s1 + $0x468] sm:$0xf0] }
  0xa8   :  { %2084 = vmatpush.bf16.msrb.mxu0 %v2491_v48  ;;  %v3544_v48 = vld [vmem:[%s5625_s1 + $0x2a4] sm:$0xf]  ;;  %v2523_v52 = vor.u32 %v3512_v36, %v2520_v43  ;;  %v2944_v43 = vld [vmem:[%s5625_s1 + $0x4f8] sm:$0xf0] }
  0xa9   :  { %2097 = vmatpush.bf16.msrb.mxu1 %v2555_v49  ;;  %v2648_v49 = vld [vmem:[%s5625_s1 + $0x2a8] sm:$0xf0]  ;;  %v3492_v22 = vld [vmem:[%s5625_s1 + $0x104] sm:$0xf]  ;;  %v1871_v14 = vpop.f32.mrf.mxu3  ;;  %v1847_v46 = vpop.f32.mrf.mxu1 }
  0xaa   :  { %2110 = vmatpush.bf16.msrb.mxu2 %v2619_v50  ;;  %v2459_v50 = vor.u32 %v3496_v26, %v2456_v34  ;;  %v2651_v59 = vor.u32 %v3544_v48, %v2648_v49  ;;  %v3524_v7 = vld [vmem:[%s5625_s1 + $0x204] sm:$0xf]  ;;  %v2443_v21 = vor.u32 %v3492_v22, %v2440_v2  ;;  %v3602_v26 = vld [vmem:[%s5625_s1 + $0x474] sm:$0xf]  ;;  %v1834_v34 = vpop.f32.mrf.mxu0  ;;  %v2755_v48 = vor.u32 %v3570_v15, %v2752_v16  ;;  %v2920_v15 = vld [vmem:[%s5625_s1 + $0x4c8] sm:$0xf0] }
  0xab   :  { %2123 = vmatpush.bf16.msrb.mxu3 %v2683_v54  ;;  %v3494_v54 = vld [vmem:[%s5625_s1 + $0x114] sm:$0xf]  ;;  %v2571_v39 = vor.u32 %v3524_v7, %v2568_v10  ;;  %v3616_v58 = vld [vmem:[%s5625_s1 + $0x4e4] sm:$0xf] }
  0xac   :  { %2085 = vmatpush.bf16.msrb.mxu0 %v2483_v60  ;;  %v2512_v60 = vld [vmem:[%s5625_s1 + $0x198] sm:$0xf0]  ;;  %v3582_v22 = vld [vmem:[%s5625_s1 + $0x3d4] sm:$0xf]  ;;  %v3564_v10 = vld [vmem:[%s5625_s1 + $0x344] sm:$0xf] }
  0xad   :  { %2098 = vmatpush.bf16.msrb.mxu1 %v2547_v61  ;;  %v3526_v61 = vld [vmem:[%s5625_s1 + $0x214] sm:$0xf]  ;;  %v2515_v3 = vor.u32 %v3510_v56, %v2512_v60  ;;  %v3600_v56 = vld [vmem:[%s5625_s1 + $0x464] sm:$0xf]  ;;  %v2731_v16 = vor.u32 %v3564_v10, %v2728_v11  ;;  %v2832_v10 = vld [vmem:[%s5625_s1 + $0x418] sm:$0xf0] }
  0xae   :  { %2111 = vmatpush.bf16.msrb.mxu2 %v2611_v62  ;;  %v2576_v62 = vld [vmem:[%s5625_s1 + $0x218] sm:$0xf0]  ;;  %v3578_v34 = vld [vmem:[%s5625_s1 + $0x3b4] sm:$0xf] }
  0xaf   :  { %2124 = vmatpush.bf16.msrb.mxu3 %v2675_v1  ;;  %v2451_v1 = vor.u32 %v3494_v54, %v2448_v55  ;;  %v2579_v4 = vor.u32 %v3526_v61, %v2576_v62  ;;  %v2808_v55 = vld [vmem:[%s5625_s1 + $0x3e8] sm:$0xf0]  ;;  %v3594_v46 = vld [vmem:[%s5625_s1 + $0x434] sm:$0xf] }
  0xb0   :  { %2086 = vmatpush.bf16.msrb.mxu0 %v2475_v6  ;;  %v2504_v6 = vld [vmem:[%s5625_s1 + $0x188] sm:$0xf0]  ;;  %v3606_v11 = vld [vmem:[%s5625_s1 + $0x494] sm:$0xf] }
  0xb1   :  { %2099 = vmatpush.bf16.msrb.mxu1 %v2539_v8  ;;  %v1858_v8 = vpop.f32.mrf.mxu2  ;;  %v2507_v36 = vor.u32 %v3508_v5, %v2504_v6  ;;  %v1873_v62 = vpop.f32.mrf.mxu3  ;;  %v2864_v5 = vld [vmem:[%s5625_s1 + $0x458] sm:$0xf0]  ;;  %v3614_v6 = vld [vmem:[%s5625_s1 + $0x4d4] sm:$0xf] }
  0xb2   :  { %2112 = vmatpush.bf16.msrb.mxu2 %v2603_v9  ;;  %v2643_v9 = vor.u32 %v3542_v63, %v2640_v0  ;;  %v2875_v0 = vor.u32 %v3600_v56, %v2872_v57 }
  0xb3   :  { %2125 = vmatpush.bf16.msrb.mxu3 %v2667_v13  ;;  %v1859_v13 = vadd.f32 %v1858_v8, %v1846_v19  ;;  %v3566_v19 = vld [vmem:[%s5625_s1 + $0x354] sm:$0xf] }
  0xb4   :  { %2087 = vmatpush.bf16.msrb.mxu0 %v2467_v24  ;;  %v2816_v24 = vld [vmem:[%s5625_s1 + $0x3f8] sm:$0xf0] }
  0xb5   :  { %2100 = vmatpush.bf16.msrb.mxu1 %v2531_v27  ;;  %v2880_v27 = vld [vmem:[%s5625_s1 + $0x478] sm:$0xf0]  ;;  %v2819_v49 = vor.u32 %v3586_v17, %v2816_v24 }
  0xb6   :  { %2113 = vmatpush.bf16.msrb.mxu2 %v2595_v32  ;;  %v5036_v32 = vadd.f32 %v1871_v14, %v1859_v13  ;;  %v2856_v13 = vld [vmem:[%s5625_s1 + $0x448] sm:$0xf0]  ;;  %v3612_v14 = vld [vmem:[%s5625_s1 + $0x4c4] sm:$0xf] }
  0xb7   :  { %2126 = vmatpush.bf16.msrb.mxu3 %v2659_v40  ;;  %v3618_v40 = vld [vmem:[%s5625_s1 + $0x4f4] sm:$0xf]  ;;  %v2859_v24 = vor.u32 %v3596_v12, %v2856_v13  ;;  %v2696_v12 = vld [vmem:[%s5625_s1 + $0x308] sm:$0xf0] }
  0xb8   :  { %2088 = vmatpush.bf16.msrb.mxu0 %v2459_v50  ;;  %v2883_v50 = vor.u32 %v3602_v26, %v2880_v27  ;;  %v2947_v54 = vor.u32 %v3618_v40, %v2944_v43  ;;  %v3562_v26 = vld [vmem:[%s5625_s1 + $0x334] sm:$0xf]  ;;  %v2720_v27 = vld [vmem:[%s5625_s1 + $0x338] sm:$0xf0]  ;;  %v2923_v40 = vor.u32 %v3612_v14, %v2920_v15  ;;  %v3572_v15 = vld [vmem:[%s5625_s1 + $0x384] sm:$0xf] }
  0xb9   :  { %2101 = vmatpush.bf16.msrb.mxu1 %v2523_v52  ;;  %v2744_v52 = vld [vmem:[%s5625_s1 + $0x368] sm:$0xf0]  ;;  %v1860_v60 = vpop.f32.mrf.mxu2  ;;  %v2784_v43 = vld [vmem:[%s5625_s1 + $0x3b8] sm:$0xf0] }
  0xba   :  { %2114 = vmatpush.bf16.msrb.mxu2 %v2587_v53  ;;  %v3584_v53 = vld [vmem:[%s5625_s1 + $0x3e4] sm:$0xf]  ;;  %v2747_v61 = vor.u32 %v3568_v51, %v2744_v52  ;;  %v2787_v51 = vor.u32 %v3578_v34, %v2784_v43  ;;  %v2840_v60 = vld [vmem:[%s5625_s1 + $0x428] sm:$0xf0]  ;;  %v3650_v43 = vld [vmem:[%s5625_s1 + $0x5f4] sm:$0xf] }
  0xbb   :  { %2127 = vmatpush.bf16.msrb.mxu3 %v2651_v59  ;;  %v2936_v59 = vld [vmem:[%s5625_s1 + $0x4e8] sm:$0xf0]  ;;  %v2811_v63 = vor.u32 %v3584_v53, %v2808_v55  ;;  %v3560_v53 = vld [vmem:[%s5625_s1 + $0x324] sm:$0xf] }
  0xbc   :  { %2089 = vmatpush.bf16.msrb.mxu0 %v2451_v1  ;;  %v2736_v1 = vld [vmem:[%s5625_s1 + $0x358] sm:$0xf0]  ;;  %v2939_v2 = vor.u32 %v3616_v58, %v2936_v59  ;;  %v3576_v55 = vld [vmem:[%s5625_s1 + $0x3a4] sm:$0xf]  ;;  %v2776_v58 = vld [vmem:[%s5625_s1 + $0x3a8] sm:$0xf0] }
  0xbd   :  { %2102 = vmatpush.bf16.msrb.mxu1 %v2515_v3  ;;  %v2800_v3 = vld [vmem:[%s5625_s1 + $0x3d8] sm:$0xf0]  ;;  %v2739_v7 = vor.u32 %v3566_v19, %v2736_v1  ;;  %v3592_v59 = vld [vmem:[%s5625_s1 + $0x424] sm:$0xf]  ;;  %v2888_v34 = vld [vmem:[%s5625_s1 + $0x488] sm:$0xf0] }
  0xbe   :  { %2115 = vmatpush.bf16.msrb.mxu2 %v2579_v4  ;;  %v3598_v4 = vld [vmem:[%s5625_s1 + $0x454] sm:$0xf]  ;;  %v2803_v8 = vor.u32 %v3582_v22, %v2800_v3  ;;  %v2843_v3 = vor.u32 %v3592_v59, %v2840_v60  ;;  %v3648_v59 = vld [vmem:[%s5625_s1 + $0x5e4] sm:$0xf] }
  0xbf   :  { %2128 = vmatpush.bf16.msrb.mxu3 %v2643_v9  ;;  %v2867_v9 = vor.u32 %v3598_v4, %v2864_v5  ;;  %v3558_v4 = vld [vmem:[%s5625_s1 + $0x314] sm:$0xf]  ;;  %v2704_v5 = vld [vmem:[%s5625_s1 + $0x318] sm:$0xf0] }
  0xc0   :  { %2090 = vmatpush.bf16.msrb.mxu0 %v2443_v21  ;;  %v1884_v17 = vpop.f32.mrf.mxu0 }
  0xc1   :  { %2103 = vmatpush.bf16.msrb.mxu1 %v2507_v36  ;;  %v1885_v36 = vadd.f32 %v1884_v17, %v5036_v32  ;;  %v2912_v32 = vld [vmem:[%s5625_s1 + $0x4b8] sm:$0xf0]  ;;  %v3588_v17 = vld [vmem:[%s5625_s1 + $0x404] sm:$0xf] }
  0xc2   :  { %2116 = vmatpush.bf16.msrb.mxu2 %v2571_v39  ;;  %v1897_v39 = vpop.f32.mrf.mxu1 }
  0xc3   :  { %2129 = vmatpush.bf16.msrb.mxu3 %v2635_v47  ;;  %2091 = vmatmul.bf16.vlgmr.msrb.gmra.mxu0 %v4071_v18  ;;  %v3580_v18 = vld [vmem:[%s5625_s1 + $0x3c4] sm:$0xf]  ;;  %v2848_v47 = vld [vmem:[%s5625_s1 + $0x438] sm:$0xf0] }
  0xc4   :  { %2135 = vmatpush.bf16.msra.mxu0 %v2755_v48  ;;  %2104 = vmatmul.bf16.vlgmr.msrb.gmra.mxu1 %v4075_v20  ;;  %v2792_v20 = vld [vmem:[%s5625_s1 + $0x3c8] sm:$0xf0]  ;;  %v3610_v48 = vld [vmem:[%s5625_s1 + $0x4b4] sm:$0xf]  ;;  %v2851_v52 = vor.u32 %v3594_v46, %v2848_v47  ;;  %v3072_v47 = vld [vmem:[%s5625_s1 + $0x5f8] sm:$0xf0] }
  0xc5   :  { %2148 = vmatpush.bf16.msra.mxu1 %v2819_v49  ;;  %2117 = vmatmul.bf16.vlgmr.msrb.gmra.mxu2 %v4235_v41  ;;  %v2928_v41 = vld [vmem:[%s5625_s1 + $0x4d8] sm:$0xf0]  ;;  %v2795_v21 = vor.u32 %v3580_v18, %v2792_v20  ;;  %v1898_v49 = vadd.f32 %v1897_v39, %v1885_v36  ;;  %v2915_v57 = vor.u32 %v3610_v48, %v2912_v32  ;;  %v3556_v20 = vld [vmem:[%s5625_s1 + $0x304] sm:$0xf]  ;;  %v3634_v39 = vld [vmem:[%s5625_s1 + $0x574] sm:$0xf] }
  0xc6   :  { %2161 = vmatpush.bf16.msra.mxu2 %v2883_v50  ;;  %2130 = vmatmul.bf16.vlgmr.msrb.gmra.mxu3 %v4239_v44  ;;  %v2931_v44 = vor.u32 %v3614_v6, %v2928_v41  ;;  %v2723_v50 = vor.u32 %v3562_v26, %v2720_v27  ;;  %v3574_v6 = vld [vmem:[%s5625_s1 + $0x394] sm:$0xf]  ;;  %v2896_v18 = vld [vmem:[%s5625_s1 + $0x498] sm:$0xf0]  ;;  %v2824_v26 = vld [vmem:[%s5625_s1 + $0x408] sm:$0xf0]  ;;  %v2699_v46 = vor.u32 %v3556_v20, %v2696_v12 }
  0xc7   :  { %2174 = vmatpush.bf16.msra.mxu3 %v2947_v54  ;;  %v2712_v54 = vld [vmem:[%s5625_s1 + $0x328] sm:$0xf0]  ;;  %v3604_v27 = vld [vmem:[%s5625_s1 + $0x484] sm:$0xf]  ;;  %v3666_v48 = vld [vmem:[%s5625_s1 + $0x674] sm:$0xf] }
  0xc8   :  { %2136 = vmatpush.bf16.msra.mxu0 %v2747_v61  ;;  %v1910_v56 = vpop.f32.mrf.mxu2  ;;  %v2715_v19 = vor.u32 %v3560_v53, %v2712_v54  ;;  %v1886_v22 = vpop.f32.mrf.mxu0  ;;  %v3136_v32 = vld [vmem:[%s5625_s1 + $0x678] sm:$0xf0]  ;;  %v2891_v53 = vor.u32 %v3604_v27, %v2888_v34  ;;  %v3644_v20 = vld [vmem:[%s5625_s1 + $0x5c4] sm:$0xf]  ;;  %v3048_v12 = vld [vmem:[%s5625_s1 + $0x5c8] sm:$0xf0] }
  0xc9   :  { %2149 = vmatpush.bf16.msra.mxu1 %v2811_v63  ;;  %v1911_v61 = vadd.f32 %v1910_v56, %v1898_v49  ;;  %v1923_v62 = vpop.f32.mrf.mxu3  ;;  %v3608_v63 = vld [vmem:[%s5625_s1 + $0x4a4] sm:$0xf]  ;;  %v3139_v56 = vor.u32 %v3666_v48, %v3136_v32  ;;  %v3051_v27 = vor.u32 %v3644_v20, %v3048_v12  ;;  %v3104_v48 = vld [vmem:[%s5625_s1 + $0x638] sm:$0xf0]  ;;  %v3674_v32 = vld [vmem:[%s5625_s1 + $0x6b4] sm:$0xf] }
  0xca   :  { %2162 = vmatpush.bf16.msra.mxu2 %v2875_v0  ;;  %v2904_v0 = vld [vmem:[%s5625_s1 + $0x4a8] sm:$0xf0]  ;;  %v1899_v41 = vpop.f32.mrf.mxu1  ;;  %v3636_v12 = vld [vmem:[%s5625_s1 + $0x584] sm:$0xf] }
  0xcb   :  { %2175 = vmatpush.bf16.msra.mxu3 %v2939_v2  ;;  %v5169_v1 = vadd.f32 %v1923_v62, %v1911_v61  ;;  %v2779_v2 = vor.u32 %v3576_v55, %v2776_v58  ;;  %v3075_v55 = vor.u32 %v3650_v43, %v3072_v47  ;;  %v3000_v58 = vld [vmem:[%s5625_s1 + $0x568] sm:$0xf0]  ;;  %v3664_v62 = vld [vmem:[%s5625_s1 + $0x664] sm:$0xf]  ;;  %v3658_v47 = vld [vmem:[%s5625_s1 + $0x634] sm:$0xf] }
  0xcc   :  { %2137 = vmatpush.bf16.msra.mxu0 %v2739_v7  ;;  %v2907_v7 = vor.u32 %v3608_v63, %v2904_v0  ;;  %v3064_v61 = vld [vmem:[%s5625_s1 + $0x5e8] sm:$0xf0]  ;;  %v3680_v0 = vld [vmem:[%s5625_s1 + $0x6e4] sm:$0xf] }
  0xcd   :  { %2150 = vmatpush.bf16.msra.mxu1 %v2803_v8  ;;  %v2768_v8 = vld [vmem:[%s5625_s1 + $0x398] sm:$0xf0]  ;;  %v3128_v63 = vld [vmem:[%s5625_s1 + $0x668] sm:$0xf0] }
  0xce   :  { %2163 = vmatpush.bf16.msra.mxu2 %v2867_v9  ;;  %v3590_v9 = vld [vmem:[%s5625_s1 + $0x414] sm:$0xf]  ;;  %v2771_v13 = vor.u32 %v3574_v6, %v2768_v8 }
  0xcf   :  { %2176 = vmatpush.bf16.msra.mxu3 %v2931_v44  ;;  %v2707_v44 = vor.u32 %v3558_v4, %v2704_v5  ;;  %v2835_v14 = vor.u32 %v3590_v9, %v2832_v10  ;;  %v3630_v4 = vld [vmem:[%s5625_s1 + $0x554] sm:$0xf]  ;;  %v2992_v5 = vld [vmem:[%s5625_s1 + $0x558] sm:$0xf0] }
  0xd0   :  { %2138 = vmatpush.bf16.msra.mxu0 %v2731_v16  ;;  %v2760_v16 = vld [vmem:[%s5625_s1 + $0x388] sm:$0xf0]  ;;  %v3646_v6 = vld [vmem:[%s5625_s1 + $0x5d4] sm:$0xf]  ;;  %v3120_v9 = vld [vmem:[%s5625_s1 + $0x658] sm:$0xf0] }
  0xd1   :  { %2151 = vmatpush.bf16.msra.mxu1 %v2795_v21  ;;  %v1912_v21 = vpop.f32.mrf.mxu2  ;;  %v1925_v36 = vpop.f32.mrf.mxu3  ;;  %v2763_v49 = vor.u32 %v3572_v15, %v2760_v16  ;;  %v3662_v8 = vld [vmem:[%s5625_s1 + $0x654] sm:$0xf]  ;;  %v3184_v10 = vld [vmem:[%s5625_s1 + $0x6d8] sm:$0xf0]  ;;  %v3676_v16 = vld [vmem:[%s5625_s1 + $0x6c4] sm:$0xf] }
  0xd2   :  { %2164 = vmatpush.bf16.msra.mxu2 %v2859_v24  ;;  %v2899_v24 = vor.u32 %v3606_v11, %v2896_v18  ;;  %v2995_v11 = vor.u32 %v3630_v4, %v2992_v5  ;;  %v3626_v36 = vld [vmem:[%s5625_s1 + $0x534] sm:$0xf] }
  0xd3   :  { %2177 = vmatpush.bf16.msra.mxu3 %v2923_v40  ;;  %v3008_v40 = vld [vmem:[%s5625_s1 + $0x578] sm:$0xf0] }
  0xd4   :  { %2139 = vmatpush.bf16.msra.mxu0 %v2723_v50  ;;  %v2827_v50 = vor.u32 %v3588_v17, %v2824_v26  ;;  %v3011_v54 = vor.u32 %v3634_v39, %v3008_v40  ;;  %v3176_v17 = vld [vmem:[%s5625_s1 + $0x6c8] sm:$0xf0]  ;;  %v2976_v39 = vld [vmem:[%s5625_s1 + $0x538] sm:$0xf0]  ;;  %v3642_v40 = vld [vmem:[%s5625_s1 + $0x5b4] sm:$0xf] }
  0xd5   :  { %2152 = vmatpush.bf16.msra.mxu1 %v2787_v51  ;;  %v3682_v51 = vld [vmem:[%s5625_s1 + $0x6f4] sm:$0xf] }
  0xd6   :  { %2165 = vmatpush.bf16.msra.mxu2 %v2851_v52  ;;  %v3200_v52 = vld [vmem:[%s5625_s1 + $0x6f8] sm:$0xf0] }
  0xd7   :  { %2178 = vmatpush.bf16.msra.mxu3 %v2915_v57  ;;  %v3632_v57 = vld [vmem:[%s5625_s1 + $0x564] sm:$0xf]  ;;  %v3203_v60 = vor.u32 %v3682_v51, %v3200_v52  ;;  %v3107_v52 = vor.u32 %v3658_v47, %v3104_v48  ;;  %v3746_v48 = vld [vmem:[%s5625_s1 + $0x8f4] sm:$0xf] }
  0xd8   :  { %2140 = vmatpush.bf16.msra.mxu0 %v2715_v19  ;;  %v3192_v19 = vld [vmem:[%s5625_s1 + $0x6e8] sm:$0xf0]  ;;  %v3003_v22 = vor.u32 %v3632_v57, %v3000_v58 }
  0xd9   :  { %2153 = vmatpush.bf16.msra.mxu1 %v2779_v2  ;;  %v3067_v2 = vor.u32 %v3648_v59, %v3064_v61  ;;  %v3195_v41 = vor.u32 %v3680_v0, %v3192_v19  ;;  %v3032_v58 = vld [vmem:[%s5625_s1 + $0x5a8] sm:$0xf0]  ;;  %v3656_v59 = vld [vmem:[%s5625_s1 + $0x624] sm:$0xf] }
  0xda   :  { %2166 = vmatpush.bf16.msra.mxu2 %v2843_v3  ;;  %v3131_v3 = vor.u32 %v3664_v62, %v3128_v63  ;;  %v3672_v63 = vld [vmem:[%s5625_s1 + $0x6a4] sm:$0xf]  ;;  %v3160_v0 = vld [vmem:[%s5625_s1 + $0x6a8] sm:$0xf0] }
  0xdb   :  { %2179 = vmatpush.bf16.msra.mxu3 %v2907_v7  ;;  %v3056_v7 = vld [vmem:[%s5625_s1 + $0x5d8] sm:$0xf0] }
  0xdc   :  { %2141 = vmatpush.bf16.msra.mxu0 %v2707_v44  ;;  %v3059_v18 = vor.u32 %v3646_v6, %v3056_v7  ;;  %v3123_v44 = vor.u32 %v3662_v8, %v3120_v9  ;;  %v3622_v6 = vld [vmem:[%s5625_s1 + $0x514] sm:$0xf]  ;;  %v3163_v8 = vor.u32 %v3672_v63, %v3160_v0  ;;  %v3024_v9 = vld [vmem:[%s5625_s1 + $0x598] sm:$0xf0] }
  0xdd   :  { %2154 = vmatpush.bf16.msra.mxu1 %v2771_v13  ;;  %v3660_v13 = vld [vmem:[%s5625_s1 + $0x644] sm:$0xf]  ;;  %v3638_v7 = vld [vmem:[%s5625_s1 + $0x594] sm:$0xf] }
  0xde   :  { %2167 = vmatpush.bf16.msra.mxu2 %v2835_v14  ;;  %v3112_v14 = vld [vmem:[%s5625_s1 + $0x648] sm:$0xf0]  ;;  %v3027_v20 = vor.u32 %v3638_v7, %v3024_v9  ;;  %v3440_v7 = vld [vmem:[%s5625_s1 + $0x8d8] sm:$0xf0] }
  0xdf   :  { %2180 = vmatpush.bf16.msra.mxu3 %v2899_v24  ;;  %v3115_v34 = vor.u32 %v3660_v13, %v3112_v14  ;;  %v3016_v13 = vld [vmem:[%s5625_s1 + $0x588] sm:$0xf0]  ;;  %v3652_v14 = vld [vmem:[%s5625_s1 + $0x604] sm:$0xf] }
  0xe0   :  { %2142 = vmatpush.bf16.msra.mxu0 %v2699_v46  ;;  %v1936_v15 = vpop.f32.mrf.mxu0  ;;  %v3040_v46 = vld [vmem:[%s5625_s1 + $0x5b8] sm:$0xf0] }
  0xe1   :  { %2155 = vmatpush.bf16.msra.mxu1 %v2763_v49  ;;  %v1937_v21 = vadd.f32 %v1936_v15, %v5169_v1  ;;  %v1949_v26 = vpop.f32.mrf.mxu1  ;;  %v3179_v1 = vor.u32 %v3676_v16, %v3176_v17  ;;  %v3168_v49 = vld [vmem:[%s5625_s1 + $0x6b8] sm:$0xf0]  ;;  %v3043_v51 = vor.u32 %v3642_v40, %v3040_v46  ;;  %v3080_v16 = vld [vmem:[%s5625_s1 + $0x608] sm:$0xf0]  ;;  %v3668_v17 = vld [vmem:[%s5625_s1 + $0x684] sm:$0xf]  ;;  %v3019_v46 = vor.u32 %v3636_v12, %v3016_v13 }
  0xe2   :  { %2168 = vmatpush.bf16.msra.mxu2 %v2827_v50  ;;  %v2979_v50 = vor.u32 %v3626_v36, %v2976_v39  ;;  %v3328_v40 = vld [vmem:[%s5625_s1 + $0x7f8] sm:$0xf0]  ;;  %v3083_v47 = vor.u32 %v3652_v14, %v3080_v16  ;;  %v3690_v16 = vld [vmem:[%s5625_s1 + $0x734] sm:$0xf] }
  0xe3   :  { %2181 = vmatpush.bf16.msra.mxu3 %v2891_v53  ;;  %2143 = vmatmul.bf16.vlgmr.msra.gmra.mxu0 %v4227_v38  ;;  %v3678_v38 = vld [vmem:[%s5625_s1 + $0x6d4] sm:$0xf]  ;;  %v1950_v43 = vadd.f32 %v1949_v26, %v1937_v21  ;;  %v3624_v53 = vld [vmem:[%s5625_s1 + $0x524] sm:$0xf]  ;;  %v3144_v21 = vld [vmem:[%s5625_s1 + $0x688] sm:$0xf0] }
  0xe4   :  { %2187 = vmatpush.bf16.msrb.mxu0 %v3011_v54  ;;  %2156 = vmatmul.bf16.vlgmr.msra.gmra.mxu1 %v4237_v42  ;;  %v3628_v42 = vld [vmem:[%s5625_s1 + $0x544] sm:$0xf]  ;;  %v2968_v54 = vld [vmem:[%s5625_s1 + $0x528] sm:$0xf0]  ;;  %v3698_v26 = vld [vmem:[%s5625_s1 + $0x774] sm:$0xf] }
  0xe5   :  { %2200 = vmatpush.bf16.msrb.mxu1 %v3075_v55  ;;  %2169 = vmatmul.bf16.vlgmr.msra.gmra.mxu2 %v4428_v25  ;;  %v2984_v25 = vld [vmem:[%s5625_s1 + $0x548] sm:$0xf0]  ;;  %v3640_v55 = vld [vmem:[%s5625_s1 + $0x5a4] sm:$0xf] }
  0xe6   :  { %2213 = vmatpush.bf16.msrb.mxu2 %v3139_v56  ;;  %2182 = vmatmul.bf16.vlgmr.msra.gmra.mxu3 %v4441_v30  ;;  %v3187_v30 = vor.u32 %v3678_v38, %v3184_v10  ;;  %v2987_v24 = vor.u32 %v3628_v42, %v2984_v25  ;;  %v3171_v56 = vor.u32 %v3674_v32, %v3168_v49  ;;  %v3654_v38 = vld [vmem:[%s5625_s1 + $0x614] sm:$0xf]  ;;  %v3088_v10 = vld [vmem:[%s5625_s1 + $0x618] sm:$0xf0]  ;;  %v3620_v42 = vld [vmem:[%s5625_s1 + $0x504] sm:$0xf] }
  0xe7   :  { %2226 = vmatpush.bf16.msrb.mxu3 %v3203_v60  ;;  %v3096_v60 = vld [vmem:[%s5625_s1 + $0x628] sm:$0xf0]  ;;  %v3035_v4 = vor.u32 %v3640_v55, %v3032_v58  ;;  %v3456_v32 = vld [vmem:[%s5625_s1 + $0x8f8] sm:$0xf0]  ;;  %v3147_v49 = vor.u32 %v3668_v17, %v3144_v21  ;;  %v3712_v55 = vld [vmem:[%s5625_s1 + $0x7e4] sm:$0xf] }
  0xe8   :  { %2188 = vmatpush.bf16.msrb.mxu0 %v3003_v22  ;;  %v1962_v57 = vpop.f32.mrf.mxu2  ;;  %v1938_v19 = vpop.f32.mrf.mxu0  ;;  %v2971_v22 = vor.u32 %v3624_v53, %v2968_v54  ;;  %v3099_v5 = vor.u32 %v3656_v59, %v3096_v60  ;;  %v2952_v25 = vld [vmem:[%s5625_s1 + $0x508] sm:$0xf0]  ;;  %v3696_v53 = vld [vmem:[%s5625_s1 + $0x764] sm:$0xf]  ;;  %v3232_v17 = vld [vmem:[%s5625_s1 + $0x738] sm:$0xf0] }
  0xe9   :  { %2201 = vmatpush.bf16.msrb.mxu1 %v3067_v2  ;;  %v1963_v61 = vadd.f32 %v1962_v57, %v1950_v43  ;;  %v1975_v62 = vpop.f32.mrf.mxu3  ;;  %v1951_v2 = vpop.f32.mrf.mxu1  ;;  %v2955_v39 = vor.u32 %v3620_v42, %v2952_v25  ;;  %v3392_v43 = vld [vmem:[%s5625_s1 + $0x878] sm:$0xf0]  ;;  %v3256_v54 = vld [vmem:[%s5625_s1 + $0x768] sm:$0xf0]  ;;  %v3728_v58 = vld [vmem:[%s5625_s1 + $0x864] sm:$0xf] }
  0xea   :  { %2214 = vmatpush.bf16.msrb.mxu2 %v3131_v3  ;;  %v3320_v57 = vld [vmem:[%s5625_s1 + $0x7e8] sm:$0xf0]  ;;  %v3744_v60 = vld [vmem:[%s5625_s1 + $0x8e4] sm:$0xf]  ;;  %v3694_v19 = vld [vmem:[%s5625_s1 + $0x754] sm:$0xf] }
  0xeb   :  { %2227 = vmatpush.bf16.msrb.mxu3 %v3195_v41  ;;  %v5368_v3 = vadd.f32 %v1975_v62, %v1963_v61  ;;  %v2960_v41 = vld [vmem:[%s5625_s1 + $0x518] sm:$0xf0]  ;;  %v3384_v59 = vld [vmem:[%s5625_s1 + $0x868] sm:$0xf0]  ;;  %v3259_v62 = vor.u32 %v3696_v53, %v3256_v54  ;;  %v3323_v63 = vor.u32 %v3712_v55, %v3320_v57  ;;  %v3710_v2 = vld [vmem:[%s5625_s1 + $0x7d4] sm:$0xf] }
  0xec   :  { %2189 = vmatpush.bf16.msrb.mxu0 %v2995_v11  ;;  %v3670_v11 = vld [vmem:[%s5625_s1 + $0x694] sm:$0xf]  ;;  %v3448_v61 = vld [vmem:[%s5625_s1 + $0x8e8] sm:$0xf0]  ;;  %v3387_v0 = vor.u32 %v3728_v58, %v3384_v59  ;;  %v3740_v25 = vld [vmem:[%s5625_s1 + $0x8c4] sm:$0xf] }
  0xed   :  { %2202 = vmatpush.bf16.msrb.mxu1 %v3059_v18  ;;  %v3152_v18 = vld [vmem:[%s5625_s1 + $0x698] sm:$0xf0]  ;;  %v3706_v21 = vld [vmem:[%s5625_s1 + $0x7b4] sm:$0xf]  ;;  %v3736_v55 = vld [vmem:[%s5625_s1 + $0x8a4] sm:$0xf] }
  0xee   :  { %2215 = vmatpush.bf16.msrb.mxu2 %v3123_v44  ;;  %v2963_v44 = vor.u32 %v3622_v6, %v2960_v41  ;;  %v3155_v15 = vor.u32 %v3670_v11, %v3152_v18  ;;  %v3726_v6 = vld [vmem:[%s5625_s1 + $0x854] sm:$0xf]  ;;  %v3376_v41 = vld [vmem:[%s5625_s1 + $0x858] sm:$0xf0]  ;;  %v3304_v11 = vld [vmem:[%s5625_s1 + $0x7c8] sm:$0xf0] }
  0xef   :  { %2228 = vmatpush.bf16.msrb.mxu3 %v3187_v30  ;;  %v3091_v30 = vor.u32 %v3654_v38, %v3088_v10  ;;  %v3379_v38 = vor.u32 %v3726_v6, %v3376_v41  ;;  %v3708_v10 = vld [vmem:[%s5625_s1 + $0x7c4] sm:$0xf]  ;;  %v3734_v6 = vld [vmem:[%s5625_s1 + $0x894] sm:$0xf]  ;;  %v3408_v41 = vld [vmem:[%s5625_s1 + $0x898] sm:$0xf0] }
  0xf0   :  { %2190 = vmatpush.bf16.msrb.mxu0 %v2987_v24  ;;  %v1964_v24 = vpop.f32.mrf.mxu2  ;;  %v3724_v18 = vld [vmem:[%s5625_s1 + $0x844] sm:$0xf]  ;;  %v3307_v14 = vor.u32 %v3708_v10, %v3304_v11  ;;  %v3272_v10 = vld [vmem:[%s5625_s1 + $0x788] sm:$0xf0] }
  0xf1   :  { %2203 = vmatpush.bf16.msrb.mxu1 %v3051_v27  ;;  %v3264_v27 = vld [vmem:[%s5625_s1 + $0x778] sm:$0xf0]  ;;  %v1977_v36 = vpop.f32.mrf.mxu3  ;;  %v3336_v11 = vld [vmem:[%s5625_s1 + $0x808] sm:$0xf0] }
  0xf2   :  { %2216 = vmatpush.bf16.msrb.mxu2 %v3115_v34  ;;  %v3714_v34 = vld [vmem:[%s5625_s1 + $0x7f4] sm:$0xf] }
  0xf3   :  { %2229 = vmatpush.bf16.msrb.mxu3 %v3179_v1  ;;  %v3730_v1 = vld [vmem:[%s5625_s1 + $0x874] sm:$0xf] }
  0xf4   :  { %2191 = vmatpush.bf16.msrb.mxu0 %v2979_v50  ;;  %v3267_v50 = vor.u32 %v3698_v26, %v3264_v27  ;;  %v3296_v26 = vld [vmem:[%s5625_s1 + $0x7b8] sm:$0xf0]  ;;  %v3722_v27 = vld [vmem:[%s5625_s1 + $0x834] sm:$0xf] }
  0xf5   :  { %2204 = vmatpush.bf16.msrb.mxu1 %v3043_v51  ;;  %v3331_v51 = vor.u32 %v3714_v34, %v3328_v40  ;;  %v3360_v34 = vld [vmem:[%s5625_s1 + $0x838] sm:$0xf0]  ;;  %v3738_v36 = vld [vmem:[%s5625_s1 + $0x8b4] sm:$0xf]  ;;  %v3235_v40 = vor.u32 %v3690_v16, %v3232_v17 }
  0xf6   :  { %2217 = vmatpush.bf16.msrb.mxu2 %v3107_v52  ;;  %v3395_v52 = vor.u32 %v3730_v1, %v3392_v43  ;;  %v3299_v1 = vor.u32 %v3706_v21, %v3296_v26  ;;  %v3363_v43 = vor.u32 %v3722_v27, %v3360_v34  ;;  %v3750_v21 = vld [vmem:[%s5628_s2] sm:$0x3] }
  0xf7   :  { %2230 = vmatpush.bf16.msrb.mxu3 %v3171_v56  ;;  %v3459_v56 = vor.u32 %v3746_v48, %v3456_v32  ;;  %v3704_v48 = vld [vmem:[%s5625_s1 + $0x7a4] sm:$0xf] }
  0xf8   :  { %2192 = vmatpush.bf16.msrb.mxu0 %v2971_v22  ;;  %v3248_v22 = vld [vmem:[%s5625_s1 + $0x758] sm:$0xf0] }
  0xf9   :  { %2205 = vmatpush.bf16.msrb.mxu1 %v3035_v4  ;;  %v3451_v4 = vor.u32 %v3744_v60, %v3448_v61 }
  0xfa   :  { %2218 = vmatpush.bf16.msrb.mxu2 %v3099_v5  ;;  %v3312_v5 = vld [vmem:[%s5625_s1 + $0x7d8] sm:$0xf0] }
  0xfb   :  { %2231 = vmatpush.bf16.msrb.mxu3 %v3163_v8  ;;  %v3251_v8 = vor.u32 %v3694_v19, %v3248_v22  ;;  %v3315_v9 = vor.u32 %v3710_v2, %v3312_v5  ;;  %v3702_v19 = vld [vmem:[%s5625_s1 + $0x794] sm:$0xf]  ;;  %v3280_v2 = vld [vmem:[%s5625_s1 + $0x798] sm:$0xf0] }
  0xfc   :  { %2193 = vmatpush.bf16.msrb.mxu0 %v2963_v44  ;;  %v3368_v44 = vld [vmem:[%s5625_s1 + $0x848] sm:$0xf0]  ;;  %v3344_v5 = vld [vmem:[%s5625_s1 + $0x818] sm:$0xf0] }
  0xfd   :  { %2206 = vmatpush.bf16.msrb.mxu1 %v3027_v20  ;;  %v3432_v20 = vld [vmem:[%s5625_s1 + $0x8c8] sm:$0xf0] }
  0xfe   :  { %2219 = vmatpush.bf16.msrb.mxu2 %v3091_v30 }
  0xff   :  { %2232 = vmatpush.bf16.msrb.mxu3 %v3155_v15  ;;  %v3371_v15 = vor.u32 %v3724_v18, %v3368_v44  ;;  %v3732_v44 = vld [vmem:[%s5625_s1 + $0x884] sm:$0xf] }
 0x100   :  { %2194 = vmatpush.bf16.msrb.mxu0 %v2955_v39  ;;  %v1988_v42 = vpop.f32.mrf.mxu0  ;;  %v3424_v39 = vld [vmem:[%s5625_s1 + $0x8b8] sm:$0xf0] }
 0x101   :  { %2207 = vmatpush.bf16.msrb.mxu1 %v3019_v46  ;;  %v1989_v30 = vadd.f32 %v1988_v42, %v5368_v3  ;;  %v2001_v13 = vpop.f32.mrf.mxu1  ;;  %v3435_v3 = vor.u32 %v3740_v25, %v3432_v20  ;;  %v3688_v46 = vld [vmem:[%s5625_s1 + $0x724] sm:$0xf]  ;;  %v3427_v32 = vor.u32 %v3738_v36, %v3424_v39  ;;  %v3400_v42 = vld [vmem:[%s5625_s1 + $0x888] sm:$0xf0] }
 0x102   :  { %2220 = vmatpush.bf16.msrb.mxu2 %v3083_v47  ;;  %v3224_v47 = vld [vmem:[%s5625_s1 + $0x728] sm:$0xf0] }
 0x103   :  { %2233 = vmatpush.bf16.msrb.mxu3 %v3147_v49  ;;  %2195 = vmatmul.bf16.vlgmr.msrb.gmra.mxu0 %v4439_v29  ;;  %v3742_v29 = vld [vmem:[%s5625_s1 + $0x8d4] sm:$0xf]  ;;  %v2002_v24 = vadd.f32 %v2001_v13, %v1989_v30  ;;  %v3227_v58 = vor.u32 %v3688_v46, %v3224_v47  ;;  %v3403_v13 = vor.u32 %v3732_v44, %v3400_v42 }
 0x104   :  { %2239 = vmatpush.bf16.msra.mxu0 %v3267_v50  ;;  %2208 = vmatmul.bf16.vlgmr.msrb.gmra.mxu1 %v4449_v33  ;;  %v3692_v33 = vld [vmem:[%s5625_s1 + $0x744] sm:$0xf]  ;;  %v3288_v50 = vld [vmem:[%s5625_s1 + $0x7a8] sm:$0xf0] }
 0x105   :  { %2252 = vmatpush.bf16.msra.mxu1 %v3331_v51  ;;  %2221 = vmatmul.bf16.vlgmr.msrb.gmra.mxu2 %v4638_v23  ;;  %v3240_v23 = vld [vmem:[%s5625_s1 + $0x748] sm:$0xf0]  ;;  %v3720_v51 = vld [vmem:[%s5625_s1 + $0x824] sm:$0xf]  ;;  %v3291_v61 = vor.u32 %v3704_v48, %v3288_v50 }
 0x106   :  { %2265 = vmatpush.bf16.msra.mxu2 %v3395_v52  ;;  %2234 = vmatmul.bf16.vlgmr.msrb.gmra.mxu3 %v4651_v31  ;;  %v3443_v31 = vor.u32 %v3742_v29, %v3440_v7  ;;  %v3243_v12 = vor.u32 %v3692_v33, %v3240_v23  ;;  %v3352_v52 = vld [vmem:[%s5625_s1 + $0x828] sm:$0xf0]  ;;  %v3283_v7 = vor.u32 %v3702_v19, %v3280_v2  ;;  %v3700_v33 = vld [vmem:[%s5625_s1 + $0x784] sm:$0xf] }
 0x107   :  { %2278 = vmatpush.bf16.msra.mxu3 %v3459_v56  ;;  %v3416_v56 = vld [vmem:[%s5625_s1 + $0x8a8] sm:$0xf0]  ;;  %v3411_v23 = vor.u32 %v3734_v6, %v3408_v41  ;;  %v3275_v30 = vor.u32 %v3700_v33, %v3272_v10 }
 0x108   :  { %2240 = vmatpush.bf16.msra.mxu0 %v3259_v62  ;;  %v2014_v49 = vpop.f32.mrf.mxu2  ;;  %v1990_v57 = vpop.f32.mrf.mxu0  ;;  %v3355_v62 = vor.u32 %v3720_v51, %v3352_v52  ;;  %v3419_v22 = vor.u32 %v3736_v55, %v3416_v56 }
 0x109   :  { %2253 = vmatpush.bf16.msra.mxu1 %v3323_v63  ;;  %v2015_v53 = vadd.f32 %v2014_v49, %v2002_v24  ;;  %v2027_v54 = vpop.f32.mrf.mxu3  ;;  %v2003_v59 = vpop.f32.mrf.mxu1  ;;  %v3686_v63 = vld [vmem:[%s5625_s1 + $0x714] sm:$0xf] }
 0x10a   :  { %2266 = vmatpush.bf16.msra.mxu2 %v3387_v0  ;;  %v3216_v0 = vld [vmem:[%s5625_s1 + $0x718] sm:$0xf0] }
 0x10b   :  { %2279 = vmatpush.bf16.msra.mxu3 %v3451_v4  ;;  %v2028_v60 = vadd.f32 %v2027_v54, %v2015_v53  ;;  %v3718_v4 = vld [vmem:[%s5625_s1 + $0x814] sm:$0xf]  ;;  %v3219_v29 = vor.u32 %v3686_v63, %v3216_v0 }
 0x10c   :  { %2241 = vmatpush.bf16.msra.mxu0 %v3251_v8  ;;  %v3347_v8 = vor.u32 %v3718_v4, %v3344_v5 }
 0x10d   :  { %2254 = vmatpush.bf16.msra.mxu1 %v3315_v9  ;;  %v3684_v9 = vld [vmem:[%s5625_s1 + $0x704] sm:$0xf] }
 0x10e   :  { %2267 = vmatpush.bf16.msra.mxu2 %v3379_v38  ;;  %v3208_v38 = vld [vmem:[%s5625_s1 + $0x708] sm:$0xf0] }
 0x10f   :  { %2280 = vmatpush.bf16.msra.mxu3 %v3443_v31  ;;  %v3716_v31 = vld [vmem:[%s5625_s1 + $0x804] sm:$0xf]  ;;  %v3211_v20 = vor.u32 %v3684_v9, %v3208_v38 }
 0x110   :  { %2242 = vmatpush.bf16.msra.mxu0 %v3243_v12  ;;  %v2016_v18 = vpop.f32.mrf.mxu2  ;;  %v3339_v12 = vor.u32 %v3716_v31, %v3336_v11 }
 0x111   :  { %2255 = vmatpush.bf16.msra.mxu1 %v3307_v14  ;;  %v2029_v25 = vpop.f32.mrf.mxu3 }
 0x112   :  { %2268 = vmatpush.bf16.msra.mxu2 %v3371_v15 }
 0x113   :  { %2281 = vmatpush.bf16.msra.mxu3 %v3435_v3  ;;  %v317_v3 = vperm.slane %v3750_v21, 1 }
 0x114   :  { %2243 = vmatpush.bf16.msra.mxu0 %v3235_v40 }
 0x115   :  { %2256 = vmatpush.bf16.msra.mxu1 %v3299_v1 }
 0x116   :  { %2269 = vmatpush.bf16.msra.mxu2 %v3363_v43 }
 0x117   :  { %2282 = vmatpush.bf16.msra.mxu3 %v3427_v32 }
 0x118   :  { %2244 = vmatpush.bf16.msra.mxu0 %v3227_v58 }
 0x119   :  { %2257 = vmatpush.bf16.msra.mxu1 %v3291_v61 }
 0x11a   :  { %2270 = vmatpush.bf16.msra.mxu2 %v3355_v62 }
 0x11b   :  { %2283 = vmatpush.bf16.msra.mxu3 %v3419_v22 }
 0x11c   :  { %2245 = vmatpush.bf16.msra.mxu0 %v3219_v29 }
 0x11d   :  { %2258 = vmatpush.bf16.msra.mxu1 %v3283_v7 }
 0x11e   :  { %2271 = vmatpush.bf16.msra.mxu2 %v3347_v8 }
 0x11f   :  { %2284 = vmatpush.bf16.msra.mxu3 %v3411_v23 }
 0x120   :  { %2246 = vmatpush.bf16.msra.mxu0 %v3211_v20  ;;  %v2040_v14 = vpop.f32.mrf.mxu0 }
 0x121   :  { %2259 = vmatpush.bf16.msra.mxu1 %v3275_v30  ;;  %v2041_v15 = vadd.f32 %v2040_v14, %v2028_v60  ;;  %v2053_v16 = vpop.f32.mrf.mxu1  ;;  %v2298_v30 = vpop.permute.xlu0 %2297 }
 0x122   :  { %2272 = vmatpush.bf16.msra.mxu2 %v3339_v12 }
 0x123   :  { %2285 = vmatpush.bf16.msra.mxu3 %v3403_v13  ;;  %2247 = vmatmul.bf16.vlgmr.msra.gmra.mxu0 %v4649_v28  ;;  %v2054_v17 = vadd.f32 %v2053_v16, %v2041_v15 }
 0x124   :  { %2260 = vmatmul.bf16.vlgmr.msra.gmra.mxu1 %v4659_v35 }
 0x125   :  { %2273 = vmatmul.bf16.vlgmr.msra.gmra.mxu2 %v4848_v37  ;;  %v2291_v25 = vmax.f32 %v2054_v17, 0.0 }
 0x126   :  { %2286 = vmatmul.bf16.vlgmr.msra.gmra.mxu3 %v4859_v45 }
 0x127   :  { %v2300_v13 = vmul.f32 %v2298_v30, %v2291_v25 }
 0x128   :  { %v2066_v24 = vpop.f32.mrf.mxu2  ;;  %v2042_v34 = vpop.f32.mrf.mxu0 }
 0x129   :  { %v2067_v26 = vadd.f32 %v2066_v24, %v317_v3  ;;  %v2079_v27 = vpop.f32.mrf.mxu3  ;;  %v2055_v28 = vpop.f32.mrf.mxu1 }
 0x12b   :  { %v2080_v36 = vadd.f32 %v2079_v27, %v2067_v26 }
 0x130   :  { %v2068_v35 = vpop.f32.mrf.mxu2 }
 0x131   :  { %v2081_v39 = vpop.f32.mrf.mxu3 }
 0x140   :  { %v2092_v37 = vpop.f32.mrf.mxu0 }
 0x141   :  { %v2093_v40 = vadd.f32 %v2092_v37, %v2080_v36  ;;  %v2105_v45 = vpop.f32.mrf.mxu1 }
 0x143   :  { %v2106_v1 = vadd.f32 %v2105_v45, %v2093_v40 }
 0x148   :  { %v2118_v43 = vpop.f32.mrf.mxu2  ;;  %v2094_v32 = vpop.f32.mrf.mxu0 }
 0x149   :  { %v2119_v46 = vadd.f32 %v2118_v43, %v2106_v1  ;;  %v2131_v47 = vpop.f32.mrf.mxu3  ;;  %v2107_v49 = vpop.f32.mrf.mxu1 }
 0x14b   :  { %v2132_v48 = vadd.f32 %v2131_v47, %v2119_v46 }
 0x150   :  { %v2120_v50 = vpop.f32.mrf.mxu2 }
 0x151   :  { %v2133_v51 = vpop.f32.mrf.mxu3 }
 0x160   :  { %v2144_v52 = vpop.f32.mrf.mxu0 }
 0x161   :  { %v2157_v53 = vpop.f32.mrf.mxu1  ;;  %v2145_v62 = vadd.f32 %v2144_v52, %v2132_v48 }
 0x163   :  { %v2158_v2 = vadd.f32 %v2157_v53, %v2145_v62 }
 0x168   :  { %v2170_v54 = vpop.f32.mrf.mxu2  ;;  %v2146_v56 = vpop.f32.mrf.mxu0 }
 0x169   :  { %v2183_v55 = vpop.f32.mrf.mxu3  ;;  %v2159_v57 = vpop.f32.mrf.mxu1  ;;  %v2171_v4 = vadd.f32 %v2170_v54, %v2158_v2 }
 0x16b   :  { %v2184_v41 = vadd.f32 %v2183_v55, %v2171_v4 }
 0x170   :  { %v2172_v58 = vpop.f32.mrf.mxu2 }
 0x171   :  { %v2185_v59 = vpop.f32.mrf.mxu3 }
 0x180   :  { %v2196_v60 = vpop.f32.mrf.mxu0 }
 0x181   :  { %v2209_v61 = vpop.f32.mrf.mxu1  ;;  %v2197_v29 = vadd.f32 %v2196_v60, %v2184_v41 }
 0x183   :  { %v2210_v7 = vadd.f32 %v2209_v61, %v2197_v29 }
 0x188   :  { %v2222_v63 = vpop.f32.mrf.mxu2  ;;  %v2198_v19 = vpop.f32.mrf.mxu0 }
 0x189   :  { %v2235_v0 = vpop.f32.mrf.mxu3  ;;  %v2211_v22 = vpop.f32.mrf.mxu1  ;;  %v2223_v8 = vadd.f32 %v2222_v63, %v2210_v7 }
 0x18b   :  { %v2236_v9 = vadd.f32 %v2235_v0, %v2223_v8 }
 0x190   :  { %v2224_v5 = vpop.f32.mrf.mxu2 }
 0x191   :  { %v2237_v6 = vpop.f32.mrf.mxu3 }
 0x1a0   :  { %v2248_v38 = vpop.f32.mrf.mxu0 }
 0x1a1   :  { %v2261_v33 = vpop.f32.mrf.mxu1  ;;  %v2249_v23 = vadd.f32 %v2248_v38, %v2236_v9 }
 0x1a3   :  { %v2262_v10 = vadd.f32 %v2261_v33, %v2249_v23 }
 0x1a8   :  { %v2274_v31 = vpop.f32.mrf.mxu2  ;;  %v2250_v44 = vpop.f32.mrf.mxu0 }
 0x1a9   :  { %v2275_v11 = vadd.f32 %v2274_v31, %v2262_v10  ;;  %v2287_v18 = vpop.f32.mrf.mxu3  ;;  %v2263_v42 = vpop.f32.mrf.mxu1 }
 0x1ab   :  { %v2288_v20 = vadd.f32 %v2287_v18, %v2275_v11 }
 0x1ad   :  { %v2292_v12 = vmax.f32 %v2288_v20, 0.0 }
 0x1af   :  { %v2301_v14 = vmul.f32 %v2298_v30, %v2292_v12 }
 0x1b0   :  { %v2276_v15 = vpop.f32.mrf.mxu2 }
 0x1b1   :  { %v2302_v16 = vpack.c.bf16 %v2301_v14, %v2300_v13  ;;  %v2289_v21 = vpop.f32.mrf.mxu3 }
 0x1b3   :  { %2303 = vst [vmem:[%s5629_s4] sm:$0xff] %v2302_v16 }

</bundles_post_ra>
